<compile_context>
chip_gen: v7x
topology: tpu7x:2x2x1
jax: 0.10.0
libtpu: 0.0.40
codegen_flags: <defaults>
</compile_context>

<pallas_src>
import jax
import jax.numpy as jnp
from jax import lax
from jax.experimental import pallas as pl
from jax.experimental.pallas import tpu as pltpu

GRID_SIZE = 101      # raw precompute-grid extent (indices in [-50, 50] + 50)
GRID_PAD = 128       # zero-padded, lane/MXU-aligned histogram extent
INVALID_BIN = GRID_PAD - 1   # lives in the zero-padded region of the grid planes


def _make_kernel(dot_reg_factor):
    drf = float(dot_reg_factor)

    def kernel(nev_ref, ex_ref, ey_ref, cc_ref, cct_ref, g0_ref, g1_ref,
               mask_ref, pd_ref, corr_ref, out_ref, hist_ref):
        # grid = (dot_tiles, event_tiles); axis 1 is the event reduction axis.
        e_idx = pl.program_id(1)
        nt, et = ex_ref.shape
        G = GRID_PAD

        @pl.when(e_idx == 0)
        def _init():
            hist_ref[...] = jnp.zeros_like(hist_ref)

        cc = cc_ref[...]                       # (nt, 2): col 0 = y, col 1 = x
        cx = cc[:, 1:2]                        # (nt, 1)
        cy = cc[:, 0:1]

        ex = ex_ref[...]                       # (nt, et) f32
        ey = ey_ref[...]
        # dx = (events_x.long() - cx).long(); clip to [-50, 50]; shift by +50.
        ex_i = ex.astype(jnp.int32).astype(jnp.float32)   # events_x.long()
        ey_i = ey.astype(jnp.int32).astype(jnp.float32)
        dx = (ex_i - cx).astype(jnp.int32)     # trailing .long() (trunc to 0)
        dy = (ey_i - cy).astype(jnp.int32)
        ix = jnp.clip(dx, -50, 50) + 50        # (nt, et) in [0, 100]
        iy = jnp.clip(dy, -50, 50) + 50

        # Padded events (global index >= true event count) are redirected to
        # bin 127, which lies in the zero region of both grid planes.
        ev_ids = e_idx * et + lax.broadcasted_iota(jnp.int32, (nt, et), 1)
        valid = ev_ids < nev_ref[0]
        ix = jnp.where(valid, ix, INVALID_BIN)
        iy = jnp.where(valid, iy, INVALID_BIN)

        # Per-dot 2-D histogram accumulated over event tiles:
        #   hist[n, a, b] += #{e : ix[n,e] == a and iy[n,e] == b}
        # One-hots are built lane-major (events on lanes, bins on sublanes);
        # bool -> f32 -> bf16 keeps the select 32-bit (v5e-safe), 0/1 in bf16
        # is exact, accumulation is f32 on the MXU.
        bin_iota = lax.broadcasted_iota(jnp.int32, (nt, G, et), 1)
        oh_x = (ix[:, None, :] == bin_iota).astype(jnp.float32).astype(jnp.bfloat16)
        oh_y = (iy[:, None, :] == bin_iota).astype(jnp.float32).astype(jnp.bfloat16)
        hist_ref[...] += jnp.einsum('nae,nbe->nab', oh_x, oh_y,
                                    preferred_element_type=jnp.float32)

        @pl.when(e_idx == pl.num_programs(1) - 1)
        def _finalize():
            h = hist_ref[...]                                    # (nt, G, G) f32
            # Frobenius product with grid planes == sum_e grid[ix_e, iy_e, c].
            upd_dx = jnp.sum(jnp.sum(h * g0_ref[...], axis=2),
                             axis=1, keepdims=True)              # (nt, 1)
            upd_dy = jnp.sum(jnp.sum(h * g1_ref[...], axis=2),
                             axis=1, keepdims=True)
            update_or_not = (upd_dx != 0.0).astype(jnp.float32)  # (nt, 1)

            # Pairwise center-interaction term for this dot tile.
            cct = cct_ref[...]                                   # (2, N) all dots
            cx_all = cct[1:2, :]                                 # (1, N)
            cy_all = cct[0:1, :]
            mask = mask_ref[...]                                 # (nt, N)
            pd = pd_ref[...]
            dxc = cx_all - cx                                    # cx[j] - cx[i]
            dyc = cy_all - cy
            sdx = dxc * mask
            sdy = dyc * mask
            radi = sdx * sdx + sdy * sdy - pd * pd
            dtx = 4.0 * dxc * radi
            dty = 4.0 * dyc * radi
            corr = corr_ref[...]                                 # (nt, 1)
            cdx = corr * update_or_not * jnp.sum(dtx, axis=1, keepdims=True)
            cdy = corr * update_or_not * jnp.sum(dty, axis=1, keepdims=True)

            new_cx = (cx - 200.0 * 1.5e-05 * jnp.clip(upd_dx, -400.0, 400.0)
                      + drf * 2.5e-07 * cdx)
            new_cy = (cy - 200.0 * 1.5e-05 * jnp.clip(upd_dy, -400.0, 400.0)
                      + drf * 2.5e-07 * cdy)
            # Single store; column 0 = y-center, column 1 = x-center.
            out_ref[...] = jnp.concatenate([new_cy, new_cx], axis=1)

    return kernel


def prepare_dot_tracking_constants(precompute_grid, pairwise_dists_mask,
                                   pairwise_dists, correction):
    """One-time (per calibration grid) preprocessing, hoisted out of the per-frame call."""
    g0 = jnp.zeros((GRID_PAD, GRID_PAD), jnp.float32)
    g0 = g0.at[:GRID_SIZE, :GRID_SIZE].set(precompute_grid[:, :, 0].astype(jnp.float32))
    g1 = jnp.zeros((GRID_PAD, GRID_PAD), jnp.float32)
    g1 = g1.at[:GRID_SIZE, :GRID_SIZE].set(precompute_grid[:, :, 1].astype(jnp.float32))
    mask = pairwise_dists_mask.astype(jnp.float32)
    pd = pairwise_dists.astype(jnp.float32)
    corr = jnp.reshape(correction.astype(jnp.float32), (-1, 1))
    return g0, g1, mask, pd, corr


def _round_up(x, m):
    return ((x + m - 1) // m) * m


def _pick_event_tile(E):
    if E <= 128:
        return 128
    if E <= 256:
        return 256
    return 512


def dot_tracking_forward(events_x, events_y, calib_center, consts,
                         dot_regularization_factor, *, n_tile=8, e_tile=None):
    """Pallas-backed equivalent of DotTrackingOnnxModel.forward.

    Handles arbitrary (ragged) dot / event counts by zero-padding; padded
    columns of the pairwise terms contribute exactly 0 (mask and dists padded
    with zeros), padded events are masked inside the kernel via the prefetched
    true event count, and padded dot rows are sliced off the output.
    """
    g0, g1, mask, pd, corr = consts
    N, E = events_x.shape
    if e_tile is None:
        e_tile = _pick_event_tile(E)
    N_pad = _round_up(max(N, n_tile), n_tile)
    E_pad = _round_up(max(E, e_tile), e_tile)

    ex = jnp.pad(events_x.astype(jnp.float32), ((0, N_pad - N), (0, E_pad - E)))
    ey = jnp.pad(events_y.astype(jnp.float32), ((0, N_pad - N), (0, E_pad - E)))
    cc = jnp.pad(calib_center.astype(jnp.float32), ((0, N_pad - N), (0, 0)))
    cct = cc.T                                   # (2, N_pad): all centers, lane-major
    mask_p = jnp.pad(mask, ((0, N_pad - N), (0, N_pad - N)))
    pd_p = jnp.pad(pd, ((0, N_pad - N), (0, N_pad - N)))
    corr_p = jnp.pad(corr, ((0, N_pad - N), (0, 0)))
    n_events = jnp.array([E], jnp.int32)         # scalar-prefetch: true event count

    kernel = _make_kernel(dot_regularization_factor)
    grid = (N_pad // n_tile, E_pad // e_tile)

    out = pl.pallas_call(
        kernel,
        out_shape=jax.ShapeDtypeStruct((N_pad, 2), jnp.float32),
        grid_spec=pltpu.PrefetchScalarGridSpec(
            num_scalar_prefetch=1,
            grid=grid,
            in_specs=[
                pl.BlockSpec((n_tile, e_tile), lambda d, e, nev: (d, e)),      # events_x
                pl.BlockSpec((n_tile, e_tile), lambda d, e, nev: (d, e)),      # events_y
                pl.BlockSpec((n_tile, 2), lambda d, e, nev: (d, 0)),           # centers (tile)
                pl.BlockSpec((2, N_pad), lambda d, e, nev: (0, 0)),            # centers^T (all)
                pl.BlockSpec((GRID_PAD, GRID_PAD), lambda d, e, nev: (0, 0)),  # grid chan 0
                pl.BlockSpec((GRID_PAD, GRID_PAD), lambda d, e, nev: (0, 0)),  # grid chan 1
                pl.BlockSpec((n_tile, N_pad), lambda d, e, nev: (d, 0)),       # mask rows
                pl.BlockSpec((n_tile, N_pad), lambda d, e, nev: (d, 0)),       # pairwise dists
                pl.BlockSpec((n_tile, 1), lambda d, e, nev: (d, 0)),           # correction
            ],
            out_specs=pl.BlockSpec((n_tile, 2), lambda d, e, nev: (d, 0)),
            scratch_shapes=[pltpu.VMEM((n_tile, GRID_PAD, GRID_PAD), jnp.float32)]),
        compiler_params=pltpu.CompilerParams(
            dimension_semantics=("parallel", "arbitrary")),
    )(n_events, ex, ey, cc, cct, g0, g1, mask_p, pd_p, corr_p)
    return out[:N]


def reference_forward(events_x, events_y, calib_center,
                      precompute_grid, pairwise_dists_mask, pairwise_dists,
                      correction, dot_regularization_factor):
    """Plain-JAX reference mirroring the PyTorch forward."""
    cx = calib_center[:, 1][:, None]
    cy = calib_center[:, 0][:, None]
    dx = (events_x.astype(jnp.int32).astype(jnp.float32) - cx).astype(jnp.int32)
    dy = (events_y.astype(jnp.int32).astype(jnp.float32) - cy).astype(jnp.int32)
    ix = jnp.clip(dx, -50, 50) + 50
    iy = jnp.clip(dy, -50, 50) + 50
    test = precompute_grid[ix, iy, :]                       # (N, E, 2)
    update_dx_fast = jnp.sum(test[..., 0], axis=1)
    update_dy_fast = jnp.sum(test[..., 1], axis=1)
    update_or_not = (update_dx_fast != 0).astype(jnp.float32)
    dx_c = calib_center[:, 1][None, :] - calib_center[:, 1][:, None]
    dy_c = calib_center[:, 0][None, :] - calib_center[:, 0][:, None]
    sel_dx = dx_c * pairwise_dists_mask
    sel_dy = dy_c * pairwise_dists_mask
    radi = sel_dx ** 2 + sel_dy ** 2 - pairwise_dists ** 2
    dtx = 4.0 * dx_c * radi
    dty = 4.0 * dy_c * radi
    cdx = correction * update_or_not * jnp.sum(dtx, axis=1)
    cdy = correction * update_or_not * jnp.sum(dty, axis=1)
    new_cx = (calib_center[:, 1]
              - 200.0 * 1.5e-05 * jnp.clip(update_dx_fast, -400.0, 400.0)
              + dot_regularization_factor * 2.5e-07 * cdx)
    new_cy = (calib_center[:, 0]
              - 200.0 * 1.5e-05 * jnp.clip(update_dy_fast, -400.0, 400.0)
              + dot_regularization_factor * 2.5e-07 * cdy)
    return jnp.stack([new_cy, new_cx], axis=1)


if __name__ == "__main__":
    key = jax.random.PRNGKey(0)
    # Ragged shapes on purpose: exercises dot padding (12 -> 16) and event
    # padding (500 -> 512 with e_tile=256 -> 2 event tiles, accumulator path).
    N, E = 12, 500
    k1, k2, k3, k4, k5, k6 = jax.random.split(key, 6)

    precompute_grid = jax.random.normal(k1, (GRID_SIZE, GRID_SIZE, 2),
                                        dtype=jnp.float32)
    calib_center = jax.random.uniform(k2, (N, 2), minval=40.0, maxval=160.0,
                                      dtype=jnp.float32)
    events_x = calib_center[:, 1:2] + jax.random.uniform(
        k3, (N, E), minval=-60.0, maxval=60.0, dtype=jnp.float32)
    events_y = calib_center[:, 0:1] + jax.random.uniform(
        k4, (N, E), minval=-60.0, maxval=60.0, dtype=jnp.float32)

    pairwise_dists_mask = 1.0 - jnp.eye(N, dtype=jnp.float32)
    pairwise_dists = jax.random.uniform(k5, (N, N), minval=5.0, maxval=50.0,
                                        dtype=jnp.float32)
    pairwise_dists = 0.5 * (pairwise_dists + pairwise_dists.T)
    correction = jax.random.uniform(k6, (N,), minval=0.0, maxval=0.1,
                                    dtype=jnp.float32)
    dot_regularization_factor = 1.0

    # Hoisted, once-per-grid constant preparation.
    consts = prepare_dot_tracking_constants(precompute_grid, pairwise_dists_mask,
                                            pairwise_dists, correction)

    out = dot_tracking_forward(events_x, events_y, calib_center, consts,
                               dot_regularization_factor, e_tile=256)
    out = jax.block_until_ready(out)

    ref = reference_forward(events_x, events_y, calib_center, precompute_grid,
                            pairwise_dists_mask, pairwise_dists, correction,
                            dot_regularization_factor)
    assert out.shape == (N, 2) and out.dtype == jnp.float32
    assert jnp.allclose(out, ref, rtol=1e-4, atol=1e-3), (out, ref)
    print("KERNEL_OK")
</pallas_src>

<mosaic_0001>
module attributes {stable_mosaic.version = 11 : i64} {
  func.func @kernel(%arg0: i32, %arg1: i32, %arg2: memref<1xi32, #tpu.memory_space<smem>>, %arg3: memref<8x256xf32, #tpu.memory_space<vmem>>, %arg4: memref<8x256xf32, #tpu.memory_space<vmem>>, %arg5: memref<8x2xf32, #tpu.memory_space<vmem>>, %arg6: memref<2x16xf32, #tpu.memory_space<vmem>>, %arg7: memref<128x128xf32, #tpu.memory_space<vmem>>, %arg8: memref<128x128xf32, #tpu.memory_space<vmem>>, %arg9: memref<8x16xf32, #tpu.memory_space<vmem>>, %arg10: memref<8x16xf32, #tpu.memory_space<vmem>>, %arg11: memref<8x1xf32, #tpu.memory_space<vmem>>, %arg12: memref<8x2xf32, #tpu.memory_space<vmem>>, %arg13: memref<8x128x128xf32, #tpu.memory_space<vmem>>) attributes {dimension_semantics = [#tpu.dimension_semantics<parallel>, #tpu.dimension_semantics<arbitrary>], iteration_bounds = array<i64: 2, 2>, scalar_prefetch = 1 : i64, scratch_operands = 1 : i64, tpu.core_type = #tpu.core_type<tc>, window_params = [{transform_indices = @transform_0, window_bounds = array<i64: 8, 256>}, {transform_indices = @transform_1, window_bounds = array<i64: 8, 256>}, {transform_indices = @transform_2, window_bounds = array<i64: 8, 2>}, {pipeline_mode = #tpu.pipeline_mode<synchronous>, transform_indices = @transform_3, window_bounds = array<i64: 2, 16>}, {pipeline_mode = #tpu.pipeline_mode<synchronous>, transform_indices = @transform_4, window_bounds = array<i64: 128, 128>}, {pipeline_mode = #tpu.pipeline_mode<synchronous>, transform_indices = @transform_5, window_bounds = array<i64: 128, 128>}, {transform_indices = @transform_6, window_bounds = array<i64: 8, 16>}, {transform_indices = @transform_7, window_bounds = array<i64: 8, 16>}, {transform_indices = @transform_8, window_bounds = array<i64: 8, 1>}, {transform_indices = @transform_9, window_bounds = array<i64: 8, 2>}]} {
    %c0_i32 = arith.constant 0 : i32
    %0 = arith.cmpi eq, %arg1, %c0_i32 : i32
    %1 = arith.extui %0 : i1 to i32
    %c0_i32_0 = arith.constant 0 : i32
    %2 = arith.cmpi ne, %1, %c0_i32_0 : i32
    scf.if %2 {
      %cst_19 = arith.constant 0.000000e+00 : f32
      %61 = vector.broadcast %cst_19 : f32 to vector<8x128x128xf32>
      %c0_20 = arith.constant 0 : index
      %c0_21 = arith.constant 0 : index
      %c0_22 = arith.constant 0 : index
      %62 = vector.load %arg13[%c0_20, %c0_21, %c0_22] : memref<8x128x128xf32, #tpu.memory_space<vmem>>, vector<8x128x128xf32>
      tpu.vector_store %arg13[%c0_20, %c0_21, %c0_22], %61 {strides = array<i32>} : memref<8x128x128xf32, #tpu.memory_space<vmem>>, vector<8x128x128xf32>,
    } else {
    }
    %c0 = arith.constant 0 : index
    %c0_1 = arith.constant 0 : index
    %3 = vector.load %arg5[%c0, %c0_1] : memref<8x2xf32, #tpu.memory_space<vmem>>, vector<8x2xf32>
    %4 = vector.extract_strided_slice %3 {offsets = [0, 1], sizes = [8, 1], strides = [1, 1]} : vector<8x2xf32> to vector<8x1xf32>
    %5 = vector.extract_strided_slice %3 {offsets = [0, 0], sizes = [8, 1], strides = [1, 1]} : vector<8x2xf32> to vector<8x1xf32>
    %c0_2 = arith.constant 0 : index
    %c0_3 = arith.constant 0 : index
    %6 = vector.load %arg3[%c0_2, %c0_3] : memref<8x256xf32, #tpu.memory_space<vmem>>, vector<8x256xf32>
    %c0_4 = arith.constant 0 : index
    %c0_5 = arith.constant 0 : index
    %7 = vector.load %arg4[%c0_4, %c0_5] : memref<8x256xf32, #tpu.memory_space<vmem>>, vector<8x256xf32>
    %8 = arith.fptosi %6 : vector<8x256xf32> to vector<8x256xi32>
    %9 = arith.sitofp %8 : vector<8x256xi32> to vector<8x256xf32>
    %10 = arith.fptosi %7 : vector<8x256xf32> to vector<8x256xi32>
    %11 = arith.sitofp %10 : vector<8x256xi32> to vector<8x256xf32>
    %12 = vector.broadcast %4 : vector<8x1xf32> to vector<8x256xf32>
    %13 = arith.subf %9, %12 : vector<8x256xf32>
    %14 = arith.fptosi %13 : vector<8x256xf32> to vector<8x256xi32>
    %15 = vector.broadcast %5 : vector<8x1xf32> to vector<8x256xf32>
    %16 = arith.subf %11, %15 : vector<8x256xf32>
    %17 = arith.fptosi %16 : vector<8x256xf32> to vector<8x256xi32>
    %c-50_i32 = arith.constant -50 : i32
    %c50_i32 = arith.constant 50 : i32
    %18 = vector.broadcast %c-50_i32 : i32 to vector<8x256xi32>
    %19 = arith.maxsi %18, %14 : vector<8x256xi32>
    %20 = vector.broadcast %c50_i32 : i32 to vector<8x256xi32>
    %21 = arith.minsi %20, %19 : vector<8x256xi32>
    %c50_i32_6 = arith.constant 50 : i32
    %22 = vector.broadcast %c50_i32_6 : i32 to vector<8x256xi32>
    %23 = arith.addi %21, %22 : vector<8x256xi32>
    %c-50_i32_7 = arith.constant -50 : i32
    %c50_i32_8 = arith.constant 50 : i32
    %24 = vector.broadcast %c-50_i32_7 : i32 to vector<8x256xi32>
    %25 = arith.maxsi %24, %17 : vector<8x256xi32>
    %26 = vector.broadcast %c50_i32_8 : i32 to vector<8x256xi32>
    %27 = arith.minsi %26, %25 : vector<8x256xi32>
    %c50_i32_9 = arith.constant 50 : i32
    %28 = vector.broadcast %c50_i32_9 : i32 to vector<8x256xi32>
    %29 = arith.addi %27, %28 : vector<8x256xi32>
    %c256_i32 = arith.constant 256 : i32
    %30 = arith.muli %arg1, %c256_i32 : i32
    %31 = tpu.iota {dimensions = array<i32: 1>} : vector<8x256xi32>
    %32 = vector.broadcast %30 : i32 to vector<8x256xi32>
    %33 = arith.addi %32, %31 : vector<8x256xi32>
    %c0_10 = arith.constant 0 : index
    %34 = memref.load %arg2[%c0_10] : memref<1xi32, #tpu.memory_space<smem>>
    %35 = vector.broadcast %34 : i32 to vector<8x256xi32>
    %36 = arith.cmpi slt, %33, %35 : vector<8x256xi32>
    %c127_i32 = arith.constant 127 : i32
    %37 = vector.broadcast %c127_i32 : i32 to vector<8x256xi32>
    %38 = arith.select %36, %23, %37 : vector<8x256xi1>, vector<8x256xi32>
    %c127_i32_11 = arith.constant 127 : i32
    %39 = vector.broadcast %c127_i32_11 : i32 to vector<8x256xi32>
    %40 = arith.select %36, %29, %39 : vector<8x256xi1>, vector<8x256xi32>
    %41 = tpu.iota {dimensions = array<i32: 1>} : vector<8x128x256xi32>
    %42 = vector.shape_cast %38 : vector<8x256xi32> to vector<8x1x256xi32>
    %43 = vector.broadcast %42 : vector<8x1x256xi32> to vector<8x128x256xi32>
    %44 = arith.cmpi eq, %43, %41 : vector<8x128x256xi32>
    %45 = arith.extui %44 : vector<8x128x256xi1> to vector<8x128x256xi32>
    %46 = arith.sitofp %45 : vector<8x128x256xi32> to vector<8x128x256xf32>
    %47 = arith.truncf %46 : vector<8x128x256xf32> to vector<8x128x256xbf16>
    %48 = vector.shape_cast %40 : vector<8x256xi32> to vector<8x1x256xi32>
    %49 = vector.broadcast %48 : vector<8x1x256xi32> to vector<8x128x256xi32>
    %50 = arith.cmpi eq, %49, %41 : vector<8x128x256xi32>
    %51 = arith.extui %50 : vector<8x128x256xi1> to vector<8x128x256xi32>
    %52 = arith.sitofp %51 : vector<8x128x256xi32> to vector<8x128x256xf32>
    %53 = arith.truncf %52 : vector<8x128x256xf32> to vector<8x128x256xbf16>
    %c0_12 = arith.constant 0 : index
    %c0_13 = arith.constant 0 : index
    %c0_14 = arith.constant 0 : index
    %54 = vector.load %arg13[%c0_12, %c0_13, %c0_14] : memref<8x128x128xf32, #tpu.memory_space<vmem>>, vector<8x128x128xf32>
    "tpu.trace_start"() <{level = 10 : i32, message = "nae,nbe->nab"}> : () -> ()
    %cst = arith.constant dense<0.000000e+00> : vector<8x128x128xf32>
    %55 = tpu.matmul %47, %53, %cst {dimension_numbers = #tpu.dot_dimension_numbers<[2], [2], [1], [1], [0, 0, 0, 1, 1, 1], [0], [0]>} : vector<8x128x256xbf16>, vector<8x128x256xbf16>, vector<8x128x128xf32> -> vector<8x128x128xf32>
    "tpu.trace_stop"() : () -> ()
    %56 = arith.addf %54, %55 : vector<8x128x128xf32>
    %c0_15 = arith.constant 0 : index
    %c0_16 = arith.constant 0 : index
    %c0_17 = arith.constant 0 : index
    %57 = vector.load %arg13[%c0_15, %c0_16, %c0_17] : memref<8x128x128xf32, #tpu.memory_space<vmem>>, vector<8x128x128xf32>
    tpu.vector_store %arg13[%c0_15, %c0_16, %c0_17], %56 {strides = array<i32>} : memref<8x128x128xf32, #tpu.memory_space<vmem>>, vector<8x128x128xf32>,
    %c1_i32 = arith.constant 1 : i32
    %58 = arith.cmpi eq, %arg1, %c1_i32 : i32
    %59 = arith.extui %58 : i1 to i32
    %c0_i32_18 = arith.constant 0 : i32
    %60 = arith.cmpi ne, %59, %c0_i32_18 : i32
    scf.if %60 {
      %c0_19 = arith.constant 0 : index
      %c0_20 = arith.constant 0 : index
      %c0_21 = arith.constant 0 : index
      %61 = vector.load %arg13[%c0_19, %c0_20, %c0_21] : memref<8x128x128xf32, #tpu.memory_space<vmem>>, vector<8x128x128xf32>
      %c0_22 = arith.constant 0 : index
      %c0_23 = arith.constant 0 : index
      %62 = vector.load %arg7[%c0_22, %c0_23] : memref<128x128xf32, #tpu.memory_space<vmem>>, vector<128x128xf32>
      %63 = vector.shape_cast %62 : vector<128x128xf32> to vector<1x128x128xf32>
      %64 = vector.broadcast %63 : vector<1x128x128xf32> to vector<8x128x128xf32>
      %65 = arith.mulf %61, %64 : vector<8x128x128xf32>
      %cst_24 = arith.constant dense<0.000000e+00> : vector<8x128xf32>
      %66 = vector.multi_reduction <add>, %65, %cst_24 [2] : vector<8x128x128xf32> to vector<8x128xf32>
      %cst_25 = arith.constant dense<0.000000e+00> : vector<8xf32>
      %67 = vector.multi_reduction <add>, %66, %cst_25 [1] : vector<8x128xf32> to vector<8xf32>
      %68 = vector.shape_cast %67 : vector<8xf32> to vector<8x1xf32>
      %c0_26 = arith.constant 0 : index
      %c0_27 = arith.constant 0 : index
      %69 = vector.load %arg8[%c0_26, %c0_27] : memref<128x128xf32, #tpu.memory_space<vmem>>, vector<128x128xf32>
      %70 = vector.shape_cast %69 : vector<128x128xf32> to vector<1x128x128xf32>
      %71 = vector.broadcast %70 : vector<1x128x128xf32> to vector<8x128x128xf32>
      %72 = arith.mulf %61, %71 : vector<8x128x128xf32>
      %cst_28 = arith.constant dense<0.000000e+00> : vector<8x128xf32>
      %73 = vector.multi_reduction <add>, %72, %cst_28 [2] : vector<8x128x128xf32> to vector<8x128xf32>
      %cst_29 = arith.constant dense<0.000000e+00> : vector<8xf32>
      %74 = vector.multi_reduction <add>, %73, %cst_29 [1] : vector<8x128xf32> to vector<8xf32>
      %75 = vector.shape_cast %74 : vector<8xf32> to vector<8x1xf32>
      %cst_30 = arith.constant 0.000000e+00 : f32
      %76 = vector.broadcast %cst_30 : f32 to vector<8x1xf32>
      %77 = arith.cmpf one, %68, %76 : vector<8x1xf32>
      %78 = arith.extui %77 : vector<8x1xi1> to vector<8x1xi32>
      %79 = arith.sitofp %78 : vector<8x1xi32> to vector<8x1xf32>
      %c0_31 = arith.constant 0 : index
      %c0_32 = arith.constant 0 : index
      %80 = vector.load %arg6[%c0_31, %c0_32] : memref<2x16xf32, #tpu.memory_space<vmem>>, vector<2x16xf32>
      %81 = vector.extract_strided_slice %80 {offsets = [1, 0], sizes = [1, 16], strides = [1, 1]} : vector<2x16xf32> to vector<1x16xf32>
      %82 = vector.extract_strided_slice %80 {offsets = [0, 0], sizes = [1, 16], strides = [1, 1]} : vector<2x16xf32> to vector<1x16xf32>
      %c0_33 = arith.constant 0 : index
      %c0_34 = arith.constant 0 : index
      %83 = vector.load %arg9[%c0_33, %c0_34] : memref<8x16xf32, #tpu.memory_space<vmem>>, vector<8x16xf32>
      %c0_35 = arith.constant 0 : index
      %c0_36 = arith.constant 0 : index
      %84 = vector.load %arg10[%c0_35, %c0_36] : memref<8x16xf32, #tpu.memory_space<vmem>>, vector<8x16xf32>
      %85 = vector.broadcast %81 : vector<1x16xf32> to vector<8x16xf32>
      %86 = vector.broadcast %4 : vector<8x1xf32> to vector<8x16xf32>
      %87 = arith.subf %85, %86 : vector<8x16xf32>
      %88 = vector.broadcast %82 : vector<1x16xf32> to vector<8x16xf32>
      %89 = vector.broadcast %5 : vector<8x1xf32> to vector<8x16xf32>
      %90 = arith.subf %88, %89 : vector<8x16xf32>
      %91 = arith.mulf %87, %83 : vector<8x16xf32>
      %92 = arith.mulf %90, %83 : vector<8x16xf32>
      %93 = arith.mulf %91, %91 : vector<8x16xf32>
      %94 = arith.mulf %92, %92 : vector<8x16xf32>
      %95 = arith.addf %93, %94 : vector<8x16xf32>
      %96 = arith.mulf %84, %84 : vector<8x16xf32>
      %97 = arith.subf %95, %96 : vector<8x16xf32>
      %cst_37 = arith.constant 4.000000e+00 : f32
      %98 = vector.broadcast %cst_37 : f32 to vector<8x16xf32>
      %99 = arith.mulf %98, %87 : vector<8x16xf32>
      %100 = arith.mulf %99, %97 : vector<8x16xf32>
      %cst_38 = arith.constant 4.000000e+00 : f32
      %101 = vector.broadcast %cst_38 : f32 to vector<8x16xf32>
      %102 = arith.mulf %101, %90 : vector<8x16xf32>
      %103 = arith.mulf %102, %97 : vector<8x16xf32>
      %c0_39 = arith.constant 0 : index
      %c0_40 = arith.constant 0 : index
      %104 = vector.load %arg11[%c0_39, %c0_40] : memref<8x1xf32, #tpu.memory_space<vmem>>, vector<8x1xf32>
      %105 = arith.mulf %104, %79 : vector<8x1xf32>
      %cst_41 = arith.constant dense<0.000000e+00> : vector<8xf32>
      %106 = vector.multi_reduction <add>, %100, %cst_41 [1] : vector<8x16xf32> to vector<8xf32>
      %107 = vector.shape_cast %106 : vector<8xf32> to vector<8x1xf32>
      %108 = arith.mulf %105, %107 : vector<8x1xf32>
      %109 = arith.mulf %104, %79 : vector<8x1xf32>
      %cst_42 = arith.constant dense<0.000000e+00> : vector<8xf32>
      %110 = vector.multi_reduction <add>, %103, %cst_42 [1] : vector<8x16xf32> to vector<8xf32>
      %111 = vector.shape_cast %110 : vector<8xf32> to vector<8x1xf32>
      %112 = arith.mulf %109, %111 : vector<8x1xf32>
      %cst_43 = arith.constant -4.000000e+02 : f32
      %cst_44 = arith.constant 4.000000e+02 : f32
      %113 = vector.broadcast %cst_43 : f32 to vector<8x1xf32>
      %114 = arith.maximumf %113, %68 : vector<8x1xf32>
      %115 = vector.broadcast %cst_44 : f32 to vector<8x1xf32>
      %116 = arith.minimumf %115, %114 : vector<8x1xf32>
      %cst_45 = arith.constant 3.000000e-03 : f32
      %117 = vector.broadcast %cst_45 : f32 to vector<8x1xf32>
      %118 = arith.mulf %117, %116 : vector<8x1xf32>
      %119 = arith.subf %4, %118 : vector<8x1xf32>
      %cst_46 = arith.constant 2.500000e-07 : f32
      %120 = vector.broadcast %cst_46 : f32 to vector<8x1xf32>
      %121 = arith.mulf %120, %108 : vector<8x1xf32>
      %122 = arith.addf %119, %121 : vector<8x1xf32>
      %cst_47 = arith.constant -4.000000e+02 : f32
      %cst_48 = arith.constant 4.000000e+02 : f32
      %123 = vector.broadcast %cst_47 : f32 to vector<8x1xf32>
      %124 = arith.maximumf %123, %75 : vector<8x1xf32>
      %125 = vector.broadcast %cst_48 : f32 to vector<8x1xf32>
      %126 = arith.minimumf %125, %124 : vector<8x1xf32>
      %cst_49 = arith.constant 3.000000e-03 : f32
      %127 = vector.broadcast %cst_49 : f32 to vector<8x1xf32>
      %128 = arith.mulf %127, %126 : vector<8x1xf32>
      %129 = arith.subf %5, %128 : vector<8x1xf32>
      %cst_50 = arith.constant 2.500000e-07 : f32
      %130 = vector.broadcast %cst_50 : f32 to vector<8x1xf32>
      %131 = arith.mulf %130, %112 : vector<8x1xf32>
      %132 = arith.addf %129, %131 : vector<8x1xf32>
      %133 = tpu.concatenate %132, %122 in 1 : vector<8x1xf32>, vector<8x1xf32> -> vector<8x2xf32>
      %c0_51 = arith.constant 0 : index
      %c0_52 = arith.constant 0 : index
      %134 = vector.load %arg12[%c0_51, %c0_52] : memref<8x2xf32, #tpu.memory_space<vmem>>, vector<8x2xf32>
      tpu.vector_store %arg12[%c0_51, %c0_52], %133 {strides = array<i32>} : memref<8x2xf32, #tpu.memory_space<vmem>>, vector<8x2xf32>,
    } else {
    }
    return
  }
  func.func @transform_0(%arg0: i32, %arg1: i32, %arg2: memref<1xi32, #tpu.memory_space<smem>>) -> (i32, i32) {
    %c0_i32 = arith.constant 0 : i32
    return %arg0, %arg1 : i32, i32
  }
  func.func @transform_1(%arg0: i32, %arg1: i32, %arg2: memref<1xi32, #tpu.memory_space<smem>>) -> (i32, i32) {
    %c0_i32 = arith.constant 0 : i32
    return %arg0, %arg1 : i32, i32
  }
  func.func @transform_2(%arg0: i32, %arg1: i32, %arg2: memref<1xi32, #tpu.memory_space<smem>>) -> (i32, i32) {
    %c0_i32 = arith.constant 0 : i32
    %c0_i32_0 = arith.constant 0 : i32
    return %arg0, %c0_i32 : i32, i32
  }
  func.func @transform_3(%arg0: i32, %arg1: i32, %arg2: memref<1xi32, #tpu.memory_space<smem>>) -> (i32, i32) {
    %c0_i32 = arith.constant 0 : i32
    %c0_i32_0 = arith.constant 0 : i32
    %c0_i32_1 = arith.constant 0 : i32
    return %c0_i32, %c0_i32_0 : i32, i32
  }
  func.func @transform_4(%arg0: i32, %arg1: i32, %arg2: memref<1xi32, #tpu.memory_space<smem>>) -> (i32, i32) {
    %c0_i32 = arith.constant 0 : i32
    %c0_i32_0 = arith.constant 0 : i32
    %c0_i32_1 = arith.constant 0 : i32
    return %c0_i32, %c0_i32_0 : i32, i32
  }
  func.func @transform_5(%arg0: i32, %arg1: i32, %arg2: memref<1xi32, #tpu.memory_space<smem>>) -> (i32, i32) {
    %c0_i32 = arith.constant 0 : i32
    %c0_i32_0 = arith.constant 0 : i32
    %c0_i32_1 = arith.constant 0 : i32
    return %c0_i32, %c0_i32_0 : i32, i32
  }
  func.func @transform_6(%arg0: i32, %arg1: i32, %arg2: memref<1xi32, #tpu.memory_space<smem>>) -> (i32, i32) {
    %c0_i32 = arith.constant 0 : i32
    %c0_i32_0 = arith.constant 0 : i32
    return %arg0, %c0_i32 : i32, i32
  }
  func.func @transform_7(%arg0: i32, %arg1: i32, %arg2: memref<1xi32, #tpu.memory_space<smem>>) -> (i32, i32) {
    %c0_i32 = arith.constant 0 : i32
    %c0_i32_0 = arith.constant 0 : i32
    return %arg0, %c0_i32 : i32, i32
  }
  func.func @transform_8(%arg0: i32, %arg1: i32, %arg2: memref<1xi32, #tpu.memory_space<smem>>) -> (i32, i32) {
    %c0_i32 = arith.constant 0 : i32
    %c0_i32_0 = arith.constant 0 : i32
    return %arg0, %c0_i32 : i32, i32
  }
  func.func @transform_9(%arg0: i32, %arg1: i32, %arg2: memref<1xi32, #tpu.memory_space<smem>>) -> (i32, i32) {
    %c0_i32 = arith.constant 0 : i32
    %c0_i32_0 = arith.constant 0 : i32
    return %arg0, %c0_i32 : i32, i32
  }
}

</mosaic_0001>

<bundles_post_ra>
// kernel: tpu_custom_call.1
= control target key start
LH: loop header
LB: loop body
LE: loop exit
PB: predicated region body
PF: predicated region fallthrough
CT: control target
= control target key end

     0   :  { %s11346_s0 = inlined_call_operand.<no memory space> [shape: s32[1], index: 0, kind: input, shape index: {}]   ;;  %s11347_s1 = inlined_call_operand.hbm [shape: f32[16,512], index: 1, kind: input, shape index: {}]   ;;  %s11348_s2 = inlined_call_operand.hbm [shape: f32[16,512], index: 2, kind: input, shape index: {}]   ;;  %s11349_s3 = inlined_call_operand.vmem [shape: f32[16,2], index: 3, kind: input, shape index: {}]   ;;  %s11350_s4 = inlined_call_operand.vmem [shape: f32[2,16], index: 4, kind: input, shape index: {}]   ;;  %s11351_s5 = inlined_call_operand.hbm [shape: f32[128,128], index: 5, kind: input, shape index: {}]   ;;  %s11352_s6 = inlined_call_operand.hbm [shape: f32[128,128], index: 6, kind: input, shape index: {}]   ;;  %s11353_s7 = inlined_call_operand.vmem [shape: f32[16,16], index: 7, kind: input, shape index: {}]   ;;  %s11354_s8 = inlined_call_operand.vmem [shape: f32[16,16], index: 8, kind: input, shape index: {}]   ;;  %s11355_s9 = inlined_call_operand.vmem [shape: f32[16,1], index: 9, kind: input, shape index: {}]   ;;  %s11356_s10 = inlined_call_operand.vmem [shape: f32[16,2], index: 10, kind: output, shape index: {}]  }
   0x1   :  { %11383 = sst [smem:[#allocation28_spill]] %s11350_s4 }
   0x2   :  { %11384 = sst [smem:[#allocation29_spill]] %s11351_s5 }
   0x3   :  { %11385 = sst [smem:[#allocation30_spill]] %s11352_s6 }
   0x4   :  { %11386 = sst [smem:[#allocation31_spill]] %s11355_s9 }
   0x5   :  { %11387 = sst [smem:[#allocation32_spill]] %s11356_s10 }
   0x6   :  { %15 = sst [smem:[#allocation4]] %s11346_s0 }
   0x7   :  { %16 = vsyncpa [#allocation6], 0 }
   0x8   :  { %18 = vsyncpa [#allocation6 + $0x1], 0 }
   0x9   :  { %19 = vsyncpa [#allocation8], 0 }
   0xa   :  { %21 = vsyncpa [#allocation8 + $0x1], 0 }
   0xb   :  { %22 = vsyncpa [#allocation11], 0  ;;  %s8224_s15 = smov 0   ;;  %s8226_s16 = smov 0  }
   0xc   :  { %s8228_s17 = smov 0   ;;  %s8230_s18 = smov 0  }
   0xd   :  { %s8232_s19 = smov 0   ;;  %s8234_s20 = smov 0  }
   0xe   :  { %s8236_s21 = smov 0   ;;  %s8238_s0 = smov 0  }
   0xf LB: > { %11388 = sst [smem:[#allocation16_spill]] %s8135_s18  ;;  %s11357_s22 = sadd.s32 4294967295, %s8151_s0   ;;  %s8151_s0 = sphi %s8238_s0, %s28_s0   ;;  %s8147_s21 = sphi %s8236_s21, %s11451_s21   ;;  %s8143_s20 = sphi %s8234_s20, %s11446_s20   ;;  %s8139_s19 = sphi %s8232_s19, %s11450_s19   ;;  %s8135_s18 = sphi %s8230_s18, %s11445_s18   ;;  %s8131_s17 = sphi %s8228_s17, %s11449_s17   ;;  %s8127_s16 = sphi %s8226_s16, %s11448_s16   ;;  %s8123_s15 = sphi %s8224_s15, %s11447_s15  }
  0x10   : > { %11389 = sst [smem:[#allocation17_spill]] %s8143_s20  ;;  %p62_p0 = scmp.ne.s32.totalorder %s8127_s16, %s8123_s15 }
  0x11   : > { %p8266_p1 = scmp.eq.s32.totalorder %s11357_s22, 0  ;;  %p6644_p2 = scmp.ge.s32.totalorder %s8151_s0, 1 }
  0x12   : > { %p294_p3 = scmp.lt.s32.totalorder %s8151_s0, 5  ;;  %s8153_s26 = smov [#allocation9]  }
  0x13   : > { %s11390_s23 = scalar_select %p8266_p1, 1, 0 }
  0x14   : > { %p8274_p4 = por %p8266_p1, %p62_p0  ;;  %p8278_p5 = pnand %p6644_p2, %p294_p3 }
  0x15   : > { %s309_s27 = sshll.u32 %s8153_s26, 4  ;;  %s8154_s29 = smov [#allocation10]   ;;  %s310_s27 = int_to_ptr.vmem [resolvable:$true] %s309_s27 }
  0x16   : > { %s11391_s24 = scalar_select %p8274_p4, 1, 0 }
  0x17   : > { %s11392_s25 = scalar_select %p8278_p5, 1, 0 }
  0x18   : > { %p7726_p6 = pneg %p8278_p5  ;;  %s322_s30 = sshll.u32 %s8154_s29, 4  ;;  %s8290_s30 = int_to_ptr.vmem [resolvable:$true] %s322_s30 }
  0x19   : > { %s11394_s5 = sld [smem:[#allocation29_spill]] }
  0x1a   : > { %p8286_p7 = pnand %p7726_p6, %p8266_p1 }
  0x1c   : > { %p7959_p9 = pneg %p8286_p7 }
  0x1f   : > { %s7957_s13 = scalar_lea.hbm %s11394_s5, 2048 }
  0x20   : > { %p7958_p8 = scmp.ne.s32.totalorder %s11394_s5, %s7957_s13  ;;  %p7964_p12 = scmp.lt.u32.totalorder %s7957_s13, %s11394_s5 }
  0x22   : > { %p7960_p10 = pnand %p7959_p9, %p7958_p8 }
  0x24   : > { %p7961_p11 = pneg %p7960_p10 }
  0x26   : > { %p7966_p13 = pnand %p7964_p12, %p7961_p11 }
  0x28   : > { %7969 = shalt.err (!%p7966_p13)
}
  0x29   : > { %s7970_s29 = scalar_lea.vmem %s310_s27, 2048  ;;  %p7978_p6 = scmp.lt.s32.totalorder %s310_s27, %s310_s27 }
  0x2a   : > { %p7971_p0 = scmp.ne.s32.totalorder %s310_s27, %s7970_s29  ;;  %p7979_p1 = scmp.lt.s32.totalorder %s7970_s29, %s7970_s29 }
  0x2c   : > { %p7973_p2 = pnand %p7971_p0, %p7959_p9  ;;  %p7980_p4 = por %p7979_p1, %p7978_p6 }
  0x2e   : > { %p7974_p3 = pneg %p7973_p2 }
  0x30   : > { %p7981_p5 = pnand %p7980_p4, %p7974_p3 }
  0x32   : > { %7984 = shalt.err (!%p7981_p5)
}
  0x33   : > { %s8155_s11 = smov 128   ;;  %s8156_s12 = smov 8  }
  0x34   : > { %7729 = dma.hbm_to_vmem [thread:$0]  (!%p8286_p7), %s11394_s5, 2048, %s310_s27, [#allocation8], %s8155_s11, %s8155_s11, %s8156_s12  }
  0x35   : > { %s11395_s6 = sld [smem:[#allocation30_spill]] }
  0x3b   : > { %s7985_s26 = scalar_lea.hbm %s11395_s6, 2048 }
  0x3c   : > { %p7986_p8 = scmp.ne.s32.totalorder %s11395_s6, %s7985_s26  ;;  %p7992_p5 = scmp.lt.u32.totalorder %s7985_s26, %s11395_s6 }
  0x3e   : > { %p7988_p1 = pnand %p7986_p8, %p7959_p9 }
  0x40   : > { %p7989_p4 = pneg %p7988_p1 }
  0x42   : > { %p7994_p10 = pnand %p7992_p5, %p7989_p4 }
  0x44   : > { %7997 = shalt.err (!%p7994_p10)
}
  0x45   : > { %s7998_s27 = scalar_lea.vmem %s8290_s30, 2048  ;;  %p8006_p0 = scmp.lt.s32.totalorder %s8290_s30, %s8290_s30 }
  0x46   : > { %p7999_p11 = scmp.ne.s32.totalorder %s8290_s30, %s7998_s27  ;;  %p8007_p2 = scmp.lt.s32.totalorder %s7998_s27, %s7998_s27 }
  0x48   : > { %p8001_p12 = pnand %p7999_p11, %p7959_p9  ;;  %p8008_p3 = por %p8007_p2, %p8006_p0 }
  0x4a   : > { %p8002_p13 = pneg %p8001_p12 }
  0x4c   : > { %p8009_p6 = pnand %p8008_p3, %p8002_p13 }
  0x4e   : > { %8012 = shalt.err (!%p8009_p6)
}
  0x4f   : > { %7732 = dma.hbm_to_vmem [thread:$0]  (!%p8286_p7), %s11395_s6, 2048, %s8290_s30, [#allocation11], %s8155_s11, %s8155_s11, %s8156_s12  }
  0x50   : > { %s37_s18 = sadd.s32 1, %s8143_s20  ;;  %s40_s22 = sadd.s32 1, %s8147_s21 }
  0x51   : > { %p38_p9 = scmp.ge.s32.totalorder %s37_s18, 2  ;;  %s49_s28 = sadd.s32 1, %s8131_s17 }
  0x52   : > { %p56_p8 = scmp.ne.s32.totalorder %s8131_s17, %s8127_s16  ;;  %p57_p1 = scmp.eq.s32.totalorder %s8151_s0, 0 }
  0x53   : > { %s11453_s18 = smov (%p38_p9, %s37_s18), 0  ;;  %s11455_s22 = smov (!%p38_p9, %s40_s22), %s8147_s21 }
  0x54   : > { %11396 = sst [smem:[#allocation18_spill]] %s11453_s18  ;;  %s45_s13 = ssub.s32 %s8143_s20, %s11453_s18 }
  0x55   : > { %p8350_p4 = por %p57_p1, %p56_p8  ;;  %p42_p5 = scmp.ge.s32.totalorder %s11455_s22, 2 }
  0x56   : > { %p7742_p7 = scmp.lt.s32.totalorder %s8151_s0, 4  ;;  %s336_s30 = sand.u32 1, %s8131_s17  }
  0x57   : > { %s6649_s11 = sshll.u32 %s8143_s20, 1  ;;  %s11457_s22 = smov (%p42_p5, %s11455_s22), 0 }
  0x58   : > { %s8359_s12 = sshll.u32 %s336_s30, 4  ;;  %s44_s15 = ssub.s32 %s8147_s21, %s11457_s22 }
  0x59   : > { %s46_s26 = sor.u32 %s45_s13, %s44_s15  ;;  %s6650_s29 = sshll.u32 %s8147_s21, 2 }
  0x5a   : > { %p47_p10 = scmp.eq.s32.totalorder %s46_s26, 0  ;;  %s346_s27 = sadd.s32 %s6650_s29, %s6649_s11 }
  0x5b   : > { %s6651_s4 = sshll.u32 %s346_s27, 7  ;;  %s340_s10 = scalar_lea.vmem [#allocation5], %s8359_s12 }
  0x5c   : > { %s350_s5 = sshll.u32 %s340_s10, 4  ;;  %s8371_s20 = scalar_lea.hbm %s11347_s1, %s6651_s4  ;;  %s8373_s5 = int_to_ptr.vmem [resolvable:$true] %s350_s5 }
  0x5d   : > { %s8366_s6 = scalar_select %p47_p10, %s8131_s17, %s49_s28  }
  0x5e   : > { %p8379_p11 = pnand %p7742_p7, %p8350_p4  ;;  %s8386_s9 = scalar_lea.hbm %s11348_s2, %s6651_s4 }
  0x5f   : > { %s357_s18 = sand.u32 1, %s8151_s0   ;;  %s337_s15 = scalar_lea.sflag [#allocation6], %s336_s30 }
  0x60   : > { %s8013_s26 = scalar_lea.hbm %s8371_s20, 256  ;;  %p8015_p13 = pneg %p8379_p11 }
  0x61   : > { %p8014_p12 = scmp.ne.s32.totalorder %s8371_s20, %s8013_s26  ;;  %s8018_s27 = scalar_lea.hbm %s11347_s1, 1024 }
  0x62   : > { %p8019_p3 = scmp.lt.u32.totalorder %s8371_s20, %s11347_s1  ;;  %p8020_p6 = scmp.lt.u32.totalorder %s8018_s27, %s8013_s26 }
  0x63   : > { %p8016_p0 = pnand %p8015_p13, %p8014_p12  ;;  %p8022_p8 = scmp.lt.u32.totalorder %s8013_s26, %s8371_s20 }
  0x64   : > { %p8021_p9 = por %p8020_p6, %p8019_p3 }
  0x65   : > { %p8017_p2 = pneg %p8016_p0 }
  0x66   : > { %p8023_p1 = por %p8022_p8, %p8021_p9 }
  0x68   : > { %p8024_p4 = pnand %p8023_p1, %p8017_p2 }
  0x6a   : > { %8027 = shalt.err (!%p8024_p4)
}
  0x6b   : > { %s8028_s30 = scalar_lea.vmem %s8373_s5, 256  ;;  %s8157_s4 = smov [#allocation5]  }
  0x6c   : > { %p8029_p5 = scmp.ne.s32.totalorder %s8373_s5, %s8028_s30  ;;  %s8033_s28 = sshll.u32 %s8157_s4, 4  ;;  %s8034_s28 = int_to_ptr.vmem [resolvable:$false] %s8033_s28 }
  0x6d   : > { %s8035_s14 = scalar_lea.vmem %s8034_s28, 512  ;;  %p8036_p12 = scmp.lt.s32.totalorder %s8373_s5, %s8034_s28 }
  0x6e   : > { %p8031_p7 = pnand %p8029_p5, %p8015_p13  ;;  %p8037_p0 = scmp.lt.s32.totalorder %s8035_s14, %s8028_s30 }
  0x70   : > { %p8032_p10 = pneg %p8031_p7  ;;  %p8038_p3 = por %p8037_p0, %p8036_p12 }
  0x72   : > { %p8039_p6 = pnand %p8038_p3, %p8032_p10 }
  0x74   : > { %8042 = shalt.err (!%p8039_p6)
}
  0x75   : > { %7736 = dma.hbm_to_vmem [thread:$0]  (!%p8379_p11), %s8371_s20, 256, %s8373_s5, %s337_s15  }
  0x76   : > { %s361_s26 = scalar_lea.vmem [#allocation7], %s8359_s12  ;;  %s358_s27 = scalar_lea.sflag [#allocation8], %s357_s18 }
  0x77   : > { %s371_s29 = sshll.u32 %s361_s26, 4  ;;  %s8043_s10 = scalar_lea.hbm %s8386_s9, 256  ;;  %s372_s29 = int_to_ptr.vmem [resolvable:$true] %s371_s29 }
  0x78   : > { %p8044_p2 = scmp.ne.s32.totalorder %s8386_s9, %s8043_s10  ;;  %s8048_s4 = scalar_lea.hbm %s11348_s2, 1024 }
  0x79   : > { %p8049_p1 = scmp.lt.u32.totalorder %s8386_s9, %s11348_s2  ;;  %p8050_p4 = scmp.lt.u32.totalorder %s8048_s4, %s8043_s10 }
  0x7a   : > { %p8046_p9 = pnand %p8044_p2, %p8015_p13  ;;  %p8052_p7 = scmp.lt.u32.totalorder %s8043_s10, %s8386_s9 }
  0x7b   : > { %p8051_p5 = por %p8050_p4, %p8049_p1 }
  0x7c   : > { %p8047_p8 = pneg %p8046_p9 }
  0x7d   : > { %p8053_p10 = por %p8052_p7, %p8051_p5 }
  0x7f   : > { %p8054_p12 = pnand %p8053_p10, %p8047_p8 }
  0x81   : > { %8057 = shalt.err (!%p8054_p12)
}
  0x82   : > { %s8058_s5 = scalar_lea.vmem %s372_s29, 256  ;;  %s8158_s20 = smov [#allocation7]  }
  0x83   : > { %p8059_p0 = scmp.ne.s32.totalorder %s372_s29, %s8058_s5  ;;  %s8063_s12 = sshll.u32 %s8158_s20, 4  ;;  %s8064_s12 = int_to_ptr.vmem [resolvable:$false] %s8063_s12 }
  0x84   : > { %s8065_s18 = scalar_lea.vmem %s8064_s12, 512  ;;  %p8066_p2 = scmp.lt.s32.totalorder %s372_s29, %s8064_s12 }
  0x85   : > { %p8061_p3 = pnand %p8059_p0, %p8015_p13  ;;  %p8067_p9 = scmp.lt.s32.totalorder %s8065_s18, %s8058_s5 }
  0x87   : > { %p8062_p6 = pneg %p8061_p3  ;;  %p8068_p1 = por %p8067_p9, %p8066_p2 }
  0x89   : > { %p8069_p4 = pnand %p8068_p1, %p8062_p6 }
  0x8b   : > { %8072 = shalt.err (!%p8069_p4)
}
  0x8c   : > { %7739 = dma.hbm_to_vmem [thread:$0]  (!%p8379_p11), %s8386_s9, 256, %s372_s29, %s358_s27  }
  0x8d   : > { %p11399_p8 = scmp.ne.s32.totalorder %s11392_s25, 0 }
  0x8f   : > { %408 = sbr.rel (%p11399_p8) target bundleno = 1880 (0x758), region = 56 }
  0x96   : > { %s410_s15 = sand.u32 1, %s8127_s16   ;;  %p11400_p13 = scmp.ne.s32.totalorder %s11391_s24, 0 }
  0x97   : > { %s8439_s26 = sshll.u32 %s410_s15, 4  ;;  %s411_s10 = scalar_lea.sflag [#allocation6], %s410_s15 }
  0x98   : > { %s414_s11 = scalar_lea.vmem [#allocation5], %s8439_s26 }
  0x99   : > { %8106 = dma.done.wait (%p11400_p13), %s411_s10, 256  }
  0x9a   : > { %8108 = vsyncadd (%p11400_p13), %s411_s10, 4294967040  ;;  %s11401_s13 = sadd.s32 4294967295, %s8151_s0   ;;  %s423_s29 = scalar_lea.vmem [#allocation7], %s8439_s26 }
  0x9b   : > { %s419_s9 = sand.u32 1, %s11401_s13  }
  0x9c   : > { %s420_s25 = scalar_lea.sflag [#allocation8], %s419_s9 }
  0x9d   : > { %8110 = dma.done.wait (%p11400_p13), %s420_s25, 256  }
  0x9e   : > { %8112 = vsyncadd (%p11400_p13), %s420_s25, 4294967040  ;;  %p11402_p11 = scmp.ne.s32.totalorder %s11390_s23, 0 }
  0xa0   : > { %8114 = dma.done.wait (%p11402_p11), [#allocation8], 2048  }
  0xa1   : > { %8116 = vsyncadd (%p11402_p11), [#allocation8], 4294965248 }
  0xa2   : > { %8118 = dma.done.wait (%p11402_p11), [#allocation11], 2048  }
  0xa3   : > { %8120 = vsyncadd (%p11402_p11), [#allocation11], 4294965248  ;;  %p488_p5 = scmp.lt.s32.totalorder %s8139_s19, 1  ;;  %s11403_s15 = sld [smem:[#allocation31_spill]] }
  0xa4   : > { %s11404_s25 = sld [smem:[#allocation32_spill]]  ;;  %s11405_s30 = sld [smem:[#allocation16_spill]] }
  0xa5   : > { %s11459_s19 = smov (!%p488_p5, %s8139_s19), 1 }
  0xa6   : > { %s8463_s27 = sshll.u32 %s11459_s19, 3 }
  0xa7   : > { %s491_s4 = scalar_lea.vmem %s11349_s3, %s8463_s27  ;;  %s495_s23 = scalar_lea.vmem %s11353_s7, %s8463_s27 }
  0xa8   : > { %s499_s12 = scalar_lea.vmem %s11354_s8, %s8463_s27 }
  0xa9   : > { %s503_s10 = scalar_lea.vmem %s11403_s15, %s8463_s27 }
  0xaa   : > { %s507_s24 = scalar_lea.vmem %s11404_s25, %s8463_s27  ;;  %p6666_p7 = scmp.ne.s32.totalorder %s11405_s30, 0 }
  0xab   : > { %v8159_v0 = vmov (!%p6666_p7), 0.0  }
  0xac   : > { %512 = sbr.rel (%p6666_p7) target bundleno = 236 (0xec), region = 76  ;;  %513 = vst [vmem:[#allocation2] sm:$0xff] (!%p6666_p7), %v8159_v0  ;;  %514 = vst [vmem:[#allocation2 + $0x8] sm:$0xff] (!%p6666_p7), %v8159_v0 }
  0xad   : > { %515 = vst [vmem:[#allocation2 + $0x10] sm:$0xff] (!%p6666_p7), %v8159_v0  ;;  %516 = vst [vmem:[#allocation2 + $0x18] sm:$0xff] (!%p6666_p7), %v8159_v0 }
  0xae   : > { %517 = vst [vmem:[#allocation2 + $0x20] sm:$0xff] (!%p6666_p7), %v8159_v0  ;;  %518 = vst [vmem:[#allocation2 + $0x28] sm:$0xff] (!%p6666_p7), %v8159_v0 }
  0xaf   : > { %519 = vst [vmem:[#allocation2 + $0x30] sm:$0xff] (!%p6666_p7), %v8159_v0  ;;  %520 = vst [vmem:[#allocation2 + $0x38] sm:$0xff] (!%p6666_p7), %v8159_v0 }
  0xb0   : > { %521 = vst [vmem:[#allocation2 + $0x40] sm:$0xff] (!%p6666_p7), %v8159_v0  ;;  %522 = vst [vmem:[#allocation2 + $0x48] sm:$0xff] (!%p6666_p7), %v8159_v0 }
  0xb1   : > { %523 = vst [vmem:[#allocation2 + $0x50] sm:$0xff] (!%p6666_p7), %v8159_v0  ;;  %524 = vst [vmem:[#allocation2 + $0x58] sm:$0xff] (!%p6666_p7), %v8159_v0 }
  0xb2   : > { %525 = vst [vmem:[#allocation2 + $0x60] sm:$0xff] (!%p6666_p7), %v8159_v0  ;;  %526 = vst [vmem:[#allocation2 + $0x68] sm:$0xff] (!%p6666_p7), %v8159_v0 }
  0xb3   : > { %527 = vst [vmem:[#allocation2 + $0x70] sm:$0xff] %v8159_v0  ;;  %528 = vst [vmem:[#allocation2 + $0x78] sm:$0xff] %v8159_v0 }
  0xb4   : > { %529 = vst [vmem:[#allocation2 + $0x80] sm:$0xff] %v8159_v0  ;;  %530 = vst [vmem:[#allocation2 + $0x88] sm:$0xff] %v8159_v0 }
  0xb5   : > { %531 = vst [vmem:[#allocation2 + $0x90] sm:$0xff] %v8159_v0  ;;  %532 = vst [vmem:[#allocation2 + $0x98] sm:$0xff] %v8159_v0 }
  0xb6   : > { %533 = vst [vmem:[#allocation2 + $0xa0] sm:$0xff] %v8159_v0  ;;  %534 = vst [vmem:[#allocation2 + $0xa8] sm:$0xff] %v8159_v0 }
  0xb7   : > { %535 = vst [vmem:[#allocation2 + $0xb0] sm:$0xff] %v8159_v0  ;;  %536 = vst [vmem:[#allocation2 + $0xb8] sm:$0xff] %v8159_v0 }
  0xb8   : > { %537 = vst [vmem:[#allocation2 + $0xc0] sm:$0xff] %v8159_v0  ;;  %538 = vst [vmem:[#allocation2 + $0xc8] sm:$0xff] %v8159_v0 }
  0xb9   : > { %539 = vst [vmem:[#allocation2 + $0xd0] sm:$0xff] %v8159_v0  ;;  %540 = vst [vmem:[#allocation2 + $0xd8] sm:$0xff] %v8159_v0 }
  0xba   : > { %541 = vst [vmem:[#allocation2 + $0xe0] sm:$0xff] %v8159_v0  ;;  %542 = vst [vmem:[#allocation2 + $0xe8] sm:$0xff] %v8159_v0 }
  0xbb   : > { %543 = vst [vmem:[#allocation2 + $0xf0] sm:$0xff] %v8159_v0  ;;  %544 = vst [vmem:[#allocation2 + $0xf8] sm:$0xff] %v8159_v0 }
  0xbc   : > { %545 = vst [vmem:[#allocation2 + $0x100] sm:$0xff] %v8159_v0  ;;  %546 = vst [vmem:[#allocation2 + $0x108] sm:$0xff] %v8159_v0 }
  0xbd   : > { %547 = vst [vmem:[#allocation2 + $0x110] sm:$0xff] %v8159_v0  ;;  %548 = vst [vmem:[#allocation2 + $0x118] sm:$0xff] %v8159_v0 }
  0xbe   : > { %549 = vst [vmem:[#allocation2 + $0x120] sm:$0xff] %v8159_v0  ;;  %550 = vst [vmem:[#allocation2 + $0x128] sm:$0xff] %v8159_v0 }
  0xbf   : > { %551 = vst [vmem:[#allocation2 + $0x130] sm:$0xff] %v8159_v0  ;;  %552 = vst [vmem:[#allocation2 + $0x138] sm:$0xff] %v8159_v0 }
  0xc0   : > { %553 = vst [vmem:[#allocation2 + $0x140] sm:$0xff] %v8159_v0  ;;  %554 = vst [vmem:[#allocation2 + $0x148] sm:$0xff] %v8159_v0 }
  0xc1   : > { %555 = vst [vmem:[#allocation2 + $0x150] sm:$0xff] %v8159_v0  ;;  %556 = vst [vmem:[#allocation2 + $0x158] sm:$0xff] %v8159_v0 }
  0xc2   : > { %557 = vst [vmem:[#allocation2 + $0x160] sm:$0xff] %v8159_v0  ;;  %558 = vst [vmem:[#allocation2 + $0x168] sm:$0xff] %v8159_v0 }
  0xc3   : > { %559 = vst [vmem:[#allocation2 + $0x170] sm:$0xff] %v8159_v0  ;;  %560 = vst [vmem:[#allocation2 + $0x178] sm:$0xff] %v8159_v0 }
  0xc4   : > { %561 = vst [vmem:[#allocation2 + $0x180] sm:$0xff] %v8159_v0  ;;  %562 = vst [vmem:[#allocation2 + $0x188] sm:$0xff] %v8159_v0 }
  0xc5   : > { %563 = vst [vmem:[#allocation2 + $0x190] sm:$0xff] %v8159_v0  ;;  %564 = vst [vmem:[#allocation2 + $0x198] sm:$0xff] %v8159_v0 }
  0xc6   : > { %565 = vst [vmem:[#allocation2 + $0x1a0] sm:$0xff] %v8159_v0  ;;  %566 = vst [vmem:[#allocation2 + $0x1a8] sm:$0xff] %v8159_v0 }
  0xc7   : > { %567 = vst [vmem:[#allocation2 + $0x1b0] sm:$0xff] %v8159_v0  ;;  %568 = vst [vmem:[#allocation2 + $0x1b8] sm:$0xff] %v8159_v0 }
  0xc8   : > { %569 = vst [vmem:[#allocation2 + $0x1c0] sm:$0xff] %v8159_v0  ;;  %570 = vst [vmem:[#allocation2 + $0x1c8] sm:$0xff] %v8159_v0 }
  0xc9   : > { %571 = vst [vmem:[#allocation2 + $0x1d0] sm:$0xff] %v8159_v0  ;;  %572 = vst [vmem:[#allocation2 + $0x1d8] sm:$0xff] %v8159_v0 }
  0xca   : > { %573 = vst [vmem:[#allocation2 + $0x1e0] sm:$0xff] %v8159_v0  ;;  %574 = vst [vmem:[#allocation2 + $0x1e8] sm:$0xff] %v8159_v0 }
  0xcb   : > { %575 = vst [vmem:[#allocation2 + $0x1f0] sm:$0xff] %v8159_v0  ;;  %576 = vst [vmem:[#allocation2 + $0x1f8] sm:$0xff] %v8159_v0 }
  0xcc   : > { %577 = vst [vmem:[#allocation2 + $0x200] sm:$0xff] %v8159_v0  ;;  %578 = vst [vmem:[#allocation2 + $0x208] sm:$0xff] %v8159_v0 }
  0xcd   : > { %579 = vst [vmem:[#allocation2 + $0x210] sm:$0xff] %v8159_v0  ;;  %580 = vst [vmem:[#allocation2 + $0x218] sm:$0xff] %v8159_v0 }
  0xce   : > { %581 = vst [vmem:[#allocation2 + $0x220] sm:$0xff] %v8159_v0  ;;  %582 = vst [vmem:[#allocation2 + $0x228] sm:$0xff] %v8159_v0 }
  0xcf   : > { %583 = vst [vmem:[#allocation2 + $0x230] sm:$0xff] %v8159_v0  ;;  %584 = vst [vmem:[#allocation2 + $0x238] sm:$0xff] %v8159_v0 }
  0xd0   : > { %585 = vst [vmem:[#allocation2 + $0x240] sm:$0xff] %v8159_v0  ;;  %586 = vst [vmem:[#allocation2 + $0x248] sm:$0xff] %v8159_v0 }
  0xd1   : > { %587 = vst [vmem:[#allocation2 + $0x250] sm:$0xff] %v8159_v0  ;;  %588 = vst [vmem:[#allocation2 + $0x258] sm:$0xff] %v8159_v0 }
  0xd2   : > { %589 = vst [vmem:[#allocation2 + $0x260] sm:$0xff] %v8159_v0  ;;  %590 = vst [vmem:[#allocation2 + $0x268] sm:$0xff] %v8159_v0 }
  0xd3   : > { %591 = vst [vmem:[#allocation2 + $0x270] sm:$0xff] %v8159_v0  ;;  %592 = vst [vmem:[#allocation2 + $0x278] sm:$0xff] %v8159_v0 }
  0xd4   : > { %593 = vst [vmem:[#allocation2 + $0x280] sm:$0xff] %v8159_v0  ;;  %594 = vst [vmem:[#allocation2 + $0x288] sm:$0xff] %v8159_v0 }
  0xd5   : > { %595 = vst [vmem:[#allocation2 + $0x290] sm:$0xff] %v8159_v0  ;;  %596 = vst [vmem:[#allocation2 + $0x298] sm:$0xff] %v8159_v0 }
  0xd6   : > { %597 = vst [vmem:[#allocation2 + $0x2a0] sm:$0xff] %v8159_v0  ;;  %598 = vst [vmem:[#allocation2 + $0x2a8] sm:$0xff] %v8159_v0 }
  0xd7   : > { %599 = vst [vmem:[#allocation2 + $0x2b0] sm:$0xff] %v8159_v0  ;;  %600 = vst [vmem:[#allocation2 + $0x2b8] sm:$0xff] %v8159_v0 }
  0xd8   : > { %601 = vst [vmem:[#allocation2 + $0x2c0] sm:$0xff] %v8159_v0  ;;  %602 = vst [vmem:[#allocation2 + $0x2c8] sm:$0xff] %v8159_v0 }
  0xd9   : > { %603 = vst [vmem:[#allocation2 + $0x2d0] sm:$0xff] %v8159_v0  ;;  %604 = vst [vmem:[#allocation2 + $0x2d8] sm:$0xff] %v8159_v0 }
  0xda   : > { %605 = vst [vmem:[#allocation2 + $0x2e0] sm:$0xff] %v8159_v0  ;;  %606 = vst [vmem:[#allocation2 + $0x2e8] sm:$0xff] %v8159_v0 }
  0xdb   : > { %607 = vst [vmem:[#allocation2 + $0x2f0] sm:$0xff] %v8159_v0  ;;  %608 = vst [vmem:[#allocation2 + $0x2f8] sm:$0xff] %v8159_v0 }
  0xdc   : > { %609 = vst [vmem:[#allocation2 + $0x300] sm:$0xff] %v8159_v0  ;;  %610 = vst [vmem:[#allocation2 + $0x308] sm:$0xff] %v8159_v0 }
  0xdd   : > { %611 = vst [vmem:[#allocation2 + $0x310] sm:$0xff] %v8159_v0  ;;  %612 = vst [vmem:[#allocation2 + $0x318] sm:$0xff] %v8159_v0 }
  0xde   : > { %613 = vst [vmem:[#allocation2 + $0x320] sm:$0xff] %v8159_v0  ;;  %614 = vst [vmem:[#allocation2 + $0x328] sm:$0xff] %v8159_v0 }
  0xdf   : > { %615 = vst [vmem:[#allocation2 + $0x330] sm:$0xff] %v8159_v0  ;;  %616 = vst [vmem:[#allocation2 + $0x338] sm:$0xff] %v8159_v0 }
  0xe0   : > { %617 = vst [vmem:[#allocation2 + $0x340] sm:$0xff] %v8159_v0  ;;  %618 = vst [vmem:[#allocation2 + $0x348] sm:$0xff] %v8159_v0 }
  0xe1   : > { %619 = vst [vmem:[#allocation2 + $0x350] sm:$0xff] %v8159_v0  ;;  %620 = vst [vmem:[#allocation2 + $0x358] sm:$0xff] %v8159_v0 }
  0xe2   : > { %621 = vst [vmem:[#allocation2 + $0x360] sm:$0xff] %v8159_v0  ;;  %622 = vst [vmem:[#allocation2 + $0x368] sm:$0xff] %v8159_v0 }
  0xe3   : > { %623 = vst [vmem:[#allocation2 + $0x370] sm:$0xff] %v8159_v0  ;;  %624 = vst [vmem:[#allocation2 + $0x378] sm:$0xff] %v8159_v0 }
  0xe4   : > { %625 = vst [vmem:[#allocation2 + $0x380] sm:$0xff] %v8159_v0  ;;  %626 = vst [vmem:[#allocation2 + $0x388] sm:$0xff] %v8159_v0 }
  0xe5   : > { %627 = vst [vmem:[#allocation2 + $0x390] sm:$0xff] %v8159_v0  ;;  %628 = vst [vmem:[#allocation2 + $0x398] sm:$0xff] %v8159_v0 }
  0xe6   : > { %629 = vst [vmem:[#allocation2 + $0x3a0] sm:$0xff] %v8159_v0  ;;  %630 = vst [vmem:[#allocation2 + $0x3a8] sm:$0xff] %v8159_v0 }
  0xe7   : > { %631 = vst [vmem:[#allocation2 + $0x3b0] sm:$0xff] %v8159_v0  ;;  %632 = vst [vmem:[#allocation2 + $0x3b8] sm:$0xff] %v8159_v0 }
  0xe8   : > { %633 = vst [vmem:[#allocation2 + $0x3c0] sm:$0xff] %v8159_v0  ;;  %634 = vst [vmem:[#allocation2 + $0x3c8] sm:$0xff] %v8159_v0 }
  0xe9   : > { %635 = vst [vmem:[#allocation2 + $0x3d0] sm:$0xff] %v8159_v0  ;;  %636 = vst [vmem:[#allocation2 + $0x3d8] sm:$0xff] %v8159_v0 }
  0xea   : > { %637 = vst [vmem:[#allocation2 + $0x3e0] sm:$0xff] %v8159_v0  ;;  %638 = vst [vmem:[#allocation2 + $0x3e8] sm:$0xff] %v8159_v0 }
  0xeb   : > { %639 = vst [vmem:[#allocation2 + $0x3f0] sm:$0xff] %v8159_v0  ;;  %640 = vst [vmem:[#allocation2 + $0x3f8] sm:$0xff] %v8159_v0 }
  0xec PF: > { %v8619_v1 = vld [vmem:[%s491_s4] sm:$0xff]  ;;  %v8160_v2 = vmov 0   ;;  %v8161_v3 = vmov 1   ;;  %v645_v5 = vld [vmem:[%s423_s29 + $0x8] sm:$0xff]  ;;  %s11407_s5 = sld [smem:[#allocation16_spill]]  ;;  %v692_v12 = vlaneseq  ;;  %s8633_s4 = sld [smem:[#allocation4]] }
  0xed   : > { %11406 = vst [vmem:[#allocation19_spill] sm:$0xff] %v8619_v1  ;;  %7820 = vset.pattern.permute.xlu0 %v8160_v2  ;;  %v644_v4 = vld [vmem:[%s423_s29] sm:$0xff]  ;;  %v7704_v7 = vtrunc.f32 %v645_v5  ;;  %v643_v9 = vld [vmem:[%s414_s11 + $0x8] sm:$0xff]  ;;  %v8162_v27 = vmov 1966171168  }
  0xee   : > { %664 = vperm.xlu0 %7820, %v8619_v1   ;;  %v7702_v6 = vtrunc.f32 %v644_v4  ;;  %v642_v8 = vld [vmem:[%s414_s11] sm:$0xff]  ;;  %v7700_v14 = vtrunc.f32 %v643_v9  ;;  %v8631_v17 = vand.u32 127, %v692_v12  ;;  %v726_v28 = vunpack.c.l.s4 %v8162_v27 }
  0xef   : > { %v7705_v11 = vcvt.f32.s32 %v7704_v7  ;;  %v7698_v13 = vtrunc.f32 %v642_v8  ;;  %v8647_v39 = vshrl.u32 %v692_v12, 7 }
  0xf0   : > { %v7703_v10 = vcvt.f32.s32 %v7702_v6  ;;  %v7701_v19 = vcvt.f32.s32 %v7700_v14  ;;  %v694_v21 = vadd.s32 128, %v8631_v17  ;;  %v727_v40 = vunpack.c.0.s8 %v726_v28 }
  0xf1   : > { %v653_v16 = vcvt.s32.f32 %v7705_v11  ;;  %v7699_v18 = vcvt.f32.s32 %v7698_v13  ;;  %v8667_v60 = vsub.s32 0, %v8647_v39  ;;  %v8670_v61 = vsub.s32 1, %v8647_v39 }
  0xf2   : > { %7821 = vset.pattern.permute.xlu0 %v8161_v3  ;;  %v652_v15 = vcvt.s32.f32 %v7703_v10  ;;  %s6667_s29 = sshll.u32 %s11407_s5, 8  ;;  %v649_v26 = vcvt.s32.f32 %v7701_v19  ;;  %v699_v36 = vstv %s8633_s4  ;;  %v8658_v53 = vsub.s32 %v727_v40, %v8647_v39  ;;  %p7692_p10 = scmp.ne.s32.totalorder %s11407_s5, 1 }
  0xf3   : > { %656 = vperm.xlu0 %7821, %v8619_v1   ;;  %v695_v24 = vstv %s6667_s29  ;;  %v648_v25 = vcvt.s32.f32 %v7699_v18  ;;  %11414 = vst [vmem:[#allocation22_spill] sm:$0xff] %v8667_v60  ;;  %11415 = vst [vmem:[#allocation23_spill] sm:$0xff] %v8670_v61  ;;  %v8677_v5 = vadd.s32 8, %v8647_v39  ;;  %v8680_v6 = vadd.s32 16, %v8647_v39 }
  0xf4   : > { %v696_v31 = vadd.s32 %v695_v24, %v8631_v17  ;;  %v697_v32 = vadd.s32 %v695_v24, %v694_v21  ;;  %v8163_v28 = vmov 1.0|1.0   ;;  %v8791_v40 = vadd.s32 56, %v8647_v39 }
  0xf6   : > { %vm8649_vm2 = vcmp.lt.s32.totalorder %v696_v31, %v699_v36  ;;  %vm8653_vm3 = vcmp.lt.s32.totalorder %v697_v32, %v699_v36 }
  0xf7   : > { %7822 = vset.pattern.permute.xlu0 %v8160_v2 }
 0x16d   : > { %v8636_v20 = vpop.permute.xlu0 %664 }
 0x16e   : > { %11408 = vst [vmem:[#allocation20_spill] sm:$0xff] %v8636_v20  ;;  %v667_v22 = vsub.f32 %v652_v15, %v8636_v20  ;;  %v668_v23 = vsub.f32 %v653_v16, %v8636_v20  ;;  %v8701_v15 = vadd.s32 24, %v8647_v39 }
 0x170   : > { %v7710_v29 = vtrunc.f32 %v667_v22  ;;  %v7712_v30 = vtrunc.f32 %v668_v23 }
 0x172   : > { %v7711_v33 = vcvt.f32.s32 %v7710_v29  ;;  %v7713_v34 = vcvt.f32.s32 %v7712_v30  ;;  %v8642_v35 = vpop.permute.xlu0 %656  ;;  %v8757_v29 = vadd.s32 32, %v8647_v39  ;;  %v8760_v30 = vadd.s32 40, %v8647_v39 }
 0x173   : > { %11409 = vst [vmem:[#allocation21_spill] sm:$0xff] %v8642_v35  ;;  %v659_v37 = vsub.f32 %v648_v25, %v8642_v35  ;;  %v660_v38 = vsub.f32 %v649_v26, %v8642_v35 }
 0x174   : > { %vm681_vm0 = vcmp.gt.s32.totalorder %v7711_v33, 4294967246  ;;  %vm683_vm1 = vcmp.gt.s32.totalorder %v7713_v34, 4294967246 }
 0x175   : > { %v682_v41 = vsel %vm681_vm0, %v7711_v33, 4294967246  ;;  %v684_v42 = vsel %vm683_vm1, %v7713_v34, 4294967246  ;;  %v7706_v43 = vtrunc.f32 %v659_v37  ;;  %v7708_v44 = vtrunc.f32 %v660_v38 }
 0x176   : > { %vm685_vm4 = vcmp.lt.s32.totalorder %v682_v41, 50  ;;  %vm687_vm5 = vcmp.lt.s32.totalorder %v684_v42, 50  ;;  %v8788_v38 = vadd.s32 48, %v8647_v39 }
 0x177   : > { %v686_v47 = vsel %vm685_vm4, %v682_v41, 50  ;;  %v688_v48 = vsel %vm687_vm5, %v684_v42, 50  ;;  %v7707_v49 = vcvt.f32.s32 %v7706_v43  ;;  %v7709_v50 = vcvt.f32.s32 %v7708_v44 }
 0x178   : > { %v689_v51 = vadd.s32 50, %v686_v47  ;;  %v690_v52 = vadd.s32 50, %v688_v48  ;;  %v8810_v47 = vadd.s32 64, %v8647_v39  ;;  %v8813_v48 = vadd.s32 72, %v8647_v39 }
 0x179   : > { %vm671_vm6 = vcmp.gt.s32.totalorder %v7707_v49, 4294967246  ;;  %vm673_vm7 = vcmp.gt.s32.totalorder %v7709_v50, 4294967246 }
 0x17a   : > { %v704_v54 = vsel %vm8649_vm2, %v689_v51, 127  ;;  %v705_v55 = vsel %vm8653_vm3, %v690_v52, 127  ;;  %v672_v62 = vsel %vm671_vm6, %v7707_v49, 4294967246  ;;  %v674_v63 = vsel %vm673_vm7, %v7709_v50, 4294967246 }
 0x17b   : > { %v1733_v56 = vcombine.low %v704_v54, %v705_v55  ;;  %v1734_v57 = vcombine.high %v704_v54, %v705_v55  ;;  %vm675_vm8 = vcmp.lt.s32.totalorder %v672_v62, 50  ;;  %vm677_vm9 = vcmp.lt.s32.totalorder %v674_v63, 50 }
 0x17c   : > { %v676_v24 = vsel %vm675_vm8, %v672_v62, 50  ;;  %v678_v25 = vsel %vm677_vm9, %v674_v63, 50 }
 0x17d   : > { %v1741_v58 = vrot.slane %v1733_v56, %v8658_v53  ;;  %v1748_v59 = vrot.slane %v1734_v57, %v8658_v53  ;;  %v679_v31 = vadd.s32 50, %v676_v24  ;;  %v680_v32 = vadd.s32 50, %v678_v25 }
 0x17e   : > { %v8901_v24 = vadd.s32 88, %v8647_v39 }
 0x17f   : > { %v1749_v0 = vcombine.high %v1741_v58, %v1741_v58  ;;  %v1750_v2 = vcombine.high %v1748_v59, %v1748_v59  ;;  %v8673_v3 = vrot.slane %v1741_v58, %v8658_v53  ;;  %v1764_v4 = vrot.slane %v1748_v59, %v8658_v53 }
 0x180   : > { %v702_v33 = vsel %vm8649_vm2, %v679_v31, 127  ;;  %v703_v34 = vsel %vm8653_vm3, %v680_v32, 127  ;;  %v8941_v32 = vadd.s32 96, %v8647_v39 }
 0x181   : > { %v8683_v7 = vrot.slane %v1749_v0, %v8658_v53  ;;  %v1778_v8 = vrot.slane %v1750_v2, %v8658_v53  ;;  %v1780_v9 = vcombine.high %v1764_v4, %v1764_v4  ;;  %v8688_v10 = vrot.slane %v8673_v3, %v8670_v61 }
 0x182   : > { %v8691_v11 = vrot.slane %v1764_v4, %v8667_v60  ;;  %v8694_v12 = vrot.slane %v1764_v4, %v8670_v61  ;;  %v8698_v14 = vrot.slane %v8673_v3, %v8667_v60  ;;  %v723_v36 = vcombine.low %v702_v33, %v703_v34 }
 0x183   : > { %v1782_v13 = vcombine.high %v1778_v8, %v1778_v8  ;;  %v8705_v16 = vrot.slane %v8683_v7, %v8667_v60  ;;  %v8709_v18 = vrot.slane %v8683_v7, %v8670_v61  ;;  %v8712_v19 = vrot.slane %v1778_v8, %v8667_v60 }
 0x184   : > { %v8715_v21 = vrot.slane %v1778_v8, %v8670_v61  ;;  %v8718_v22 = vrot.slane %v1780_v9, %v8667_v60  ;;  %v8721_v23 = vrot.slane %v1780_v9, %v8670_v61  ;;  %vm1848_vm10 = vcmp.eq.s32.totalorder %v8688_v10, %v8647_v39 }
 0x185   : > { %v8724_v26 = vrot.slane %v1782_v13, %v8667_v60  ;;  %v8727_v27 = vrot.slane %v1782_v13, %v8670_v61  ;;  %vm1850_vm11 = vcmp.eq.s32.totalorder %v8688_v10, %v8677_v5  ;;  %vm1847_vm13 = vcmp.eq.s32.totalorder %v8698_v14, %v8647_v39 }
 0x186   : > { %vm7180_vm12 = vmpackc.low %vm1850_vm11, %vm1848_vm10  ;;  %vm1849_vm14 = vcmp.eq.s32.totalorder %v8698_v14, %v8677_v5  ;;  %vm1852_vm15 = vcmp.eq.s32.totalorder %v8688_v10, %v8680_v6  ;;  %vm1854_vm0 = vcmp.eq.s32.totalorder %v8688_v10, %v8701_v15  ;;  %vm1880_vm4 = vcmp.eq.s32.totalorder %v8709_v18, %v8647_v39 }
 0x187   : > { %7181 = vmatprep.subr.msk.bf16.mxu0 %vm7180_vm12, %v8163_v28  ;;  %vm7182_vm1 = vmpackc.low %vm1849_vm14, %vm1847_vm13  ;;  %vm1882_vm5 = vcmp.eq.s32.totalorder %v8709_v18, %v8677_v5  ;;  %vm1879_vm6 = vcmp.eq.s32.totalorder %v8705_v16, %v8647_v39  ;;  %vm1881_vm7 = vcmp.eq.s32.totalorder %v8705_v16, %v8677_v5  ;;  %vm1884_vm9 = vcmp.eq.s32.totalorder %v8709_v18, %v8680_v6 }
 0x188   : > { %7183 = vmatpush1.bf16.xpose.msk.msra.mxu0 %vm7182_vm1, %v8163_v28  ;;  %vm7184_vm8 = vmpackc.low %vm1854_vm0, %vm1852_vm15  ;;  %vm1886_vm10 = vcmp.eq.s32.totalorder %v8709_v18, %v8701_v15  ;;  %vm1851_vm14 = vcmp.eq.s32.totalorder %v8698_v14, %v8680_v6  ;;  %vm1853_vm15 = vcmp.eq.s32.totalorder %v8698_v14, %v8701_v15  ;;  %vm1856_vm0 = vcmp.eq.s32.totalorder %v8688_v10, %v8757_v29 }
 0x189   : > { %7185 = vmatprep.subr.msk.bf16.mxu0 %vm7184_vm8, %v8163_v28  ;;  %vm7244_vm11 = vmpackc.low %vm1882_vm5, %vm1880_vm4  ;;  %vm1858_vm1 = vcmp.eq.s32.totalorder %v8688_v10, %v8760_v30  ;;  %vm1883_vm5 = vcmp.eq.s32.totalorder %v8705_v16, %v8680_v6  ;;  %vm1888_vm8 = vcmp.eq.s32.totalorder %v8709_v18, %v8757_v29  ;;  %v724_v37 = vcombine.high %v702_v33, %v703_v34 }
 0x18a   : > { %7245 = vmatprep.subr.msk.bf16.mxu1 %vm7244_vm11, %v8163_v28  ;;  %vm7246_vm12 = vmpackc.low %vm1881_vm7, %vm1879_vm6  ;;  %vm1885_vm6 = vcmp.eq.s32.totalorder %v8705_v16, %v8701_v15  ;;  %v731_v41 = vrot.slane %v723_v36, %v8658_v53  ;;  %vm1857_vm11 = vcmp.eq.s32.totalorder %v8698_v14, %v8760_v30  ;;  %v8898_v13 = vadd.s32 80, %v8647_v39 }
 0x18b   : > { %7247 = vmatpush1.bf16.xpose.msk.msra.mxu1 %vm7246_vm12, %v8163_v28  ;;  %vm7248_vm13 = vmpackc.low %vm1886_vm10, %vm1884_vm9  ;;  %vm1890_vm9 = vcmp.eq.s32.totalorder %v8709_v18, %v8760_v30  ;;  %v738_v42 = vrot.slane %v724_v37, %v8658_v53  ;;  %vm1855_vm10 = vcmp.eq.s32.totalorder %v8698_v14, %v8757_v29  ;;  %vm1860_vm12 = vcmp.eq.s32.totalorder %v8688_v10, %v8788_v38 }
 0x18c   : > { %7249 = vmatprep.subr.msk.bf16.mxu1 %vm7248_vm13, %v8163_v28  ;;  %vm7186_vm4 = vmpackc.low %vm1853_vm15, %vm1851_vm14  ;;  %v739_v43 = vcombine.high %v731_v41, %v731_v41  ;;  %v8802_v45 = vrot.slane %v731_v41, %v8658_v53  ;;  %vm1862_vm13 = vcmp.eq.s32.totalorder %v8688_v10, %v8791_v40  ;;  %vm1887_vm15 = vcmp.eq.s32.totalorder %v8705_v16, %v8757_v29 }
 0x18d   : > { %vm7188_vm7 = vmpackc.low %vm1858_vm1, %vm1856_vm0  ;;  %v740_v44 = vcombine.high %v738_v42, %v738_v42  ;;  %v754_v46 = vrot.slane %v738_v42, %v8658_v53  ;;  %vm1889_vm0 = vcmp.eq.s32.totalorder %v8705_v16, %v8760_v30  ;;  %v8944_v33 = vadd.s32 104, %v8647_v39 }
 0x18e   : > { %vm7250_vm2 = vmpackc.low %vm1885_vm6, %vm1883_vm5  ;;  %v8816_v49 = vrot.slane %v739_v43, %v8658_v53  ;;  %v769_v51 = vcombine.high %v8802_v45, %v8802_v45  ;;  %vm1894_vm5 = vcmp.eq.s32.totalorder %v8709_v18, %v8791_v40  ;;  %v8906_v25 = vrot.slane %v8802_v45, %v8670_v61 }
 0x18f   : > { %vm7252_vm3 = vmpackc.low %vm1890_vm9, %vm1888_vm8  ;;  %v768_v50 = vrot.slane %v740_v44, %v8658_v53  ;;  %v770_v52 = vcombine.high %v754_v46, %v754_v46  ;;  %v8829_v54 = vrot.slane %v754_v46, %v8667_v60  ;;  %v8832_v55 = vrot.slane %v754_v46, %v8670_v61 }
 0x190   : > { %7187 = vmatpush1.bf16.xpose.msk.msra.mxu0 %vm7186_vm4, %v8163_v28  ;;  %vm7190_vm14 = vmpackc.low %vm1857_vm11, %vm1855_vm10  ;;  %vm1892_vm4 = vcmp.eq.s32.totalorder %v8709_v18, %v8788_v38  ;;  %v771_v53 = vcombine.high %v8816_v49, %v8816_v49  ;;  %v8843_v57 = vrot.slane %v769_v51, %v8667_v60  ;;  %v8846_v58 = vrot.slane %v769_v51, %v8670_v61 }
 0x191   : > { %7189 = vmatprep.subr.msk.bf16.mxu0 %vm7188_vm7, %v8163_v28  ;;  %vm7192_vm1 = vmpackc.low %vm1862_vm13, %vm1860_vm12  ;;  %v772_v56 = vcombine.high %v768_v50, %v768_v50  ;;  %v8849_v59 = vrot.slane %v768_v50, %v8667_v60  ;;  %v8852_v62 = vrot.slane %v768_v50, %v8670_v61  ;;  %v8864_v2 = vrot.slane %v770_v52, %v8667_v60  ;;  %v2761_v50 = vld [vmem:[#allocation2 + $0x90] sm:$0xff] }
 0x192   : > { %vm7254_vm6 = vmpackc.low %vm1889_vm0, %vm1887_vm15  ;;  %v8858_v63 = vrot.slane %v771_v53, %v8667_v60  ;;  %v8861_v0 = vrot.slane %v771_v53, %v8670_v61  ;;  %v8867_v4 = vrot.slane %v770_v52, %v8670_v61  ;;  %vm1859_vm8 = vcmp.eq.s32.totalorder %v8698_v14, %v8788_v38  ;;  %v2762_v53 = vld [vmem:[#allocation2 + $0x98] sm:$0xff] }
 0x193   : > { %7251 = vmatpush1.bf16.xpose.msk.msra.mxu1 %vm7250_vm2, %v8163_v28  ;;  %vm7256_vm7 = vmpackc.low %vm1894_vm5, %vm1892_vm4  ;;  %v8874_v8 = vrot.slane %v772_v56, %v8667_v60  ;;  %v8877_v9 = vrot.slane %v772_v56, %v8670_v61  ;;  %vm1861_vm9 = vcmp.eq.s32.totalorder %v8698_v14, %v8791_v40  ;;  %vm1864_vm2 = vcmp.eq.s32.totalorder %v8688_v10, %v8810_v47 }
 0x194   : > { %7253 = vmatprep.subr.msk.bf16.mxu1 %vm7252_vm3, %v8163_v28  ;;  %vm1866_vm3 = vcmp.eq.s32.totalorder %v8688_v10, %v8813_v48  ;;  %vm7194_vm10 = vmpackc.low %vm1861_vm9, %vm1859_vm8  ;;  %vm1891_vm11 = vcmp.eq.s32.totalorder %v8705_v16, %v8788_v38  ;;  %vm1893_vm12 = vcmp.eq.s32.totalorder %v8705_v16, %v8791_v40  ;;  %vm1898_vm15 = vcmp.eq.s32.totalorder %v8709_v18, %v8813_v48 }
 0x195   : > { %vm7196_vm13 = vmpackc.low %vm1866_vm3, %vm1864_vm2  ;;  %vm1863_vm4 = vcmp.eq.s32.totalorder %v8698_v14, %v8810_v47  ;;  %vm1865_vm5 = vcmp.eq.s32.totalorder %v8698_v14, %v8813_v48  ;;  %v8915_v31 = vrot.slane %v8816_v49, %v8670_v61  ;;  %vm838_vm8 = vcmp.eq.s32.totalorder %v8906_v25, %v8647_v39 }
 0x196   : > { %vm7258_vm0 = vmpackc.low %vm1893_vm12, %vm1891_vm11  ;;  %vm840_vm9 = vcmp.eq.s32.totalorder %v8906_v25, %v8677_v5  ;;  %vm1895_vm3 = vcmp.eq.s32.totalorder %v8705_v16, %v8810_v47  ;;  %v8969_v34 = vadd.s32 112, %v8647_v39  ;;  %v8972_v36 = vadd.s32 120, %v8647_v39 }
 0x197   : > { %vm7198_vm2 = vmpackc.low %vm1865_vm5, %vm1863_vm4  ;;  %vm870_vm12 = vcmp.eq.s32.totalorder %v8915_v31, %v8647_v39  ;;  %v1779_v37 = vcombine.high %v8673_v3, %v8673_v3  ;;  %v1781_v41 = vcombine.high %v8683_v7, %v8683_v7 }
 0x198   : > { %7191 = vmatpush1.bf16.xpose.msk.msra.mxu0 %vm7190_vm14, %v8163_v28  ;;  %vm1896_vm14 = vcmp.eq.s32.totalorder %v8709_v18, %v8810_v47 }
 0x199   : > { %7193 = vmatprep.subr.msk.bf16.mxu0 %vm7192_vm1, %v8163_v28  ;;  %vm7260_vm1 = vmpackc.low %vm1898_vm15, %vm1896_vm14  ;;  %vm1900_vm14 = vcmp.eq.s32.totalorder %v8709_v18, %v8898_v13  ;;  %vm1902_vm15 = vcmp.eq.s32.totalorder %v8709_v18, %v8901_v24  ;;  %v8998_v3 = vrot.slane %v1779_v37, %v8670_v61  ;;  %v9003_v7 = vrot.slane %v1781_v41, %v8670_v61 }
 0x19a   : > { %vm7264_vm5 = vmpackc.low %vm1902_vm15, %vm1900_vm14 }
 0x19b   : > { %7255 = vmatpush1.bf16.xpose.msk.msra.mxu1 %vm7254_vm6, %v8163_v28  ;;  %vm1868_vm6 = vcmp.eq.s32.totalorder %v8688_v10, %v8898_v13 }
 0x19c   : > { %7257 = vmatprep.subr.msk.bf16.mxu1 %vm7256_vm7, %v8163_v28  ;;  %vm1870_vm7 = vcmp.eq.s32.totalorder %v8688_v10, %v8901_v24 }
 0x19d   : > { %vm7200_vm11 = vmpackc.low %vm1870_vm7, %vm1868_vm6  ;;  %vm1867_vm6 = vcmp.eq.s32.totalorder %v8698_v14, %v8898_v13  ;;  %vm1869_vm7 = vcmp.eq.s32.totalorder %v8698_v14, %v8901_v24 }
 0x1a0   : > { %7195 = vmatpush1.bf16.xpose.msk.msra.mxu0 %vm7194_vm10, %v8163_v28  ;;  %vm1897_vm10 = vcmp.eq.s32.totalorder %v8705_v16, %v8813_v48 }
 0x1a1   : > { %7197 = vmatprep.subr.msk.bf16.mxu0 %vm7196_vm13, %v8163_v28  ;;  %vm872_vm13 = vcmp.eq.s32.totalorder %v8915_v31, %v8677_v5 }
 0x1a2   : > { %vm7276_vm4 = vmpackc.low %vm872_vm13, %vm870_vm12  ;;  %vm1904_vm12 = vcmp.eq.s32.totalorder %v8709_v18, %v8941_v32  ;;  %vm1906_vm13 = vcmp.eq.s32.totalorder %v8709_v18, %v8944_v33 }
 0x1a3   : > { %7259 = vmatpush1.bf16.xpose.msk.msra.mxu1 %vm7258_vm0, %v8163_v28  ;;  %vm7212_vm0 = vmpackc.low %vm840_vm9, %vm838_vm8  ;;  %7277 = vmatprep.mubr.msk.bf16.mxu1 %vm7276_vm4, %v8163_v28  ;;  %vm1872_vm8 = vcmp.eq.s32.totalorder %v8688_v10, %v8941_v32  ;;  %vm1874_vm9 = vcmp.eq.s32.totalorder %v8688_v10, %v8944_v33  ;;  %vm1876_vm4 = vcmp.eq.s32.totalorder %v8688_v10, %v8969_v34 }
 0x1a4   : > { %7261 = vmatprep.subr.msk.bf16.mxu1 %vm7260_vm1, %v8163_v28  ;;  %vm7262_vm1 = vmpackc.low %vm1897_vm10, %vm1895_vm3  ;;  %7213 = vmatprep.mubr.msk.bf16.mxu0 %vm7212_vm0, %v8163_v28  ;;  %vm1899_vm3 = vcmp.eq.s32.totalorder %v8705_v16, %v8898_v13  ;;  %vm1901_vm10 = vcmp.eq.s32.totalorder %v8705_v16, %v8901_v24  ;;  %vm1871_vm0 = vcmp.eq.s32.totalorder %v8698_v14, %v8941_v32 }
 0x1a5   : > { %vm7266_vm14 = vmpackc.low %vm1901_vm10, %vm1899_vm3  ;;  %vm1910_vm3 = vcmp.eq.s32.totalorder %v8709_v18, %v8972_v36 }
 0x1a6   : > { %vm7268_vm15 = vmpackc.low %vm1906_vm13, %vm1904_vm12  ;;  %vm1875_vm12 = vcmp.eq.s32.totalorder %v8698_v14, %v8969_v34  ;;  %vm1877_vm13 = vcmp.eq.s32.totalorder %v8698_v14, %v8972_v36 }
 0x1a8   : > { %7199 = vmatpush1.bf16.xpose.msk.msra.mxu0 %vm7198_vm2, %v8163_v28  ;;  %vm7202_vm2 = vmpackc.low %vm1869_vm7, %vm1867_vm6  ;;  %vm1903_vm7 = vcmp.eq.s32.totalorder %v8705_v16, %v8941_v32 }
 0x1a9   : > { %7201 = vmatprep.subr.msk.bf16.mxu0 %vm7200_vm11, %v8163_v28  ;;  %vm7204_vm11 = vmpackc.low %vm1874_vm9, %vm1872_vm8  ;;  %vm1905_vm8 = vcmp.eq.s32.totalorder %v8705_v16, %v8944_v33 }
 0x1aa   : > { %vm7270_vm10 = vmpackc.low %vm1905_vm8, %vm1903_vm7  ;;  %vm1946_vm7 = vcmp.eq.s32.totalorder %v9003_v7, %v8677_v5 }
 0x1ab   : > { %7263 = vmatpush1.bf16.xpose.msk.msra.mxu1 %vm7262_vm1, %v8163_v28  ;;  %vm1873_vm1 = vcmp.eq.s32.totalorder %v8698_v14, %v8944_v33  ;;  %v9027_v14 = vrot.slane %v8816_v49, %v8667_v60 }
 0x1ac   : > { %7265 = vmatprep.subr.msk.bf16.mxu1 %vm7264_vm5, %v8163_v28  ;;  %vm1878_vm5 = vcmp.eq.s32.totalorder %v8688_v10, %v8972_v36  ;;  %vm7206_vm6 = vmpackc.low %vm1873_vm1, %vm1871_vm0  ;;  %v9012_v10 = vrot.slane %v8802_v45, %v8667_v60  ;;  %vm1907_vm1 = vcmp.eq.s32.totalorder %v8705_v16, %v8969_v34  ;;  %v2746_v45 = vld [vmem:[#allocation2 + $0x18] sm:$0xff] }
 0x1ad   : > { %vm7208_vm9 = vmpackc.low %vm1878_vm5, %vm1876_vm4  ;;  %vm1909_vm4 = vcmp.eq.s32.totalorder %v8705_v16, %v8972_v36  ;;  %v9044_v16 = vrot.slane %v1781_v41, %v8667_v60 }
 0x1ae   : > { %vm7210_vm0 = vmpackc.low %vm1877_vm13, %vm1875_vm12  ;;  %vm837_vm8 = vcmp.eq.s32.totalorder %v9012_v10, %v8647_v39 }
 0x1b0   : > { %7203 = vmatpush1.bf16.xpose.msk.msra.mxu0 %vm7202_vm2, %v8163_v28  ;;  %vm1908_vm2 = vcmp.eq.s32.totalorder %v8709_v18, %v8969_v34  ;;  %v9019_v18 = vrot.slane %v1779_v37, %v8667_v60 }
 0x1b1   : > { %7205 = vmatprep.subr.msk.bf16.mxu0 %vm7204_vm11, %v8163_v28  ;;  %vm7272_vm11 = vmpackc.low %vm1910_vm3, %vm1908_vm2  ;;  %vm842_vm3 = vcmp.eq.s32.totalorder %v8906_v25, %v8680_v6 }
 0x1b2   : > { %vm7274_vm2 = vmpackc.low %vm1909_vm4, %vm1907_vm1  ;;  %vm1911_vm12 = vcmp.eq.s32.totalorder %v9019_v18, %v8647_v39  ;;  %vm1913_vm13 = vcmp.eq.s32.totalorder %v9019_v18, %v8677_v5  ;;  %vm1916_vm4 = vcmp.eq.s32.totalorder %v8998_v3, %v8680_v6 }
 0x1b3   : > { %7267 = vmatpush1.bf16.xpose.msk.msra.mxu1 %vm7266_vm14, %v8163_v28  ;;  %vm1912_vm14 = vcmp.eq.s32.totalorder %v8998_v3, %v8647_v39 }
 0x1b4   : > { %7269 = vmatprep.subr.msk.bf16.mxu1 %vm7268_vm15, %v8163_v28  ;;  %vm1914_vm15 = vcmp.eq.s32.totalorder %v8998_v3, %v8677_v5 }
 0x1b5   : > { %vm7308_vm5 = vmpackc.low %vm1914_vm15, %vm1912_vm14  ;;  %vm869_vm15 = vcmp.eq.s32.totalorder %v9027_v14, %v8647_v39 }
 0x1b8   : > { %7207 = vmatpush1.bf16.xpose.msk.msra.mxu0 %vm7206_vm6, %v8163_v28  ;;  %vm1944_vm6 = vcmp.eq.s32.totalorder %v9003_v7, %v8647_v39 }
 0x1b9   : > { %7209 = vmatprep.subr.msk.bf16.mxu0 %vm7208_vm9, %v8163_v28  ;;  %vm839_vm9 = vcmp.eq.s32.totalorder %v9012_v10, %v8677_v5 }
 0x1ba   : > { %vm7214_vm14 = vmpackc.low %vm839_vm9, %vm837_vm8  ;;  %vm876_vm8 = vcmp.eq.s32.totalorder %v8915_v31, %v8701_v15 }
 0x1bb   : > { %7271 = vmatpush1.bf16.xpose.msk.msra.mxu1 %vm7270_vm10, %v8163_v28  ;;  %vm844_vm10 = vcmp.eq.s32.totalorder %v8906_v25, %v8701_v15 }
 0x1bc   : > { %7273 = vmatprep.subr.msk.bf16.mxu1 %vm7272_vm11, %v8163_v28  ;;  %vm7372_vm11 = vmpackc.low %vm1946_vm7, %vm1944_vm6  ;;  %vm874_vm7 = vcmp.eq.s32.totalorder %v8915_v31, %v8680_v6 }
 0x1bd   : > { %vm7216_vm1 = vmpackc.low %vm844_vm10, %vm842_vm3  ;;  %vm1945_vm3 = vcmp.eq.s32.totalorder %v9044_v16, %v8677_v5 }
 0x1be   : > { %vm7310_vm6 = vmpackc.low %vm1913_vm13, %vm1911_vm12  ;;  %vm1950_vm12 = vcmp.eq.s32.totalorder %v9003_v7, %v8701_v15 }
 0x1bf   : > { %vm7280_vm13 = vmpackc.low %vm876_vm8, %vm874_vm7  ;;  %vm1917_vm7 = vcmp.eq.s32.totalorder %v9019_v18, %v8701_v15 }
 0x1c0   : > { %7211 = vmatpush1.bf16.xpose.msk.msra.mxu0 %vm7210_vm0, %v8163_v28  ;;  %vm871_vm0 = vcmp.eq.s32.totalorder %v9027_v14, %v8677_v5 }
 0x1c1   : > { %7309 = vmatprep.subr.msk.bf16.mxu0 %vm7308_vm5, %v8163_v28  ;;  %vm1918_vm5 = vcmp.eq.s32.totalorder %v8998_v3, %v8701_v15  ;;  %vm7278_vm9 = vmpackc.low %vm871_vm0, %vm869_vm15  ;;  %vm843_vm15 = vcmp.eq.s32.totalorder %v9012_v10, %v8701_v15 }
 0x1c2   : > { %vm7312_vm10 = vmpackc.low %vm1918_vm5, %vm1916_vm4  ;;  %vm848_vm4 = vcmp.eq.s32.totalorder %v8906_v25, %v8760_v30 }
 0x1c3   : > { %7275 = vmatpush1.bf16.xpose.msk.msra.mxu1 %vm7274_vm2, %v8163_v28  ;;  %vm1943_vm2 = vcmp.eq.s32.totalorder %v9044_v16, %v8647_v39 }
 0x1c4   : > { %7373 = vmatprep.subr.msk.bf16.mxu1 %vm7372_vm11, %v8163_v28  ;;  %vm1948_vm11 = vcmp.eq.s32.totalorder %v9003_v7, %v8680_v6  ;;  %vm7374_vm0 = vmpackc.low %vm1945_vm3, %vm1943_vm2  ;;  %vm875_vm2 = vcmp.eq.s32.totalorder %v9027_v14, %v8701_v15 }
 0x1c5   : > { %vm7376_vm5 = vmpackc.low %vm1950_vm12, %vm1948_vm11  ;;  %vm1922_vm11 = vcmp.eq.s32.totalorder %v8998_v3, %v8760_v30 }
 0x1c7   : > { %7215 = vmatmul.mubr.msk.bf16.vlgmr.msra.gmra.mrb[0].mxu0 %vm7214_vm14, %v8163_v28  ;;  %vm841_vm14 = vcmp.eq.s32.totalorder %v9012_v10, %v8680_v6 }
 0x1c8   : > { %7217 = vmatprep.mubr.msk.bf16.mxu0 %vm7216_vm1, %v8163_v28  ;;  %7311 = vmatpush1.bf16.xpose.msk.msra.mxu0 %vm7310_vm6, %v8163_v28  ;;  %vm846_vm1 = vcmp.eq.s32.totalorder %v8906_v25, %v8757_v29  ;;  %vm1915_vm6 = vcmp.eq.s32.totalorder %v9019_v18, %v8680_v6  ;;  %vm7218_vm8 = vmpackc.low %vm843_vm15, %vm841_vm14  ;;  %vm880_vm14 = vcmp.eq.s32.totalorder %v8915_v31, %v8760_v30 }
 0x1c9   : > { %7313 = vmatprep.subr.msk.bf16.mxu0 %vm7312_vm10, %v8163_v28  ;;  %vm7220_vm3 = vmpackc.low %vm848_vm4, %vm846_vm1  ;;  %vm1920_vm10 = vcmp.eq.s32.totalorder %v8998_v3, %v8757_v29  ;;  %vm1949_vm1 = vcmp.eq.s32.totalorder %v9044_v16, %v8701_v15 }
 0x1ca   : > { %7279 = vmatmul.mubr.msk.bf16.vlgmr.msra.gmra.mrb[0].mxu1 %vm7278_vm9, %v8163_v28  ;;  %vm873_vm9 = vcmp.eq.s32.totalorder %v9027_v14, %v8680_v6  ;;  %vm7314_vm12 = vmpackc.low %vm1917_vm7, %vm1915_vm6  ;;  %vm1954_vm6 = vcmp.eq.s32.totalorder %v9003_v7, %v8760_v30 }
 0x1cb   : > { %7281 = vmatprep.mubr.msk.bf16.mxu1 %vm7280_vm13, %v8163_v28  ;;  %7375 = vmatpush1.bf16.xpose.msk.msra.mxu1 %vm7374_vm0, %v8163_v28  ;;  %vm878_vm13 = vcmp.eq.s32.totalorder %v8915_v31, %v8757_v29  ;;  %vm7282_vm15 = vmpackc.low %vm875_vm2, %vm873_vm9  ;;  %vm1947_vm0 = vcmp.eq.s32.totalorder %v9044_v16, %v8680_v6  ;;  %vm847_vm9 = vcmp.eq.s32.totalorder %v9012_v10, %v8760_v30 }
 0x1cc   : > { %7377 = vmatprep.subr.msk.bf16.mxu1 %vm7376_vm5, %v8163_v28  ;;  %vm7316_vm4 = vmpackc.low %vm1922_vm11, %vm1920_vm10  ;;  %vm1952_vm5 = vcmp.eq.s32.totalorder %v9003_v7, %v8757_v29  ;;  %vm852_vm10 = vcmp.eq.s32.totalorder %v8906_v25, %v8791_v40 }
 0x1cd   : > { %vm7284_vm7 = vmpackc.low %vm880_vm14, %vm878_vm13  ;;  %vm1921_vm13 = vcmp.eq.s32.totalorder %v9019_v18, %v8760_v30 }
 0x1ce   : > { %vm7378_vm2 = vmpackc.low %vm1949_vm1, %vm1947_vm0  ;;  %vm879_vm0 = vcmp.eq.s32.totalorder %v9027_v14, %v8760_v30 }
 0x1cf   : > { %7219 = vmatmul.mubr.msk.bf16.gmra.mrb[4].mxu0 %vm7218_vm8, %v8163_v28  ;;  %vm845_vm8 = vcmp.eq.s32.totalorder %v9012_v10, %v8757_v29  ;;  %vm7380_vm11 = vmpackc.low %vm1954_vm6, %vm1952_vm5  ;;  %vm1926_vm5 = vcmp.eq.s32.totalorder %v8998_v3, %v8791_v40 }
 0x1d0   : > { %7221 = vmatprep.mubr.msk.bf16.mxu0 %vm7220_vm3, %v8163_v28  ;;  %7315 = vmatpush1.bf16.xpose.msk.msra.mxu0 %vm7314_vm12, %v8163_v28  ;;  %vm850_vm3 = vcmp.eq.s32.totalorder %v8906_v25, %v8788_v38  ;;  %vm1919_vm12 = vcmp.eq.s32.totalorder %v9019_v18, %v8757_v29  ;;  %vm7222_vm14 = vmpackc.low %vm847_vm9, %vm845_vm8  ;;  %vm884_vm8 = vcmp.eq.s32.totalorder %v8915_v31, %v8791_v40 }
 0x1d1   : > { %7317 = vmatprep.subr.msk.bf16.mxu0 %vm7316_vm4, %v8163_v28  ;;  %vm7224_vm1 = vmpackc.low %vm852_vm10, %vm850_vm3  ;;  %vm1924_vm4 = vcmp.eq.s32.totalorder %v8998_v3, %v8788_v38  ;;  %vm1953_vm3 = vcmp.eq.s32.totalorder %v9044_v16, %v8760_v30 }
 0x1d2   : > { %7283 = vmatmul.mubr.msk.bf16.gmra.mrb[4].mxu1 %vm7282_vm15, %v8163_v28  ;;  %vm877_vm15 = vcmp.eq.s32.totalorder %v9027_v14, %v8757_v29  ;;  %vm7318_vm6 = vmpackc.low %vm1921_vm13, %vm1919_vm12  ;;  %vm1958_vm12 = vcmp.eq.s32.totalorder %v9003_v7, %v8791_v40 }
 0x1d3   : > { %7285 = vmatprep.mubr.msk.bf16.mxu1 %vm7284_vm7, %v8163_v28  ;;  %7379 = vmatpush1.bf16.xpose.msk.msra.mxu1 %vm7378_vm2, %v8163_v28  ;;  %vm882_vm7 = vcmp.eq.s32.totalorder %v8915_v31, %v8788_v38  ;;  %vm7286_vm9 = vmpackc.low %vm879_vm0, %vm877_vm15  ;;  %vm1951_vm2 = vcmp.eq.s32.totalorder %v9044_v16, %v8757_v29  ;;  %vm851_vm15 = vcmp.eq.s32.totalorder %v9012_v10, %v8791_v40 }
 0x1d4   : > { %7381 = vmatprep.subr.msk.bf16.mxu1 %vm7380_vm11, %v8163_v28  ;;  %vm7320_vm10 = vmpackc.low %vm1926_vm5, %vm1924_vm4  ;;  %vm1956_vm11 = vcmp.eq.s32.totalorder %v9003_v7, %v8788_v38  ;;  %vm856_vm4 = vcmp.eq.s32.totalorder %v8906_v25, %v8813_v48 }
 0x1d5   : > { %vm7288_vm13 = vmpackc.low %vm884_vm8, %vm882_vm7  ;;  %vm1925_vm7 = vcmp.eq.s32.totalorder %v9019_v18, %v8791_v40 }
 0x1d6   : > { %vm7382_vm0 = vmpackc.low %vm1953_vm3, %vm1951_vm2  ;;  %vm883_vm2 = vcmp.eq.s32.totalorder %v9027_v14, %v8791_v40 }
 0x1d7   : > { %7223 = vmatmul.mubr.msk.bf16.gmra.mrb[8].mxu0 %vm7222_vm14, %v8163_v28  ;;  %vm849_vm14 = vcmp.eq.s32.totalorder %v9012_v10, %v8788_v38  ;;  %vm7384_vm5 = vmpackc.low %vm1958_vm12, %vm1956_vm11  ;;  %vm1930_vm11 = vcmp.eq.s32.totalorder %v8998_v3, %v8813_v48 }
 0x1d8   : > { %7225 = vmatprep.mubr.msk.bf16.mxu0 %vm7224_vm1, %v8163_v28  ;;  %7319 = vmatpush1.bf16.xpose.msk.msra.mxu0 %vm7318_vm6, %v8163_v28  ;;  %vm854_vm1 = vcmp.eq.s32.totalorder %v8906_v25, %v8810_v47  ;;  %vm1923_vm6 = vcmp.eq.s32.totalorder %v9019_v18, %v8788_v38  ;;  %vm7226_vm8 = vmpackc.low %vm851_vm15, %vm849_vm14  ;;  %vm888_vm14 = vcmp.eq.s32.totalorder %v8915_v31, %v8813_v48 }
 0x1d9   : > { %7321 = vmatprep.subr.msk.bf16.mxu0 %vm7320_vm10, %v8163_v28  ;;  %vm7228_vm3 = vmpackc.low %vm856_vm4, %vm854_vm1  ;;  %vm1928_vm10 = vcmp.eq.s32.totalorder %v8998_v3, %v8810_v47  ;;  %vm1957_vm1 = vcmp.eq.s32.totalorder %v9044_v16, %v8791_v40 }
 0x1da   : > { %7287 = vmatmul.mubr.msk.bf16.gmra.mrb[8].mxu1 %vm7286_vm9, %v8163_v28  ;;  %vm881_vm9 = vcmp.eq.s32.totalorder %v9027_v14, %v8788_v38  ;;  %vm7322_vm12 = vmpackc.low %vm1925_vm7, %vm1923_vm6  ;;  %vm1962_vm6 = vcmp.eq.s32.totalorder %v9003_v7, %v8813_v48 }
 0x1db   : > { %7289 = vmatprep.mubr.msk.bf16.mxu1 %vm7288_vm13, %v8163_v28  ;;  %7383 = vmatpush1.bf16.xpose.msk.msra.mxu1 %vm7382_vm0, %v8163_v28  ;;  %vm886_vm13 = vcmp.eq.s32.totalorder %v8915_v31, %v8810_v47  ;;  %vm7290_vm15 = vmpackc.low %vm883_vm2, %vm881_vm9  ;;  %vm1955_vm0 = vcmp.eq.s32.totalorder %v9044_v16, %v8788_v38  ;;  %vm855_vm9 = vcmp.eq.s32.totalorder %v9012_v10, %v8813_v48 }
 0x1dc   : > { %7385 = vmatprep.subr.msk.bf16.mxu1 %vm7384_vm5, %v8163_v28  ;;  %vm7324_vm4 = vmpackc.low %vm1930_vm11, %vm1928_vm10  ;;  %vm1960_vm5 = vcmp.eq.s32.totalorder %v9003_v7, %v8810_v47  ;;  %vm860_vm10 = vcmp.eq.s32.totalorder %v8906_v25, %v8901_v24 }
 0x1dd   : > { %vm7292_vm7 = vmpackc.low %vm888_vm14, %vm886_vm13  ;;  %vm1929_vm13 = vcmp.eq.s32.totalorder %v9019_v18, %v8813_v48 }
 0x1de   : > { %vm7386_vm2 = vmpackc.low %vm1957_vm1, %vm1955_vm0  ;;  %vm887_vm0 = vcmp.eq.s32.totalorder %v9027_v14, %v8813_v48 }
 0x1df   : > { %7227 = vmatmul.mubr.msk.bf16.gmra.mrb[12].mxu0 %vm7226_vm8, %v8163_v28  ;;  %vm853_vm8 = vcmp.eq.s32.totalorder %v9012_v10, %v8810_v47  ;;  %vm7388_vm11 = vmpackc.low %vm1962_vm6, %vm1960_vm5  ;;  %vm1934_vm5 = vcmp.eq.s32.totalorder %v8998_v3, %v8901_v24 }
 0x1e0   : > { %7229 = vmatprep.mubr.msk.bf16.mxu0 %vm7228_vm3, %v8163_v28  ;;  %7323 = vmatpush1.bf16.xpose.msk.msra.mxu0 %vm7322_vm12, %v8163_v28  ;;  %vm858_vm3 = vcmp.eq.s32.totalorder %v8906_v25, %v8898_v13  ;;  %vm1927_vm12 = vcmp.eq.s32.totalorder %v9019_v18, %v8810_v47  ;;  %vm7230_vm14 = vmpackc.low %vm855_vm9, %vm853_vm8  ;;  %vm892_vm8 = vcmp.eq.s32.totalorder %v8915_v31, %v8901_v24 }
 0x1e1   : > { %7325 = vmatprep.subr.msk.bf16.mxu0 %vm7324_vm4, %v8163_v28  ;;  %vm7232_vm1 = vmpackc.low %vm860_vm10, %vm858_vm3  ;;  %vm1932_vm4 = vcmp.eq.s32.totalorder %v8998_v3, %v8898_v13  ;;  %vm1961_vm3 = vcmp.eq.s32.totalorder %v9044_v16, %v8813_v48 }
 0x1e2   : > { %7291 = vmatmul.mubr.msk.bf16.gmra.mrb[12].mxu1 %vm7290_vm15, %v8163_v28  ;;  %vm885_vm15 = vcmp.eq.s32.totalorder %v9027_v14, %v8810_v47  ;;  %vm7326_vm6 = vmpackc.low %vm1929_vm13, %vm1927_vm12  ;;  %vm1966_vm12 = vcmp.eq.s32.totalorder %v9003_v7, %v8901_v24 }
 0x1e3   : > { %7293 = vmatprep.mubr.msk.bf16.mxu1 %vm7292_vm7, %v8163_v28  ;;  %7387 = vmatpush1.bf16.xpose.msk.msra.mxu1 %vm7386_vm2, %v8163_v28  ;;  %vm890_vm7 = vcmp.eq.s32.totalorder %v8915_v31, %v8898_v13  ;;  %vm7294_vm9 = vmpackc.low %vm887_vm0, %vm885_vm15  ;;  %vm1959_vm2 = vcmp.eq.s32.totalorder %v9044_v16, %v8810_v47  ;;  %vm859_vm15 = vcmp.eq.s32.totalorder %v9012_v10, %v8901_v24 }
 0x1e4   : > { %7389 = vmatprep.subr.msk.bf16.mxu1 %vm7388_vm11, %v8163_v28  ;;  %vm7328_vm10 = vmpackc.low %vm1934_vm5, %vm1932_vm4  ;;  %vm1964_vm11 = vcmp.eq.s32.totalorder %v9003_v7, %v8898_v13  ;;  %vm864_vm4 = vcmp.eq.s32.totalorder %v8906_v25, %v8944_v33 }
 0x1e5   : > { %vm7296_vm13 = vmpackc.low %vm892_vm8, %vm890_vm7  ;;  %vm1933_vm7 = vcmp.eq.s32.totalorder %v9019_v18, %v8901_v24 }
 0x1e6   : > { %vm7390_vm0 = vmpackc.low %vm1961_vm3, %vm1959_vm2  ;;  %vm891_vm2 = vcmp.eq.s32.totalorder %v9027_v14, %v8901_v24 }
 0x1e7   : > { %7231 = vmatmul.mubr.msk.bf16.gmra.mrb[16].mxu0 %vm7230_vm14, %v8163_v28  ;;  %vm857_vm14 = vcmp.eq.s32.totalorder %v9012_v10, %v8898_v13  ;;  %vm7392_vm5 = vmpackc.low %vm1966_vm12, %vm1964_vm11  ;;  %vm1938_vm11 = vcmp.eq.s32.totalorder %v8998_v3, %v8944_v33 }
 0x1e8   : > { %7233 = vmatprep.mubr.msk.bf16.mxu0 %vm7232_vm1, %v8163_v28  ;;  %7327 = vmatpush1.bf16.xpose.msk.msra.mxu0 %vm7326_vm6, %v8163_v28  ;;  %vm862_vm1 = vcmp.eq.s32.totalorder %v8906_v25, %v8941_v32  ;;  %vm1931_vm6 = vcmp.eq.s32.totalorder %v9019_v18, %v8898_v13  ;;  %vm7234_vm8 = vmpackc.low %vm859_vm15, %vm857_vm14  ;;  %vm896_vm14 = vcmp.eq.s32.totalorder %v8915_v31, %v8944_v33 }
 0x1e9   : > { %7329 = vmatprep.subr.msk.bf16.mxu0 %vm7328_vm10, %v8163_v28  ;;  %vm7236_vm3 = vmpackc.low %vm864_vm4, %vm862_vm1  ;;  %vm1936_vm10 = vcmp.eq.s32.totalorder %v8998_v3, %v8941_v32  ;;  %vm1965_vm1 = vcmp.eq.s32.totalorder %v9044_v16, %v8901_v24 }
 0x1ea   : > { %7295 = vmatmul.mubr.msk.bf16.gmra.mrb[16].mxu1 %vm7294_vm9, %v8163_v28  ;;  %vm889_vm9 = vcmp.eq.s32.totalorder %v9027_v14, %v8898_v13  ;;  %vm7330_vm12 = vmpackc.low %vm1933_vm7, %vm1931_vm6  ;;  %vm1970_vm6 = vcmp.eq.s32.totalorder %v9003_v7, %v8944_v33 }
 0x1eb   : > { %7297 = vmatprep.mubr.msk.bf16.mxu1 %vm7296_vm13, %v8163_v28  ;;  %7391 = vmatpush1.bf16.xpose.msk.msra.mxu1 %vm7390_vm0, %v8163_v28  ;;  %vm894_vm13 = vcmp.eq.s32.totalorder %v8915_v31, %v8941_v32  ;;  %vm7298_vm15 = vmpackc.low %vm891_vm2, %vm889_vm9  ;;  %vm1963_vm0 = vcmp.eq.s32.totalorder %v9044_v16, %v8898_v13  ;;  %vm863_vm9 = vcmp.eq.s32.totalorder %v9012_v10, %v8944_v33 }
 0x1ec   : > { %7393 = vmatprep.subr.msk.bf16.mxu1 %vm7392_vm5, %v8163_v28  ;;  %vm7332_vm4 = vmpackc.low %vm1938_vm11, %vm1936_vm10  ;;  %vm1968_vm5 = vcmp.eq.s32.totalorder %v9003_v7, %v8941_v32  ;;  %vm868_vm10 = vcmp.eq.s32.totalorder %v8906_v25, %v8972_v36 }
 0x1ed   : > { %vm7300_vm7 = vmpackc.low %vm896_vm14, %vm894_vm13  ;;  %vm1937_vm13 = vcmp.eq.s32.totalorder %v9019_v18, %v8944_v33 }
 0x1ee   : > { %vm7394_vm2 = vmpackc.low %vm1965_vm1, %vm1963_vm0  ;;  %vm895_vm0 = vcmp.eq.s32.totalorder %v9027_v14, %v8944_v33 }
 0x1ef   : > { %7235 = vmatmul.mubr.msk.bf16.gmra.mrb[20].mxu0 %vm7234_vm8, %v8163_v28  ;;  %vm861_vm8 = vcmp.eq.s32.totalorder %v9012_v10, %v8941_v32  ;;  %vm7396_vm11 = vmpackc.low %vm1970_vm6, %vm1968_vm5  ;;  %vm1942_vm5 = vcmp.eq.s32.totalorder %v8998_v3, %v8972_v36 }
 0x1f0   : > { %7237 = vmatprep.mubr.msk.bf16.mxu0 %vm7236_vm3, %v8163_v28  ;;  %7331 = vmatpush1.bf16.xpose.msk.msra.mxu0 %vm7330_vm12, %v8163_v28  ;;  %vm866_vm3 = vcmp.eq.s32.totalorder %v8906_v25, %v8969_v34  ;;  %vm1935_vm12 = vcmp.eq.s32.totalorder %v9019_v18, %v8941_v32  ;;  %vm7238_vm14 = vmpackc.low %vm863_vm9, %vm861_vm8  ;;  %vm900_vm8 = vcmp.eq.s32.totalorder %v8915_v31, %v8972_v36 }
 0x1f1   : > { %7333 = vmatprep.subr.msk.bf16.mxu0 %vm7332_vm4, %v8163_v28  ;;  %vm7240_vm1 = vmpackc.low %vm868_vm10, %vm866_vm3  ;;  %vm1940_vm4 = vcmp.eq.s32.totalorder %v8998_v3, %v8969_v34  ;;  %vm1969_vm3 = vcmp.eq.s32.totalorder %v9044_v16, %v8944_v33 }
 0x1f2   : > { %7299 = vmatmul.mubr.msk.bf16.gmra.mrb[20].mxu1 %vm7298_vm15, %v8163_v28  ;;  %vm893_vm15 = vcmp.eq.s32.totalorder %v9027_v14, %v8941_v32  ;;  %vm7334_vm6 = vmpackc.low %vm1937_vm13, %vm1935_vm12  ;;  %vm1974_vm12 = vcmp.eq.s32.totalorder %v9003_v7, %v8972_v36 }
 0x1f3   : > { %7301 = vmatprep.mubr.msk.bf16.mxu1 %vm7300_vm7, %v8163_v28  ;;  %7395 = vmatpush1.bf16.xpose.msk.msra.mxu1 %vm7394_vm2, %v8163_v28  ;;  %vm898_vm7 = vcmp.eq.s32.totalorder %v8915_v31, %v8969_v34  ;;  %vm7302_vm9 = vmpackc.low %vm895_vm0, %vm893_vm15  ;;  %vm1967_vm2 = vcmp.eq.s32.totalorder %v9044_v16, %v8941_v32  ;;  %vm867_vm15 = vcmp.eq.s32.totalorder %v9012_v10, %v8972_v36  ;;  %v2763_v31 = vld [vmem:[#allocation2 + $0xa0] sm:$0xff] }
 0x1f4   : > { %7397 = vmatprep.subr.msk.bf16.mxu1 %vm7396_vm11, %v8163_v28  ;;  %vm7336_vm10 = vmpackc.low %vm1942_vm5, %vm1940_vm4  ;;  %vm1972_vm11 = vcmp.eq.s32.totalorder %v9003_v7, %v8969_v34  ;;  %vm1941_vm4 = vcmp.eq.s32.totalorder %v9019_v18, %v8972_v36 }
 0x1f5   : > { %vm7304_vm13 = vmpackc.low %vm900_vm8, %vm898_vm7  ;;  %vm904_vm7 = vcmp.eq.s32.totalorder %v8846_v58, %v8677_v5 }
 0x1f6   : > { %vm7398_vm0 = vmpackc.low %vm1969_vm3, %vm1967_vm2  ;;  %vm899_vm2 = vcmp.eq.s32.totalorder %v9027_v14, %v8972_v36 }
 0x1f7   : > { %7239 = vmatmul.mubr.msk.bf16.gmra.mrb[24].mxu0 %vm7238_vm14, %v8163_v28  ;;  %vm865_vm14 = vcmp.eq.s32.totalorder %v9012_v10, %v8969_v34  ;;  %vm7400_vm5 = vmpackc.low %vm1974_vm12, %vm1972_vm11  ;;  %vm1978_vm11 = vcmp.eq.s32.totalorder %v8694_v12, %v8677_v5  ;;  %v2764_v10 = vld [vmem:[#allocation2 + $0xa8] sm:$0xff] }
 0x1f8   : > { %7241 = vmatprep.mubr.msk.bf16.mxu0 %vm7240_vm1, %v8163_v28  ;;  %7335 = vmatpush1.bf16.xpose.msk.msra.mxu0 %vm7334_vm6, %v8163_v28  ;;  %vm1939_vm1 = vcmp.eq.s32.totalorder %v9019_v18, %v8969_v34  ;;  %vm902_vm6 = vcmp.eq.s32.totalorder %v8846_v58, %v8647_v39  ;;  %vm7242_vm8 = vmpackc.low %vm867_vm15, %vm865_vm14  ;;  %vm1973_vm14 = vcmp.eq.s32.totalorder %v9044_v16, %v8972_v36 }
 0x1f9   : > { %7337 = vmatprep.subr.msk.bf16.mxu0 %vm7336_vm10, %v8163_v28  ;;  %vm7338_vm3 = vmpackc.low %vm1941_vm4, %vm1939_vm1  ;;  %vm1976_vm10 = vcmp.eq.s32.totalorder %v8694_v12, %v8647_v39  ;;  %vm936_vm1 = vcmp.eq.s32.totalorder %v8861_v0, %v8677_v5 }
 0x1fa   : > { %7303 = vmatmul.mubr.msk.bf16.gmra.mrb[24].mxu1 %vm7302_vm9, %v8163_v28  ;;  %vm897_vm9 = vcmp.eq.s32.totalorder %v9027_v14, %v8969_v34  ;;  %vm7340_vm12 = vmpackc.low %vm904_vm7, %vm902_vm6  ;;  %vm2010_vm6 = vcmp.eq.s32.totalorder %v8715_v21, %v8677_v5 }
 0x1fb   : > { %7305 = vmatprep.mubr.msk.bf16.mxu1 %vm7304_vm13, %v8163_v28  ;;  %7399 = vmatpush1.bf16.xpose.msk.msra.mxu1 %vm7398_vm0, %v8163_v28  ;;  %vm1971_vm13 = vcmp.eq.s32.totalorder %v9044_v16, %v8969_v34  ;;  %vm7306_vm15 = vmpackc.low %vm899_vm2, %vm897_vm9  ;;  %vm934_vm0 = vcmp.eq.s32.totalorder %v8861_v0, %v8647_v39  ;;  %vm903_vm9 = vcmp.eq.s32.totalorder %v8843_v57, %v8677_v5 }
 0x1fc   : > { %7401 = vmatprep.subr.msk.bf16.mxu1 %vm7400_vm5, %v8163_v28  ;;  %vm7436_vm4 = vmpackc.low %vm1978_vm11, %vm1976_vm10  ;;  %vm2008_vm5 = vcmp.eq.s32.totalorder %v8715_v21, %v8647_v39  ;;  %vm908_vm10 = vcmp.eq.s32.totalorder %v8846_v58, %v8701_v15 }
 0x1fd   : > { %vm7402_vm7 = vmpackc.low %vm1973_vm14, %vm1971_vm13  ;;  %vm1977_vm13 = vcmp.eq.s32.totalorder %v8691_v11, %v8677_v5 }
 0x1fe   : > { %vm7404_vm2 = vmpackc.low %vm936_vm1, %vm934_vm0  ;;  %vm935_vm0 = vcmp.eq.s32.totalorder %v8858_v63, %v8677_v5 }
 0x1ff   : > { %7243 = vmatmul.mubr.msk.bf16.gmra.mrb[28].mxu0 %vm7242_vm8, %v8163_v28  ;;  %vm901_vm8 = vcmp.eq.s32.totalorder %v8843_v57, %v8647_v39  ;;  %vm7500_vm11 = vmpackc.low %vm2010_vm6, %vm2008_vm5  ;;  %vm1982_vm5 = vcmp.eq.s32.totalorder %v8694_v12, %v8701_v15 }
 0x200   : > { %7339 = vmatpush1.bf16.xpose.msk.msra.mxu0 %vm7338_vm3, %v8163_v28  ;;  %7341 = vmatprep.mubr.msk.bf16.mxu0 %vm7340_vm12, %v8163_v28  ;;  %vm906_vm3 = vcmp.eq.s32.totalorder %v8846_v58, %v8680_v6  ;;  %vm1975_vm12 = vcmp.eq.s32.totalorder %v8691_v11, %v8647_v39  ;;  %vm7342_vm14 = vmpackc.low %vm903_vm9, %vm901_vm8  ;;  %vm940_vm8 = vcmp.eq.s32.totalorder %v8861_v0, %v8701_v15 }
 0x201   : > { %7437 = vmatprep.subr.msk.bf16.mxu0 %vm7436_vm4, %v8163_v28  ;;  %vm7344_vm1 = vmpackc.low %vm908_vm10, %vm906_vm3  ;;  %vm1980_vm4 = vcmp.eq.s32.totalorder %v8694_v12, %v8680_v6  ;;  %vm2009_vm3 = vcmp.eq.s32.totalorder %v8712_v19, %v8677_v5 }
 0x202   : > { %7307 = vmatmul.mubr.msk.bf16.gmra.mrb[28].mxu1 %vm7306_vm15, %v8163_v28  ;;  %vm933_vm15 = vcmp.eq.s32.totalorder %v8858_v63, %v8647_v39  ;;  %vm7438_vm6 = vmpackc.low %vm1977_vm13, %vm1975_vm12  ;;  %vm2014_vm12 = vcmp.eq.s32.totalorder %v8715_v21, %v8701_v15 }
 0x203   : > { %7403 = vmatpush1.bf16.xpose.msk.msra.mxu1 %vm7402_vm7, %v8163_v28  ;;  %7405 = vmatprep.mubr.msk.bf16.mxu1 %vm7404_vm2, %v8163_v28  ;;  %vm938_vm7 = vcmp.eq.s32.totalorder %v8861_v0, %v8680_v6  ;;  %vm7406_vm9 = vmpackc.low %vm935_vm0, %vm933_vm15  ;;  %vm2007_vm2 = vcmp.eq.s32.totalorder %v8712_v19, %v8647_v39  ;;  %vm907_vm15 = vcmp.eq.s32.totalorder %v8843_v57, %v8701_v15 }
 0x204   : > { %7501 = vmatprep.subr.msk.bf16.mxu1 %vm7500_vm11, %v8163_v28  ;;  %vm7440_vm10 = vmpackc.low %vm1982_vm5, %vm1980_vm4  ;;  %vm2012_vm11 = vcmp.eq.s32.totalorder %v8715_v21, %v8680_v6  ;;  %vm912_vm4 = vcmp.eq.s32.totalorder %v8846_v58, %v8760_v30 }
 0x205   : > { %vm7408_vm13 = vmpackc.low %vm940_vm8, %vm938_vm7  ;;  %vm1981_vm7 = vcmp.eq.s32.totalorder %v8691_v11, %v8701_v15 }
 0x206   : > { %vm7502_vm0 = vmpackc.low %vm2009_vm3, %vm2007_vm2  ;;  %vm939_vm2 = vcmp.eq.s32.totalorder %v8858_v63, %v8701_v15 }
 0x207   : > { %7343 = vmatmul.mubr.msk.bf16.vlgmr.msra.gmra.mrb[32].mxu0 %vm7342_vm14, %v8163_v28  ;;  %vm905_vm14 = vcmp.eq.s32.totalorder %v8843_v57, %v8680_v6  ;;  %vm7504_vm5 = vmpackc.low %vm2014_vm12, %vm2012_vm11  ;;  %vm1986_vm11 = vcmp.eq.s32.totalorder %v8694_v12, %v8760_v30 }
 0x208   : > { %7345 = vmatprep.mubr.msk.bf16.mxu0 %vm7344_vm1, %v8163_v28  ;;  %7439 = vmatpush1.bf16.xpose.msk.msra.mxu0 %vm7438_vm6, %v8163_v28  ;;  %vm910_vm1 = vcmp.eq.s32.totalorder %v8846_v58, %v8757_v29  ;;  %vm1979_vm6 = vcmp.eq.s32.totalorder %v8691_v11, %v8680_v6  ;;  %vm7346_vm8 = vmpackc.low %vm907_vm15, %vm905_vm14  ;;  %vm944_vm14 = vcmp.eq.s32.totalorder %v8861_v0, %v8760_v30 }
 0x209   : > { %7441 = vmatprep.subr.msk.bf16.mxu0 %vm7440_vm10, %v8163_v28  ;;  %vm7348_vm3 = vmpackc.low %vm912_vm4, %vm910_vm1  ;;  %vm1984_vm10 = vcmp.eq.s32.totalorder %v8694_v12, %v8757_v29  ;;  %vm2013_vm1 = vcmp.eq.s32.totalorder %v8712_v19, %v8701_v15 }
 0x20a   : > { %7407 = vmatmul.mubr.msk.bf16.vlgmr.msra.gmra.mrb[32].mxu1 %vm7406_vm9, %v8163_v28  ;;  %vm937_vm9 = vcmp.eq.s32.totalorder %v8858_v63, %v8680_v6  ;;  %vm7442_vm12 = vmpackc.low %vm1981_vm7, %vm1979_vm6  ;;  %vm2018_vm6 = vcmp.eq.s32.totalorder %v8715_v21, %v8760_v30 }
 0x20b   : > { %7409 = vmatprep.mubr.msk.bf16.mxu1 %vm7408_vm13, %v8163_v28  ;;  %7503 = vmatpush1.bf16.xpose.msk.msra.mxu1 %vm7502_vm0, %v8163_v28  ;;  %vm942_vm13 = vcmp.eq.s32.totalorder %v8861_v0, %v8757_v29  ;;  %vm7410_vm15 = vmpackc.low %vm939_vm2, %vm937_vm9  ;;  %vm2011_vm0 = vcmp.eq.s32.totalorder %v8712_v19, %v8680_v6  ;;  %vm911_vm9 = vcmp.eq.s32.totalorder %v8843_v57, %v8760_v30 }
 0x20c   : > { %7505 = vmatprep.subr.msk.bf16.mxu1 %vm7504_vm5, %v8163_v28  ;;  %vm7444_vm4 = vmpackc.low %vm1986_vm11, %vm1984_vm10  ;;  %vm2016_vm5 = vcmp.eq.s32.totalorder %v8715_v21, %v8757_v29  ;;  %vm916_vm10 = vcmp.eq.s32.totalorder %v8846_v58, %v8791_v40 }
 0x20d   : > { %vm7412_vm7 = vmpackc.low %vm944_vm14, %vm942_vm13  ;;  %vm1985_vm13 = vcmp.eq.s32.totalorder %v8691_v11, %v8760_v30 }
 0x20e   : > { %vm7506_vm2 = vmpackc.low %vm2013_vm1, %vm2011_vm0  ;;  %vm943_vm0 = vcmp.eq.s32.totalorder %v8858_v63, %v8760_v30 }
 0x20f   : > { %7347 = vmatmul.mubr.msk.bf16.gmra.mrb[36].mxu0 %vm7346_vm8, %v8163_v28  ;;  %vm909_vm8 = vcmp.eq.s32.totalorder %v8843_v57, %v8757_v29  ;;  %vm7508_vm11 = vmpackc.low %vm2018_vm6, %vm2016_vm5  ;;  %vm1990_vm5 = vcmp.eq.s32.totalorder %v8694_v12, %v8791_v40 }
 0x210   : > { %7349 = vmatprep.mubr.msk.bf16.mxu0 %vm7348_vm3, %v8163_v28  ;;  %7443 = vmatpush1.bf16.xpose.msk.msra.mxu0 %vm7442_vm12, %v8163_v28  ;;  %vm914_vm3 = vcmp.eq.s32.totalorder %v8846_v58, %v8788_v38  ;;  %vm1983_vm12 = vcmp.eq.s32.totalorder %v8691_v11, %v8757_v29  ;;  %vm7350_vm14 = vmpackc.low %vm911_vm9, %vm909_vm8  ;;  %vm948_vm8 = vcmp.eq.s32.totalorder %v8861_v0, %v8791_v40 }
 0x211   : > { %7445 = vmatprep.subr.msk.bf16.mxu0 %vm7444_vm4, %v8163_v28  ;;  %vm7352_vm1 = vmpackc.low %vm916_vm10, %vm914_vm3  ;;  %vm1988_vm4 = vcmp.eq.s32.totalorder %v8694_v12, %v8788_v38  ;;  %vm2017_vm3 = vcmp.eq.s32.totalorder %v8712_v19, %v8760_v30 }
 0x212   : > { %7411 = vmatmul.mubr.msk.bf16.gmra.mrb[36].mxu1 %vm7410_vm15, %v8163_v28  ;;  %vm941_vm15 = vcmp.eq.s32.totalorder %v8858_v63, %v8757_v29  ;;  %vm7446_vm6 = vmpackc.low %vm1985_vm13, %vm1983_vm12  ;;  %vm2022_vm12 = vcmp.eq.s32.totalorder %v8715_v21, %v8791_v40 }
 0x213   : > { %7413 = vmatprep.mubr.msk.bf16.mxu1 %vm7412_vm7, %v8163_v28  ;;  %7507 = vmatpush1.bf16.xpose.msk.msra.mxu1 %vm7506_vm2, %v8163_v28  ;;  %vm946_vm7 = vcmp.eq.s32.totalorder %v8861_v0, %v8788_v38  ;;  %vm7414_vm9 = vmpackc.low %vm943_vm0, %vm941_vm15  ;;  %vm2015_vm2 = vcmp.eq.s32.totalorder %v8712_v19, %v8757_v29  ;;  %vm915_vm15 = vcmp.eq.s32.totalorder %v8843_v57, %v8791_v40 }
 0x214   : > { %7509 = vmatprep.subr.msk.bf16.mxu1 %vm7508_vm11, %v8163_v28  ;;  %vm7448_vm10 = vmpackc.low %vm1990_vm5, %vm1988_vm4  ;;  %vm2020_vm11 = vcmp.eq.s32.totalorder %v8715_v21, %v8788_v38  ;;  %vm920_vm4 = vcmp.eq.s32.totalorder %v8846_v58, %v8813_v48 }
 0x215   : > { %vm7416_vm13 = vmpackc.low %vm948_vm8, %vm946_vm7  ;;  %vm1989_vm7 = vcmp.eq.s32.totalorder %v8691_v11, %v8791_v40 }
 0x216   : > { %vm7510_vm0 = vmpackc.low %vm2017_vm3, %vm2015_vm2  ;;  %vm947_vm2 = vcmp.eq.s32.totalorder %v8858_v63, %v8791_v40 }
 0x217   : > { %7351 = vmatmul.mubr.msk.bf16.gmra.mrb[40].mxu0 %vm7350_vm14, %v8163_v28  ;;  %vm913_vm14 = vcmp.eq.s32.totalorder %v8843_v57, %v8788_v38  ;;  %vm7512_vm5 = vmpackc.low %vm2022_vm12, %vm2020_vm11  ;;  %vm1994_vm11 = vcmp.eq.s32.totalorder %v8694_v12, %v8813_v48 }
 0x218   : > { %7353 = vmatprep.mubr.msk.bf16.mxu0 %vm7352_vm1, %v8163_v28  ;;  %7447 = vmatpush1.bf16.xpose.msk.msra.mxu0 %vm7446_vm6, %v8163_v28  ;;  %vm918_vm1 = vcmp.eq.s32.totalorder %v8846_v58, %v8810_v47  ;;  %vm1987_vm6 = vcmp.eq.s32.totalorder %v8691_v11, %v8788_v38  ;;  %vm7354_vm8 = vmpackc.low %vm915_vm15, %vm913_vm14  ;;  %vm952_vm14 = vcmp.eq.s32.totalorder %v8861_v0, %v8813_v48 }
 0x219   : > { %7449 = vmatprep.subr.msk.bf16.mxu0 %vm7448_vm10, %v8163_v28  ;;  %vm7356_vm3 = vmpackc.low %vm920_vm4, %vm918_vm1  ;;  %vm1992_vm10 = vcmp.eq.s32.totalorder %v8694_v12, %v8810_v47  ;;  %vm2021_vm1 = vcmp.eq.s32.totalorder %v8712_v19, %v8791_v40 }
 0x21a   : > { %7415 = vmatmul.mubr.msk.bf16.gmra.mrb[40].mxu1 %vm7414_vm9, %v8163_v28  ;;  %vm945_vm9 = vcmp.eq.s32.totalorder %v8858_v63, %v8788_v38  ;;  %vm7450_vm12 = vmpackc.low %vm1989_vm7, %vm1987_vm6  ;;  %vm2026_vm6 = vcmp.eq.s32.totalorder %v8715_v21, %v8813_v48 }
 0x21b   : > { %7417 = vmatprep.mubr.msk.bf16.mxu1 %vm7416_vm13, %v8163_v28  ;;  %7511 = vmatpush1.bf16.xpose.msk.msra.mxu1 %vm7510_vm0, %v8163_v28  ;;  %vm950_vm13 = vcmp.eq.s32.totalorder %v8861_v0, %v8810_v47  ;;  %vm7418_vm15 = vmpackc.low %vm947_vm2, %vm945_vm9  ;;  %vm2019_vm0 = vcmp.eq.s32.totalorder %v8712_v19, %v8788_v38  ;;  %vm919_vm9 = vcmp.eq.s32.totalorder %v8843_v57, %v8813_v48 }
 0x21c   : > { %7513 = vmatprep.subr.msk.bf16.mxu1 %vm7512_vm5, %v8163_v28  ;;  %vm7452_vm4 = vmpackc.low %vm1994_vm11, %vm1992_vm10  ;;  %vm2024_vm5 = vcmp.eq.s32.totalorder %v8715_v21, %v8810_v47  ;;  %vm924_vm10 = vcmp.eq.s32.totalorder %v8846_v58, %v8901_v24 }
 0x21d   : > { %vm7420_vm7 = vmpackc.low %vm952_vm14, %vm950_vm13  ;;  %vm1993_vm13 = vcmp.eq.s32.totalorder %v8691_v11, %v8813_v48 }
 0x21e   : > { %vm7514_vm2 = vmpackc.low %vm2021_vm1, %vm2019_vm0  ;;  %vm951_vm0 = vcmp.eq.s32.totalorder %v8858_v63, %v8813_v48 }
 0x21f   : > { %7355 = vmatmul.mubr.msk.bf16.gmra.mrb[44].mxu0 %vm7354_vm8, %v8163_v28  ;;  %vm917_vm8 = vcmp.eq.s32.totalorder %v8843_v57, %v8810_v47  ;;  %vm7516_vm11 = vmpackc.low %vm2026_vm6, %vm2024_vm5  ;;  %vm1998_vm5 = vcmp.eq.s32.totalorder %v8694_v12, %v8901_v24 }
 0x220   : > { %7357 = vmatprep.mubr.msk.bf16.mxu0 %vm7356_vm3, %v8163_v28  ;;  %7451 = vmatpush1.bf16.xpose.msk.msra.mxu0 %vm7450_vm12, %v8163_v28  ;;  %vm922_vm3 = vcmp.eq.s32.totalorder %v8846_v58, %v8898_v13  ;;  %vm1991_vm12 = vcmp.eq.s32.totalorder %v8691_v11, %v8810_v47  ;;  %vm7358_vm14 = vmpackc.low %vm919_vm9, %vm917_vm8  ;;  %vm956_vm8 = vcmp.eq.s32.totalorder %v8861_v0, %v8901_v24 }
 0x221   : > { %7453 = vmatprep.subr.msk.bf16.mxu0 %vm7452_vm4, %v8163_v28  ;;  %vm7360_vm1 = vmpackc.low %vm924_vm10, %vm922_vm3  ;;  %vm1996_vm4 = vcmp.eq.s32.totalorder %v8694_v12, %v8898_v13  ;;  %vm2025_vm3 = vcmp.eq.s32.totalorder %v8712_v19, %v8813_v48 }
 0x222   : > { %7419 = vmatmul.mubr.msk.bf16.gmra.mrb[44].mxu1 %vm7418_vm15, %v8163_v28  ;;  %vm949_vm15 = vcmp.eq.s32.totalorder %v8858_v63, %v8810_v47  ;;  %vm7454_vm6 = vmpackc.low %vm1993_vm13, %vm1991_vm12  ;;  %vm2030_vm12 = vcmp.eq.s32.totalorder %v8715_v21, %v8901_v24 }
 0x223   : > { %7421 = vmatprep.mubr.msk.bf16.mxu1 %vm7420_vm7, %v8163_v28  ;;  %7515 = vmatpush1.bf16.xpose.msk.msra.mxu1 %vm7514_vm2, %v8163_v28  ;;  %vm954_vm7 = vcmp.eq.s32.totalorder %v8861_v0, %v8898_v13  ;;  %vm7422_vm9 = vmpackc.low %vm951_vm0, %vm949_vm15  ;;  %vm2023_vm2 = vcmp.eq.s32.totalorder %v8712_v19, %v8810_v47  ;;  %vm923_vm15 = vcmp.eq.s32.totalorder %v8843_v57, %v8901_v24 }
 0x224   : > { %7517 = vmatprep.subr.msk.bf16.mxu1 %vm7516_vm11, %v8163_v28  ;;  %vm7456_vm10 = vmpackc.low %vm1998_vm5, %vm1996_vm4  ;;  %vm2028_vm11 = vcmp.eq.s32.totalorder %v8715_v21, %v8898_v13  ;;  %vm928_vm4 = vcmp.eq.s32.totalorder %v8846_v58, %v8944_v33 }
 0x225   : > { %vm7424_vm13 = vmpackc.low %vm956_vm8, %vm954_vm7  ;;  %vm1997_vm7 = vcmp.eq.s32.totalorder %v8691_v11, %v8901_v24 }
 0x226   : > { %vm7518_vm0 = vmpackc.low %vm2025_vm3, %vm2023_vm2  ;;  %vm955_vm2 = vcmp.eq.s32.totalorder %v8858_v63, %v8901_v24 }
 0x227   : > { %7359 = vmatmul.mubr.msk.bf16.gmra.mrb[48].mxu0 %vm7358_vm14, %v8163_v28  ;;  %vm921_vm14 = vcmp.eq.s32.totalorder %v8843_v57, %v8898_v13  ;;  %vm7520_vm5 = vmpackc.low %vm2030_vm12, %vm2028_vm11  ;;  %vm2002_vm11 = vcmp.eq.s32.totalorder %v8694_v12, %v8944_v33 }
 0x228   : > { %7361 = vmatprep.mubr.msk.bf16.mxu0 %vm7360_vm1, %v8163_v28  ;;  %7455 = vmatpush1.bf16.xpose.msk.msra.mxu0 %vm7454_vm6, %v8163_v28  ;;  %vm926_vm1 = vcmp.eq.s32.totalorder %v8846_v58, %v8941_v32  ;;  %vm1995_vm6 = vcmp.eq.s32.totalorder %v8691_v11, %v8898_v13  ;;  %vm7362_vm8 = vmpackc.low %vm923_vm15, %vm921_vm14  ;;  %vm960_vm14 = vcmp.eq.s32.totalorder %v8861_v0, %v8944_v33 }
 0x229   : > { %7457 = vmatprep.subr.msk.bf16.mxu0 %vm7456_vm10, %v8163_v28  ;;  %vm7364_vm3 = vmpackc.low %vm928_vm4, %vm926_vm1  ;;  %vm2000_vm10 = vcmp.eq.s32.totalorder %v8694_v12, %v8941_v32  ;;  %vm2029_vm1 = vcmp.eq.s32.totalorder %v8712_v19, %v8901_v24 }
 0x22a   : > { %7423 = vmatmul.mubr.msk.bf16.gmra.mrb[48].mxu1 %vm7422_vm9, %v8163_v28  ;;  %vm953_vm9 = vcmp.eq.s32.totalorder %v8858_v63, %v8898_v13  ;;  %vm7458_vm12 = vmpackc.low %vm1997_vm7, %vm1995_vm6  ;;  %vm2034_vm6 = vcmp.eq.s32.totalorder %v8715_v21, %v8944_v33 }
 0x22b   : > { %7425 = vmatprep.mubr.msk.bf16.mxu1 %vm7424_vm13, %v8163_v28  ;;  %7519 = vmatpush1.bf16.xpose.msk.msra.mxu1 %vm7518_vm0, %v8163_v28  ;;  %vm958_vm13 = vcmp.eq.s32.totalorder %v8861_v0, %v8941_v32  ;;  %vm7426_vm15 = vmpackc.low %vm955_vm2, %vm953_vm9  ;;  %vm2027_vm0 = vcmp.eq.s32.totalorder %v8712_v19, %v8898_v13  ;;  %vm927_vm9 = vcmp.eq.s32.totalorder %v8843_v57, %v8944_v33 }
 0x22c   : > { %7521 = vmatprep.subr.msk.bf16.mxu1 %vm7520_vm5, %v8163_v28  ;;  %vm7460_vm4 = vmpackc.low %vm2002_vm11, %vm2000_vm10  ;;  %vm2032_vm5 = vcmp.eq.s32.totalorder %v8715_v21, %v8941_v32  ;;  %vm932_vm10 = vcmp.eq.s32.totalorder %v8846_v58, %v8972_v36 }
 0x22d   : > { %vm7428_vm7 = vmpackc.low %vm960_vm14, %vm958_vm13  ;;  %vm2001_vm13 = vcmp.eq.s32.totalorder %v8691_v11, %v8944_v33 }
 0x22e   : > { %vm7522_vm2 = vmpackc.low %vm2029_vm1, %vm2027_vm0  ;;  %vm959_vm0 = vcmp.eq.s32.totalorder %v8858_v63, %v8944_v33 }
 0x22f   : > { %7363 = vmatmul.mubr.msk.bf16.gmra.mrb[52].mxu0 %vm7362_vm8, %v8163_v28  ;;  %vm925_vm8 = vcmp.eq.s32.totalorder %v8843_v57, %v8941_v32  ;;  %vm7524_vm11 = vmpackc.low %vm2034_vm6, %vm2032_vm5  ;;  %vm2006_vm5 = vcmp.eq.s32.totalorder %v8694_v12, %v8972_v36 }
 0x230   : > { %7365 = vmatprep.mubr.msk.bf16.mxu0 %vm7364_vm3, %v8163_v28  ;;  %7459 = vmatpush1.bf16.xpose.msk.msra.mxu0 %vm7458_vm12, %v8163_v28  ;;  %vm930_vm3 = vcmp.eq.s32.totalorder %v8846_v58, %v8969_v34  ;;  %vm1999_vm12 = vcmp.eq.s32.totalorder %v8691_v11, %v8941_v32  ;;  %vm7366_vm14 = vmpackc.low %vm927_vm9, %vm925_vm8  ;;  %vm964_vm8 = vcmp.eq.s32.totalorder %v8861_v0, %v8972_v36 }
 0x231   : > { %7461 = vmatprep.subr.msk.bf16.mxu0 %vm7460_vm4, %v8163_v28  ;;  %vm7368_vm1 = vmpackc.low %vm932_vm10, %vm930_vm3  ;;  %vm2004_vm4 = vcmp.eq.s32.totalorder %v8694_v12, %v8969_v34  ;;  %vm2033_vm3 = vcmp.eq.s32.totalorder %v8712_v19, %v8944_v33 }
 0x232   : > { %7427 = vmatmul.mubr.msk.bf16.gmra.mrb[52].mxu1 %vm7426_vm15, %v8163_v28  ;;  %vm957_vm15 = vcmp.eq.s32.totalorder %v8858_v63, %v8941_v32  ;;  %vm7462_vm6 = vmpackc.low %vm2001_vm13, %vm1999_vm12  ;;  %vm2038_vm12 = vcmp.eq.s32.totalorder %v8715_v21, %v8972_v36 }
 0x233   : > { %7429 = vmatprep.mubr.msk.bf16.mxu1 %vm7428_vm7, %v8163_v28  ;;  %7523 = vmatpush1.bf16.xpose.msk.msra.mxu1 %vm7522_vm2, %v8163_v28  ;;  %vm962_vm7 = vcmp.eq.s32.totalorder %v8861_v0, %v8969_v34  ;;  %vm7430_vm9 = vmpackc.low %vm959_vm0, %vm957_vm15  ;;  %vm2031_vm2 = vcmp.eq.s32.totalorder %v8712_v19, %v8941_v32  ;;  %vm931_vm15 = vcmp.eq.s32.totalorder %v8843_v57, %v8972_v36 }
 0x234   : > { %7525 = vmatprep.subr.msk.bf16.mxu1 %vm7524_vm11, %v8163_v28  ;;  %vm7464_vm10 = vmpackc.low %vm2006_vm5, %vm2004_vm4  ;;  %vm2036_vm11 = vcmp.eq.s32.totalorder %v8715_v21, %v8969_v34  ;;  %vm2005_vm4 = vcmp.eq.s32.totalorder %v8691_v11, %v8972_v36 }
 0x235   : > { %vm7432_vm13 = vmpackc.low %vm964_vm8, %vm962_vm7  ;;  %vm968_vm7 = vcmp.eq.s32.totalorder %v8832_v55, %v8677_v5 }
 0x236   : > { %vm7526_vm0 = vmpackc.low %vm2033_vm3, %vm2031_vm2  ;;  %vm963_vm2 = vcmp.eq.s32.totalorder %v8858_v63, %v8972_v36 }
 0x237   : > { %7367 = vmatmul.mubr.msk.bf16.gmra.mrb[56].mxu0 %vm7366_vm14, %v8163_v28  ;;  %vm929_vm14 = vcmp.eq.s32.totalorder %v8843_v57, %v8969_v34  ;;  %vm7528_vm5 = vmpackc.low %vm2038_vm12, %vm2036_vm11  ;;  %vm2042_vm11 = vcmp.eq.s32.totalorder %v8721_v23, %v8677_v5 }
 0x238   : > { %7369 = vmatprep.mubr.msk.bf16.mxu0 %vm7368_vm1, %v8163_v28  ;;  %7463 = vmatpush1.bf16.xpose.msk.msra.mxu0 %vm7462_vm6, %v8163_v28  ;;  %vm2003_vm1 = vcmp.eq.s32.totalorder %v8691_v11, %v8969_v34  ;;  %vm966_vm6 = vcmp.eq.s32.totalorder %v8832_v55, %v8647_v39  ;;  %vm7370_vm8 = vmpackc.low %vm931_vm15, %vm929_vm14  ;;  %vm2037_vm14 = vcmp.eq.s32.totalorder %v8712_v19, %v8972_v36  ;;  %v2744_v11 = vld [vmem:[#allocation2 + $0x8] sm:$0xff] }
 0x239   : > { %7465 = vmatprep.subr.msk.bf16.mxu0 %vm7464_vm10, %v8163_v28  ;;  %vm7466_vm3 = vmpackc.low %vm2005_vm4, %vm2003_vm1  ;;  %vm2040_vm10 = vcmp.eq.s32.totalorder %v8721_v23, %v8647_v39  ;;  %vm1000_vm1 = vcmp.eq.s32.totalorder %v8852_v62, %v8677_v5 }
 0x23a   : > { %7431 = vmatmul.mubr.msk.bf16.gmra.mrb[56].mxu1 %vm7430_vm9, %v8163_v28  ;;  %vm961_vm9 = vcmp.eq.s32.totalorder %v8858_v63, %v8969_v34  ;;  %vm7468_vm12 = vmpackc.low %vm968_vm7, %vm966_vm6  ;;  %vm2074_vm6 = vcmp.eq.s32.totalorder %v8727_v27, %v8677_v5  ;;  %v2748_v63 = vld [vmem:[#allocation2 + $0x28] sm:$0xff] }
 0x23b   : > { %7433 = vmatprep.mubr.msk.bf16.mxu1 %vm7432_vm13, %v8163_v28  ;;  %7527 = vmatpush1.bf16.xpose.msk.msra.mxu1 %vm7526_vm0, %v8163_v28  ;;  %vm2035_vm13 = vcmp.eq.s32.totalorder %v8712_v19, %v8969_v34  ;;  %vm7434_vm15 = vmpackc.low %vm963_vm2, %vm961_vm9  ;;  %vm998_vm0 = vcmp.eq.s32.totalorder %v8852_v62, %v8647_v39  ;;  %vm967_vm9 = vcmp.eq.s32.totalorder %v8829_v54, %v8677_v5  ;;  %v2759_v19 = vld [vmem:[#allocation2 + $0x80] sm:$0xff] }
 0x23c   : > { %7529 = vmatprep.subr.msk.bf16.mxu1 %vm7528_vm5, %v8163_v28  ;;  %vm7564_vm4 = vmpackc.low %vm2042_vm11, %vm2040_vm10  ;;  %vm2072_vm5 = vcmp.eq.s32.totalorder %v8727_v27, %v8647_v39  ;;  %vm972_vm10 = vcmp.eq.s32.totalorder %v8832_v55, %v8701_v15 }
 0x23d   : > { %vm7530_vm7 = vmpackc.low %vm2037_vm14, %vm2035_vm13  ;;  %vm2041_vm13 = vcmp.eq.s32.totalorder %v8718_v22, %v8677_v5 }
 0x23e   : > { %vm7532_vm2 = vmpackc.low %vm1000_vm1, %vm998_vm0  ;;  %vm999_vm0 = vcmp.eq.s32.totalorder %v8849_v59, %v8677_v5 }
 0x23f   : > { %7371 = vmatmul.mubr.msk.bf16.gmra.mrb[60].mxu0 %vm7370_vm8, %v8163_v28  ;;  %vm965_vm8 = vcmp.eq.s32.totalorder %v8829_v54, %v8647_v39  ;;  %vm7628_vm11 = vmpackc.low %vm2074_vm6, %vm2072_vm5  ;;  %vm2046_vm5 = vcmp.eq.s32.totalorder %v8721_v23, %v8701_v15 }
 0x240   : > { %7467 = vmatpush1.bf16.xpose.msk.msra.mxu0 %vm7466_vm3, %v8163_v28  ;;  %7469 = vmatprep.mubr.msk.bf16.mxu0 %vm7468_vm12, %v8163_v28  ;;  %vm970_vm3 = vcmp.eq.s32.totalorder %v8832_v55, %v8680_v6  ;;  %vm2039_vm12 = vcmp.eq.s32.totalorder %v8718_v22, %v8647_v39  ;;  %vm7470_vm14 = vmpackc.low %vm967_vm9, %vm965_vm8  ;;  %vm1004_vm8 = vcmp.eq.s32.totalorder %v8852_v62, %v8701_v15 }
 0x241   : > { %7565 = vmatprep.subr.msk.bf16.mxu0 %vm7564_vm4, %v8163_v28  ;;  %vm7472_vm1 = vmpackc.low %vm972_vm10, %vm970_vm3  ;;  %vm2044_vm4 = vcmp.eq.s32.totalorder %v8721_v23, %v8680_v6  ;;  %vm2073_vm3 = vcmp.eq.s32.totalorder %v8724_v26, %v8677_v5 }
 0x242   : > { %7435 = vmatmul.mubr.msk.bf16.gmra.mrb[60].mxu1 %vm7434_vm15, %v8163_v28  ;;  %vm997_vm15 = vcmp.eq.s32.totalorder %v8849_v59, %v8647_v39  ;;  %vm7566_vm6 = vmpackc.low %vm2041_vm13, %vm2039_vm12  ;;  %vm2078_vm12 = vcmp.eq.s32.totalorder %v8727_v27, %v8701_v15 }
 0x243   : > { %7531 = vmatpush1.bf16.xpose.msk.msra.mxu1 %vm7530_vm7, %v8163_v28  ;;  %7533 = vmatprep.mubr.msk.bf16.mxu1 %vm7532_vm2, %v8163_v28  ;;  %vm1002_vm7 = vcmp.eq.s32.totalorder %v8852_v62, %v8680_v6  ;;  %vm7534_vm9 = vmpackc.low %vm999_vm0, %vm997_vm15  ;;  %vm2071_vm2 = vcmp.eq.s32.totalorder %v8724_v26, %v8647_v39  ;;  %vm971_vm15 = vcmp.eq.s32.totalorder %v8829_v54, %v8701_v15 }
 0x244   : > { %7629 = vmatprep.subr.msk.bf16.mxu1 %vm7628_vm11, %v8163_v28  ;;  %vm7568_vm10 = vmpackc.low %vm2046_vm5, %vm2044_vm4  ;;  %vm2076_vm11 = vcmp.eq.s32.totalorder %v8727_v27, %v8680_v6  ;;  %vm976_vm4 = vcmp.eq.s32.totalorder %v8832_v55, %v8760_v30 }
 0x245   : > { %vm7536_vm13 = vmpackc.low %vm1004_vm8, %vm1002_vm7  ;;  %vm2045_vm7 = vcmp.eq.s32.totalorder %v8718_v22, %v8701_v15 }
 0x246   : > { %vm7630_vm0 = vmpackc.low %vm2073_vm3, %vm2071_vm2  ;;  %vm1003_vm2 = vcmp.eq.s32.totalorder %v8849_v59, %v8701_v15 }
 0x247   : > { %7471 = vmatmul.mubr.msk.bf16.vlgmr.msra.gmra.mrb[64].mxu0 %vm7470_vm14, %v8163_v28  ;;  %vm969_vm14 = vcmp.eq.s32.totalorder %v8829_v54, %v8680_v6  ;;  %vm7632_vm5 = vmpackc.low %vm2078_vm12, %vm2076_vm11  ;;  %vm2050_vm11 = vcmp.eq.s32.totalorder %v8721_v23, %v8760_v30 }
 0x248   : > { %7473 = vmatprep.mubr.msk.bf16.mxu0 %vm7472_vm1, %v8163_v28  ;;  %7567 = vmatpush1.bf16.xpose.msk.msra.mxu0 %vm7566_vm6, %v8163_v28  ;;  %vm974_vm1 = vcmp.eq.s32.totalorder %v8832_v55, %v8757_v29  ;;  %vm2043_vm6 = vcmp.eq.s32.totalorder %v8718_v22, %v8680_v6  ;;  %vm7474_vm8 = vmpackc.low %vm971_vm15, %vm969_vm14  ;;  %vm1008_vm14 = vcmp.eq.s32.totalorder %v8852_v62, %v8760_v30 }
 0x249   : > { %7569 = vmatprep.subr.msk.bf16.mxu0 %vm7568_vm10, %v8163_v28  ;;  %vm7476_vm3 = vmpackc.low %vm976_vm4, %vm974_vm1  ;;  %vm2048_vm10 = vcmp.eq.s32.totalorder %v8721_v23, %v8757_v29  ;;  %vm2077_vm1 = vcmp.eq.s32.totalorder %v8724_v26, %v8701_v15 }
 0x24a   : > { %7535 = vmatmul.mubr.msk.bf16.vlgmr.msra.gmra.mrb[64].mxu1 %vm7534_vm9, %v8163_v28  ;;  %vm1001_vm9 = vcmp.eq.s32.totalorder %v8849_v59, %v8680_v6  ;;  %vm7570_vm12 = vmpackc.low %vm2045_vm7, %vm2043_vm6  ;;  %vm2082_vm6 = vcmp.eq.s32.totalorder %v8727_v27, %v8760_v30 }
 0x24b   : > { %7537 = vmatprep.mubr.msk.bf16.mxu1 %vm7536_vm13, %v8163_v28  ;;  %7631 = vmatpush1.bf16.xpose.msk.msra.mxu1 %vm7630_vm0, %v8163_v28  ;;  %vm1006_vm13 = vcmp.eq.s32.totalorder %v8852_v62, %v8757_v29  ;;  %vm7538_vm15 = vmpackc.low %vm1003_vm2, %vm1001_vm9  ;;  %vm2075_vm0 = vcmp.eq.s32.totalorder %v8724_v26, %v8680_v6  ;;  %vm975_vm9 = vcmp.eq.s32.totalorder %v8829_v54, %v8760_v30 }
 0x24c   : > { %7633 = vmatprep.subr.msk.bf16.mxu1 %vm7632_vm5, %v8163_v28  ;;  %vm7572_vm4 = vmpackc.low %vm2050_vm11, %vm2048_vm10  ;;  %vm2080_vm5 = vcmp.eq.s32.totalorder %v8727_v27, %v8757_v29  ;;  %vm980_vm10 = vcmp.eq.s32.totalorder %v8832_v55, %v8791_v40 }
 0x24d   : > { %vm7540_vm7 = vmpackc.low %vm1008_vm14, %vm1006_vm13  ;;  %vm2049_vm13 = vcmp.eq.s32.totalorder %v8718_v22, %v8760_v30 }
 0x24e   : > { %vm7634_vm2 = vmpackc.low %vm2077_vm1, %vm2075_vm0  ;;  %vm1007_vm0 = vcmp.eq.s32.totalorder %v8849_v59, %v8760_v30 }
 0x24f   : > { %7475 = vmatmul.mubr.msk.bf16.gmra.mrb[68].mxu0 %vm7474_vm8, %v8163_v28  ;;  %vm973_vm8 = vcmp.eq.s32.totalorder %v8829_v54, %v8757_v29  ;;  %vm7636_vm11 = vmpackc.low %vm2082_vm6, %vm2080_vm5  ;;  %vm2054_vm5 = vcmp.eq.s32.totalorder %v8721_v23, %v8791_v40 }
 0x250   : > { %7477 = vmatprep.mubr.msk.bf16.mxu0 %vm7476_vm3, %v8163_v28  ;;  %7571 = vmatpush1.bf16.xpose.msk.msra.mxu0 %vm7570_vm12, %v8163_v28  ;;  %vm978_vm3 = vcmp.eq.s32.totalorder %v8832_v55, %v8788_v38  ;;  %vm2047_vm12 = vcmp.eq.s32.totalorder %v8718_v22, %v8757_v29  ;;  %vm7478_vm14 = vmpackc.low %vm975_vm9, %vm973_vm8  ;;  %vm1012_vm8 = vcmp.eq.s32.totalorder %v8852_v62, %v8791_v40 }
 0x251   : > { %7573 = vmatprep.subr.msk.bf16.mxu0 %vm7572_vm4, %v8163_v28  ;;  %vm7480_vm1 = vmpackc.low %vm980_vm10, %vm978_vm3  ;;  %vm2052_vm4 = vcmp.eq.s32.totalorder %v8721_v23, %v8788_v38  ;;  %vm2081_vm3 = vcmp.eq.s32.totalorder %v8724_v26, %v8760_v30 }
 0x252   : > { %7539 = vmatmul.mubr.msk.bf16.gmra.mrb[68].mxu1 %vm7538_vm15, %v8163_v28  ;;  %vm1005_vm15 = vcmp.eq.s32.totalorder %v8849_v59, %v8757_v29  ;;  %vm7574_vm6 = vmpackc.low %vm2049_vm13, %vm2047_vm12  ;;  %vm2086_vm12 = vcmp.eq.s32.totalorder %v8727_v27, %v8791_v40 }
 0x253   : > { %7541 = vmatprep.mubr.msk.bf16.mxu1 %vm7540_vm7, %v8163_v28  ;;  %7635 = vmatpush1.bf16.xpose.msk.msra.mxu1 %vm7634_vm2, %v8163_v28  ;;  %vm1010_vm7 = vcmp.eq.s32.totalorder %v8852_v62, %v8788_v38  ;;  %vm7542_vm9 = vmpackc.low %vm1007_vm0, %vm1005_vm15  ;;  %vm2079_vm2 = vcmp.eq.s32.totalorder %v8724_v26, %v8757_v29  ;;  %vm979_vm15 = vcmp.eq.s32.totalorder %v8829_v54, %v8791_v40 }
 0x254   : > { %7637 = vmatprep.subr.msk.bf16.mxu1 %vm7636_vm11, %v8163_v28  ;;  %vm7576_vm10 = vmpackc.low %vm2054_vm5, %vm2052_vm4  ;;  %vm2084_vm11 = vcmp.eq.s32.totalorder %v8727_v27, %v8788_v38  ;;  %vm984_vm4 = vcmp.eq.s32.totalorder %v8832_v55, %v8813_v48 }
 0x255   : > { %vm7544_vm13 = vmpackc.low %vm1012_vm8, %vm1010_vm7  ;;  %vm2053_vm7 = vcmp.eq.s32.totalorder %v8718_v22, %v8791_v40 }
 0x256   : > { %vm7638_vm0 = vmpackc.low %vm2081_vm3, %vm2079_vm2  ;;  %vm1011_vm2 = vcmp.eq.s32.totalorder %v8849_v59, %v8791_v40 }
 0x257   : > { %7479 = vmatmul.mubr.msk.bf16.gmra.mrb[72].mxu0 %vm7478_vm14, %v8163_v28  ;;  %vm977_vm14 = vcmp.eq.s32.totalorder %v8829_v54, %v8788_v38  ;;  %vm7640_vm5 = vmpackc.low %vm2086_vm12, %vm2084_vm11  ;;  %vm2058_vm11 = vcmp.eq.s32.totalorder %v8721_v23, %v8813_v48 }
 0x258   : > { %7481 = vmatprep.mubr.msk.bf16.mxu0 %vm7480_vm1, %v8163_v28  ;;  %7575 = vmatpush1.bf16.xpose.msk.msra.mxu0 %vm7574_vm6, %v8163_v28  ;;  %vm982_vm1 = vcmp.eq.s32.totalorder %v8832_v55, %v8810_v47  ;;  %vm2051_vm6 = vcmp.eq.s32.totalorder %v8718_v22, %v8788_v38  ;;  %vm7482_vm8 = vmpackc.low %vm979_vm15, %vm977_vm14  ;;  %vm1016_vm14 = vcmp.eq.s32.totalorder %v8852_v62, %v8813_v48 }
 0x259   : > { %7577 = vmatprep.subr.msk.bf16.mxu0 %vm7576_vm10, %v8163_v28  ;;  %vm7484_vm3 = vmpackc.low %vm984_vm4, %vm982_vm1  ;;  %vm2056_vm10 = vcmp.eq.s32.totalorder %v8721_v23, %v8810_v47  ;;  %vm2085_vm1 = vcmp.eq.s32.totalorder %v8724_v26, %v8791_v40 }
 0x25a   : > { %7543 = vmatmul.mubr.msk.bf16.gmra.mrb[72].mxu1 %vm7542_vm9, %v8163_v28  ;;  %vm1009_vm9 = vcmp.eq.s32.totalorder %v8849_v59, %v8788_v38  ;;  %vm7578_vm12 = vmpackc.low %vm2053_vm7, %vm2051_vm6  ;;  %vm2090_vm6 = vcmp.eq.s32.totalorder %v8727_v27, %v8813_v48 }
 0x25b   : > { %7545 = vmatprep.mubr.msk.bf16.mxu1 %vm7544_vm13, %v8163_v28  ;;  %7639 = vmatpush1.bf16.xpose.msk.msra.mxu1 %vm7638_vm0, %v8163_v28  ;;  %vm1014_vm13 = vcmp.eq.s32.totalorder %v8852_v62, %v8810_v47  ;;  %vm7546_vm15 = vmpackc.low %vm1011_vm2, %vm1009_vm9  ;;  %vm2083_vm0 = vcmp.eq.s32.totalorder %v8724_v26, %v8788_v38  ;;  %vm983_vm9 = vcmp.eq.s32.totalorder %v8829_v54, %v8813_v48 }
 0x25c   : > { %7641 = vmatprep.subr.msk.bf16.mxu1 %vm7640_vm5, %v8163_v28  ;;  %vm7580_vm4 = vmpackc.low %vm2058_vm11, %vm2056_vm10  ;;  %vm2088_vm5 = vcmp.eq.s32.totalorder %v8727_v27, %v8810_v47  ;;  %vm988_vm10 = vcmp.eq.s32.totalorder %v8832_v55, %v8901_v24 }
 0x25d   : > { %vm7548_vm7 = vmpackc.low %vm1016_vm14, %vm1014_vm13  ;;  %vm2057_vm13 = vcmp.eq.s32.totalorder %v8718_v22, %v8813_v48 }
 0x25e   : > { %vm7642_vm2 = vmpackc.low %vm2085_vm1, %vm2083_vm0  ;;  %vm1015_vm0 = vcmp.eq.s32.totalorder %v8849_v59, %v8813_v48 }
 0x25f   : > { %7483 = vmatmul.mubr.msk.bf16.gmra.mrb[76].mxu0 %vm7482_vm8, %v8163_v28  ;;  %vm981_vm8 = vcmp.eq.s32.totalorder %v8829_v54, %v8810_v47  ;;  %vm7644_vm11 = vmpackc.low %vm2090_vm6, %vm2088_vm5  ;;  %vm2062_vm5 = vcmp.eq.s32.totalorder %v8721_v23, %v8901_v24 }
 0x260   : > { %7485 = vmatprep.mubr.msk.bf16.mxu0 %vm7484_vm3, %v8163_v28  ;;  %7579 = vmatpush1.bf16.xpose.msk.msra.mxu0 %vm7578_vm12, %v8163_v28  ;;  %vm986_vm3 = vcmp.eq.s32.totalorder %v8832_v55, %v8898_v13  ;;  %vm2055_vm12 = vcmp.eq.s32.totalorder %v8718_v22, %v8810_v47  ;;  %vm7486_vm14 = vmpackc.low %vm983_vm9, %vm981_vm8  ;;  %vm1020_vm8 = vcmp.eq.s32.totalorder %v8852_v62, %v8901_v24 }
 0x261   : > { %7581 = vmatprep.subr.msk.bf16.mxu0 %vm7580_vm4, %v8163_v28  ;;  %vm7488_vm1 = vmpackc.low %vm988_vm10, %vm986_vm3  ;;  %vm2060_vm4 = vcmp.eq.s32.totalorder %v8721_v23, %v8898_v13  ;;  %vm2089_vm3 = vcmp.eq.s32.totalorder %v8724_v26, %v8813_v48 }
 0x262   : > { %7547 = vmatmul.mubr.msk.bf16.gmra.mrb[76].mxu1 %vm7546_vm15, %v8163_v28  ;;  %vm1013_vm15 = vcmp.eq.s32.totalorder %v8849_v59, %v8810_v47  ;;  %vm7582_vm6 = vmpackc.low %vm2057_vm13, %vm2055_vm12  ;;  %vm2094_vm12 = vcmp.eq.s32.totalorder %v8727_v27, %v8901_v24 }
 0x263   : > { %7549 = vmatprep.mubr.msk.bf16.mxu1 %vm7548_vm7, %v8163_v28  ;;  %7643 = vmatpush1.bf16.xpose.msk.msra.mxu1 %vm7642_vm2, %v8163_v28  ;;  %vm1018_vm7 = vcmp.eq.s32.totalorder %v8852_v62, %v8898_v13  ;;  %vm7550_vm9 = vmpackc.low %vm1015_vm0, %vm1013_vm15  ;;  %vm2087_vm2 = vcmp.eq.s32.totalorder %v8724_v26, %v8810_v47  ;;  %vm987_vm15 = vcmp.eq.s32.totalorder %v8829_v54, %v8901_v24 }
 0x264   : > { %7645 = vmatprep.subr.msk.bf16.mxu1 %vm7644_vm11, %v8163_v28  ;;  %vm7584_vm10 = vmpackc.low %vm2062_vm5, %vm2060_vm4  ;;  %vm2092_vm11 = vcmp.eq.s32.totalorder %v8727_v27, %v8898_v13  ;;  %vm992_vm4 = vcmp.eq.s32.totalorder %v8832_v55, %v8944_v33 }
 0x265   : > { %vm7552_vm13 = vmpackc.low %vm1020_vm8, %vm1018_vm7  ;;  %vm2061_vm7 = vcmp.eq.s32.totalorder %v8718_v22, %v8901_v24 }
 0x266   : > { %vm7646_vm0 = vmpackc.low %vm2089_vm3, %vm2087_vm2  ;;  %vm1019_vm2 = vcmp.eq.s32.totalorder %v8849_v59, %v8901_v24 }
 0x267   : > { %7487 = vmatmul.mubr.msk.bf16.gmra.mrb[80].mxu0 %vm7486_vm14, %v8163_v28  ;;  %vm985_vm14 = vcmp.eq.s32.totalorder %v8829_v54, %v8898_v13  ;;  %vm7648_vm5 = vmpackc.low %vm2094_vm12, %vm2092_vm11  ;;  %vm2066_vm11 = vcmp.eq.s32.totalorder %v8721_v23, %v8944_v33 }
 0x268   : > { %7489 = vmatprep.mubr.msk.bf16.mxu0 %vm7488_vm1, %v8163_v28  ;;  %7583 = vmatpush1.bf16.xpose.msk.msra.mxu0 %vm7582_vm6, %v8163_v28  ;;  %vm990_vm1 = vcmp.eq.s32.totalorder %v8832_v55, %v8941_v32  ;;  %vm2059_vm6 = vcmp.eq.s32.totalorder %v8718_v22, %v8898_v13  ;;  %vm7490_vm8 = vmpackc.low %vm987_vm15, %vm985_vm14  ;;  %vm1024_vm14 = vcmp.eq.s32.totalorder %v8852_v62, %v8944_v33 }
 0x269   : > { %7585 = vmatprep.subr.msk.bf16.mxu0 %vm7584_vm10, %v8163_v28  ;;  %vm7492_vm3 = vmpackc.low %vm992_vm4, %vm990_vm1  ;;  %vm2064_vm10 = vcmp.eq.s32.totalorder %v8721_v23, %v8941_v32  ;;  %vm2093_vm1 = vcmp.eq.s32.totalorder %v8724_v26, %v8901_v24 }
 0x26a   : > { %7551 = vmatmul.mubr.msk.bf16.gmra.mrb[80].mxu1 %vm7550_vm9, %v8163_v28  ;;  %vm1017_vm9 = vcmp.eq.s32.totalorder %v8849_v59, %v8898_v13  ;;  %vm7586_vm12 = vmpackc.low %vm2061_vm7, %vm2059_vm6  ;;  %vm2098_vm6 = vcmp.eq.s32.totalorder %v8727_v27, %v8944_v33 }
 0x26b   : > { %7553 = vmatprep.mubr.msk.bf16.mxu1 %vm7552_vm13, %v8163_v28  ;;  %7647 = vmatpush1.bf16.xpose.msk.msra.mxu1 %vm7646_vm0, %v8163_v28  ;;  %vm1022_vm13 = vcmp.eq.s32.totalorder %v8852_v62, %v8941_v32  ;;  %vm7554_vm15 = vmpackc.low %vm1019_vm2, %vm1017_vm9  ;;  %vm2091_vm0 = vcmp.eq.s32.totalorder %v8724_v26, %v8898_v13  ;;  %vm991_vm9 = vcmp.eq.s32.totalorder %v8829_v54, %v8944_v33 }
 0x26c   : > { %7649 = vmatprep.subr.msk.bf16.mxu1 %vm7648_vm5, %v8163_v28  ;;  %vm7588_vm4 = vmpackc.low %vm2066_vm11, %vm2064_vm10  ;;  %vm2096_vm5 = vcmp.eq.s32.totalorder %v8727_v27, %v8941_v32  ;;  %vm996_vm10 = vcmp.eq.s32.totalorder %v8832_v55, %v8972_v36 }
 0x26d   : > { %vm7556_vm7 = vmpackc.low %vm1024_vm14, %vm1022_vm13  ;;  %vm2065_vm13 = vcmp.eq.s32.totalorder %v8718_v22, %v8944_v33 }
 0x26e   : > { %vm7650_vm2 = vmpackc.low %vm2093_vm1, %vm2091_vm0  ;;  %vm1023_vm0 = vcmp.eq.s32.totalorder %v8849_v59, %v8944_v33 }
 0x26f   : > { %7491 = vmatmul.mubr.msk.bf16.gmra.mrb[84].mxu0 %vm7490_vm8, %v8163_v28  ;;  %vm989_vm8 = vcmp.eq.s32.totalorder %v8829_v54, %v8941_v32  ;;  %vm7652_vm11 = vmpackc.low %vm2098_vm6, %vm2096_vm5  ;;  %vm2070_vm5 = vcmp.eq.s32.totalorder %v8721_v23, %v8972_v36 }
 0x270   : > { %7493 = vmatprep.mubr.msk.bf16.mxu0 %vm7492_vm3, %v8163_v28  ;;  %7587 = vmatpush1.bf16.xpose.msk.msra.mxu0 %vm7586_vm12, %v8163_v28  ;;  %vm994_vm3 = vcmp.eq.s32.totalorder %v8832_v55, %v8969_v34  ;;  %vm2063_vm12 = vcmp.eq.s32.totalorder %v8718_v22, %v8941_v32  ;;  %vm7494_vm14 = vmpackc.low %vm991_vm9, %vm989_vm8  ;;  %vm1028_vm8 = vcmp.eq.s32.totalorder %v8852_v62, %v8972_v36 }
 0x271   : > { %7589 = vmatprep.subr.msk.bf16.mxu0 %vm7588_vm4, %v8163_v28  ;;  %vm7496_vm1 = vmpackc.low %vm996_vm10, %vm994_vm3  ;;  %vm2068_vm4 = vcmp.eq.s32.totalorder %v8721_v23, %v8969_v34  ;;  %vm2097_vm3 = vcmp.eq.s32.totalorder %v8724_v26, %v8944_v33 }
 0x272   : > { %7555 = vmatmul.mubr.msk.bf16.gmra.mrb[84].mxu1 %vm7554_vm15, %v8163_v28  ;;  %vm1021_vm15 = vcmp.eq.s32.totalorder %v8849_v59, %v8941_v32  ;;  %vm7590_vm6 = vmpackc.low %vm2065_vm13, %vm2063_vm12  ;;  %vm2102_vm12 = vcmp.eq.s32.totalorder %v8727_v27, %v8972_v36 }
 0x273   : > { %7557 = vmatprep.mubr.msk.bf16.mxu1 %vm7556_vm7, %v8163_v28  ;;  %7651 = vmatpush1.bf16.xpose.msk.msra.mxu1 %vm7650_vm2, %v8163_v28  ;;  %vm1026_vm7 = vcmp.eq.s32.totalorder %v8852_v62, %v8969_v34  ;;  %vm7558_vm9 = vmpackc.low %vm1023_vm0, %vm1021_vm15  ;;  %vm2095_vm2 = vcmp.eq.s32.totalorder %v8724_v26, %v8941_v32  ;;  %vm993_vm15 = vcmp.eq.s32.totalorder %v8829_v54, %v8969_v34 }
 0x274   : > { %7653 = vmatprep.subr.msk.bf16.mxu1 %vm7652_vm11, %v8163_v28  ;;  %vm7592_vm10 = vmpackc.low %vm2070_vm5, %vm2068_vm4  ;;  %vm2100_vm11 = vcmp.eq.s32.totalorder %v8727_v27, %v8969_v34  ;;  %vm995_vm0 = vcmp.eq.s32.totalorder %v8829_v54, %v8972_v36  ;;  %vm2067_vm4 = vcmp.eq.s32.totalorder %v8718_v22, %v8969_v34  ;;  %vm2069_vm5 = vcmp.eq.s32.totalorder %v8718_v22, %v8972_v36  ;;  %v2760_v27 = vld [vmem:[#allocation2 + $0x88] sm:$0xff] }
 0x275   : > { %vm7560_vm13 = vmpackc.low %vm1028_vm8, %vm1026_vm7  ;;  %vm1032_vm7 = vcmp.eq.s32.totalorder %v8867_v4, %v8677_v5 }
 0x276   : > { %vm7498_vm8 = vmpackc.low %vm995_vm0, %vm993_vm15 }
 0x277   : > { %7495 = vmatmul.mubr.msk.bf16.gmra.mrb[88].mxu0 %vm7494_vm14, %v8163_v28  ;;  %vm7654_vm14 = vmpackc.low %vm2097_vm3, %vm2095_vm2  ;;  %vm1027_vm2 = vcmp.eq.s32.totalorder %v8849_v59, %v8972_v36 }
 0x278   : > { %7497 = vmatprep.mubr.msk.bf16.mxu0 %vm7496_vm1, %v8163_v28  ;;  %7591 = vmatpush1.bf16.xpose.msk.msra.mxu0 %vm7590_vm6, %v8163_v28  ;;  %vm7656_vm1 = vmpackc.low %vm2102_vm12, %vm2100_vm11  ;;  %vm1030_vm6 = vcmp.eq.s32.totalorder %v8867_v4, %v8647_v39  ;;  %vm2101_vm11 = vcmp.eq.s32.totalorder %v8724_v26, %v8972_v36 }
 0x279   : > { %7593 = vmatprep.subr.msk.bf16.mxu0 %vm7592_vm10, %v8163_v28  ;;  %vm7594_vm3 = vmpackc.low %vm2069_vm5, %vm2067_vm4  ;;  %vm2099_vm10 = vcmp.eq.s32.totalorder %v8724_v26, %v8969_v34  ;;  %vm1029_vm4 = vcmp.eq.s32.totalorder %v8864_v2, %v8647_v39  ;;  %vm1031_vm5 = vcmp.eq.s32.totalorder %v8864_v2, %v8677_v5 }
 0x27a   : > { %7559 = vmatmul.mubr.msk.bf16.gmra.mrb[88].mxu1 %vm7558_vm9, %v8163_v28  ;;  %vm1025_vm9 = vcmp.eq.s32.totalorder %v8849_v59, %v8969_v34  ;;  %vm7596_vm12 = vmpackc.low %vm1032_vm7, %vm1030_vm6  ;;  %vm1034_vm6 = vcmp.eq.s32.totalorder %v8867_v4, %v8680_v6  ;;  %vm1036_vm7 = vcmp.eq.s32.totalorder %v8867_v4, %v8701_v15 }
 0x27b   : > { %7561 = vmatprep.mubr.msk.bf16.mxu1 %vm7560_vm13, %v8163_v28  ;;  %7655 = vmatpush1.bf16.xpose.msk.msra.mxu1 %vm7654_vm14, %v8163_v28  ;;  %vm1062_vm13 = vcmp.eq.s32.totalorder %v8877_v9, %v8647_v39  ;;  %vm1064_vm14 = vcmp.eq.s32.totalorder %v8877_v9, %v8677_v5  ;;  %vm7562_vm15 = vmpackc.low %vm1027_vm2, %vm1025_vm9  ;;  %vm1061_vm9 = vcmp.eq.s32.totalorder %v8874_v8, %v8647_v39 }
 0x27c   : > { %7657 = vmatprep.subr.msk.bf16.mxu1 %vm7656_vm1, %v8163_v28  ;;  %vm7658_vm0 = vmpackc.low %vm2101_vm11, %vm2099_vm10  ;;  %vm1063_vm2 = vcmp.eq.s32.totalorder %v8874_v8, %v8677_v5  ;;  %vm1066_vm10 = vcmp.eq.s32.totalorder %v8877_v9, %v8680_v6  ;;  %vm1068_vm11 = vcmp.eq.s32.totalorder %v8877_v9, %v8701_v15  ;;  %v2743_v5 = vld [vmem:[#allocation2] sm:$0xff] }
 0x27d   : > { %vm7660_vm1 = vmpackc.low %vm1064_vm14, %vm1062_vm13  ;;  %vm1033_vm14 = vcmp.eq.s32.totalorder %v8864_v2, %v8680_v6 }
 0x27e   : > { %vm7664_vm13 = vmpackc.low %vm1068_vm11, %vm1066_vm10  ;;  %vm1037_vm10 = vcmp.eq.s32.totalorder %v8864_v2, %v8757_v29  ;;  %vm1039_vm11 = vcmp.eq.s32.totalorder %v8864_v2, %v8760_v30 }
 0x27f   : > { %7499 = vmatmul.mubr.msk.bf16.gmra.mrb[92].mxu0 %vm7498_vm8, %v8163_v28  ;;  %vm7598_vm8 = vmpackc.low %vm1031_vm5, %vm1029_vm4  ;;  %vm1065_vm5 = vcmp.eq.s32.totalorder %v8874_v8, %v8680_v6 }
 0x280   : > { %7595 = vmatpush1.bf16.xpose.msk.msra.mxu0 %vm7594_vm3, %v8163_v28  ;;  %7597 = vmatprep.mubr.msk.bf16.mxu0 %vm7596_vm12, %v8163_v28  ;;  %vm7600_vm3 = vmpackc.low %vm1036_vm7, %vm1034_vm6  ;;  %vm1067_vm6 = vcmp.eq.s32.totalorder %v8874_v8, %v8701_v15 }
 0x281   : > { %vm7662_vm12 = vmpackc.low %vm1063_vm2, %vm1061_vm9  ;;  %vm1072_vm9 = vcmp.eq.s32.totalorder %v8877_v9, %v8760_v30 }
 0x282   : > { %7563 = vmatmul.mubr.msk.bf16.gmra.mrb[92].mxu1 %vm7562_vm15, %v8163_v28  ;;  %vm1035_vm15 = vcmp.eq.s32.totalorder %v8864_v2, %v8701_v15  ;;  %vm7666_vm2 = vmpackc.low %vm1067_vm6, %vm1065_vm5  ;;  %vm1076_vm5 = vcmp.eq.s32.totalorder %v8877_v9, %v8791_v40 }
 0x283   : > { %7659 = vmatpush1.bf16.xpose.msk.msra.mxu1 %vm7658_vm0, %v8163_v28  ;;  %7661 = vmatprep.mubr.msk.bf16.mxu1 %vm7660_vm1, %v8163_v28  ;;  %vm1038_vm0 = vcmp.eq.s32.totalorder %v8867_v4, %v8757_v29  ;;  %vm1040_vm1 = vcmp.eq.s32.totalorder %v8867_v4, %v8760_v30  ;;  %vm7602_vm4 = vmpackc.low %vm1035_vm15, %vm1033_vm14  ;;  %vm1069_vm15 = vcmp.eq.s32.totalorder %v8874_v8, %v8757_v29 }
 0x284   : > { %vm7604_vm7 = vmpackc.low %vm1040_vm1, %vm1038_vm0  ;;  %vm1071_vm0 = vcmp.eq.s32.totalorder %v8874_v8, %v8760_v30 }
 0x285   : > { %vm7606_vm14 = vmpackc.low %vm1039_vm11, %vm1037_vm10  ;;  %vm1073_vm11 = vcmp.eq.s32.totalorder %v8874_v8, %v8788_v38 }
 0x286   : > { %vm7670_vm6 = vmpackc.low %vm1071_vm0, %vm1069_vm15  ;;  %vm1080_vm15 = vcmp.eq.s32.totalorder %v8877_v9, %v8813_v48 }
 0x287   : > { %7599 = vmatmul.mubr.msk.bf16.vlgmr.msra.gmra.mrb[96].mxu0 %vm7598_vm8, %v8163_v28  ;;  %vm1070_vm8 = vcmp.eq.s32.totalorder %v8877_v9, %v8757_v29 }
 0x288   : > { %7601 = vmatprep.mubr.msk.bf16.mxu0 %vm7600_vm3, %v8163_v28  ;;  %vm7668_vm3 = vmpackc.low %vm1072_vm9, %vm1070_vm8  ;;  %vm1041_vm8 = vcmp.eq.s32.totalorder %v8864_v2, %v8788_v38  ;;  %vm1043_vm9 = vcmp.eq.s32.totalorder %v8864_v2, %v8791_v40 }
 0x289   : > { %vm7610_vm10 = vmpackc.low %vm1043_vm9, %vm1041_vm8  ;;  %vm1077_vm9 = vcmp.eq.s32.totalorder %v8874_v8, %v8810_v47 }
 0x28a   : > { %7663 = vmatmul.mubr.msk.bf16.vlgmr.msra.gmra.mrb[96].mxu1 %vm7662_vm12, %v8163_v28  ;;  %vm1042_vm12 = vcmp.eq.s32.totalorder %v8867_v4, %v8788_v38 }
 0x28b   : > { %7665 = vmatprep.mubr.msk.bf16.mxu1 %vm7664_vm13, %v8163_v28  ;;  %vm1044_vm13 = vcmp.eq.s32.totalorder %v8867_v4, %v8791_v40 }
 0x28c   : > { %vm7608_vm1 = vmpackc.low %vm1044_vm13, %vm1042_vm12  ;;  %vm1075_vm12 = vcmp.eq.s32.totalorder %v8874_v8, %v8791_v40  ;;  %v2745_v40 = vld [vmem:[#allocation2 + $0x10] sm:$0xff] }
 0x28d   : > { %vm7674_vm0 = vmpackc.low %vm1075_vm12, %vm1073_vm11  ;;  %vm1084_vm11 = vcmp.eq.s32.totalorder %v8877_v9, %v8901_v24 }
 0x28f   : > { %7603 = vmatmul.mubr.msk.bf16.gmra.mrb[100].mxu0 %vm7602_vm4, %v8163_v28  ;;  %vm1074_vm4 = vcmp.eq.s32.totalorder %v8877_v9, %v8788_v38 }
 0x290   : > { %7605 = vmatprep.mubr.msk.bf16.mxu0 %vm7604_vm7, %v8163_v28  ;;  %vm7672_vm7 = vmpackc.low %vm1076_vm5, %vm1074_vm4  ;;  %vm1045_vm4 = vcmp.eq.s32.totalorder %v8864_v2, %v8810_v47  ;;  %vm1047_vm5 = vcmp.eq.s32.totalorder %v8864_v2, %v8813_v48 }
 0x291   : > { %vm7614_vm8 = vmpackc.low %vm1047_vm5, %vm1045_vm4  ;;  %vm1081_vm5 = vcmp.eq.s32.totalorder %v8874_v8, %v8898_v13 }
 0x292   : > { %7667 = vmatmul.mubr.msk.bf16.gmra.mrb[100].mxu1 %vm7666_vm2, %v8163_v28  ;;  %vm1046_vm2 = vcmp.eq.s32.totalorder %v8867_v4, %v8810_v47 }
 0x293   : > { %7669 = vmatprep.mubr.msk.bf16.mxu1 %vm7668_vm3, %v8163_v28  ;;  %vm1048_vm3 = vcmp.eq.s32.totalorder %v8867_v4, %v8813_v48 }
 0x294   : > { %vm7612_vm13 = vmpackc.low %vm1048_vm3, %vm1046_vm2  ;;  %vm1079_vm2 = vcmp.eq.s32.totalorder %v8874_v8, %v8813_v48  ;;  %v2747_v48 = vld [vmem:[#allocation2 + $0x20] sm:$0xff] }
 0x295   : > { %vm7678_vm12 = vmpackc.low %vm1079_vm2, %vm1077_vm9  ;;  %vm1088_vm9 = vcmp.eq.s32.totalorder %v8877_v9, %v8944_v33 }
 0x297   : > { %7607 = vmatmul.mubr.msk.bf16.gmra.mrb[104].mxu0 %vm7606_vm14, %v8163_v28  ;;  %vm1078_vm14 = vcmp.eq.s32.totalorder %v8877_v9, %v8810_v47 }
 0x298   : > { %7609 = vmatprep.mubr.msk.bf16.mxu0 %vm7608_vm1, %v8163_v28  ;;  %vm7676_vm1 = vmpackc.low %vm1080_vm15, %vm1078_vm14  ;;  %vm1049_vm14 = vcmp.eq.s32.totalorder %v8864_v2, %v8898_v13  ;;  %vm1051_vm15 = vcmp.eq.s32.totalorder %v8864_v2, %v8901_v24 }
 0x299   : > { %vm7618_vm4 = vmpackc.low %vm1051_vm15, %vm1049_vm14  ;;  %vm1085_vm15 = vcmp.eq.s32.totalorder %v8874_v8, %v8941_v32 }
 0x29a   : > { %7671 = vmatmul.mubr.msk.bf16.gmra.mrb[104].mxu1 %vm7670_vm6, %v8163_v28  ;;  %v2905_v6 = vpop.f32.mrb[0].mxu0  ;;  %vm1050_vm6 = vcmp.eq.s32.totalorder %v8867_v4, %v8898_v13 }
 0x29b   : > { %v3647_v12 = vadd.f32 %v2905_v6, %v2743_v5  ;;  %7673 = vmatprep.mubr.msk.bf16.mxu1 %vm7672_vm7, %v8163_v28  ;;  %v2907_v15 = vpop.f32.mrb[1].mxu0  ;;  %vm1052_vm7 = vcmp.eq.s32.totalorder %v8867_v4, %v8901_v24 }
 0x29c   : > { %v2908_v21 = vpop.f32.mrb[2].mxu0  ;;  %vm7616_vm3 = vmpackc.low %vm1052_vm7, %vm1050_vm6  ;;  %vm1083_vm6 = vcmp.eq.s32.totalorder %v8874_v8, %v8901_v24  ;;  %v2749_v24 = vld [vmem:[#allocation2 + $0x30] sm:$0xff] }
 0x29d   : > { %3775 = vst [vmem:[#allocation2] sm:$0xff] %v3647_v12  ;;  %v3648_v22 = vadd.f32 %v2908_v21, %v2744_v11  ;;  %v3002_v23 = vpop.f32.mrb[0].mxu1  ;;  %v2910_v26 = vpop.f32.mrb[3].mxu0  ;;  %vm7682_vm2 = vmpackc.low %vm1083_vm6, %vm1081_vm5  ;;  %v2750_v11 = vld [vmem:[#allocation2 + $0x38] sm:$0xff]  ;;  %vm1092_vm5 = vcmp.eq.s32.totalorder %v8877_v9, %v8972_v36 }
 0x29e   : > { %v3663_v29 = vadd.f32 %v3002_v23, %v2759_v19  ;;  %v3004_v30 = vpop.f32.mrb[1].mxu1  ;;  %v2765_v19 = vld [vmem:[#allocation2 + $0xb0] sm:$0xff] }
 0x29f   : > { %3776 = vst [vmem:[#allocation2 + $0x8] sm:$0xff] %v3648_v22  ;;  %v3005_v42 = vpop.f32.mrb[2].mxu1  ;;  %7611 = vmatmul.mubr.msk.bf16.gmra.mrb[108].mxu0 %vm7610_vm10, %v8163_v28  ;;  %vm1082_vm10 = vcmp.eq.s32.totalorder %v8877_v9, %v8898_v13 }
 0x2a0   : > { %3791 = vst [vmem:[#allocation2 + $0x80] sm:$0xff] %v3663_v29  ;;  %v3664_v43 = vadd.f32 %v3005_v42, %v2760_v27  ;;  %v3007_v38 = vpop.f32.mrb[3].mxu1  ;;  %7613 = vmatprep.mubr.msk.bf16.mxu0 %vm7612_vm13, %v8163_v28  ;;  %vm7680_vm13 = vmpackc.low %vm1084_vm11, %vm1082_vm10  ;;  %vm1053_vm10 = vcmp.eq.s32.totalorder %v8864_v2, %v8941_v32  ;;  %vm1055_vm11 = vcmp.eq.s32.totalorder %v8864_v2, %v8944_v33  ;;  %v2766_v27 = vld [vmem:[#allocation2 + $0xb8] sm:$0xff] }
 0x2a1   : > { %vm7622_vm14 = vmpackc.low %vm1055_vm11, %vm1053_vm10  ;;  %vm1091_vm10 = vcmp.eq.s32.totalorder %v8874_v8, %v8972_v36 }
 0x2a2   : > { %3792 = vst [vmem:[#allocation2 + $0x88] sm:$0xff] %v3664_v43  ;;  %7675 = vmatmul.mubr.msk.bf16.gmra.mrb[108].mxu1 %vm7674_vm0, %v8163_v28  ;;  %v2913_v44 = vpop.f32.mrb[4].mxu0  ;;  %vm1054_vm0 = vcmp.eq.s32.totalorder %v8867_v4, %v8941_v32 }
 0x2a3   : > { %v3649_v46 = vadd.f32 %v2913_v44, %v2745_v40  ;;  %7677 = vmatprep.mubr.msk.bf16.mxu1 %vm7676_vm1, %v8163_v28  ;;  %v2915_v49 = vpop.f32.mrb[5].mxu0  ;;  %vm1056_vm1 = vcmp.eq.s32.totalorder %v8867_v4, %v8944_v33 }
 0x2a4   : > { %v2916_v51 = vpop.f32.mrb[6].mxu0  ;;  %vm7620_vm7 = vmpackc.low %vm1056_vm1, %vm1054_vm0  ;;  %vm1087_vm0 = vcmp.eq.s32.totalorder %v8874_v8, %v8944_v33  ;;  %v2751_v33 = vld [vmem:[#allocation2 + $0x40] sm:$0xff] }
 0x2a5   : > { %3777 = vst [vmem:[#allocation2 + $0x10] sm:$0xff] %v3649_v46  ;;  %v3650_v52 = vadd.f32 %v2916_v51, %v2746_v45  ;;  %v3010_v54 = vpop.f32.mrb[4].mxu1  ;;  %v2918_v55 = vpop.f32.mrb[7].mxu0  ;;  %vm7686_vm6 = vmpackc.low %vm1087_vm0, %vm1085_vm15  ;;  %v2767_v45 = vld [vmem:[#allocation2 + $0xc0] sm:$0xff]  ;;  %v2768_v51 = vld [vmem:[#allocation2 + $0xc8] sm:$0xff] }
 0x2a6   : > { %v3665_v56 = vadd.f32 %v3010_v54, %v2761_v50  ;;  %v3012_v57 = vpop.f32.mrb[5].mxu1 }
 0x2a7   : > { %3778 = vst [vmem:[#allocation2 + $0x18] sm:$0xff] %v3650_v52  ;;  %v3013_v58 = vpop.f32.mrb[6].mxu1  ;;  %7615 = vmatmul.mubr.msk.bf16.gmra.mrb[112].mxu0 %vm7614_vm8, %v8163_v28  ;;  %vm1086_vm8 = vcmp.eq.s32.totalorder %v8877_v9, %v8941_v32 }
 0x2a8   : > { %3793 = vst [vmem:[#allocation2 + $0x90] sm:$0xff] %v3665_v56  ;;  %v3666_v59 = vadd.f32 %v3013_v58, %v2762_v53  ;;  %v3015_v47 = vpop.f32.mrb[7].mxu1  ;;  %7617 = vmatprep.mubr.msk.bf16.mxu0 %vm7616_vm3, %v8163_v28  ;;  %vm7684_vm3 = vmpackc.low %vm1088_vm9, %vm1086_vm8  ;;  %vm1057_vm8 = vcmp.eq.s32.totalorder %v8864_v2, %v8969_v34  ;;  %vm1059_vm9 = vcmp.eq.s32.totalorder %v8864_v2, %v8972_v36  ;;  %v2753_v56 = vld [vmem:[#allocation2 + $0x50] sm:$0xff]  ;;  %v2754_v58 = vld [vmem:[#allocation2 + $0x58] sm:$0xff] }
 0x2aa   : > { %3794 = vst [vmem:[#allocation2 + $0x98] sm:$0xff] %v3666_v59  ;;  %7679 = vmatmul.mubr.msk.bf16.gmra.mrb[112].mxu1 %vm7678_vm12, %v8163_v28  ;;  %v2921_v62 = vpop.f32.mrb[8].mxu0  ;;  %vm1058_vm12 = vcmp.eq.s32.totalorder %v8867_v4, %v8969_v34 }
 0x2ab   : > { %v3651_v0 = vadd.f32 %v2921_v62, %v2747_v48  ;;  %7681 = vmatprep.mubr.msk.bf16.mxu1 %vm7680_vm13, %v8163_v28  ;;  %v2923_v25 = vpop.f32.mrb[9].mxu0  ;;  %vm1060_vm13 = vcmp.eq.s32.totalorder %v8867_v4, %v8972_v36  ;;  %v2752_v4 = vld [vmem:[#allocation2 + $0x48] sm:$0xff] }
 0x2ac   : > { %v2924_v37 = vpop.f32.mrb[10].mxu0  ;;  %vm7624_vm1 = vmpackc.low %vm1060_vm13, %vm1058_vm12 }
 0x2ad   : > { %3779 = vst [vmem:[#allocation2 + $0x20] sm:$0xff] %v3651_v0  ;;  %v3652_v41 = vadd.f32 %v2924_v37, %v2748_v63  ;;  %v3018_v3 = vpop.f32.mrb[8].mxu1  ;;  %v2926_v7 = vpop.f32.mrb[11].mxu0  ;;  %v2770_v63 = vld [vmem:[#allocation2 + $0xd8] sm:$0xff] }
 0x2ae   : > { %v3667_v18 = vadd.f32 %v3018_v3, %v2763_v31  ;;  %v3020_v14 = vpop.f32.mrb[9].mxu1  ;;  %v2755_v3 = vld [vmem:[#allocation2 + $0x60] sm:$0xff]  ;;  %v2756_v7 = vld [vmem:[#allocation2 + $0x68] sm:$0xff] }
 0x2af   : > { %3780 = vst [vmem:[#allocation2 + $0x28] sm:$0xff] %v3652_v41  ;;  %v3021_v16 = vpop.f32.mrb[10].mxu1  ;;  %7619 = vmatmul.mubr.msk.bf16.gmra.mrb[116].mxu0 %vm7618_vm4, %v8163_v28  ;;  %vm1090_vm4 = vcmp.eq.s32.totalorder %v8877_v9, %v8969_v34  ;;  %v2771_v14 = vld [vmem:[#allocation2 + $0xe0] sm:$0xff] }
 0x2b0   : > { %3795 = vst [vmem:[#allocation2 + $0xa0] sm:$0xff] %v3667_v18  ;;  %v3668_v5 = vadd.f32 %v3021_v16, %v2764_v10  ;;  %v3023_v13 = vpop.f32.mrb[11].mxu1  ;;  %7621 = vmatprep.mubr.msk.bf16.mxu0 %vm7620_vm7, %v8163_v28  ;;  %vm7688_vm7 = vmpackc.low %vm1092_vm5, %vm1090_vm4 }
 0x2b2   : > { %3796 = vst [vmem:[#allocation2 + $0xa8] sm:$0xff] %v3668_v5  ;;  %7683 = vmatmul.mubr.msk.bf16.gmra.mrb[116].mxu1 %vm7682_vm2, %v8163_v28  ;;  %v2929_v6 = vpop.f32.mrb[12].mxu0  ;;  %vm7626_vm2 = vmpackc.low %vm1059_vm9, %vm1057_vm8 }
 0x2b3   : > { %v3653_v12 = vadd.f32 %v2929_v6, %v2749_v24  ;;  %7685 = vmatprep.mubr.msk.bf16.mxu1 %vm7684_vm3, %v8163_v28  ;;  %v2931_v15 = vpop.f32.mrb[13].mxu0  ;;  %vm1089_vm3 = vcmp.eq.s32.totalorder %v8874_v8, %v8969_v34  ;;  %v2769_v34 = vld [vmem:[#allocation2 + $0xd0] sm:$0xff]  ;;  %v2772_v6 = vld [vmem:[#allocation2 + $0xe8] sm:$0xff] }
 0x2b4   : > { %v2932_v21 = vpop.f32.mrb[14].mxu0  ;;  %vm7690_vm11 = vmpackc.low %vm1091_vm10, %vm1089_vm3 }
 0x2b5   : > { %3781 = vst [vmem:[#allocation2 + $0x30] sm:$0xff] %v3653_v12  ;;  %v3654_v22 = vadd.f32 %v2932_v21, %v2750_v11  ;;  %v3026_v23 = vpop.f32.mrb[12].mxu1  ;;  %v2934_v26 = vpop.f32.mrb[15].mxu0 }
 0x2b6   : > { %v3669_v29 = vadd.f32 %v3026_v23, %v2765_v19  ;;  %v3028_v30 = vpop.f32.mrb[13].mxu1  ;;  %v2758_v26 = vld [vmem:[#allocation2 + $0x78] sm:$0xff] }
 0x2b7   : > { %3782 = vst [vmem:[#allocation2 + $0x38] sm:$0xff] %v3654_v22  ;;  %v3029_v42 = vpop.f32.mrb[14].mxu1  ;;  %7623 = vmatmul.mubr.msk.bf16.gmra.mrb[120].mxu0 %vm7622_vm14, %v8163_v28  ;;  %v2757_v22 = vld [vmem:[#allocation2 + $0x70] sm:$0xff] }
 0x2b8   : > { %3797 = vst [vmem:[#allocation2 + $0xb0] sm:$0xff] %v3669_v29  ;;  %v3670_v43 = vadd.f32 %v3029_v42, %v2766_v27  ;;  %v3031_v32 = vpop.f32.mrb[15].mxu1  ;;  %7625 = vmatprep.mubr.msk.bf16.mxu0 %vm7624_vm1, %v8163_v28  ;;  %v2773_v30 = vld [vmem:[#allocation2 + $0xf0] sm:$0xff] }
 0x2ba   : > { %3798 = vst [vmem:[#allocation2 + $0xb8] sm:$0xff] %v3670_v43  ;;  %7687 = vmatmul.mubr.msk.bf16.gmra.mrb[120].mxu1 %vm7686_vm6, %v8163_v28  ;;  %v2937_v38 = vpop.f32.mrb[16].mxu0 }
 0x2bb   : > { %v3655_v40 = vadd.f32 %v2937_v38, %v2751_v33  ;;  %7689 = vmatprep.mubr.msk.bf16.mxu1 %vm7688_vm7, %v8163_v28  ;;  %v2939_v44 = vpop.f32.mrb[17].mxu0  ;;  %v2774_v38 = vld [vmem:[#allocation2 + $0xf8] sm:$0xff] }
 0x2bc   : > { %v2940_v9 = vpop.f32.mrb[18].mxu0 }
 0x2bd   : > { %3783 = vst [vmem:[#allocation2 + $0x40] sm:$0xff] %v3655_v40  ;;  %v3656_v46 = vadd.f32 %v2940_v9, %v2752_v4  ;;  %v3034_v49 = vpop.f32.mrb[16].mxu1  ;;  %v2942_v50 = vpop.f32.mrb[19].mxu0 }
 0x2be   : > { %v3671_v52 = vadd.f32 %v3034_v49, %v2767_v45  ;;  %v3036_v54 = vpop.f32.mrb[17].mxu1  ;;  %v2776_v50 = vld [vmem:[#allocation2 + $0x108] sm:$0xff] }
 0x2bf   : > { %3784 = vst [vmem:[#allocation2 + $0x48] sm:$0xff] %v3656_v46  ;;  %v3037_v55 = vpop.f32.mrb[18].mxu1  ;;  %7627 = vmatmul.mubr.msk.bf16.gmra.mrb[124].mxu0 %vm7626_vm2, %v8163_v28  ;;  %v2775_v46 = vld [vmem:[#allocation2 + $0x100] sm:$0xff] }
 0x2c0   : > { %3799 = vst [vmem:[#allocation2 + $0xc0] sm:$0xff] %v3671_v52  ;;  %v3672_v2 = vadd.f32 %v3037_v55, %v2768_v51  ;;  %v3039_v53 = vpop.f32.mrb[19].mxu1  ;;  %v2791_v54 = vld [vmem:[#allocation2 + $0x180] sm:$0xff] }
 0x2c2   : > { %3800 = vst [vmem:[#allocation2 + $0xc8] sm:$0xff] %v3672_v2  ;;  %7691 = vmatmul.mubr.msk.bf16.gmra.mrb[124].mxu1 %vm7690_vm11, %v8163_v28  ;;  %v2945_v57 = vpop.f32.mrb[20].mxu0 }
 0x2c3   : > { %v3657_v59 = vadd.f32 %v2945_v57, %v2753_v56  ;;  %v2947_v47 = vpop.f32.mrb[21].mxu0  ;;  %v2792_v57 = vld [vmem:[#allocation2 + $0x188] sm:$0xff] }
 0x2c4   : > { %v2948_v48 = vpop.f32.mrb[22].mxu0 }
 0x2c5   : > { %3785 = vst [vmem:[#allocation2 + $0x50] sm:$0xff] %v3657_v59  ;;  %v3658_v8 = vadd.f32 %v2948_v48, %v2754_v58  ;;  %v3042_v36 = vpop.f32.mrb[20].mxu1  ;;  %v2950_v62 = vpop.f32.mrb[23].mxu0 }
 0x2c6   : > { %v3673_v0 = vadd.f32 %v3042_v36, %v2769_v34  ;;  %v3044_v25 = vpop.f32.mrb[21].mxu1  ;;  %v2778_v62 = vld [vmem:[#allocation2 + $0x118] sm:$0xff] }
 0x2c7   : > { %3786 = vst [vmem:[#allocation2 + $0x58] sm:$0xff] %v3658_v8  ;;  %v3045_v31 = vpop.f32.mrb[22].mxu1  ;;  %v2777_v8 = vld [vmem:[#allocation2 + $0x110] sm:$0xff] }
 0x2c8   : > { %3801 = vst [vmem:[#allocation2 + $0xd0] sm:$0xff] %v3673_v0  ;;  %v3674_v37 = vadd.f32 %v3045_v31, %v2770_v63  ;;  %v3047_v41 = vpop.f32.mrb[23].mxu1  ;;  %v2793_v25 = vld [vmem:[#allocation2 + $0x190] sm:$0xff] }
 0x2ca   : > { %3802 = vst [vmem:[#allocation2 + $0xd8] sm:$0xff] %v3674_v37  ;;  %v2953_v28 = vpop.f32.mrb[24].mxu0 }
 0x2cb   : > { %v3659_v10 = vadd.f32 %v2953_v28, %v2755_v3  ;;  %v2955_v18 = vpop.f32.mrb[25].mxu0  ;;  %v2794_v28 = vld [vmem:[#allocation2 + $0x198] sm:$0xff] }
 0x2cc   : > { %v2956_v16 = vpop.f32.mrb[26].mxu0 }
 0x2cd   : > { %3787 = vst [vmem:[#allocation2 + $0x60] sm:$0xff] %v3659_v10  ;;  %v3660_v5 = vadd.f32 %v2956_v16, %v2756_v7  ;;  %v3050_v13 = vpop.f32.mrb[24].mxu1  ;;  %v2958_v24 = vpop.f32.mrb[27].mxu0 }
 0x2ce   : > { %v3675_v11 = vadd.f32 %v3050_v13, %v2771_v14  ;;  %v3052_v12 = vpop.f32.mrb[25].mxu1  ;;  %v2780_v24 = vld [vmem:[#allocation2 + $0x128] sm:$0xff] }
 0x2cf   : > { %3788 = vst [vmem:[#allocation2 + $0x68] sm:$0xff] %v3660_v5  ;;  %v3053_v15 = vpop.f32.mrb[26].mxu1  ;;  %v2779_v5 = vld [vmem:[#allocation2 + $0x120] sm:$0xff] }
 0x2d0   : > { %3803 = vst [vmem:[#allocation2 + $0xe0] sm:$0xff] %v3675_v11  ;;  %v3676_v19 = vadd.f32 %v3053_v15, %v2772_v6  ;;  %v3055_v21 = vpop.f32.mrb[27].mxu1  ;;  %v2795_v12 = vld [vmem:[#allocation2 + $0x1a0] sm:$0xff] }
 0x2d2   : > { %3804 = vst [vmem:[#allocation2 + $0xe8] sm:$0xff] %v3676_v19  ;;  %v2961_v23 = vpop.f32.mrb[28].mxu0 }
 0x2d3   : > { %v3661_v27 = vadd.f32 %v2961_v23, %v2757_v22  ;;  %v2963_v29 = vpop.f32.mrb[29].mxu0  ;;  %v2796_v23 = vld [vmem:[#allocation2 + $0x1a8] sm:$0xff] }
 0x2d4   : > { %v2964_v42 = vpop.f32.mrb[30].mxu0 }
 0x2d5   : > { %3789 = vst [vmem:[#allocation2 + $0x70] sm:$0xff] %v3661_v27  ;;  %v3662_v43 = vadd.f32 %v2964_v42, %v2758_v26  ;;  %v3058_v32 = vpop.f32.mrb[28].mxu1  ;;  %v2966_v33 = vpop.f32.mrb[31].mxu0 }
 0x2d6   : > { %v3677_v4 = vadd.f32 %v3058_v32, %v2773_v30  ;;  %v3060_v40 = vpop.f32.mrb[29].mxu1  ;;  %v2782_v33 = vld [vmem:[#allocation2 + $0x138] sm:$0xff] }
 0x2d7   : > { %3790 = vst [vmem:[#allocation2 + $0x78] sm:$0xff] %v3662_v43  ;;  %v3061_v44 = vpop.f32.mrb[30].mxu1  ;;  %v2781_v43 = vld [vmem:[#allocation2 + $0x130] sm:$0xff] }
 0x2d8   : > { %3805 = vst [vmem:[#allocation2 + $0xf0] sm:$0xff] %v3677_v4  ;;  %v3678_v45 = vadd.f32 %v3061_v44, %v2774_v38  ;;  %v3063_v9 = vpop.f32.mrb[31].mxu1  ;;  %v2797_v40 = vld [vmem:[#allocation2 + $0x1b0] sm:$0xff] }
 0x2da   : > { %3806 = vst [vmem:[#allocation2 + $0xf8] sm:$0xff] %v3678_v45  ;;  %v3099_v49 = vpop.f32.mrb[32].mxu0 }
 0x2db   : > { %v3679_v51 = vadd.f32 %v3099_v49, %v2775_v46  ;;  %v3101_v52 = vpop.f32.mrb[33].mxu0  ;;  %v2798_v49 = vld [vmem:[#allocation2 + $0x1b8] sm:$0xff] }
 0x2dc   : > { %v3102_v55 = vpop.f32.mrb[34].mxu0 }
 0x2dd   : > { %3807 = vst [vmem:[#allocation2 + $0x100] sm:$0xff] %v3679_v51  ;;  %v3680_v2 = vadd.f32 %v3102_v55, %v2776_v50  ;;  %v3196_v53 = vpop.f32.mrb[32].mxu1  ;;  %v3104_v56 = vpop.f32.mrb[35].mxu0 }
 0x2de   : > { %v3695_v58 = vadd.f32 %v3196_v53, %v2791_v54  ;;  %v3198_v59 = vpop.f32.mrb[33].mxu1  ;;  %v2784_v56 = vld [vmem:[#allocation2 + $0x148] sm:$0xff] }
 0x2df   : > { %3808 = vst [vmem:[#allocation2 + $0x108] sm:$0xff] %v3680_v2  ;;  %v3199_v47 = vpop.f32.mrb[34].mxu1  ;;  %v2783_v2 = vld [vmem:[#allocation2 + $0x140] sm:$0xff] }
 0x2e0   : > { %3823 = vst [vmem:[#allocation2 + $0x180] sm:$0xff] %v3695_v58  ;;  %v3696_v34 = vadd.f32 %v3199_v47, %v2792_v57  ;;  %v3201_v48 = vpop.f32.mrb[35].mxu1  ;;  %v2799_v59 = vld [vmem:[#allocation2 + $0x1c0] sm:$0xff] }
 0x2e2   : > { %3824 = vst [vmem:[#allocation2 + $0x188] sm:$0xff] %v3696_v34  ;;  %v3107_v36 = vpop.f32.mrb[36].mxu0 }
 0x2e3   : > { %v3681_v63 = vadd.f32 %v3107_v36, %v2777_v8  ;;  %v3109_v0 = vpop.f32.mrb[37].mxu0  ;;  %v2800_v36 = vld [vmem:[#allocation2 + $0x1c8] sm:$0xff] }
 0x2e4   : > { %v3110_v31 = vpop.f32.mrb[38].mxu0 }
 0x2e5   : > { %3809 = vst [vmem:[#allocation2 + $0x110] sm:$0xff] %v3681_v63  ;;  %v3682_v37 = vadd.f32 %v3110_v31, %v2778_v62  ;;  %v3204_v41 = vpop.f32.mrb[36].mxu1  ;;  %v3112_v3 = vpop.f32.mrb[39].mxu0 }
 0x2e6   : > { %v3697_v7 = vadd.f32 %v3204_v41, %v2793_v25  ;;  %v3206_v10 = vpop.f32.mrb[37].mxu1  ;;  %v2786_v3 = vld [vmem:[#allocation2 + $0x158] sm:$0xff] }
 0x2e7   : > { %3810 = vst [vmem:[#allocation2 + $0x118] sm:$0xff] %v3682_v37  ;;  %v3207_v18 = vpop.f32.mrb[38].mxu1  ;;  %v2785_v37 = vld [vmem:[#allocation2 + $0x150] sm:$0xff] }
 0x2e8   : > { %3825 = vst [vmem:[#allocation2 + $0x190] sm:$0xff] %v3697_v7  ;;  %v3698_v14 = vadd.f32 %v3207_v18, %v2794_v28  ;;  %v3209_v16 = vpop.f32.mrb[39].mxu1  ;;  %v2801_v10 = vld [vmem:[#allocation2 + $0x1d0] sm:$0xff] }
 0x2ea   : > { %3826 = vst [vmem:[#allocation2 + $0x198] sm:$0xff] %v3698_v14  ;;  %v3115_v13 = vpop.f32.mrb[40].mxu0 }
 0x2eb   : > { %v3683_v6 = vadd.f32 %v3115_v13, %v2779_v5  ;;  %v3117_v11 = vpop.f32.mrb[41].mxu0  ;;  %v2802_v13 = vld [vmem:[#allocation2 + $0x1d8] sm:$0xff] }
 0x2ec   : > { %v3118_v15 = vpop.f32.mrb[42].mxu0 }
 0x2ed   : > { %3811 = vst [vmem:[#allocation2 + $0x120] sm:$0xff] %v3683_v6  ;;  %v3684_v19 = vadd.f32 %v3118_v15, %v2780_v24  ;;  %v3212_v21 = vpop.f32.mrb[40].mxu1  ;;  %v3120_v22 = vpop.f32.mrb[43].mxu0 }
 0x2ee   : > { %v3699_v26 = vadd.f32 %v3212_v21, %v2795_v12  ;;  %v3214_v27 = vpop.f32.mrb[41].mxu1  ;;  %v2788_v22 = vld [vmem:[#allocation2 + $0x168] sm:$0xff] }
 0x2ef   : > { %3812 = vst [vmem:[#allocation2 + $0x128] sm:$0xff] %v3684_v19  ;;  %v3215_v29 = vpop.f32.mrb[42].mxu1  ;;  %v2787_v19 = vld [vmem:[#allocation2 + $0x160] sm:$0xff] }
 0x2f0   : > { %3827 = vst [vmem:[#allocation2 + $0x1a0] sm:$0xff] %v3699_v26  ;;  %v3700_v30 = vadd.f32 %v3215_v29, %v2796_v23  ;;  %v3217_v42 = vpop.f32.mrb[43].mxu1  ;;  %v2803_v27 = vld [vmem:[#allocation2 + $0x1e0] sm:$0xff] }
 0x2f2   : > { %3828 = vst [vmem:[#allocation2 + $0x1a8] sm:$0xff] %v3700_v30  ;;  %v3123_v32 = vpop.f32.mrb[44].mxu0 }
 0x2f3   : > { %v3685_v38 = vadd.f32 %v3123_v32, %v2781_v43  ;;  %v3125_v4 = vpop.f32.mrb[45].mxu0  ;;  %v2804_v32 = vld [vmem:[#allocation2 + $0x1e8] sm:$0xff] }
 0x2f4   : > { %v3126_v44 = vpop.f32.mrb[46].mxu0 }
 0x2f5   : > { %3813 = vst [vmem:[#allocation2 + $0x130] sm:$0xff] %v3685_v38  ;;  %v3686_v45 = vadd.f32 %v3126_v44, %v2782_v33  ;;  %v3220_v9 = vpop.f32.mrb[44].mxu1  ;;  %v3128_v46 = vpop.f32.mrb[47].mxu0 }
 0x2f6   : > { %v3701_v50 = vadd.f32 %v3220_v9, %v2797_v40  ;;  %v3222_v51 = vpop.f32.mrb[45].mxu1  ;;  %v2790_v46 = vld [vmem:[#allocation2 + $0x178] sm:$0xff] }
 0x2f7   : > { %3814 = vst [vmem:[#allocation2 + $0x138] sm:$0xff] %v3686_v45  ;;  %v3223_v52 = vpop.f32.mrb[46].mxu1  ;;  %v2789_v45 = vld [vmem:[#allocation2 + $0x170] sm:$0xff] }
 0x2f8   : > { %3829 = vst [vmem:[#allocation2 + $0x1b0] sm:$0xff] %v3701_v50  ;;  %v3702_v54 = vadd.f32 %v3223_v52, %v2798_v49  ;;  %v3225_v55 = vpop.f32.mrb[47].mxu1  ;;  %v2805_v51 = vld [vmem:[#allocation2 + $0x1f0] sm:$0xff] }
 0x2fa   : > { %3830 = vst [vmem:[#allocation2 + $0x1b8] sm:$0xff] %v3702_v54  ;;  %v3131_v53 = vpop.f32.mrb[48].mxu0 }
 0x2fb   : > { %v3687_v57 = vadd.f32 %v3131_v53, %v2783_v2  ;;  %v3133_v58 = vpop.f32.mrb[49].mxu0  ;;  %v2806_v53 = vld [vmem:[#allocation2 + $0x1f8] sm:$0xff] }
 0x2fc   : > { %v3134_v47 = vpop.f32.mrb[50].mxu0 }
 0x2fd   : > { %3815 = vst [vmem:[#allocation2 + $0x140] sm:$0xff] %v3687_v57  ;;  %v3688_v34 = vadd.f32 %v3134_v47, %v2784_v56  ;;  %v3228_v48 = vpop.f32.mrb[48].mxu1  ;;  %v3136_v8 = vpop.f32.mrb[51].mxu0 }
 0x2fe   : > { %v3703_v62 = vadd.f32 %v3228_v48, %v2799_v59  ;;  %v3230_v63 = vpop.f32.mrb[49].mxu1  ;;  %v2808_v8 = vld [vmem:[#allocation2 + $0x208] sm:$0xff] }
 0x2ff   : > { %3816 = vst [vmem:[#allocation2 + $0x148] sm:$0xff] %v3688_v34  ;;  %v3231_v0 = vpop.f32.mrb[50].mxu1  ;;  %v2807_v34 = vld [vmem:[#allocation2 + $0x200] sm:$0xff] }
 0x300   : > { %3831 = vst [vmem:[#allocation2 + $0x1c0] sm:$0xff] %v3703_v62  ;;  %v3704_v25 = vadd.f32 %v3231_v0, %v2800_v36  ;;  %v3233_v31 = vpop.f32.mrb[51].mxu1  ;;  %v2823_v63 = vld [vmem:[#allocation2 + $0x280] sm:$0xff] }
 0x302   : > { %3832 = vst [vmem:[#allocation2 + $0x1c8] sm:$0xff] %v3704_v25  ;;  %v3139_v41 = vpop.f32.mrb[52].mxu0 }
 0x303   : > { %v3689_v28 = vadd.f32 %v3139_v41, %v2785_v37  ;;  %v3141_v7 = vpop.f32.mrb[53].mxu0  ;;  %v2824_v41 = vld [vmem:[#allocation2 + $0x288] sm:$0xff] }
 0x304   : > { %v3142_v18 = vpop.f32.mrb[54].mxu0 }
 0x305   : > { %3817 = vst [vmem:[#allocation2 + $0x150] sm:$0xff] %v3689_v28  ;;  %v3690_v14 = vadd.f32 %v3142_v18, %v2786_v3  ;;  %v3236_v16 = vpop.f32.mrb[52].mxu1  ;;  %v3144_v5 = vpop.f32.mrb[55].mxu0 }
 0x306   : > { %v3705_v24 = vadd.f32 %v3236_v16, %v2801_v10  ;;  %v3238_v6 = vpop.f32.mrb[53].mxu1  ;;  %v2810_v5 = vld [vmem:[#allocation2 + $0x218] sm:$0xff] }
 0x307   : > { %3818 = vst [vmem:[#allocation2 + $0x158] sm:$0xff] %v3690_v14  ;;  %v3239_v11 = vpop.f32.mrb[54].mxu1  ;;  %v2809_v14 = vld [vmem:[#allocation2 + $0x210] sm:$0xff] }
 0x308   : > { %3833 = vst [vmem:[#allocation2 + $0x1d0] sm:$0xff] %v3705_v24  ;;  %v3706_v12 = vadd.f32 %v3239_v11, %v2802_v13  ;;  %v3241_v15 = vpop.f32.mrb[55].mxu1  ;;  %v2825_v6 = vld [vmem:[#allocation2 + $0x290] sm:$0xff] }
 0x30a   : > { %3834 = vst [vmem:[#allocation2 + $0x1d8] sm:$0xff] %v3706_v12  ;;  %v3147_v21 = vpop.f32.mrb[56].mxu0 }
 0x30b   : > { %v3691_v23 = vadd.f32 %v3147_v21, %v2787_v19  ;;  %v3149_v26 = vpop.f32.mrb[57].mxu0  ;;  %v2826_v21 = vld [vmem:[#allocation2 + $0x298] sm:$0xff] }
 0x30c   : > { %v3150_v29 = vpop.f32.mrb[58].mxu0 }
 0x30d   : > { %3819 = vst [vmem:[#allocation2 + $0x160] sm:$0xff] %v3691_v23  ;;  %v3692_v30 = vadd.f32 %v3150_v29, %v2788_v22  ;;  %v3244_v42 = vpop.f32.mrb[56].mxu1  ;;  %v3152_v43 = vpop.f32.mrb[59].mxu0 }
 0x30e   : > { %v3707_v33 = vadd.f32 %v3244_v42, %v2803_v27  ;;  %v3246_v38 = vpop.f32.mrb[57].mxu1  ;;  %v2812_v43 = vld [vmem:[#allocation2 + $0x228] sm:$0xff] }
 0x30f   : > { %3820 = vst [vmem:[#allocation2 + $0x168] sm:$0xff] %v3692_v30  ;;  %v3247_v4 = vpop.f32.mrb[58].mxu1  ;;  %v2811_v30 = vld [vmem:[#allocation2 + $0x220] sm:$0xff] }
 0x310   : > { %3835 = vst [vmem:[#allocation2 + $0x1e0] sm:$0xff] %v3707_v33  ;;  %v3708_v40 = vadd.f32 %v3247_v4, %v2804_v32  ;;  %v3249_v44 = vpop.f32.mrb[59].mxu1  ;;  %v2827_v38 = vld [vmem:[#allocation2 + $0x2a0] sm:$0xff] }
 0x312   : > { %3836 = vst [vmem:[#allocation2 + $0x1e8] sm:$0xff] %v3708_v40  ;;  %v3155_v9 = vpop.f32.mrb[60].mxu0 }
 0x313   : > { %v3693_v49 = vadd.f32 %v3155_v9, %v2789_v45  ;;  %v3157_v50 = vpop.f32.mrb[61].mxu0  ;;  %v2828_v9 = vld [vmem:[#allocation2 + $0x2a8] sm:$0xff] }
 0x314   : > { %v3158_v52 = vpop.f32.mrb[62].mxu0 }
 0x315   : > { %3821 = vst [vmem:[#allocation2 + $0x170] sm:$0xff] %v3693_v49  ;;  %v3694_v54 = vadd.f32 %v3158_v52, %v2790_v46  ;;  %v3252_v55 = vpop.f32.mrb[60].mxu1  ;;  %v3160_v2 = vpop.f32.mrb[63].mxu0 }
 0x316   : > { %v3709_v56 = vadd.f32 %v3252_v55, %v2805_v51  ;;  %v3254_v57 = vpop.f32.mrb[61].mxu1  ;;  %v2814_v2 = vld [vmem:[#allocation2 + $0x238] sm:$0xff] }
 0x317   : > { %3822 = vst [vmem:[#allocation2 + $0x178] sm:$0xff] %v3694_v54  ;;  %v3255_v58 = vpop.f32.mrb[62].mxu1  ;;  %v2813_v54 = vld [vmem:[#allocation2 + $0x230] sm:$0xff] }
 0x318   : > { %3837 = vst [vmem:[#allocation2 + $0x1f0] sm:$0xff] %v3709_v56  ;;  %v3710_v59 = vadd.f32 %v3255_v58, %v2806_v53  ;;  %v3257_v47 = vpop.f32.mrb[63].mxu1  ;;  %v2829_v57 = vld [vmem:[#allocation2 + $0x2b0] sm:$0xff] }
 0x31a   : > { %3838 = vst [vmem:[#allocation2 + $0x1f8] sm:$0xff] %v3710_v59  ;;  %v3293_v48 = vpop.f32.mrb[64].mxu0 }
 0x31b   : > { %v3711_v36 = vadd.f32 %v3293_v48, %v2807_v34  ;;  %v3295_v62 = vpop.f32.mrb[65].mxu0  ;;  %v2830_v48 = vld [vmem:[#allocation2 + $0x2b8] sm:$0xff] }
 0x31c   : > { %v3296_v0 = vpop.f32.mrb[66].mxu0 }
 0x31d   : > { %3839 = vst [vmem:[#allocation2 + $0x200] sm:$0xff] %v3711_v36  ;;  %v3712_v25 = vadd.f32 %v3296_v0, %v2808_v8  ;;  %v3390_v31 = vpop.f32.mrb[64].mxu1  ;;  %v3298_v37 = vpop.f32.mrb[67].mxu0 }
 0x31e   : > { %v3727_v3 = vadd.f32 %v3390_v31, %v2823_v63  ;;  %v3392_v28 = vpop.f32.mrb[65].mxu1  ;;  %v2816_v37 = vld [vmem:[#allocation2 + $0x248] sm:$0xff] }
 0x31f   : > { %3840 = vst [vmem:[#allocation2 + $0x208] sm:$0xff] %v3712_v25  ;;  %v3393_v7 = vpop.f32.mrb[66].mxu1  ;;  %v2815_v25 = vld [vmem:[#allocation2 + $0x240] sm:$0xff] }
 0x320   : > { %3855 = vst [vmem:[#allocation2 + $0x280] sm:$0xff] %v3727_v3  ;;  %v3728_v10 = vadd.f32 %v3393_v7, %v2824_v41  ;;  %v3395_v18 = vpop.f32.mrb[67].mxu1  ;;  %v2831_v28 = vld [vmem:[#allocation2 + $0x2c0] sm:$0xff] }
 0x322   : > { %3856 = vst [vmem:[#allocation2 + $0x288] sm:$0xff] %v3728_v10  ;;  %v3301_v16 = vpop.f32.mrb[68].mxu0 }
 0x323   : > { %v3713_v13 = vadd.f32 %v3301_v16, %v2809_v14  ;;  %v3303_v24 = vpop.f32.mrb[69].mxu0  ;;  %v2832_v16 = vld [vmem:[#allocation2 + $0x2c8] sm:$0xff] }
 0x324   : > { %v3304_v11 = vpop.f32.mrb[70].mxu0 }
 0x325   : > { %3841 = vst [vmem:[#allocation2 + $0x210] sm:$0xff] %v3713_v13  ;;  %v3714_v12 = vadd.f32 %v3304_v11, %v2810_v5  ;;  %v3398_v15 = vpop.f32.mrb[68].mxu1  ;;  %v3306_v19 = vpop.f32.mrb[71].mxu0 }
 0x326   : > { %v3729_v22 = vadd.f32 %v3398_v15, %v2825_v6  ;;  %v3400_v23 = vpop.f32.mrb[69].mxu1  ;;  %v2818_v19 = vld [vmem:[#allocation2 + $0x258] sm:$0xff] }
 0x327   : > { %3842 = vst [vmem:[#allocation2 + $0x218] sm:$0xff] %v3714_v12  ;;  %v3401_v26 = vpop.f32.mrb[70].mxu1  ;;  %v2817_v12 = vld [vmem:[#allocation2 + $0x250] sm:$0xff] }
 0x328   : > { %3857 = vst [vmem:[#allocation2 + $0x290] sm:$0xff] %v3729_v22  ;;  %v3730_v27 = vadd.f32 %v3401_v26, %v2826_v21  ;;  %v3403_v29 = vpop.f32.mrb[71].mxu1  ;;  %v2833_v23 = vld [vmem:[#allocation2 + $0x2d0] sm:$0xff] }
 0x32a   : > { %3858 = vst [vmem:[#allocation2 + $0x298] sm:$0xff] %v3730_v27  ;;  %v3309_v42 = vpop.f32.mrb[72].mxu0 }
 0x32b   : > { %v3715_v32 = vadd.f32 %v3309_v42, %v2811_v30  ;;  %v3311_v33 = vpop.f32.mrb[73].mxu0  ;;  %v2834_v42 = vld [vmem:[#allocation2 + $0x2d8] sm:$0xff] }
 0x32c   : > { %v3312_v4 = vpop.f32.mrb[74].mxu0 }
 0x32d   : > { %3843 = vst [vmem:[#allocation2 + $0x220] sm:$0xff] %v3715_v32  ;;  %v3716_v40 = vadd.f32 %v3312_v4, %v2812_v43  ;;  %v3406_v44 = vpop.f32.mrb[72].mxu1  ;;  %v3314_v45 = vpop.f32.mrb[75].mxu0 }
 0x32e   : > { %v3731_v46 = vadd.f32 %v3406_v44, %v2827_v38  ;;  %v3408_v49 = vpop.f32.mrb[73].mxu1  ;;  %v2820_v45 = vld [vmem:[#allocation2 + $0x268] sm:$0xff] }
 0x32f   : > { %3844 = vst [vmem:[#allocation2 + $0x228] sm:$0xff] %v3716_v40  ;;  %v3409_v50 = vpop.f32.mrb[74].mxu1  ;;  %v2819_v40 = vld [vmem:[#allocation2 + $0x260] sm:$0xff] }
 0x330   : > { %3859 = vst [vmem:[#allocation2 + $0x2a0] sm:$0xff] %v3731_v46  ;;  %v3732_v51 = vadd.f32 %v3409_v50, %v2828_v9  ;;  %v3411_v52 = vpop.f32.mrb[75].mxu1  ;;  %v2835_v49 = vld [vmem:[#allocation2 + $0x2e0] sm:$0xff] }
 0x332   : > { %3860 = vst [vmem:[#allocation2 + $0x2a8] sm:$0xff] %v3732_v51  ;;  %v3317_v55 = vpop.f32.mrb[76].mxu0 }
 0x333   : > { %v3717_v53 = vadd.f32 %v3317_v55, %v2813_v54  ;;  %v3319_v56 = vpop.f32.mrb[77].mxu0  ;;  %v2836_v55 = vld [vmem:[#allocation2 + $0x2e8] sm:$0xff] }
 0x334   : > { %v3320_v58 = vpop.f32.mrb[78].mxu0 }
 0x335   : > { %3845 = vst [vmem:[#allocation2 + $0x230] sm:$0xff] %v3717_v53  ;;  %v3718_v59 = vadd.f32 %v3320_v58, %v2814_v2  ;;  %v3414_v47 = vpop.f32.mrb[76].mxu1  ;;  %v3322_v34 = vpop.f32.mrb[79].mxu0 }
 0x336   : > { %v3733_v8 = vadd.f32 %v3414_v47, %v2829_v57  ;;  %v3416_v36 = vpop.f32.mrb[77].mxu1  ;;  %v2822_v34 = vld [vmem:[#allocation2 + $0x278] sm:$0xff] }
 0x337   : > { %3846 = vst [vmem:[#allocation2 + $0x238] sm:$0xff] %v3718_v59  ;;  %v3417_v62 = vpop.f32.mrb[78].mxu1  ;;  %v2821_v59 = vld [vmem:[#allocation2 + $0x270] sm:$0xff] }
 0x338   : > { %3861 = vst [vmem:[#allocation2 + $0x2b0] sm:$0xff] %v3733_v8  ;;  %v3734_v63 = vadd.f32 %v3417_v62, %v2830_v48  ;;  %v3419_v0 = vpop.f32.mrb[79].mxu1  ;;  %v2837_v36 = vld [vmem:[#allocation2 + $0x2f0] sm:$0xff] }
 0x33a   : > { %3862 = vst [vmem:[#allocation2 + $0x2b8] sm:$0xff] %v3734_v63  ;;  %v3325_v31 = vpop.f32.mrb[80].mxu0 }
 0x33b   : > { %v3719_v41 = vadd.f32 %v3325_v31, %v2815_v25  ;;  %v3327_v3 = vpop.f32.mrb[81].mxu0  ;;  %v2838_v31 = vld [vmem:[#allocation2 + $0x2f8] sm:$0xff] }
 0x33c   : > { %v3328_v7 = vpop.f32.mrb[82].mxu0 }
 0x33d   : > { %3847 = vst [vmem:[#allocation2 + $0x240] sm:$0xff] %v3719_v41  ;;  %v3720_v10 = vadd.f32 %v3328_v7, %v2816_v37  ;;  %v3422_v18 = vpop.f32.mrb[80].mxu1  ;;  %v3330_v14 = vpop.f32.mrb[83].mxu0 }
 0x33e   : > { %v3735_v5 = vadd.f32 %v3422_v18, %v2831_v28  ;;  %v3424_v13 = vpop.f32.mrb[81].mxu1  ;;  %v2840_v14 = vld [vmem:[#allocation2 + $0x308] sm:$0xff] }
 0x33f   : > { %3848 = vst [vmem:[#allocation2 + $0x248] sm:$0xff] %v3720_v10  ;;  %v3425_v24 = vpop.f32.mrb[82].mxu1  ;;  %v2839_v10 = vld [vmem:[#allocation2 + $0x300] sm:$0xff] }
 0x340   : > { %3863 = vst [vmem:[#allocation2 + $0x2c0] sm:$0xff] %v3735_v5  ;;  %v3736_v6 = vadd.f32 %v3425_v24, %v2832_v16  ;;  %v3427_v11 = vpop.f32.mrb[83].mxu1  ;;  %v2855_v13 = vld [vmem:[#allocation2 + $0x380] sm:$0xff] }
 0x342   : > { %3864 = vst [vmem:[#allocation2 + $0x2c8] sm:$0xff] %v3736_v6  ;;  %v3333_v15 = vpop.f32.mrb[84].mxu0 }
 0x343   : > { %v3721_v21 = vadd.f32 %v3333_v15, %v2817_v12  ;;  %v3335_v22 = vpop.f32.mrb[85].mxu0  ;;  %v2856_v15 = vld [vmem:[#allocation2 + $0x388] sm:$0xff] }
 0x344   : > { %v3336_v26 = vpop.f32.mrb[86].mxu0 }
 0x345   : > { %3849 = vst [vmem:[#allocation2 + $0x250] sm:$0xff] %v3721_v21  ;;  %v3722_v27 = vadd.f32 %v3336_v26, %v2818_v19  ;;  %v3430_v29 = vpop.f32.mrb[84].mxu1  ;;  %v3338_v30 = vpop.f32.mrb[87].mxu0 }
 0x346   : > { %v3737_v43 = vadd.f32 %v3430_v29, %v2833_v23  ;;  %v3432_v32 = vpop.f32.mrb[85].mxu1  ;;  %v2842_v30 = vld [vmem:[#allocation2 + $0x318] sm:$0xff] }
 0x347   : > { %3850 = vst [vmem:[#allocation2 + $0x258] sm:$0xff] %v3722_v27  ;;  %v3433_v33 = vpop.f32.mrb[86].mxu1  ;;  %v2841_v27 = vld [vmem:[#allocation2 + $0x310] sm:$0xff] }
 0x348   : > { %3865 = vst [vmem:[#allocation2 + $0x2d0] sm:$0xff] %v3737_v43  ;;  %v3738_v38 = vadd.f32 %v3433_v33, %v2834_v42  ;;  %v3435_v4 = vpop.f32.mrb[87].mxu1  ;;  %v2857_v32 = vld [vmem:[#allocation2 + $0x390] sm:$0xff] }
 0x34a   : > { %3866 = vst [vmem:[#allocation2 + $0x2d8] sm:$0xff] %v3738_v38  ;;  %v3341_v44 = vpop.f32.mrb[88].mxu0 }
 0x34b   : > { %v3723_v9 = vadd.f32 %v3341_v44, %v2819_v40  ;;  %v3343_v46 = vpop.f32.mrb[89].mxu0  ;;  %v2858_v44 = vld [vmem:[#allocation2 + $0x398] sm:$0xff] }
 0x34c   : > { %v3344_v50 = vpop.f32.mrb[90].mxu0 }
 0x34d   : > { %3851 = vst [vmem:[#allocation2 + $0x260] sm:$0xff] %v3723_v9  ;;  %v3724_v51 = vadd.f32 %v3344_v50, %v2820_v45  ;;  %v3438_v52 = vpop.f32.mrb[88].mxu1  ;;  %v3346_v54 = vpop.f32.mrb[91].mxu0 }
 0x34e   : > { %v3739_v2 = vadd.f32 %v3438_v52, %v2835_v49  ;;  %v3440_v53 = vpop.f32.mrb[89].mxu1  ;;  %v2844_v54 = vld [vmem:[#allocation2 + $0x328] sm:$0xff] }
 0x34f   : > { %3852 = vst [vmem:[#allocation2 + $0x268] sm:$0xff] %v3724_v51  ;;  %v3441_v56 = vpop.f32.mrb[90].mxu1  ;;  %v2843_v51 = vld [vmem:[#allocation2 + $0x320] sm:$0xff] }
 0x350   : > { %3867 = vst [vmem:[#allocation2 + $0x2e0] sm:$0xff] %v3739_v2  ;;  %v3740_v57 = vadd.f32 %v3441_v56, %v2836_v55  ;;  %v3443_v58 = vpop.f32.mrb[91].mxu1  ;;  %v2859_v53 = vld [vmem:[#allocation2 + $0x3a0] sm:$0xff] }
 0x352   : > { %3868 = vst [vmem:[#allocation2 + $0x2e8] sm:$0xff] %v3740_v57  ;;  %v3349_v47 = vpop.f32.mrb[92].mxu0 }
 0x353   : > { %v3725_v48 = vadd.f32 %v3349_v47, %v2821_v59  ;;  %v3351_v8 = vpop.f32.mrb[93].mxu0  ;;  %v2860_v47 = vld [vmem:[#allocation2 + $0x3a8] sm:$0xff] }
 0x354   : > { %v3352_v62 = vpop.f32.mrb[94].mxu0 }
 0x355   : > { %3853 = vst [vmem:[#allocation2 + $0x270] sm:$0xff] %v3725_v48  ;;  %v3726_v63 = vadd.f32 %v3352_v62, %v2822_v34  ;;  %v3446_v0 = vpop.f32.mrb[92].mxu1  ;;  %v3354_v25 = vpop.f32.mrb[95].mxu0 }
 0x356   : > { %v3741_v37 = vadd.f32 %v3446_v0, %v2837_v36  ;;  %v3448_v41 = vpop.f32.mrb[93].mxu1  ;;  %v2846_v25 = vld [vmem:[#allocation2 + $0x338] sm:$0xff] }
 0x357   : > { %3854 = vst [vmem:[#allocation2 + $0x278] sm:$0xff] %v3726_v63  ;;  %v3449_v3 = vpop.f32.mrb[94].mxu1  ;;  %v2845_v63 = vld [vmem:[#allocation2 + $0x330] sm:$0xff] }
 0x358   : > { %3869 = vst [vmem:[#allocation2 + $0x2f0] sm:$0xff] %v3741_v37  ;;  %v3742_v28 = vadd.f32 %v3449_v3, %v2838_v31  ;;  %v3451_v7 = vpop.f32.mrb[95].mxu1  ;;  %v2861_v41 = vld [vmem:[#allocation2 + $0x3b0] sm:$0xff] }
 0x35a   : > { %3870 = vst [vmem:[#allocation2 + $0x2f8] sm:$0xff] %v3742_v28  ;;  %v3487_v18 = vpop.f32.mrb[96].mxu0 }
 0x35b   : > { %v3743_v16 = vadd.f32 %v3487_v18, %v2839_v10  ;;  %v3489_v5 = vpop.f32.mrb[97].mxu0  ;;  %v2862_v18 = vld [vmem:[#allocation2 + $0x3b8] sm:$0xff] }
 0x35c   : > { %v3490_v24 = vpop.f32.mrb[98].mxu0 }
 0x35d   : > { %3871 = vst [vmem:[#allocation2 + $0x300] sm:$0xff] %v3743_v16  ;;  %v3744_v6 = vadd.f32 %v3490_v24, %v2840_v14  ;;  %v3584_v11 = vpop.f32.mrb[96].mxu1  ;;  %v3492_v12 = vpop.f32.mrb[99].mxu0 }
 0x35e   : > { %v3759_v19 = vadd.f32 %v3584_v11, %v2855_v13  ;;  %v3586_v21 = vpop.f32.mrb[97].mxu1  ;;  %v2848_v12 = vld [vmem:[#allocation2 + $0x348] sm:$0xff] }
 0x35f   : > { %3872 = vst [vmem:[#allocation2 + $0x308] sm:$0xff] %v3744_v6  ;;  %v3587_v22 = vpop.f32.mrb[98].mxu1  ;;  %v2847_v6 = vld [vmem:[#allocation2 + $0x340] sm:$0xff] }
 0x360   : > { %3887 = vst [vmem:[#allocation2 + $0x380] sm:$0xff] %v3759_v19  ;;  %v3760_v23 = vadd.f32 %v3587_v22, %v2856_v15  ;;  %v3589_v26 = vpop.f32.mrb[99].mxu1  ;;  %v2863_v21 = vld [vmem:[#allocation2 + $0x3c0] sm:$0xff] }
 0x362   : > { %3888 = vst [vmem:[#allocation2 + $0x388] sm:$0xff] %v3760_v23  ;;  %v3495_v29 = vpop.f32.mrb[100].mxu0 }
 0x363   : > { %v3745_v42 = vadd.f32 %v3495_v29, %v2841_v27  ;;  %v3497_v43 = vpop.f32.mrb[101].mxu0  ;;  %v2864_v29 = vld [vmem:[#allocation2 + $0x3c8] sm:$0xff] }
 0x364   : > { %v3498_v33 = vpop.f32.mrb[102].mxu0 }
 0x365   : > { %3873 = vst [vmem:[#allocation2 + $0x310] sm:$0xff] %v3745_v42  ;;  %v3746_v38 = vadd.f32 %v3498_v33, %v2842_v30  ;;  %v3592_v4 = vpop.f32.mrb[100].mxu1  ;;  %v3500_v40 = vpop.f32.mrb[103].mxu0 }
 0x366   : > { %v3761_v45 = vadd.f32 %v3592_v4, %v2857_v32  ;;  %v3594_v9 = vpop.f32.mrb[101].mxu1  ;;  %v2850_v40 = vld [vmem:[#allocation2 + $0x358] sm:$0xff] }
 0x367   : > { %3874 = vst [vmem:[#allocation2 + $0x318] sm:$0xff] %v3746_v38  ;;  %v3595_v46 = vpop.f32.mrb[102].mxu1  ;;  %v2849_v38 = vld [vmem:[#allocation2 + $0x350] sm:$0xff] }
 0x368   : > { %3889 = vst [vmem:[#allocation2 + $0x390] sm:$0xff] %v3761_v45  ;;  %v3762_v49 = vadd.f32 %v3595_v46, %v2858_v44  ;;  %v3597_v50 = vpop.f32.mrb[103].mxu1  ;;  %v2865_v9 = vld [vmem:[#allocation2 + $0x3d0] sm:$0xff] }
 0x36a   : > { %3890 = vst [vmem:[#allocation2 + $0x398] sm:$0xff] %v3762_v49  ;;  %v3503_v52 = vpop.f32.mrb[104].mxu0 }
 0x36b   : > { %v3747_v55 = vadd.f32 %v3503_v52, %v2843_v51  ;;  %v3505_v2 = vpop.f32.mrb[105].mxu0  ;;  %v2866_v52 = vld [vmem:[#allocation2 + $0x3d8] sm:$0xff] }
 0x36c   : > { %v3506_v56 = vpop.f32.mrb[106].mxu0 }
 0x36d   : > { %3875 = vst [vmem:[#allocation2 + $0x320] sm:$0xff] %v3747_v55  ;;  %v3748_v57 = vadd.f32 %v3506_v56, %v2844_v54  ;;  %v3600_v58 = vpop.f32.mrb[104].mxu1  ;;  %v3508_v59 = vpop.f32.mrb[107].mxu0 }
 0x36e   : > { %v3763_v34 = vadd.f32 %v3600_v58, %v2859_v53  ;;  %v3602_v48 = vpop.f32.mrb[105].mxu1  ;;  %v2852_v59 = vld [vmem:[#allocation2 + $0x368] sm:$0xff] }
 0x36f   : > { %3876 = vst [vmem:[#allocation2 + $0x328] sm:$0xff] %v3748_v57  ;;  %v3603_v8 = vpop.f32.mrb[106].mxu1  ;;  %v2851_v57 = vld [vmem:[#allocation2 + $0x360] sm:$0xff] }
 0x370   : > { %3891 = vst [vmem:[#allocation2 + $0x3a0] sm:$0xff] %v3763_v34  ;;  %v3764_v36 = vadd.f32 %v3603_v8, %v2860_v47  ;;  %v3605_v62 = vpop.f32.mrb[107].mxu1  ;;  %v2867_v48 = vld [vmem:[#allocation2 + $0x3e0] sm:$0xff] }
 0x372   : > { %3892 = vst [vmem:[#allocation2 + $0x3a8] sm:$0xff] %v3764_v36  ;;  %v3511_v0 = vpop.f32.mrb[108].mxu0 }
 0x373   : > { %v3749_v31 = vadd.f32 %v3511_v0, %v2845_v63  ;;  %v3513_v37 = vpop.f32.mrb[109].mxu0  ;;  %v2868_v0 = vld [vmem:[#allocation2 + $0x3e8] sm:$0xff] }
 0x374   : > { %v3514_v3 = vpop.f32.mrb[110].mxu0 }
 0x375   : > { %3877 = vst [vmem:[#allocation2 + $0x330] sm:$0xff] %v3749_v31  ;;  %v3750_v28 = vadd.f32 %v3514_v3, %v2846_v25  ;;  %v3608_v7 = vpop.f32.mrb[108].mxu1  ;;  %v3516_v10 = vpop.f32.mrb[111].mxu0 }
 0x376   : > { %v3765_v14 = vadd.f32 %v3608_v7, %v2861_v41  ;;  %v3610_v16 = vpop.f32.mrb[109].mxu1  ;;  %v2854_v10 = vld [vmem:[#allocation2 + $0x378] sm:$0xff] }
 0x377   : > { %3878 = vst [vmem:[#allocation2 + $0x338] sm:$0xff] %v3750_v28  ;;  %v3611_v5 = vpop.f32.mrb[110].mxu1  ;;  %v2853_v28 = vld [vmem:[#allocation2 + $0x370] sm:$0xff] }
 0x378   : > { %3893 = vst [vmem:[#allocation2 + $0x3b0] sm:$0xff] %v3765_v14  ;;  %v3766_v13 = vadd.f32 %v3611_v5, %v2862_v18  ;;  %v3613_v24 = vpop.f32.mrb[111].mxu1  ;;  %v2869_v16 = vld [vmem:[#allocation2 + $0x3f0] sm:$0xff] }
 0x37a   : > { %3894 = vst [vmem:[#allocation2 + $0x3b8] sm:$0xff] %v3766_v13  ;;  %v3519_v11 = vpop.f32.mrb[112].mxu0 }
 0x37b   : > { %v3751_v15 = vadd.f32 %v3519_v11, %v2847_v6  ;;  %v3521_v19 = vpop.f32.mrb[113].mxu0  ;;  %v2870_v11 = vld [vmem:[#allocation2 + $0x3f8] sm:$0xff] }
 0x37c   : > { %v3522_v22 = vpop.f32.mrb[114].mxu0 }
 0x37d   : > { %3879 = vst [vmem:[#allocation2 + $0x340] sm:$0xff] %v3751_v15  ;;  %v3752_v23 = vadd.f32 %v3522_v22, %v2848_v12  ;;  %v3616_v26 = vpop.f32.mrb[112].mxu1  ;;  %v3524_v27 = vpop.f32.mrb[115].mxu0 }
 0x37e   : > { %v3767_v30 = vadd.f32 %v3616_v26, %v2863_v21  ;;  %v3618_v42 = vpop.f32.mrb[113].mxu1 }
 0x37f   : > { %3880 = vst [vmem:[#allocation2 + $0x348] sm:$0xff] %v3752_v23  ;;  %v3619_v43 = vpop.f32.mrb[114].mxu1 }
 0x380   : > { %3895 = vst [vmem:[#allocation2 + $0x3c0] sm:$0xff] %v3767_v30  ;;  %v3768_v32 = vadd.f32 %v3619_v43, %v2864_v29  ;;  %v3621_v33 = vpop.f32.mrb[115].mxu1 }
 0x382   : > { %3896 = vst [vmem:[#allocation2 + $0x3c8] sm:$0xff] %v3768_v32  ;;  %v3527_v4 = vpop.f32.mrb[116].mxu0 }
 0x383   : > { %v3753_v44 = vadd.f32 %v3527_v4, %v2849_v38  ;;  %v3529_v45 = vpop.f32.mrb[117].mxu0 }
 0x384   : > { %v3530_v46 = vpop.f32.mrb[118].mxu0 }
 0x385   : > { %3881 = vst [vmem:[#allocation2 + $0x350] sm:$0xff] %v3753_v44  ;;  %v3754_v49 = vadd.f32 %v3530_v46, %v2850_v40  ;;  %v3624_v50 = vpop.f32.mrb[116].mxu1  ;;  %v3532_v51 = vpop.f32.mrb[119].mxu0 }
 0x386   : > { %v3769_v54 = vadd.f32 %v3624_v50, %v2865_v9  ;;  %v3626_v55 = vpop.f32.mrb[117].mxu1 }
 0x387   : > { %3882 = vst [vmem:[#allocation2 + $0x358] sm:$0xff] %v3754_v49  ;;  %v3627_v2 = vpop.f32.mrb[118].mxu1 }
 0x388   : > { %3897 = vst [vmem:[#allocation2 + $0x3d0] sm:$0xff] %v3769_v54  ;;  %v3770_v53 = vadd.f32 %v3627_v2, %v2866_v52  ;;  %v3629_v56 = vpop.f32.mrb[119].mxu1 }
 0x38a   : > { %3898 = vst [vmem:[#allocation2 + $0x3d8] sm:$0xff] %v3770_v53  ;;  %v3535_v58 = vpop.f32.mrb[120].mxu0 }
 0x38b   : > { %v3755_v47 = vadd.f32 %v3535_v58, %v2851_v57  ;;  %v3537_v34 = vpop.f32.mrb[121].mxu0 }
 0x38c   : > { %v3538_v8 = vpop.f32.mrb[122].mxu0 }
 0x38d   : > { %3883 = vst [vmem:[#allocation2 + $0x360] sm:$0xff] %v3755_v47  ;;  %v3756_v36 = vadd.f32 %v3538_v8, %v2852_v59  ;;  %v3632_v62 = vpop.f32.mrb[120].mxu1  ;;  %v3540_v63 = vpop.f32.mrb[123].mxu0 }
 0x38e   : > { %v3771_v25 = vadd.f32 %v3632_v62, %v2867_v48  ;;  %v3634_v31 = vpop.f32.mrb[121].mxu1 }
 0x38f   : > { %3884 = vst [vmem:[#allocation2 + $0x368] sm:$0xff] %v3756_v36  ;;  %v3635_v37 = vpop.f32.mrb[122].mxu1 }
 0x390   : > { %3899 = vst [vmem:[#allocation2 + $0x3e0] sm:$0xff] %v3771_v25  ;;  %v3772_v41 = vadd.f32 %v3635_v37, %v2868_v0  ;;  %v3637_v3 = vpop.f32.mrb[123].mxu1 }
 0x392   : > { %3900 = vst [vmem:[#allocation2 + $0x3e8] sm:$0xff] %v3772_v41  ;;  %v3543_v7 = vpop.f32.mrb[124].mxu0 }
 0x393   : > { %v3757_v18 = vadd.f32 %v3543_v7, %v2853_v28  ;;  %v3545_v14 = vpop.f32.mrb[125].mxu0 }
 0x394   : > { %v3546_v5 = vpop.f32.mrb[126].mxu0  ;;  %3906 = sbr.rel (%p7692_p10) target bundleno = 1880 (0x758), region = 80 }
 0x395   : > { %3885 = vst [vmem:[#allocation2 + $0x370] sm:$0xff] %v3757_v18  ;;  %v3758_v13 = vadd.f32 %v3546_v5, %v2854_v10  ;;  %v3640_v24 = vpop.f32.mrb[124].mxu1  ;;  %v3548_v6 = vpop.f32.mrb[127].mxu0 }
 0x396   : > { %v3773_v12 = vadd.f32 %v3640_v24, %v2869_v16  ;;  %v3642_v15 = vpop.f32.mrb[125].mxu1 }
 0x397   : > { %3886 = vst [vmem:[#allocation2 + $0x378] sm:$0xff] %v3758_v13  ;;  %v3643_v19 = vpop.f32.mrb[126].mxu1 }
 0x398   : > { %3901 = vst [vmem:[#allocation2 + $0x3f0] sm:$0xff] %v3773_v12  ;;  %v3774_v21 = vadd.f32 %v3643_v19, %v2870_v11  ;;  %v3645_v22 = vpop.f32.mrb[127].mxu1 }
 0x39a   : > { %3902 = vst [vmem:[#allocation2 + $0x3f8] sm:$0xff] %v3774_v21 }
 0x39b   : > { %v3909_v23 = vld [vmem:[#allocation2 + $0x10] sm:$0xff]  ;;  %v3907_v29 = vld [vmem:[#allocation2] sm:$0xff]  ;;  %v3910_v43 = vld [vmem:[#allocation2 + $0x18] sm:$0xff]  ;;  %vm4572_vm12 = vcmask 130112   ;;  %vm4579_vm13 = vcmask 195712   ;;  %vm4586_vm14 = vcmask 261312  }
 0x39c   : > { %v10153_v26 = vld [vmem:[#allocation9 + $0x10] sm:$0xff]  ;;  %v10156_v30 = vld [vmem:[#allocation9] sm:$0xff]  ;;  %v10159_v32 = vld [vmem:[#allocation9 + $0x18] sm:$0xff]  ;;  %vm4593_vm15 = vcmask 326912   ;;  %vm4600_vm0 = vcmask 392512   ;;  %vm4607_vm1 = vcmask 458112  }
 0x39d   : > { %v4053_v27 = vmul.f32 %v10153_v26, %v3909_v23  ;;  %v4051_v42 = vmul.f32 %v10156_v30, %v3907_v29  ;;  %v4054_v33 = vmul.f32 %v10159_v32, %v3910_v43  ;;  %v3908_v38 = vld [vmem:[#allocation2 + $0x8] sm:$0xff]  ;;  %v3911_v9 = vld [vmem:[#allocation2 + $0x20] sm:$0xff]  ;;  %v3914_v51 = vld [vmem:[#allocation2 + $0x38] sm:$0xff]  ;;  %vm4614_vm4 = vcmask 523712   ;;  %s11422_s20 = sld [smem:[#allocation28_spill]]  ;;  %s8165_s25 = smov 1  }
 0x39e   : > { %v10162_v4 = vld [vmem:[#allocation9 + $0x8] sm:$0xff]  ;;  %v10167_v46 = vld [vmem:[#allocation9 + $0x20] sm:$0xff]  ;;  %v10171_v52 = vld [vmem:[#allocation9 + $0x38] sm:$0xff]  ;;  %vm4621_vm5 = vcmask 589312   ;;  %vm4628_vm6 = vcmask 654912   ;;  %vm11381_vm7 = vcmask 720512  }
 0x39f   : > { %4183 = vadd.xlane.f32.xlu1 %v4053_v27  ;;  %4179 = vadd.xlane.f32.xlu0 %v4051_v42  ;;  %v4052_v40 = vmul.f32 %v10162_v4, %v3908_v38  ;;  %v3912_v44 = vld [vmem:[#allocation2 + $0x28] sm:$0xff]  ;;  %v4055_v50 = vmul.f32 %v10167_v46, %v3911_v9  ;;  %v3913_v54 = vld [vmem:[#allocation2 + $0x30] sm:$0xff]  ;;  %v4058_v2 = vmul.f32 %v10171_v52, %v3914_v51  ;;  %v3915_v58 = vld [vmem:[#allocation2 + $0x40] sm:$0xff]  ;;  %vm4642_vm8 = vcmask 786112  }
 0x3a0   : > { %v10165_v45 = vld [vmem:[#allocation9 + $0x28] sm:$0xff]  ;;  %v10173_v55 = vld [vmem:[#allocation9 + $0x30] sm:$0xff]  ;;  %v10179_v59 = vld [vmem:[#allocation9 + $0x40] sm:$0xff]  ;;  %vm4649_vm9 = vcmask 851712   ;;  %vm4656_vm2 = vcmask 917312   ;;  %vm4663_vm3 = vcmask 982912  }
 0x3a1   : > { %v4056_v49 = vmul.f32 %v10165_v45, %v3912_v44  ;;  %v4057_v53 = vmul.f32 %v10173_v55, %v3913_v54  ;;  %v3916_v56 = vld [vmem:[#allocation2 + $0x48] sm:$0xff]  ;;  %v4059_v34 = vmul.f32 %v10179_v59, %v3915_v58  ;;  %v3918_v48 = vld [vmem:[#allocation2 + $0x58] sm:$0xff]  ;;  %v3917_v36 = vld [vmem:[#allocation2 + $0x50] sm:$0xff]  ;;  %vm4670_vm10 = vcmask 1048512  }
 0x3a2   : > { %v10177_v57 = vld [vmem:[#allocation9 + $0x48] sm:$0xff]  ;;  %v10183_v8 = vld [vmem:[#allocation9 + $0x58] sm:$0xff]  ;;  %v10185_v62 = vld [vmem:[#allocation9 + $0x50] sm:$0xff]  ;;  %vm11365_vm11 = vcmask 1041409  }
 0x3a3   : > { %4185 = vadd.xlane.f32.xlu1 %v4054_v33  ;;  %4181 = vadd.xlane.f32.xlu0 %v4052_v40  ;;  %v4060_v47 = vmul.f32 %v10177_v57, %v3916_v56  ;;  %v4062_v63 = vmul.f32 %v10183_v8, %v3918_v48  ;;  %v4061_v0 = vmul.f32 %v10185_v62, %v3917_v36  ;;  %v3920_v25 = vld [vmem:[#allocation2 + $0x68] sm:$0xff]  ;;  %v3919_v37 = vld [vmem:[#allocation2 + $0x60] sm:$0xff]  ;;  %v3922_v7 = vld [vmem:[#allocation2 + $0x78] sm:$0xff] }
 0x3a4   : > { %v10189_v31 = vld [vmem:[#allocation9 + $0x68] sm:$0xff]  ;;  %v10191_v41 = vld [vmem:[#allocation9 + $0x60] sm:$0xff]  ;;  %v10195_v10 = vld [vmem:[#allocation9 + $0x78] sm:$0xff] }
 0x3a5   : > { %v4064_v3 = vmul.f32 %v10189_v31, %v3920_v25  ;;  %v4063_v28 = vmul.f32 %v10191_v41, %v3919_v37  ;;  %v3921_v18 = vld [vmem:[#allocation2 + $0x70] sm:$0xff]  ;;  %v4066_v16 = vmul.f32 %v10195_v10, %v3922_v7  ;;  %v3924_v13 = vld [vmem:[#allocation2 + $0x88] sm:$0xff]  ;;  %v3923_v24 = vld [vmem:[#allocation2 + $0x80] sm:$0xff] }
 0x3a6   : > { %v10197_v14 = vld [vmem:[#allocation9 + $0x70] sm:$0xff]  ;;  %v4068_v6 = vmul.f32 %v10162_v4, %v3924_v13  ;;  %v4067_v11 = vmul.f32 %v10156_v30, %v3923_v24  ;;  %v3926_v12 = vld [vmem:[#allocation2 + $0x98] sm:$0xff]  ;;  %v3928_v22 = vld [vmem:[#allocation2 + $0xa8] sm:$0xff] }
 0x3a7   : > { %4189 = vadd.xlane.f32.xlu1 %v4056_v49  ;;  %4187 = vadd.xlane.f32.xlu0 %v4055_v50  ;;  %v4065_v5 = vmul.f32 %v10197_v14, %v3921_v18  ;;  %v3925_v15 = vld [vmem:[#allocation2 + $0x90] sm:$0xff]  ;;  %v4070_v19 = vmul.f32 %v10159_v32, %v3926_v12  ;;  %v3927_v23 = vld [vmem:[#allocation2 + $0xa0] sm:$0xff]  ;;  %v4072_v27 = vmul.f32 %v10165_v45, %v3928_v22  ;;  %v3930_v42 = vld [vmem:[#allocation2 + $0xb8] sm:$0xff] }
 0x3a8   : > { %v4069_v21 = vmul.f32 %v10153_v26, %v3925_v15  ;;  %v4071_v29 = vmul.f32 %v10167_v46, %v3927_v23  ;;  %v3929_v43 = vld [vmem:[#allocation2 + $0xb0] sm:$0xff]  ;;  %v4074_v33 = vmul.f32 %v10171_v52, %v3930_v42  ;;  %v3932_v40 = vld [vmem:[#allocation2 + $0xc8] sm:$0xff]  ;;  %v3931_v44 = vld [vmem:[#allocation2 + $0xc0] sm:$0xff] }
 0x3a9   : > { %v4073_v38 = vmul.f32 %v10173_v55, %v3929_v43  ;;  %v4076_v9 = vmul.f32 %v10177_v57, %v3932_v40  ;;  %v4075_v49 = vmul.f32 %v10179_v59, %v3931_v44  ;;  %v3934_v50 = vld [vmem:[#allocation2 + $0xd8] sm:$0xff]  ;;  %v3933_v51 = vld [vmem:[#allocation2 + $0xd0] sm:$0xff]  ;;  %v3935_v56 = vld [vmem:[#allocation2 + $0xe0] sm:$0xff] }
 0x3aa   : > { %v4078_v54 = vmul.f32 %v10183_v8, %v3934_v50  ;;  %v3937_v48 = vld [vmem:[#allocation2 + $0xf0] sm:$0xff]  ;;  %v3939_v25 = vld [vmem:[#allocation2 + $0x100] sm:$0xff] }
 0x3ab   : > { %4193 = vadd.xlane.f32.xlu1 %v4058_v2  ;;  %4191 = vadd.xlane.f32.xlu0 %v4057_v53  ;;  %v4077_v2 = vmul.f32 %v10185_v62, %v3933_v51  ;;  %v3936_v53 = vld [vmem:[#allocation2 + $0xe8] sm:$0xff]  ;;  %v3941_v7 = vld [vmem:[#allocation2 + $0x110] sm:$0xff]  ;;  %v3943_v13 = vld [vmem:[#allocation2 + $0x120] sm:$0xff] }
 0x3ac   : > { %v4080_v58 = vmul.f32 %v10189_v31, %v3936_v53  ;;  %v3945_v12 = vld [vmem:[#allocation2 + $0x130] sm:$0xff]  ;;  %v3947_v22 = vld [vmem:[#allocation2 + $0x140] sm:$0xff] }
 0x3ad   : > { %v3949_v42 = vld [vmem:[#allocation2 + $0x150] sm:$0xff]  ;;  %v3951_v40 = vld [vmem:[#allocation2 + $0x160] sm:$0xff] }
 0x3ae   : > { %v3953_v50 = vld [vmem:[#allocation2 + $0x170] sm:$0xff]  ;;  %v3955_v53 = vld [vmem:[#allocation2 + $0x180] sm:$0xff] }
 0x3af   : > { %4197 = vadd.xlane.f32.xlu1 %v4060_v47  ;;  %4195 = vadd.xlane.f32.xlu0 %v4059_v34  ;;  %v4079_v47 = vmul.f32 %v10191_v41, %v3935_v56  ;;  %v3938_v34 = vld [vmem:[#allocation2 + $0xf8] sm:$0xff] }
 0x3b0   : > { %v4082_v36 = vmul.f32 %v10195_v10, %v3938_v34  ;;  %v3957_v34 = vld [vmem:[#allocation2 + $0x190] sm:$0xff] }
 0x3b3   : > { %4201 = vadd.xlane.f32.xlu1 %v4062_v63  ;;  %4199 = vadd.xlane.f32.xlu0 %v4061_v0  ;;  %v4081_v63 = vmul.f32 %v10197_v14, %v3937_v48  ;;  %v3940_v0 = vld [vmem:[#allocation2 + $0x108] sm:$0xff] }
 0x3b4   : > { %v4084_v37 = vmul.f32 %v10162_v4, %v3940_v0  ;;  %v3959_v0 = vld [vmem:[#allocation2 + $0x1a0] sm:$0xff] }
 0x3b7   : > { %4205 = vadd.xlane.f32.xlu1 %v4064_v3  ;;  %4203 = vadd.xlane.f32.xlu0 %v4063_v28  ;;  %v4083_v3 = vmul.f32 %v10156_v30, %v3939_v25  ;;  %v3942_v28 = vld [vmem:[#allocation2 + $0x118] sm:$0xff] }
 0x3b8   : > { %v4086_v18 = vmul.f32 %v10159_v32, %v3942_v28  ;;  %v3961_v28 = vld [vmem:[#allocation2 + $0x1b0] sm:$0xff] }
 0x3bb   : > { %4209 = vadd.xlane.f32.xlu1 %v4066_v16  ;;  %4207 = vadd.xlane.f32.xlu0 %v4065_v5  ;;  %v4085_v16 = vmul.f32 %v10153_v26, %v3941_v7  ;;  %v3944_v5 = vld [vmem:[#allocation2 + $0x128] sm:$0xff] }
 0x3bc   : > { %v4088_v24 = vmul.f32 %v10165_v45, %v3944_v5  ;;  %v3963_v5 = vld [vmem:[#allocation2 + $0x1c0] sm:$0xff] }
 0x3bf   : > { %4213 = vadd.xlane.f32.xlu1 %v4068_v6  ;;  %4211 = vadd.xlane.f32.xlu0 %v4067_v11  ;;  %v4087_v6 = vmul.f32 %v10167_v46, %v3943_v13  ;;  %v3946_v11 = vld [vmem:[#allocation2 + $0x138] sm:$0xff] }
 0x3c0   : > { %v4090_v15 = vmul.f32 %v10171_v52, %v3946_v11  ;;  %v3965_v11 = vld [vmem:[#allocation2 + $0x1d0] sm:$0xff] }
 0x3c3   : > { %4217 = vadd.xlane.f32.xlu1 %v4070_v19  ;;  %4215 = vadd.xlane.f32.xlu0 %v4069_v21  ;;  %v4089_v19 = vmul.f32 %v10173_v55, %v3945_v12  ;;  %v3948_v21 = vld [vmem:[#allocation2 + $0x148] sm:$0xff] }
 0x3c4   : > { %v4092_v23 = vmul.f32 %v10177_v57, %v3948_v21  ;;  %v3967_v21 = vld [vmem:[#allocation2 + $0x1e0] sm:$0xff] }
 0x3c7   : > { %4221 = vadd.xlane.f32.xlu1 %v4072_v27  ;;  %4219 = vadd.xlane.f32.xlu0 %v4071_v29  ;;  %v4091_v27 = vmul.f32 %v10179_v59, %v3947_v22  ;;  %v3950_v29 = vld [vmem:[#allocation2 + $0x158] sm:$0xff] }
 0x3c8   : > { %v4094_v43 = vmul.f32 %v10183_v8, %v3950_v29  ;;  %v3969_v29 = vld [vmem:[#allocation2 + $0x1f0] sm:$0xff] }
 0x3cb   : > { %4225 = vadd.xlane.f32.xlu1 %v4074_v33  ;;  %4223 = vadd.xlane.f32.xlu0 %v4073_v38  ;;  %v4093_v33 = vmul.f32 %v10185_v62, %v3949_v42  ;;  %v3952_v38 = vld [vmem:[#allocation2 + $0x168] sm:$0xff] }
 0x3cc   : > { %v4096_v44 = vmul.f32 %v10189_v31, %v3952_v38  ;;  %v3971_v38 = vld [vmem:[#allocation2 + $0x200] sm:$0xff] }
 0x3cf   : > { %4229 = vadd.xlane.f32.xlu1 %v4076_v9  ;;  %4227 = vadd.xlane.f32.xlu0 %v4075_v49  ;;  %v4095_v9 = vmul.f32 %v10191_v41, %v3951_v40  ;;  %v3954_v49 = vld [vmem:[#allocation2 + $0x178] sm:$0xff] }
 0x3d0   : > { %v4098_v51 = vmul.f32 %v10195_v10, %v3954_v49  ;;  %v3973_v49 = vld [vmem:[#allocation2 + $0x210] sm:$0xff] }
 0x3d3   : > { %4233 = vadd.xlane.f32.xlu1 %v4078_v54  ;;  %4231 = vadd.xlane.f32.xlu0 %v4077_v2  ;;  %v4097_v54 = vmul.f32 %v10197_v14, %v3953_v50  ;;  %v3956_v2 = vld [vmem:[#allocation2 + $0x188] sm:$0xff] }
 0x3d4   : > { %v4100_v56 = vmul.f32 %v10162_v4, %v3956_v2  ;;  %v3975_v2 = vld [vmem:[#allocation2 + $0x220] sm:$0xff] }
 0x3d7   : > { %4237 = vadd.xlane.f32.xlu1 %v4080_v58  ;;  %4235 = vadd.xlane.f32.xlu0 %v4079_v47  ;;  %v4099_v58 = vmul.f32 %v10156_v30, %v3955_v53  ;;  %v3958_v47 = vld [vmem:[#allocation2 + $0x198] sm:$0xff] }
 0x3d8   : > { %v4102_v48 = vmul.f32 %v10159_v32, %v3958_v47  ;;  %v3977_v47 = vld [vmem:[#allocation2 + $0x230] sm:$0xff] }
 0x3db   : > { %4241 = vadd.xlane.f32.xlu1 %v4082_v36  ;;  %4239 = vadd.xlane.f32.xlu0 %v4081_v63  ;;  %v4101_v36 = vmul.f32 %v10153_v26, %v3957_v34  ;;  %v3960_v63 = vld [vmem:[#allocation2 + $0x1a8] sm:$0xff] }
 0x3dc   : > { %v4104_v25 = vmul.f32 %v10165_v45, %v3960_v63  ;;  %v3979_v63 = vld [vmem:[#allocation2 + $0x240] sm:$0xff] }
 0x3df   : > { %4245 = vadd.xlane.f32.xlu1 %v4084_v37  ;;  %4243 = vadd.xlane.f32.xlu0 %v4083_v3  ;;  %v4103_v37 = vmul.f32 %v10167_v46, %v3959_v0  ;;  %v3962_v3 = vld [vmem:[#allocation2 + $0x1b8] sm:$0xff]  ;;  %v4581_v0 = vadd.s32 4294967272, %v8631_v17 }
 0x3e0   : > { %v4106_v7 = vmul.f32 %v10171_v52, %v3962_v3 }
 0x3e3   : > { %4249 = vadd.xlane.f32.xlu1 %v4086_v18  ;;  %4247 = vadd.xlane.f32.xlu0 %v4085_v16  ;;  %v4105_v18 = vmul.f32 %v10173_v55, %v3961_v28  ;;  %v3964_v16 = vld [vmem:[#allocation2 + $0x1c8] sm:$0xff] }
 0x3e4   : > { %v4108_v13 = vmul.f32 %v10177_v57, %v3964_v16 }
 0x3e7   : > { %4253 = vadd.xlane.f32.xlu1 %v4088_v24  ;;  %4251 = vadd.xlane.f32.xlu0 %v4087_v6  ;;  %v4107_v24 = vmul.f32 %v10179_v59, %v3963_v5  ;;  %v3966_v6 = vld [vmem:[#allocation2 + $0x1d8] sm:$0xff]  ;;  %v3981_v5 = vld [vmem:[#allocation2 + $0x250] sm:$0xff] }
 0x3e8   : > { %v4110_v12 = vmul.f32 %v10183_v8, %v3966_v6  ;;  %v10266_v6 = vsub.s32 %v8631_v17, %v8647_v39 }
 0x3eb   : > { %4257 = vadd.xlane.f32.xlu1 %v4090_v15  ;;  %4255 = vadd.xlane.f32.xlu0 %v4089_v19  ;;  %v4109_v15 = vmul.f32 %v10185_v62, %v3965_v11  ;;  %v3968_v19 = vld [vmem:[#allocation2 + $0x1e8] sm:$0xff]  ;;  %v10269_v11 = vsub.s32 %v4581_v0, %v8647_v39 }
 0x3ec   : > { %v4112_v22 = vmul.f32 %v10189_v31, %v3968_v19 }
 0x3ef   : > { %4261 = vadd.xlane.f32.xlu1 %v4092_v23  ;;  %4259 = vadd.xlane.f32.xlu0 %v4091_v27  ;;  %v4111_v23 = vmul.f32 %v10191_v41, %v3967_v21  ;;  %v3970_v27 = vld [vmem:[#allocation2 + $0x1f8] sm:$0xff] }
 0x3f0   : > { %v4114_v42 = vmul.f32 %v10195_v10, %v3970_v27 }
 0x3f3   : > { %4265 = vadd.xlane.f32.xlu1 %v4094_v43  ;;  %4263 = vadd.xlane.f32.xlu0 %v4093_v33  ;;  %v4113_v43 = vmul.f32 %v10197_v14, %v3969_v29  ;;  %v3972_v33 = vld [vmem:[#allocation2 + $0x208] sm:$0xff] }
 0x3f4   : > { %v4116_v40 = vmul.f32 %v10162_v4, %v3972_v33  ;;  %v4609_v33 = vadd.s32 4294967240, %v8631_v17 }
 0x3f7   : > { %4269 = vadd.xlane.f32.xlu1 %v4096_v44  ;;  %4267 = vadd.xlane.f32.xlu0 %v4095_v9  ;;  %v4115_v44 = vmul.f32 %v10156_v30, %v3971_v38  ;;  %v3974_v9 = vld [vmem:[#allocation2 + $0x218] sm:$0xff] }
 0x3f8   : > { %v4118_v50 = vmul.f32 %v10159_v32, %v3974_v9  ;;  %v4602_v9 = vadd.s32 4294967248, %v8631_v17 }
 0x3fb   : > { %4273 = vadd.xlane.f32.xlu1 %v4098_v51  ;;  %4271 = vadd.xlane.f32.xlu0 %v4097_v54  ;;  %v4117_v51 = vmul.f32 %v10153_v26, %v3973_v49  ;;  %v3976_v54 = vld [vmem:[#allocation2 + $0x228] sm:$0xff] }
 0x3fc   : > { %v4120_v53 = vmul.f32 %v10165_v45, %v3976_v54 }
 0x3ff   : > { %4277 = vadd.xlane.f32.xlu1 %v4100_v56  ;;  %4275 = vadd.xlane.f32.xlu0 %v4099_v58  ;;  %v4119_v56 = vmul.f32 %v10167_v46, %v3975_v2  ;;  %v3978_v58 = vld [vmem:[#allocation2 + $0x238] sm:$0xff] }
 0x400   : > { %v4122_v34 = vmul.f32 %v10171_v52, %v3978_v58 }
 0x403   : > { %4281 = vadd.xlane.f32.xlu1 %v4102_v48  ;;  %4279 = vadd.xlane.f32.xlu0 %v4101_v36  ;;  %v4121_v48 = vmul.f32 %v10173_v55, %v3977_v47  ;;  %v3980_v36 = vld [vmem:[#allocation2 + $0x248] sm:$0xff] }
 0x404   : > { %v4124_v3 = vmul.f32 %v10177_v57, %v3980_v36  ;;  %v4623_v36 = vadd.s32 4294967224, %v8631_v17 }
 0x407   : > { %4285 = vadd.xlane.f32.xlu1 %v4104_v25  ;;  %4283 = vadd.xlane.f32.xlu0 %v4103_v37  ;;  %v4567_v25 = vadd.s32 4294967288, %v8631_v17  ;;  %v4574_v37 = vadd.s32 4294967280, %v8631_v17 }
 0x40b   : > { %4289 = vadd.xlane.f32.xlu1 %v4106_v7  ;;  %4287 = vadd.xlane.f32.xlu0 %v4105_v18  ;;  %v4123_v7 = vmul.f32 %v10179_v59, %v3979_v63  ;;  %v3982_v18 = vld [vmem:[#allocation2 + $0x258] sm:$0xff] }
 0x40c   : > { %v4126_v19 = vmul.f32 %v10183_v8, %v3982_v18 }
 0x40f   : > { %4293 = vadd.xlane.f32.xlu1 %v4108_v13  ;;  %4291 = vadd.xlane.f32.xlu0 %v4107_v24  ;;  %v4595_v13 = vadd.s32 4294967256, %v8631_v17  ;;  %v4588_v24 = vadd.s32 4294967264, %v8631_v17 }
 0x411   : > { %v10280_v29 = vsub.s32 %v4595_v13, %v8647_v39 }
 0x413   : > { %4297 = vadd.xlane.f32.xlu1 %v4110_v12  ;;  %4295 = vadd.xlane.f32.xlu0 %v4109_v15  ;;  %v10272_v12 = vsub.s32 %v4567_v25, %v8647_v39  ;;  %v10275_v15 = vsub.s32 %v4574_v37, %v8647_v39  ;;  %v10303_v25 = vsub.s32 %v4602_v9, %v8647_v39  ;;  %v4616_v37 = vadd.s32 4294967232, %v8631_v17  ;;  %v3990_v9 = vld [vmem:[#allocation2 + $0x298] sm:$0xff] }
 0x417   : > { %4301 = vadd.xlane.f32.xlu1 %v4112_v22  ;;  %4299 = vadd.xlane.f32.xlu0 %v4111_v23  ;;  %v4125_v22 = vmul.f32 %v10185_v62, %v3981_v5  ;;  %v3984_v23 = vld [vmem:[#allocation2 + $0x268] sm:$0xff] }
 0x41b   : > { %4305 = vadd.xlane.f32.xlu1 %v4114_v42  ;;  %4303 = vadd.xlane.f32.xlu0 %v4113_v43  ;;  %v10283_v42 = vsub.s32 %v4588_v24, %v8647_v39  ;;  %v3983_v43 = vld [vmem:[#allocation2 + $0x260] sm:$0xff] }
 0x41c   : > { %v4127_v2 = vmul.f32 %v10191_v41, %v3983_v43  ;;  %v4630_v43 = vadd.s32 4294967216, %v8631_v17 }
 0x41f   : > { %4309 = vadd.xlane.f32.xlu1 %v4116_v40  ;;  %4307 = vadd.xlane.f32.xlu0 %v4115_v44 }
 0x423   : > { %4313 = vadd.xlane.f32.xlu1 %v4118_v50  ;;  %4311 = vadd.xlane.f32.xlu0 %v4117_v51  ;;  %v4128_v50 = vmul.f32 %v10189_v31, %v3984_v23 }
 0x427   : > { %4317 = vadd.xlane.f32.xlu1 %v4120_v53  ;;  %4315 = vadd.xlane.f32.xlu0 %v4119_v56  ;;  %v3986_v53 = vld [vmem:[#allocation2 + $0x278] sm:$0xff] }
 0x42b   : > { %4321 = vadd.xlane.f32.xlu1 %v4122_v34  ;;  %4319 = vadd.xlane.f32.xlu0 %v4121_v48  ;;  %v10297_v34 = vsub.s32 %v4609_v33, %v8647_v39  ;;  %v3985_v48 = vld [vmem:[#allocation2 + $0x270] sm:$0xff] }
 0x42c   : > { %v4184_v28 = vpop.xlane.xlu1 %4183  ;;  %v4180_v16 = vpop.xlane.xlu0 %4179  ;;  %v4129_v18 = vmul.f32 %v10197_v14, %v3985_v48  ;;  %v4134_v48 = vmul.f32 %v10159_v32, %v3990_v9 }
 0x42d   : > { %v4566_v38 = vrot.slane %v4180_v16, %v10266_v6  ;;  %v4578_v49 = vrot.slane %v4184_v28, %v10275_v15  ;;  %v3988_v16 = vld [vmem:[#allocation2 + $0x288] sm:$0xff] }
 0x42e   : > { %v4132_v33 = vmul.f32 %v10162_v4, %v3988_v16  ;;  %v3991_v16 = vld [vmem:[#allocation2 + $0x2a0] sm:$0xff] }
 0x42f   : > { %4325 = vadd.xlane.f32.xlu1 %v4124_v3  ;;  %4323 = vadd.xlane.f32.xlu0 %v4123_v7  ;;  %v4130_v3 = vmul.f32 %v10195_v10, %v3986_v53  ;;  %v4651_v53 = vadd.s32 4294967192, %v8631_v17 }
 0x430   : > { %v4186_v21 = vpop.xlane.xlu1 %4185  ;;  %v4182_v27 = vpop.xlane.xlu0 %4181 }
 0x431   : > { %v4585_v40 = vrot.slane %v4186_v21, %v10269_v11  ;;  %v4571_v44 = vrot.slane %v4182_v27, %v10272_v12  ;;  %v3987_v21 = vld [vmem:[#allocation2 + $0x280] sm:$0xff]  ;;  %v10317_v27 = vsub.s32 %v4616_v37, %v8647_v39  ;;  %v3992_v37 = vld [vmem:[#allocation2 + $0x2a8] sm:$0xff] }
 0x433   : > { %4329 = vadd.xlane.f32.xlu1 %v4126_v19  ;;  %v4573_v51 = vsel %vm4572_vm12, %v4571_v44, %v4566_v38  ;;  %4327 = vadd.xlane.f32.xlu0 %v4125_v22  ;;  %v10312_v19 = vsub.s32 %v4623_v36, %v8647_v39  ;;  %v4637_v22 = vadd.s32 4294967208, %v8631_v17  ;;  %v4131_v44 = vmul.f32 %v10156_v30, %v3987_v21 }
 0x434   : > { %v4190_v54 = vpop.xlane.xlu1 %4189  ;;  %v4580_v56 = vsel %vm4579_vm13, %v4578_v49, %v4573_v51  ;;  %v4188_v47 = vpop.xlane.xlu0 %4187  ;;  %v4658_v21 = vadd.s32 4294967184, %v8631_v17 }
 0x435   : > { %v4599_v58 = vrot.slane %v4190_v54, %v10280_v29  ;;  %v4587_v63 = vsel %vm4586_vm14, %v4585_v40, %v4580_v56  ;;  %v4592_v0 = vrot.slane %v4188_v47, %v10283_v42  ;;  %v10326_v54 = vsub.s32 %v4637_v22, %v8647_v39 }
 0x436   : > { %v4644_v47 = vadd.s32 4294967200, %v8631_v17  ;;  %v4136_v22 = vmul.f32 %v10165_v45, %v3992_v37  ;;  %v3995_v37 = vld [vmem:[#allocation2 + $0x2c0] sm:$0xff] }
 0x437   : > { %4333 = vadd.xlane.f32.xlu1 %v4128_v50  ;;  %v4594_v28 = vsel %vm4593_vm15, %v4592_v0, %v4587_v63  ;;  %4331 = vadd.xlane.f32.xlu0 %v4127_v2  ;;  %v3989_v2 = vld [vmem:[#allocation2 + $0x290] sm:$0xff] }
 0x438   : > { %v4194_v7 = vpop.xlane.xlu1 %4193  ;;  %v4601_v13 = vsel %vm4600_vm0, %v4599_v58, %v4594_v28  ;;  %v4192_v24 = vpop.xlane.xlu0 %4191  ;;  %v10331_v58 = vsub.s32 %v4630_v43, %v8647_v39  ;;  %v4133_v0 = vmul.f32 %v10153_v26, %v3989_v2 }
 0x439   : > { %v4613_v5 = vrot.slane %v4194_v7, %v10297_v34  ;;  %v4606_v23 = vrot.slane %v4192_v24, %v10303_v25  ;;  %v10345_v24 = vsub.s32 %v4644_v47, %v8647_v39 }
 0x43b   : > { %4337 = vadd.xlane.f32.xlu1 %v4130_v3  ;;  %v4608_v38 = vsel %vm4607_vm1, %v4606_v23, %v4601_v13  ;;  %4335 = vadd.xlane.f32.xlu0 %v4129_v18  ;;  %v10340_v18 = vsub.s32 %v4651_v53, %v8647_v39 }
 0x43c   : > { %v4198_v40 = vpop.xlane.xlu1 %4197  ;;  %v4615_v50 = vsel %vm4614_vm4, %v4613_v5, %v4608_v38  ;;  %v4196_v51 = vpop.xlane.xlu0 %4195  ;;  %v4665_v5 = vadd.s32 4294967176, %v8631_v17  ;;  %v3994_v38 = vld [vmem:[#allocation2 + $0x2b8] sm:$0xff]  ;;  %v3993_v17 = vld [vmem:[#allocation2 + $0x2b0] sm:$0xff] }
 0x43d   : > { %v4627_v49 = vrot.slane %v4198_v40, %v10312_v19  ;;  %v4620_v56 = vrot.slane %v4196_v51, %v10317_v27  ;;  %v10358_v51 = vsub.s32 %v4658_v21, %v8647_v39  ;;  %v4138_v2 = vmul.f32 %v10171_v52, %v3994_v38 }
 0x43e   : > { %v4137_v47 = vmul.f32 %v10173_v55, %v3993_v17 }
 0x43f   : > { %4341 = vadd.xlane.f32.xlu1 %v4132_v33  ;;  %v4622_v36 = vsel %vm4621_vm5, %v4620_v56, %v4615_v50  ;;  %4339 = vadd.xlane.f32.xlu0 %v4131_v44  ;;  %v4135_v33 = vmul.f32 %v10167_v46, %v3991_v16  ;;  %v4139_v16 = vmul.f32 %v10179_v59, %v3995_v37 }
 0x440   : > { %v4202_v63 = vpop.xlane.xlu1 %4201  ;;  %v4629_v28 = vsel %vm4628_vm6, %v4627_v49, %v4622_v36  ;;  %v4200_v7 = vpop.xlane.xlu0 %4199  ;;  %v10354_v49 = vsub.s32 %v4665_v5, %v8647_v39  ;;  %v3998_v5 = vld [vmem:[#allocation2 + $0x2d8] sm:$0xff] }
 0x441   : > { %v4641_v3 = vrot.slane %v4202_v63, %v10326_v54  ;;  %v4634_v13 = vrot.slane %v4200_v7, %v10331_v58 }
 0x443   : > { %4345 = vadd.xlane.f32.xlu1 %v4134_v48  ;;  %v4636_v23 = vsel %vm11381_vm7, %v4634_v13, %v4629_v28  ;;  %4343 = vadd.xlane.f32.xlu0 %v4133_v0  ;;  %v3996_v48 = vld [vmem:[#allocation2 + $0x2c8] sm:$0xff] }
 0x444   : > { %v4206_v43 = vpop.xlane.xlu1 %4205  ;;  %v4643_v44 = vsel %vm4642_vm8, %v4641_v3, %v4636_v23  ;;  %v4204_v9 = vpop.xlane.xlu0 %4203  ;;  %v4140_v3 = vmul.f32 %v10177_v57, %v3996_v48  ;;  %v3997_v23 = vld [vmem:[#allocation2 + $0x2d0] sm:$0xff] }
 0x445   : > { %v4655_v40 = vrot.slane %v4206_v43, %v10340_v18  ;;  %v4648_v50 = vrot.slane %v4204_v9, %v10345_v24  ;;  %v4000_v9 = vld [vmem:[#allocation2 + $0x2e8] sm:$0xff] }
 0x447   : > { %4349 = vadd.xlane.f32.xlu1 %v4136_v22  ;;  %v4650_v53 = vsel %vm4649_vm9, %v4648_v50, %v4643_v44  ;;  %4347 = vadd.xlane.f32.xlu0 %v4135_v33  ;;  %v4142_v33 = vmul.f32 %v10183_v8, %v3998_v5  ;;  %v4141_v44 = vmul.f32 %v10185_v62, %v3997_v23 }
 0x448   : > { %v4210_v56 = vpop.xlane.xlu1 %4209  ;;  %v4657_v63 = vsel %vm4656_vm2, %v4655_v40, %v4650_v53  ;;  %v4208_v0 = vpop.xlane.xlu0 %4207 }
 0x449   : > { %v4669_v36 = vrot.slane %v4210_v56, %v10354_v49  ;;  %v4662_v39 = vrot.slane %v4208_v0, %v10358_v51  ;;  %v4144_v56 = vmul.f32 %v10189_v31, %v4000_v9 }
 0x44b   : > { %4353 = vadd.xlane.f32.xlu1 %v4138_v2  ;;  %v4664_v28 = vsel %vm4663_vm3, %v4662_v39, %v4657_v63  ;;  %4351 = vadd.xlane.f32.xlu0 %v4137_v47  ;;  %v3999_v2 = vld [vmem:[#allocation2 + $0x2e0] sm:$0xff]  ;;  %v4002_v63 = vld [vmem:[#allocation2 + $0x2f8] sm:$0xff] }
 0x44c   : > { %v4214_v7 = vpop.xlane.xlu1 %4213  ;;  %v10370_v13 = vsel %vm4670_vm10, %v4669_v36, %v4664_v28  ;;  %v4212_v22 = vpop.xlane.xlu0 %4211  ;;  %v4143_v36 = vmul.f32 %v10191_v41, %v3999_v2  ;;  %v4006_v2 = vld [vmem:[#allocation2 + $0x318] sm:$0xff] }
 0x44d   : > { %v4679_v21 = vrot.slane %v4214_v7, %v10272_v12  ;;  %v4675_v43 = vrot.slane %v4212_v22, %v10266_v6  ;;  %v4146_v7 = vmul.f32 %v10195_v10, %v4002_v63  ;;  %v4004_v22 = vld [vmem:[#allocation2 + $0x308] sm:$0xff]  ;;  %v4150_v63 = vmul.f32 %v10159_v32, %v4006_v2 }
 0x44e   : > { %v4012_v2 = vld [vmem:[#allocation2 + $0x348] sm:$0xff] }
 0x44f   : > { %4357 = vadd.xlane.f32.xlu1 %v4140_v3  ;;  %v4680_v38 = vsel %vm4572_vm12, %v4679_v21, %v4675_v43  ;;  %4355 = vadd.xlane.f32.xlu0 %v4139_v16  ;;  %v4001_v3 = vld [vmem:[#allocation2 + $0x2f0] sm:$0xff] }
 0x450   : > { %v4218_v40 = vpop.xlane.xlu1 %4217  ;;  %v4216_v50 = vpop.xlane.xlu0 %4215  ;;  %v4145_v21 = vmul.f32 %v10197_v14, %v4001_v3  ;;  %v4008_v3 = vld [vmem:[#allocation2 + $0x328] sm:$0xff] }
 0x451   : > { %v4689_v17 = vrot.slane %v4218_v40, %v10269_v11  ;;  %v4684_v53 = vrot.slane %v4216_v50, %v10275_v15 }
 0x453   : > { %4361 = vadd.xlane.f32.xlu1 %v4142_v33  ;;  %v4685_v47 = vsel %vm4579_vm13, %v4684_v53, %v4680_v38  ;;  %4359 = vadd.xlane.f32.xlu0 %v4141_v44  ;;  %v10390_v38 = vld [vmem:[#allocation2 + $0x300] sm:$0xff]  ;;  %v4148_v44 = vmul.f32 %v10162_v4, %v4004_v22 }
 0x454   : > { %v4222_v48 = vpop.xlane.xlu1 %4221  ;;  %v4690_v37 = vsel %vm4586_vm14, %v4689_v17, %v4685_v47  ;;  %v4220_v39 = vpop.xlane.xlu0 %4219  ;;  %v4147_v50 = vmul.f32 %v10156_v30, %v10390_v38 }
 0x455   : > { %v4699_v0 = vrot.slane %v4222_v48, %v10280_v29  ;;  %v4694_v28 = vrot.slane %v4220_v39, %v10283_v42  ;;  %v4005_v48 = vld [vmem:[#allocation2 + $0x310] sm:$0xff] }
 0x456   : > { %v4149_v39 = vmul.f32 %v10153_v26, %v4005_v48  ;;  %v4011_v48 = vld [vmem:[#allocation2 + $0x340] sm:$0xff] }
 0x457   : > { %4365 = vadd.xlane.f32.xlu1 %v4144_v56  ;;  %v4695_v16 = vsel %vm4593_vm15, %v4694_v28, %v4690_v37  ;;  %4363 = vadd.xlane.f32.xlu0 %v4143_v36 }
 0x458   : > { %v4226_v5 = vpop.xlane.xlu1 %4225  ;;  %v4700_v43 = vsel %vm4600_vm0, %v4699_v0, %v4695_v16  ;;  %v4224_v33 = vpop.xlane.xlu0 %4223  ;;  %v10405_v16 = vld [vmem:[#allocation2 + $0x320] sm:$0xff] }
 0x459   : > { %v4709_v23 = vrot.slane %v4226_v5, %v10297_v34  ;;  %v4704_v40 = vrot.slane %v4224_v33, %v10303_v25  ;;  %v4151_v26 = vmul.f32 %v10167_v46, %v10405_v16 }
 0x45b   : > { %4369 = vadd.xlane.f32.xlu1 %v4146_v7  ;;  %v4705_v9 = vsel %vm4607_vm1, %v4704_v40, %v4700_v43  ;;  %4367 = vadd.xlane.f32.xlu0 %v4145_v21  ;;  %v4152_v21 = vmul.f32 %v10165_v45, %v4008_v3 }
 0x45c   : > { %v4230_v17 = vpop.xlane.xlu1 %4229  ;;  %v4710_v56 = vsel %vm4614_vm4, %v4709_v23, %v4705_v9  ;;  %v4228_v47 = vpop.xlane.xlu0 %4227  ;;  %v4010_v23 = vld [vmem:[#allocation2 + $0x338] sm:$0xff] }
 0x45d   : > { %v4719_v53 = vrot.slane %v4230_v17, %v10312_v19  ;;  %v4714_v36 = vrot.slane %v4228_v47, %v10317_v27  ;;  %v4154_v45 = vmul.f32 %v10171_v52, %v4010_v23  ;;  %v4156_v52 = vmul.f32 %v10177_v57, %v4012_v2  ;;  %v4015_v23 = vld [vmem:[#allocation2 + $0x360] sm:$0xff] }
 0x45f   : > { %4373 = vadd.xlane.f32.xlu1 %v4148_v44  ;;  %v4715_v0 = vsel %vm4621_vm5, %v4714_v36, %v4710_v56  ;;  %4371 = vadd.xlane.f32.xlu0 %v4147_v50  ;;  %v10414_v44 = vld [vmem:[#allocation2 + $0x330] sm:$0xff] }
 0x460   : > { %v4234_v37 = vpop.xlane.xlu1 %4233  ;;  %v4720_v28 = vsel %vm4628_vm6, %v4719_v53, %v4715_v0  ;;  %v4232_v7 = vpop.xlane.xlu0 %4231  ;;  %v4153_v46 = vmul.f32 %v10173_v55, %v10414_v44  ;;  %v4014_v55 = vld [vmem:[#allocation2 + $0x358] sm:$0xff] }
 0x461   : > { %v4729_v30 = vrot.slane %v4234_v37, %v10326_v54  ;;  %v4724_v5 = vrot.slane %v4232_v7, %v10331_v58  ;;  %v4155_v37 = vmul.f32 %v10179_v59, %v4011_v48  ;;  %v4158_v57 = vmul.f32 %v10183_v8, %v4014_v55  ;;  %v4020_v48 = vld [vmem:[#allocation2 + $0x388] sm:$0xff] }
 0x463   : > { %4377 = vadd.xlane.f32.xlu1 %v4150_v63  ;;  %v4725_v32 = vsel %vm11381_vm7, %v4724_v5, %v4720_v28  ;;  %4375 = vadd.xlane.f32.xlu0 %v4149_v39 }
 0x464   : > { %v4238_v22 = vpop.xlane.xlu1 %4237  ;;  %v4730_v33 = vsel %vm4642_vm8, %v4729_v30, %v4725_v32  ;;  %v4236_v40 = vpop.xlane.xlu0 %4235  ;;  %v4013_v30 = vld [vmem:[#allocation2 + $0x350] sm:$0xff]  ;;  %v4016_v32 = vld [vmem:[#allocation2 + $0x368] sm:$0xff] }
 0x465   : > { %v4739_v43 = vrot.slane %v4238_v22, %v10340_v18  ;;  %v4734_v9 = vrot.slane %v4236_v40, %v10345_v24  ;;  %v4157_v59 = vmul.f32 %v10185_v62, %v4013_v30 }
 0x467   : > { %4381 = vadd.xlane.f32.xlu1 %v4152_v21  ;;  %v4735_v17 = vsel %vm4649_vm9, %v4734_v9, %v4730_v33  ;;  %4379 = vadd.xlane.f32.xlu0 %v4151_v26  ;;  %v4160_v33 = vmul.f32 %v10189_v31, %v4016_v32  ;;  %v4159_v9 = vmul.f32 %v10191_v41, %v4015_v23 }
 0x468   : > { %v4242_v50 = vpop.xlane.xlu1 %4241  ;;  %v4740_v56 = vsel %vm4656_vm2, %v4739_v43, %v4735_v17  ;;  %v4240_v47 = vpop.xlane.xlu0 %4239 }
 0x469   : > { %v4749_v53 = vrot.slane %v4242_v50, %v10354_v49  ;;  %v4744_v36 = vrot.slane %v4240_v47, %v10358_v51 }
 0x46b   : > { %4385 = vadd.xlane.f32.xlu1 %v4154_v45  ;;  %v4745_v63 = vsel %vm4663_vm3, %v4744_v36, %v4740_v56  ;;  %4383 = vadd.xlane.f32.xlu0 %v4153_v46  ;;  %v4018_v45 = vld [vmem:[#allocation2 + $0x378] sm:$0xff]  ;;  %v4017_v46 = vld [vmem:[#allocation2 + $0x370] sm:$0xff] }
 0x46c   : > { %v4246_v0 = vpop.xlane.xlu1 %4245  ;;  %v4750_v39 = vsel %vm4670_vm10, %v4749_v53, %v4745_v63  ;;  %v4244_v3 = vpop.xlane.xlu0 %4243  ;;  %v4162_v53 = vmul.f32 %v10195_v10, %v4018_v45  ;;  %v4161_v47 = vmul.f32 %v10197_v14, %v4017_v46  ;;  %v10450_v63 = vld [vmem:[#allocation2 + $0x380] sm:$0xff]  ;;  %v7826_v45 = vld [vmem:[#allocation9 + $0x28] sm:$0xff] }
 0x46d   : > { %v10430_v28 = vsel %vm11365_vm11, %v4750_v39, %v10370_v13  ;;  %v4758_v7 = vrot.slane %v4246_v0, %v10272_v12  ;;  %v4754_v5 = vrot.slane %v4244_v3, %v10266_v6  ;;  %v7823_v39 = vld [vmem:[#allocation9] sm:$0xff]  ;;  %v4022_v3 = vld [vmem:[#allocation2 + $0x398] sm:$0xff]  ;;  %vm11366_vm11 = vcmask 1042434  }
 0x46e   : > { %v4163_v14 = vmul.f32 %v7823_v39, %v10450_v63  ;;  %v7827_v46 = vld [vmem:[#allocation9 + $0x20] sm:$0xff]  ;;  %v4028_v39 = vld [vmem:[#allocation2 + $0x3c8] sm:$0xff] }
 0x46f   : > { %4389 = vadd.xlane.f32.xlu1 %v4156_v52  ;;  %4387 = vadd.xlane.f32.xlu0 %v4155_v37  ;;  %v4759_v13 = vsel %vm4572_vm12, %v4758_v7, %v4754_v5  ;;  %v4164_v37 = vmul.f32 %v10162_v4, %v4020_v48  ;;  %v10472_v48 = vld [vmem:[#allocation2 + $0x3b0] sm:$0xff] }
 0x470   : > { %v4250_v21 = vpop.xlane.xlu1 %4249  ;;  %v4248_v26 = vpop.xlane.xlu0 %4247 }
 0x471   : > { %v4768_v22 = vrot.slane %v4250_v21, %v10269_v11  ;;  %v4763_v43 = vrot.slane %v4248_v26, %v10275_v15  ;;  %v7825_v26 = vld [vmem:[#allocation9 + $0x10] sm:$0xff] }
 0x473   : > { %4393 = vadd.xlane.f32.xlu1 %v4158_v57  ;;  %v4764_v40 = vsel %vm4579_vm13, %v4763_v43, %v4759_v13  ;;  %4391 = vadd.xlane.f32.xlu0 %v4157_v59  ;;  %v10458_v57 = vld [vmem:[#allocation2 + $0x390] sm:$0xff]  ;;  %v7824_v59 = vld [vmem:[#allocation9 + $0x18] sm:$0xff]  ;;  %v4024_v43 = vld [vmem:[#allocation2 + $0x3a8] sm:$0xff] }
 0x474   : > { %v4254_v8 = vpop.xlane.xlu1 %4253  ;;  %v4769_v17 = vsel %vm4586_vm14, %v4768_v22, %v4764_v40  ;;  %v4252_v50 = vpop.xlane.xlu0 %4251  ;;  %v4166_v4 = vmul.f32 %v7824_v59, %v4022_v3  ;;  %v4165_v23 = vmul.f32 %v7825_v26, %v10458_v57 }
 0x475   : > { %v4778_v62 = vrot.slane %v4254_v8, %v10280_v29  ;;  %v4773_v2 = vrot.slane %v4252_v50, %v10283_v42  ;;  %v10465_v8 = vld [vmem:[#allocation2 + $0x3a0] sm:$0xff] }
 0x477   : > { %4397 = vadd.xlane.f32.xlu1 %v4160_v33  ;;  %v4774_v31 = vsel %vm4593_vm15, %v4773_v2, %v4769_v17  ;;  %4395 = vadd.xlane.f32.xlu0 %v4159_v9  ;;  %v4167_v2 = vmul.f32 %v7827_v46, %v10465_v8  ;;  %v7833_v46 = vld [vmem:[#allocation9 + $0x50] sm:$0xff] }
 0x478   : > { %v4258_v56 = vpop.xlane.xlu1 %4257  ;;  %v4779_v36 = vsel %vm4600_vm0, %v4778_v62, %v4774_v31  ;;  %v4256_v52 = vpop.xlane.xlu0 %4255  ;;  %v4168_v62 = vmul.f32 %v7826_v45, %v4024_v43 }
 0x479   : > { %v4788_v41 = vrot.slane %v4258_v56, %v10297_v34  ;;  %v4783_v0 = vrot.slane %v4256_v52, %v10303_v25 }
 0x47b   : > { %4401 = vadd.xlane.f32.xlu1 %v4162_v53  ;;  %v4784_v10 = vsel %vm4607_vm1, %v4783_v0, %v4779_v36  ;;  %4399 = vadd.xlane.f32.xlu0 %v4161_v47  ;;  %v4026_v53 = vld [vmem:[#allocation2 + $0x3b8] sm:$0xff] }
 0x47c   : > { %v4262_v55 = vpop.xlane.xlu1 %4261  ;;  %v4789_v7 = vsel %vm4614_vm4, %v4788_v41, %v4784_v10  ;;  %v4260_v5 = vpop.xlane.xlu0 %4259  ;;  %v7828_v36 = vld [vmem:[#allocation9 + $0x38] sm:$0xff]  ;;  %v7829_v10 = vld [vmem:[#allocation9 + $0x30] sm:$0xff] }
 0x47d   : > { %v4798_v30 = vrot.slane %v4262_v55, %v10312_v19  ;;  %v4793_v21 = vrot.slane %v4260_v5, %v10317_v27  ;;  %v4170_v52 = vmul.f32 %v7828_v36, %v4026_v53  ;;  %v4169_v55 = vmul.f32 %v7829_v10, %v10472_v48  ;;  %v10494_v53 = vld [vmem:[#allocation2 + $0x3e8] sm:$0xff]  ;;  %v7835_v10 = vld [vmem:[#allocation9 + $0x60] sm:$0xff] }
 0x47e   : > { %11417 = vst [vmem:[#allocation25_spill] sm:$0xff] %v10494_v53  ;;  %v7834_v36 = vld [vmem:[#allocation9 + $0x68] sm:$0xff] }
 0x47f   : > { %4405 = vadd.xlane.f32.xlu1 %v4164_v37  ;;  %v4794_v32 = vsel %vm4621_vm5, %v4793_v21, %v4789_v7  ;;  %4403 = vadd.xlane.f32.xlu0 %v4163_v14  ;;  %v10479_v7 = vld [vmem:[#allocation2 + $0x3c0] sm:$0xff]  ;;  %v7830_v21 = vld [vmem:[#allocation9 + $0x48] sm:$0xff] }
 0x480   : > { %v4266_v22 = vpop.xlane.xlu1 %4265  ;;  %v4799_v33 = vsel %vm4628_vm6, %v4798_v30, %v4794_v32  ;;  %v4264_v40 = vpop.xlane.xlu0 %4263  ;;  %v4172_v59 = vmul.f32 %v7830_v21, %v4028_v39  ;;  %v4034_v39 = vld [vmem:[#allocation2 + $0x3f8] sm:$0xff] }
 0x481   : > { %v4808_v13 = vrot.slane %v4266_v22, %v10326_v54  ;;  %v4803_v9 = vrot.slane %v4264_v40, %v10331_v58  ;;  %v7831_v22 = vld [vmem:[#allocation9 + $0x40] sm:$0xff] }
 0x482   : > { %v4171_v26 = vmul.f32 %v7831_v22, %v10479_v7 }
 0x483   : > { %4409 = vadd.xlane.f32.xlu1 %v4166_v4  ;;  %v4804_v17 = vsel %vm11381_vm7, %v4803_v9, %v4799_v33  ;;  %4407 = vadd.xlane.f32.xlu0 %v4165_v23  ;;  %v4030_v23 = vld [vmem:[#allocation2 + $0x3d8] sm:$0xff]  ;;  %v10485_v33 = vld [vmem:[#allocation2 + $0x3d0] sm:$0xff] }
 0x484   : > { %v4270_v50 = vpop.xlane.xlu1 %4269  ;;  %v4809_v56 = vsel %vm4642_vm8, %v4808_v13, %v4804_v17  ;;  %v4268_v47 = vpop.xlane.xlu0 %4267  ;;  %11416 = vst [vmem:[#allocation24_spill] sm:$0xff] %v10485_v33 }
 0x485   : > { %v4818_v31 = vrot.slane %v4270_v50, %v10340_v18  ;;  %v4813_v41 = vrot.slane %v4268_v47, %v10345_v24  ;;  %v4031_v47 = vld [vmem:[#allocation2 + $0x3e0] sm:$0xff] }
 0x487   : > { %4413 = vadd.xlane.f32.xlu1 %v4168_v62  ;;  %v4814_v0 = vsel %vm4649_vm9, %v4813_v41, %v4809_v56  ;;  %4411 = vadd.xlane.f32.xlu0 %v4167_v2  ;;  %v7832_v62 = vld [vmem:[#allocation9 + $0x58] sm:$0xff]  ;;  %v4173_v2 = vmul.f32 %v7833_v46, %v10485_v33  ;;  %v10514_v46 = vld [vmem:[#allocation10 + $0x10] sm:$0xff] }
 0x488   : > { %v4274_v37 = vpop.xlane.xlu1 %4273  ;;  %v4819_v3 = vsel %vm4656_vm2, %v4818_v31, %v4814_v0  ;;  %v4272_v30 = vpop.xlane.xlu0 %4271  ;;  %v4174_v17 = vmul.f32 %v7832_v62, %v4030_v23  ;;  %v7837_v23 = vld [vmem:[#allocation9 + $0x70] sm:$0xff] }
 0x489   : > { %v4828_v14 = vrot.slane %v4274_v37, %v10354_v49  ;;  %v4823_v5 = vrot.slane %v4272_v30, %v10358_v51 }
 0x48b   : > { %4417 = vadd.xlane.f32.xlu1 %v4170_v52  ;;  %v4824_v4 = vsel %vm4663_vm3, %v4823_v5, %v4819_v3  ;;  %4415 = vadd.xlane.f32.xlu0 %v4169_v55  ;;  %v4176_v52 = vmul.f32 %v7834_v36, %v10494_v53  ;;  %v4175_v55 = vmul.f32 %v7835_v10, %v4031_v47  ;;  %v10503_v5 = vld [vmem:[#allocation2 + $0x3f0] sm:$0xff] }
 0x48c   : > { %v4278_v32 = vpop.xlane.xlu1 %4277  ;;  %v4829_v43 = vsel %vm4670_vm10, %v4828_v14, %v4824_v4  ;;  %v4276_v13 = vpop.xlane.xlu0 %4275  ;;  %11418 = vst [vmem:[#allocation26_spill] sm:$0xff] %v10503_v5  ;;  %v7839_v36 = vld [vmem:[#allocation2 + $0x10] sm:$0xff] }
 0x48d   : > { %v10489_v40 = vsel %vm11366_vm11, %v4829_v43, %v10430_v28  ;;  %v4837_v9 = vrot.slane %v4278_v32, %v10272_v12  ;;  %v4833_v45 = vrot.slane %v4276_v13, %v10266_v6  ;;  %v10506_v32 = vld [vmem:[#allocation10] sm:$0xff]  ;;  %v4177_v43 = vmul.f32 %v7837_v23, %v10503_v5  ;;  %v10671_v5 = vld [vmem:[#allocation10 + $0x18] sm:$0xff] }
 0x48e   : > { %vm11367_vm11 = vcmask 1043459  }
 0x48f   : > { %4421 = vadd.xlane.f32.xlu1 %v4172_v59  ;;  %4419 = vadd.xlane.f32.xlu0 %v4171_v26  ;;  %v4838_v41 = vsel %vm4572_vm12, %v4837_v9, %v4833_v45  ;;  %v7836_v59 = vld [vmem:[#allocation9 + $0x78] sm:$0xff] }
 0x490   : > { %v4282_v50 = vpop.xlane.xlu1 %4281  ;;  %v4280_v56 = vpop.xlane.xlu0 %4279  ;;  %v4178_v4 = vmul.f32 %v7836_v59, %v4034_v39  ;;  %v10528_v59 = vld [vmem:[#allocation10 + $0x30] sm:$0xff] }
 0x491   : > { %v4847_v31 = vrot.slane %v4282_v50, %v10269_v11  ;;  %v4842_v28 = vrot.slane %v4280_v56, %v10275_v15 }
 0x493   : > { %4425 = vadd.xlane.f32.xlu1 %v4174_v17  ;;  %v4843_v0 = vsel %vm4579_vm13, %v4842_v28, %v4838_v41  ;;  %4423 = vadd.xlane.f32.xlu0 %v4173_v2  ;;  %v7838_v17 = vld [vmem:[#allocation2] sm:$0xff] }
 0x494   : > { %v4286_v37 = vpop.xlane.xlu1 %4285  ;;  %v4848_v3 = vsel %vm4586_vm14, %v4847_v31, %v4843_v0  ;;  %v4284_v30 = vpop.xlane.xlu0 %4283  ;;  %v5258_v50 = vmul.f32 %v7838_v17, %v10506_v32  ;;  %v10521_v0 = vld [vmem:[#allocation10 + $0x20] sm:$0xff] }
 0x495   : > { %v4857_v14 = vrot.slane %v4286_v37, %v10280_v29  ;;  %v4852_v21 = vrot.slane %v4284_v30, %v10283_v42  ;;  %v7840_v30 = vld [vmem:[#allocation2 + $0x20] sm:$0xff] }
 0x497   : > { %4429 = vadd.xlane.f32.xlu1 %v4176_v52  ;;  %v4853_v22 = vsel %vm4593_vm15, %v4852_v21, %v4848_v3  ;;  %4427 = vadd.xlane.f32.xlu0 %v4175_v55  ;;  %v5260_v52 = vmul.f32 %v7839_v36, %v10514_v46  ;;  %v5262_v21 = vmul.f32 %v7840_v30, %v10521_v0  ;;  %v10542_v36 = vld [vmem:[#allocation10 + $0x50] sm:$0xff] }
 0x498   : > { %v4290_v26 = vpop.xlane.xlu1 %4289  ;;  %v4858_v9 = vsel %vm4600_vm0, %v4857_v14, %v4853_v22  ;;  %v4288_v45 = vpop.xlane.xlu0 %4287 }
 0x499   : > { %v4867_v13 = vrot.slane %v4290_v26, %v10297_v34  ;;  %v4862_v62 = vrot.slane %v4288_v45, %v10303_v25 }
 0x49b   : > { %4433 = vadd.xlane.f32.xlu1 %v4178_v4  ;;  %v4863_v2 = vsel %vm4607_vm1, %v4862_v62, %v4858_v9  ;;  %4431 = vadd.xlane.f32.xlu0 %v4177_v43  ;;  %v7841_v9 = vld [vmem:[#allocation2 + $0x30] sm:$0xff]  ;;  %v10535_v62 = vld [vmem:[#allocation10 + $0x40] sm:$0xff] }
 0x49c   : > { %v4294_v31 = vpop.xlane.xlu1 %4293  ;;  %v4868_v47 = vsel %vm4614_vm4, %v4867_v13, %v4863_v2  ;;  %v4292_v28 = vpop.xlane.xlu0 %4291  ;;  %v5264_v45 = vmul.f32 %v7841_v9, %v10528_v59 }
 0x49d   : > { %v4877_v56 = vrot.slane %v4294_v31, %v10312_v19  ;;  %v4872_v41 = vrot.slane %v4292_v28, %v10317_v27  ;;  %v7842_v28 = vld [vmem:[#allocation2 + $0x40] sm:$0xff] }
 0x49f   : > { %5386 = vadd.xlane.f32.xlu1 %v5258_v50  ;;  %v4873_v37 = vsel %vm4621_vm5, %v4872_v41, %v4868_v47  ;;  %v5266_v41 = vmul.f32 %v7842_v28, %v10535_v62  ;;  %v7845_v28 = vld [vmem:[#allocation2 + $0x70] sm:$0xff] }
 0x4a0   : > { %v4298_v10 = vpop.xlane.xlu1 %4297  ;;  %v4878_v39 = vsel %vm4628_vm6, %v4877_v56, %v4873_v37  ;;  %v4296_v14 = vpop.xlane.xlu0 %4295 }
 0x4a1   : > { %v4887_v55 = vrot.slane %v4298_v10, %v10326_v54  ;;  %v4882_v3 = vrot.slane %v4296_v14, %v10331_v58  ;;  %v7843_v14 = vld [vmem:[#allocation2 + $0x50] sm:$0xff] }
 0x4a3   : > { %5390 = vadd.xlane.f32.xlu1 %v5260_v52  ;;  %v4883_v4 = vsel %vm11381_vm7, %v4882_v3, %v4878_v39  ;;  %v5268_v3 = vmul.f32 %v7843_v14, %v10542_v36 }
 0x4a4   : > { %v4302_v22 = vpop.xlane.xlu1 %4301  ;;  %v4888_v23 = vsel %vm4642_vm8, %v4887_v55, %v4883_v4  ;;  %v4300_v43 = vpop.xlane.xlu0 %4299  ;;  %v10553_v4 = vld [vmem:[#allocation10 + $0x60] sm:$0xff] }
 0x4a5   : > { %v4897_v26 = vrot.slane %v4302_v22, %v10340_v18  ;;  %v4892_v13 = vrot.slane %v4300_v43, %v10345_v24 }
 0x4a7   : > { %5394 = vadd.xlane.f32.xlu1 %v5262_v21  ;;  %v4893_v17 = vsel %vm4649_vm9, %v4892_v13, %v4888_v23  ;;  %v7844_v13 = vld [vmem:[#allocation2 + $0x60] sm:$0xff] }
 0x4a8   : > { %v4306_v50 = vpop.xlane.xlu1 %4305  ;;  %v4898_v31 = vsel %vm4656_vm2, %v4897_v26, %v4893_v17  ;;  %v4304_v56 = vpop.xlane.xlu0 %4303 }
 0x4a9   : > { %v4907_v2 = vrot.slane %v4306_v50, %v10354_v49  ;;  %v4902_v47 = vrot.slane %v4304_v56, %v10358_v51 }
 0x4ab   : > { %5398 = vadd.xlane.f32.xlu1 %v5264_v45  ;;  %v4903_v52 = vsel %vm4663_vm3, %v4902_v47, %v4898_v31  ;;  %v10559_v45 = vld [vmem:[#allocation10 + $0x70] sm:$0xff] }
 0x4ac   : > { %v4310_v37 = vpop.xlane.xlu1 %4309  ;;  %v4908_v10 = vsel %vm4670_vm10, %v4907_v2, %v4903_v52  ;;  %v4308_v55 = vpop.xlane.xlu0 %4307  ;;  %11419 = vst [vmem:[#allocation27_spill] sm:$0xff] %v10559_v45 }
 0x4ad   : > { %v10548_v39 = vsel %vm11367_vm11, %v4908_v10, %v10489_v40  ;;  %v4916_v30 = vrot.slane %v4310_v37, %v10272_v12  ;;  %v4912_v21 = vrot.slane %v4308_v55, %v10266_v6  ;;  %v5270_v40 = vmul.f32 %v7844_v13, %v10553_v4 }
 0x4ae   : > { %vm11368_vm11 = vcmask 1044484  }
 0x4af   : > { %5402 = vadd.xlane.f32.xlu1 %v5266_v41  ;;  %v4917_v9 = vsel %vm4572_vm12, %v4916_v30, %v4912_v21  ;;  %v5272_v41 = vmul.f32 %v7845_v28, %v10559_v45  ;;  %v7846_v30 = vld [vmem:[#allocation2 + $0x80] sm:$0xff] }
 0x4b0   : > { %v4314_v22 = vpop.xlane.xlu1 %4313  ;;  %v4312_v23 = vpop.xlane.xlu0 %4311  ;;  %v5274_v21 = vmul.f32 %v7846_v30, %v10506_v32 }
 0x4b1   : > { %v4926_v26 = vrot.slane %v4314_v22, %v10269_v11  ;;  %v4921_v43 = vrot.slane %v4312_v23, %v10275_v15 }
 0x4b3   : > { %5406 = vadd.xlane.f32.xlu1 %v5268_v3  ;;  %v4922_v17 = vsel %vm4579_vm13, %v4921_v43, %v4917_v9  ;;  %v7847_v9 = vld [vmem:[#allocation2 + $0x90] sm:$0xff] }
 0x4b4   : > { %v4318_v50 = vpop.xlane.xlu1 %4317  ;;  %v4927_v31 = vsel %vm4586_vm14, %v4926_v26, %v4922_v17  ;;  %v4316_v56 = vpop.xlane.xlu0 %4315  ;;  %v5276_v17 = vmul.f32 %v7847_v9, %v10514_v46 }
 0x4b5   : > { %v4936_v2 = vrot.slane %v4318_v50, %v10280_v29  ;;  %v4931_v47 = vrot.slane %v4316_v56, %v10283_v42 }
 0x4b7   : > { %5410 = vadd.xlane.f32.xlu1 %v5270_v40  ;;  %v4932_v52 = vsel %vm4593_vm15, %v4931_v47, %v4927_v31 }
 0x4b8   : > { %v4322_v37 = vpop.xlane.xlu1 %4321  ;;  %v4937_v55 = vsel %vm4600_vm0, %v4936_v2, %v4932_v52  ;;  %v4320_v14 = vpop.xlane.xlu0 %4319 }
 0x4b9   : > { %v4946_v10 = vrot.slane %v4322_v37, %v10297_v34  ;;  %v4941_v3 = vrot.slane %v4320_v14, %v10303_v25 }
 0x4bb   : > { %5414 = vadd.xlane.f32.xlu1 %v5272_v41  ;;  %v4942_v22 = vsel %vm4607_vm1, %v4941_v3, %v4937_v55  ;;  %v7848_v41 = vld [vmem:[#allocation2 + $0xa0] sm:$0xff] }
 0x4bc   : > { %v4326_v26 = vpop.xlane.xlu1 %4325  ;;  %v4947_v43 = vsel %vm4614_vm4, %v4946_v10, %v4942_v22  ;;  %v4324_v13 = vpop.xlane.xlu0 %4323  ;;  %v5278_v52 = vmul.f32 %v7848_v41, %v10521_v0  ;;  %v7851_v41 = vld [vmem:[#allocation2 + $0xd0] sm:$0xff] }
 0x4bd   : > { %v4956_v23 = vrot.slane %v4326_v26, %v10312_v19  ;;  %v4951_v40 = vrot.slane %v4324_v13, %v10317_v27 }
 0x4bf   : > { %5418 = vadd.xlane.f32.xlu1 %v5274_v21  ;;  %v4952_v50 = vsel %vm4621_vm5, %v4951_v40, %v4947_v43  ;;  %v7849_v21 = vld [vmem:[#allocation2 + $0xb0] sm:$0xff] }
 0x4c0   : > { %v4330_v2 = vpop.xlane.xlu1 %4329  ;;  %v4957_v56 = vsel %vm4628_vm6, %v4956_v23, %v4952_v50  ;;  %v4328_v47 = vpop.xlane.xlu0 %4327  ;;  %v5280_v22 = vmul.f32 %v7849_v21, %v10528_v59  ;;  %v7852_v21 = vld [vmem:[#allocation2 + $0xe0] sm:$0xff] }
 0x4c1   : > { %v4966_v31 = vrot.slane %v4330_v2, %v10326_v54  ;;  %v4961_v28 = vrot.slane %v4328_v47, %v10331_v58 }
 0x4c3   : > { %5422 = vadd.xlane.f32.xlu1 %v5276_v17  ;;  %v4962_v37 = vsel %vm11381_vm7, %v4961_v28, %v4957_v56  ;;  %v7850_v17 = vld [vmem:[#allocation2 + $0xc0] sm:$0xff] }
 0x4c4   : > { %v4334_v10 = vpop.xlane.xlu1 %4333  ;;  %v4967_v14 = vsel %vm4642_vm8, %v4966_v31, %v4962_v37  ;;  %v4332_v3 = vpop.xlane.xlu0 %4331  ;;  %v5282_v50 = vmul.f32 %v7850_v17, %v10535_v62  ;;  %v7853_v17 = vld [vmem:[#allocation2 + $0xf0] sm:$0xff] }
 0x4c5   : > { %v4976_v55 = vrot.slane %v4334_v10, %v10340_v18  ;;  %v4971_v30 = vrot.slane %v4332_v3, %v10345_v24 }
 0x4c7   : > { %5426 = vadd.xlane.f32.xlu1 %v5278_v52  ;;  %v4972_v26 = vsel %vm4649_vm9, %v4971_v30, %v4967_v14  ;;  %v5284_v52 = vmul.f32 %v7851_v41, %v10542_v36 }
 0x4c8   : > { %v4338_v23 = vpop.xlane.xlu1 %4337  ;;  %v4977_v13 = vsel %vm4656_vm2, %v4976_v55, %v4972_v26  ;;  %v4336_v40 = vpop.xlane.xlu0 %4335 }
 0x4c9   : > { %v4986_v43 = vrot.slane %v4338_v23, %v10354_v49  ;;  %v4981_v9 = vrot.slane %v4336_v40, %v10358_v51 }
 0x4cb   : > { %5430 = vadd.xlane.f32.xlu1 %v5280_v22  ;;  %v4982_v2 = vsel %vm4663_vm3, %v4981_v9, %v4977_v13  ;;  %v5286_v22 = vmul.f32 %v7852_v21, %v10553_v4 }
 0x4cc   : > { %v4342_v31 = vpop.xlane.xlu1 %4341  ;;  %v4987_v56 = vsel %vm4670_vm10, %v4986_v43, %v4982_v2  ;;  %v4340_v47 = vpop.xlane.xlu0 %4339 }
 0x4cd   : > { %v10595_v28 = vsel %vm11368_vm11, %v4987_v56, %v10548_v39  ;;  %v4995_v37 = vrot.slane %v4342_v31, %v10272_v12  ;;  %v4991_v10 = vrot.slane %v4340_v47, %v10266_v6  ;;  %vm11380_vm11 = vcmask 1045509  }
 0x4cf   : > { %5434 = vadd.xlane.f32.xlu1 %v5282_v50  ;;  %v4996_v39 = vsel %vm4572_vm12, %v4995_v37, %v4991_v10  ;;  %v5288_v50 = vmul.f32 %v7853_v17, %v10559_v45  ;;  %v7854_v37 = vld [vmem:[#allocation2 + $0x100] sm:$0xff] }
 0x4d0   : > { %v4346_v55 = vpop.xlane.xlu1 %4345  ;;  %v4344_v3 = vpop.xlane.xlu0 %4343  ;;  %v5290_v10 = vmul.f32 %v7854_v37, %v10506_v32 }
 0x4d1   : > { %v5005_v14 = vrot.slane %v4346_v55, %v10269_v11  ;;  %v5000_v30 = vrot.slane %v4344_v3, %v10275_v15 }
 0x4d3   : > { %5438 = vadd.xlane.f32.xlu1 %v5284_v52  ;;  %v5001_v26 = vsel %vm4579_vm13, %v5000_v30, %v4996_v39  ;;  %v7855_v39 = vld [vmem:[#allocation2 + $0x110] sm:$0xff] }
 0x4d4   : > { %v4350_v23 = vpop.xlane.xlu1 %4349  ;;  %v5006_v13 = vsel %vm4586_vm14, %v5005_v14, %v5001_v26  ;;  %v4348_v40 = vpop.xlane.xlu0 %4347  ;;  %v5292_v26 = vmul.f32 %v7855_v39, %v10514_v46 }
 0x4d5   : > { %v5015_v43 = vrot.slane %v4350_v23, %v10280_v29  ;;  %v5010_v9 = vrot.slane %v4348_v40, %v10283_v42 }
 0x4d7   : > { %5442 = vadd.xlane.f32.xlu1 %v5286_v22  ;;  %v5011_v2 = vsel %vm4593_vm15, %v5010_v9, %v5006_v13 }
 0x4d8   : > { %v4354_v31 = vpop.xlane.xlu1 %4353  ;;  %v5016_v47 = vsel %vm4600_vm0, %v5015_v43, %v5011_v2  ;;  %v4352_v41 = vpop.xlane.xlu0 %4351 }
 0x4d9   : > { %v5025_v56 = vrot.slane %v4354_v31, %v10297_v34  ;;  %v5020_v52 = vrot.slane %v4352_v41, %v10303_v25 }
 0x4db   : > { %5446 = vadd.xlane.f32.xlu1 %v5288_v50  ;;  %v5021_v55 = vsel %vm4607_vm1, %v5020_v52, %v5016_v47  ;;  %v7856_v50 = vld [vmem:[#allocation2 + $0x120] sm:$0xff] }
 0x4dc   : > { %v4358_v14 = vpop.xlane.xlu1 %4357  ;;  %v5026_v30 = vsel %vm4614_vm4, %v5025_v56, %v5021_v55  ;;  %v4356_v21 = vpop.xlane.xlu0 %4355  ;;  %v5294_v2 = vmul.f32 %v7856_v50, %v10521_v0  ;;  %v7859_v50 = vld [vmem:[#allocation2 + $0x150] sm:$0xff] }
 0x4dd   : > { %v5035_v3 = vrot.slane %v4358_v14, %v10312_v19  ;;  %v5030_v22 = vrot.slane %v4356_v21, %v10317_v27 }
 0x4df   : > { %5450 = vadd.xlane.f32.xlu1 %v5290_v10  ;;  %v5031_v23 = vsel %vm4621_vm5, %v5030_v22, %v5026_v30  ;;  %v7857_v10 = vld [vmem:[#allocation2 + $0x130] sm:$0xff] }
 0x4e0   : > { %v4362_v43 = vpop.xlane.xlu1 %4361  ;;  %v5036_v40 = vsel %vm4628_vm6, %v5035_v3, %v5031_v23  ;;  %v4360_v9 = vpop.xlane.xlu0 %4359  ;;  %v5296_v55 = vmul.f32 %v7857_v10, %v10528_v59  ;;  %v7861_v10 = vld [vmem:[#allocation2 + $0x170] sm:$0xff] }
 0x4e1   : > { %v5045_v13 = vrot.slane %v4362_v43, %v10326_v54  ;;  %v5040_v17 = vrot.slane %v4360_v9, %v10331_v58 }
 0x4e3   : > { %5454 = vadd.xlane.f32.xlu1 %v5292_v26  ;;  %v5041_v31 = vsel %vm11381_vm7, %v5040_v17, %v5036_v40  ;;  %v7858_v26 = vld [vmem:[#allocation2 + $0x140] sm:$0xff] }
 0x4e4   : > { %v4366_v56 = vpop.xlane.xlu1 %4365  ;;  %v5046_v41 = vsel %vm4642_vm8, %v5045_v13, %v5041_v31  ;;  %v4364_v52 = vpop.xlane.xlu0 %4363  ;;  %v5298_v23 = vmul.f32 %v7858_v26, %v10535_v62 }
 0x4e5   : > { %v5055_v47 = vrot.slane %v4366_v56, %v10340_v18  ;;  %v5050_v37 = vrot.slane %v4364_v52, %v10345_v24 }
 0x4e7   : > { %5458 = vadd.xlane.f32.xlu1 %v5294_v2  ;;  %v5051_v14 = vsel %vm4649_vm9, %v5050_v37, %v5046_v41  ;;  %v5300_v2 = vmul.f32 %v7859_v50, %v10542_v36  ;;  %v7864_v50 = vld [vmem:[#allocation2 + $0x208] sm:$0xff] }
 0x4e8   : > { %v4370_v3 = vpop.xlane.xlu1 %4369  ;;  %v5056_v21 = vsel %vm4656_vm2, %v5055_v47, %v5051_v14  ;;  %v4368_v22 = vpop.xlane.xlu0 %4367  ;;  %v7860_v47 = vld [vmem:[#allocation2 + $0x160] sm:$0xff] }
 0x4e9   : > { %v5065_v30 = vrot.slane %v4370_v3, %v10354_v49  ;;  %v5060_v39 = vrot.slane %v4368_v22, %v10358_v51  ;;  %v5302_v41 = vmul.f32 %v7860_v47, %v10553_v4  ;;  %v7862_v3 = vld [vmem:[#allocation2 + $0x180] sm:$0xff] }
 0x4eb   : > { %5462 = vadd.xlane.f32.xlu1 %v5296_v55  ;;  %v5061_v43 = vsel %vm4663_vm3, %v5060_v39, %v5056_v21  ;;  %v5304_v55 = vmul.f32 %v7861_v10, %v10559_v45  ;;  %v7863_v39 = vld [vmem:[#allocation2 + $0x190] sm:$0xff]  ;;  %v5354_v45 = vmul.f32 %v10506_v32, %v10390_v38 }
 0x4ec   : > { %v4374_v13 = vpop.xlane.xlu1 %4373  ;;  %v4372_v40 = vpop.xlane.xlu0 %4371  ;;  %v5066_v9 = vsel %vm4670_vm10, %v5065_v30, %v5061_v43  ;;  %v5306_v30 = vmul.f32 %v7862_v3, %v10506_v32  ;;  %v5308_v26 = vmul.f32 %v7863_v39, %v10514_v46  ;;  %v7865_v10 = vld [vmem:[#allocation2 + $0x210] sm:$0xff] }
 0x4ed   : > { %v10638_v17 = vsel %vm11380_vm11, %v5066_v9, %v10595_v28  ;;  %v5074_v39 = vrot.slane %v4374_v13, %v10272_v12  ;;  %v5070_v1 = vrot.slane %v4372_v40, %v10266_v6  ;;  %vm5235_vm11 = vcmask 1046534  }
 0x4ef   : > { %5466 = vadd.xlane.f32.xlu1 %v5298_v23  ;;  %v10653_v23 = vld [vmem:[#allocation10 + $0x8] sm:$0xff]  ;;  %v5075_v60 = vsel %vm4572_vm12, %v5074_v39, %v5070_v1 }
 0x4f0   : > { %v4378_v31 = vpop.xlane.xlu1 %4377  ;;  %v4376_v56 = vpop.xlane.xlu0 %4375 }
 0x4f1   : > { %v5079_v53 = vrot.slane %v4376_v56, %v10275_v15  ;;  %v5084_v61 = vrot.slane %v4378_v31, %v10269_v11 }
 0x4f3   : > { %5470 = vadd.xlane.f32.xlu1 %v5300_v2  ;;  %v5323_v2 = vmul.f32 %v7864_v50, %v10653_v23  ;;  %v7866_v50 = vld [vmem:[#allocation2 + $0x288] sm:$0xff]  ;;  %v5080_v13 = vsel %vm4579_vm13, %v5079_v53, %v5075_v60 }
 0x4f4   : > { %v10642_v52 = vpop.xlane.xlu1 %4381  ;;  %v4380_v37 = vpop.xlane.xlu0 %4379  ;;  %v5085_v1 = vsel %vm4586_vm14, %v5084_v61, %v5080_v13  ;;  %v10688_v60 = vld [vmem:[#allocation10 + $0x28] sm:$0xff] }
 0x4f5   : > { %v5089_v40 = vrot.slane %v4380_v37, %v10283_v42 }
 0x4f7   : > { %5474 = vadd.xlane.f32.xlu1 %v5302_v41  ;;  %v5090_v53 = vsel %vm4593_vm15, %v5089_v40, %v5085_v1 }
 0x4f8   : > { %v10645_v14 = vpop.xlane.xlu1 %4385  ;;  %v4384_v28 = vpop.xlane.xlu0 %4383 }
 0x4f9   : > { %v5104_v13 = vrot.slane %v10645_v14, %v10297_v34 }
 0x4fb   : > { %5478 = vadd.xlane.f32.xlu1 %v5304_v55  ;;  %v5324_v55 = vmul.f32 %v7865_v10, %v10514_v46  ;;  %v7867_v10 = vld [vmem:[#allocation2 + $0x218] sm:$0xff] }
 0x4fc   : > { %v10648_v21 = vpop.xlane.xlu1 %4389  ;;  %v10650_v22 = vpop.xlane.xlu0 %4387 }
 0x4ff   : > { %5482 = vadd.xlane.f32.xlu1 %v5306_v30 }
 0x500   : > { %v10655_v43 = vpop.xlane.xlu1 %4393  ;;  %v10657_v9 = vpop.xlane.xlu0 %4391 }
 0x503   : > { %5486 = vadd.xlane.f32.xlu1 %v5308_v26  ;;  %v5339_v26 = vmul.f32 %v7866_v50, %v10653_v23 }
 0x504   : > { %v10660_v47 = vpop.xlane.xlu1 %4397  ;;  %v10662_v41 = vpop.xlane.xlu0 %4395 }
 0x507   : > { %5516 = vadd.xlane.f32.xlu1 %v5323_v2  ;;  %v5325_v2 = vmul.f32 %v7867_v10, %v10671_v5  ;;  %v5094_v10 = vrot.slane %v10642_v52, %v10280_v29  ;;  %v7868_v52 = vld [vmem:[#allocation2 + $0x1a8] sm:$0xff] }
 0x508   : > { %v10665_v3 = vpop.xlane.xlu1 %4401  ;;  %v10667_v30 = vpop.xlane.xlu0 %4399  ;;  %v5311_v61 = vmul.f32 %v7868_v52, %v10688_v60 }
 0x50b   : > { %5518 = vadd.xlane.f32.xlu1 %v5324_v55 }
 0x50c   : > { %v4406_v20 = vpop.xlane.xlu1 %4405  ;;  %v4404_v35 = vpop.xlane.xlu0 %4403 }
 0x50d   : > { %v5153_v33 = vrot.slane %v4406_v20, %v10272_v12  ;;  %v5149_v50 = vrot.slane %v4404_v35, %v10266_v6  ;;  %v5099_v20 = vrot.slane %v4384_v28, %v10303_v25 }
 0x50f   : > { %5548 = vadd.xlane.f32.xlu1 %v5339_v26  ;;  %v5154_v35 = vsel %vm4572_vm12, %v5153_v33, %v5149_v50  ;;  %v5109_v33 = vrot.slane %v10650_v22, %v10317_v27 }
 0x510   : > { %v4410_v56 = vpop.xlane.xlu1 %4409  ;;  %v4408_v55 = vpop.xlane.xlu0 %4407 }
 0x511   : > { %v5158_v31 = vrot.slane %v4408_v55, %v10275_v15  ;;  %v5163_v37 = vrot.slane %v4410_v56, %v10269_v11  ;;  %v5095_v55 = vsel %vm4600_vm0, %v5094_v10, %v5090_v53  ;;  %v5114_v10 = vrot.slane %v10648_v21, %v10312_v19 }
 0x512   : > { %v5100_v28 = vsel %vm4607_vm1, %v5099_v20, %v5095_v55  ;;  %v5124_v21 = vrot.slane %v10655_v43, %v10326_v54 }
 0x513   : > { %5520 = vadd.xlane.f32.xlu1 %v5325_v2  ;;  %v5159_v38 = vsel %vm4579_vm13, %v5158_v31, %v5154_v35  ;;  %v7869_v35 = vld [vmem:[#allocation2 + $0x298] sm:$0xff]  ;;  %v5105_v53 = vsel %vm4614_vm4, %v5104_v13, %v5100_v28  ;;  %v5129_v28 = vrot.slane %v10662_v41, %v10345_v24 }
 0x514   : > { %v4414_v39 = vpop.xlane.xlu1 %4413  ;;  %v4412_v26 = vpop.xlane.xlu0 %4411  ;;  %v5164_v50 = vsel %vm4586_vm14, %v5163_v37, %v5159_v38  ;;  %v5341_v14 = vmul.f32 %v7869_v35, %v10671_v5  ;;  %v5110_v22 = vsel %vm4621_vm5, %v5109_v33, %v5105_v53  ;;  %v5119_v37 = vrot.slane %v10657_v9, %v10331_v58 }
 0x515   : > { %v5168_v40 = vrot.slane %v4412_v26, %v10283_v42  ;;  %v5173_v2 = vrot.slane %v4414_v39, %v10280_v29  ;;  %v5115_v13 = vsel %vm4628_vm6, %v5114_v10, %v5110_v22  ;;  %v5139_v10 = vrot.slane %v10667_v30, %v10358_v51 }
 0x516   : > { %v5120_v9 = vsel %vm11381_vm7, %v5119_v37, %v5115_v13 }
 0x517   : > { %5578 = vadd.xlane.f32.xlu1 %v5354_v45  ;;  %v5169_v56 = vsel %vm4593_vm15, %v5168_v40, %v5164_v50  ;;  %v5370_v40 = vmul.f32 %v10506_v32, %v10450_v63  ;;  %v5134_v63 = vrot.slane %v10660_v47, %v10340_v18  ;;  %v5144_v47 = vrot.slane %v10665_v3, %v10354_v49 }
 0x518   : > { %v4418_v1 = vpop.xlane.xlu1 %4417  ;;  %v4416_v31 = vpop.xlane.xlu0 %4415  ;;  %v5174_v38 = vsel %vm4600_vm0, %v5173_v2, %v5169_v56  ;;  %v7870_v56 = vld [vmem:[#allocation2 + $0x1b0] sm:$0xff] }
 0x519   : > { %v5178_v20 = vrot.slane %v4416_v31, %v10303_v25  ;;  %v5183_v45 = vrot.slane %v4418_v1, %v10297_v34  ;;  %v5312_v1 = vmul.f32 %v7870_v56, %v10528_v59  ;;  %v5125_v31 = vsel %vm4642_vm8, %v5124_v21, %v5120_v9 }
 0x51a   : > { %v5130_v41 = vsel %vm4649_vm9, %v5129_v28, %v5125_v31  ;;  %v7873_v31 = vld [vmem:[#allocation2 + $0x230] sm:$0xff] }
 0x51b   : > { %5492 = vadd.xlane.f32.xlu1 %v5311_v61  ;;  %v5179_v39 = vsel %vm4607_vm1, %v5178_v20, %v5174_v38 }
 0x51c   : > { %v4422_v26 = vpop.xlane.xlu1 %4421  ;;  %v4420_v52 = vpop.xlane.xlu0 %4419  ;;  %v5184_v33 = vsel %vm4614_vm4, %v5183_v45, %v5179_v39  ;;  %v5135_v45 = vsel %vm4656_vm2, %v5134_v63, %v5130_v41  ;;  %v7871_v39 = vld [vmem:[#allocation2 + $0x2a0] sm:$0xff]  ;;  %v7874_v41 = vld [vmem:[#allocation2 + $0x18] sm:$0xff] }
 0x51d   : > { %v5188_v55 = vrot.slane %v4420_v52, %v10317_v27  ;;  %v5193_v61 = vrot.slane %v4422_v26, %v10312_v19  ;;  %v5342_v26 = vmul.f32 %v7871_v39, %v10521_v0  ;;  %v5140_v30 = vsel %vm4663_vm3, %v5139_v10, %v5135_v45  ;;  %v7878_v45 = vld [vmem:[#allocation2 + $0x2b0] sm:$0xff]  ;;  %v10771_v39 = vld [vmem:[#allocation10 + $0x48] sm:$0xff] }
 0x51e   : > { %v5145_v28 = vsel %vm4670_vm10, %v5144_v47, %v5140_v30  ;;  %v5358_v10 = vmul.f32 %v10521_v0, %v10405_v16 }
 0x51f   : > { %5552 = vadd.xlane.f32.xlu1 %v5341_v14  ;;  %v5189_v2 = vsel %vm4621_vm5, %v5188_v55, %v5184_v33  ;;  %v5372_v33 = vmul.f32 %v10514_v46, %v10458_v57  ;;  %v5261_v57 = vmul.f32 %v7874_v41, %v10671_v5  ;;  %v7886_v41 = vld [vmem:[#allocation2 + $0x2c0] sm:$0xff] }
 0x520   : > { %v4426_v43 = vpop.xlane.xlu1 %4425  ;;  %v4424_v50 = vpop.xlane.xlu0 %4423  ;;  %v5194_v53 = vsel %vm4628_vm6, %v5193_v61, %v5189_v2 }
 0x521   : > { %v5198_v35 = vrot.slane %v4424_v50, %v10331_v58  ;;  %v5203_v14 = vrot.slane %v4426_v43, %v10326_v54  ;;  %v5236_v50 = vsel %vm5235_vm11, %v5145_v28, %v10638_v17  ;;  %v10784_v28 = vld [vmem:[#allocation10 + $0x68] sm:$0xff] }
 0x523   : > { %5610 = vadd.xlane.f32.xlu1 %v5370_v40  ;;  %v5199_v20 = vsel %vm11381_vm7, %v5198_v35, %v5194_v53  ;;  %vm11382_vm7 = vcmask 1047559   ;;  %v5328_v35 = vmul.f32 %v7873_v31, %v10528_v59  ;;  %v7876_v53 = vld [vmem:[#allocation2 + $0x1c0] sm:$0xff]  ;;  %v7885_v31 = vld [vmem:[#allocation2 + $0x88] sm:$0xff] }
 0x524   : > { %v4430_v22 = vpop.xlane.xlu1 %4429  ;;  %v4428_v37 = vpop.xlane.xlu0 %4427  ;;  %v5204_v21 = vsel %vm4642_vm8, %v5203_v14, %v5199_v20  ;;  %v7875_v14 = vld [vmem:[#allocation2 + $0x28] sm:$0xff]  ;;  %v5314_v20 = vmul.f32 %v7876_v53, %v10535_v62 }
 0x525   : > { %v5208_v38 = vrot.slane %v4428_v37, %v10345_v24  ;;  %v5213_v52 = vrot.slane %v4430_v22, %v10340_v18  ;;  %v5263_v17 = vmul.f32 %v7875_v14, %v10688_v60  ;;  %v10767_v22 = vld [vmem:[#allocation10 + $0x38] sm:$0xff] }
 0x526   : > { %v7877_v37 = vld [vmem:[#allocation2 + $0x38] sm:$0xff] }
 0x527   : > { %5494 = vadd.xlane.f32.xlu1 %v5312_v1  ;;  %v5209_v13 = vsel %vm4649_vm9, %v5208_v38, %v5204_v21  ;;  %v7872_v1 = vld [vmem:[#allocation2 + $0x8] sm:$0xff]  ;;  %v5265_v47 = vmul.f32 %v7877_v37, %v10767_v22  ;;  %v5344_v38 = vmul.f32 %v7878_v45, %v10528_v59  ;;  %v10778_v21 = vld [vmem:[#allocation10 + $0x58] sm:$0xff] }
 0x528   : > { %v4434_v55 = vpop.xlane.xlu1 %4433  ;;  %v4432_v3 = vpop.xlane.xlu0 %4431  ;;  %v5214_v61 = vsel %vm4656_vm2, %v5213_v52, %v5209_v13  ;;  %v5259_v63 = vmul.f32 %v7872_v1, %v10653_v23  ;;  %v5374_v52 = vmul.f32 %v10521_v0, %v10465_v8  ;;  %v7880_v13 = vld [vmem:[#allocation2 + $0x58] sm:$0xff]  ;;  %v5360_v8 = vmul.f32 %v10528_v59, %v10414_v44  ;;  %v7884_v1 = vld [vmem:[#allocation2 + $0x1d0] sm:$0xff] }
 0x529   : > { %v5223_v40 = vrot.slane %v4434_v55, %v10354_v49  ;;  %v5218_v9 = vrot.slane %v4432_v3, %v10358_v51  ;;  %v5269_v55 = vmul.f32 %v7880_v13, %v10778_v21  ;;  %v7887_v44 = vld [vmem:[#allocation2 + $0x98] sm:$0xff] }
 0x52a   : > { %v5277_v14 = vmul.f32 %v7887_v44, %v10671_v5 }
 0x52b   : > { %5554 = vadd.xlane.f32.xlu1 %v5342_v26  ;;  %v5219_v2 = vsel %vm4663_vm3, %v5218_v9, %v5214_v61  ;;  %v7879_v26 = vld [vmem:[#allocation2 + $0x48] sm:$0xff] }
 0x52c   : > { %v5224_v43 = vsel %vm4670_vm10, %v5223_v40, %v5219_v2  ;;  %v10773_v16 = vpop.xlane.xlu1 %5386  ;;  %v5267_v30 = vmul.f32 %v7879_v26, %v10771_v39  ;;  %v7881_v40 = vld [vmem:[#allocation2 + $0x240] sm:$0xff]  ;;  %v7882_v61 = vld [vmem:[#allocation2 + $0x68] sm:$0xff]  ;;  %v10789_v2 = vld [vmem:[#allocation10 + $0x78] sm:$0xff] }
 0x52d   : > { %v5238_v56 = vsel %vm11382_vm7, %v5224_v43, %v5236_v50  ;;  %v5330_v3 = vmul.f32 %v7881_v40, %v10535_v62  ;;  %v7883_v50 = vld [vmem:[#allocation2 + $0x78] sm:$0xff]  ;;  %vm6441_vm7 = vcmask 130048  }
 0x52e   : > { %5240 = vadd.xlane.f32.xlu0 %v5238_v56  ;;  %v5273_v56 = vmul.f32 %v7883_v50, %v10789_v2 }
 0x52f   : > { %5614 = vadd.xlane.f32.xlu1 %v5372_v33  ;;  %v5271_v33 = vmul.f32 %v7882_v61, %v10784_v28  ;;  %v7894_v61 = vld [vmem:[#allocation2 + $0xd8] sm:$0xff] }
 0x530   : > { %v10782_v9 = vpop.xlane.xlu1 %5390 }
 0x532   : > { %5388 = vadd.xlane.f32.xlu0 %v5259_v63  ;;  %v5316_v63 = vmul.f32 %v7884_v1, %v10542_v36 }
 0x533   : > { %5526 = vadd.xlane.f32.xlu1 %v5328_v35  ;;  %v5275_v35 = vmul.f32 %v7885_v31, %v10653_v23  ;;  %v5378_v31 = vmul.f32 %v10535_v62, %v10479_v7 }
 0x534   : > { %v10791_v43 = vpop.xlane.xlu1 %5394 }
 0x536   : > { %5392 = vadd.xlane.f32.xlu0 %v5261_v57  ;;  %v5346_v57 = vmul.f32 %v7886_v41, %v10535_v62 }
 0x537   : > { %5586 = vadd.xlane.f32.xlu1 %v5358_v10 }
 0x538   : > { %v10797_v10 = vpop.xlane.xlu1 %5398 }
 0x53a   : > { %5396 = vadd.xlane.f32.xlu0 %v5263_v17  ;;  %v5376_v17 = vmul.f32 %v10528_v59, %v10472_v48  ;;  %v7892_v59 = vld [vmem:[#allocation2 + $0xc8] sm:$0xff] }
 0x53b   : > { %5498 = vadd.xlane.f32.xlu1 %v5314_v20  ;;  %v7888_v20 = vld [vmem:[#allocation2 + $0xa8] sm:$0xff]  ;;  %v5283_v13 = vmul.f32 %v7892_v59, %v10771_v39 }
 0x53c   : > { %v10802_v53 = vpop.xlane.xlu1 %5402  ;;  %v5279_v37 = vmul.f32 %v7888_v20, %v10688_v60 }
 0x53e   : > { %5400 = vadd.xlane.f32.xlu0 %v5265_v47  ;;  %v7889_v47 = vld [vmem:[#allocation2 + $0x250] sm:$0xff] }
 0x53f   : > { %5558 = vadd.xlane.f32.xlu1 %v5344_v38  ;;  %v5332_v45 = vmul.f32 %v7889_v47, %v10542_v36  ;;  %v7890_v38 = vld [vmem:[#allocation2 + $0xb8] sm:$0xff] }
 0x540   : > { %v5281_v26 = vmul.f32 %v7890_v38, %v10767_v22  ;;  %v11420_v38 = vld [vmem:[#allocation27_spill] sm:$0xff] }
 0x542   : > { %5404 = vadd.xlane.f32.xlu0 %v5267_v30  ;;  %v10807_v30 = vpop.xlane.xlu1 %5406 }
 0x543   : > { %5618 = vadd.xlane.f32.xlu1 %v5374_v52  ;;  %v7891_v52 = vld [vmem:[#allocation2 + $0x340] sm:$0xff] }
 0x544   : > { %v5362_v48 = vmul.f32 %v7891_v52, %v10535_v62  ;;  %v7902_v62 = vld [vmem:[#allocation2 + $0x1f0] sm:$0xff] }
 0x546   : > { %5408 = vadd.xlane.f32.xlu0 %v5269_v55  ;;  %v7893_v55 = vld [vmem:[#allocation2 + $0x1e0] sm:$0xff] }
 0x547   : > { %5530 = vadd.xlane.f32.xlu1 %v5330_v3  ;;  %v5318_v40 = vmul.f32 %v7893_v55, %v10553_v4  ;;  %v10812_v3 = vpop.xlane.xlu1 %5410 }
 0x54a   : > { %5412 = vadd.xlane.f32.xlu0 %v5271_v33  ;;  %v5285_v33 = vmul.f32 %v7894_v61, %v10778_v21  ;;  %v7905_v61 = vld [vmem:[#allocation2 + $0x138] sm:$0xff] }
 0x54b   : > { %5590 = vadd.xlane.f32.xlu1 %v5360_v8  ;;  %v7895_v8 = vld [vmem:[#allocation2 + $0x2d0] sm:$0xff] }
 0x54c   : > { %v5348_v50 = vmul.f32 %v7895_v8, %v10542_v36  ;;  %v11421_v8 = vld [vmem:[#allocation24_spill] sm:$0xff] }
 0x54e   : > { %5416 = vadd.xlane.f32.xlu0 %v5273_v56  ;;  %v7896_v56 = vld [vmem:[#allocation2 + $0xe8] sm:$0xff] }
 0x54f   : > { %5502 = vadd.xlane.f32.xlu1 %v5316_v63  ;;  %v5287_v1 = vmul.f32 %v7896_v56, %v10784_v28  ;;  %v10817_v63 = vpop.xlane.xlu1 %5414  ;;  %v6415_v56 = vld [vmem:[%s11422_s20] sm:$0x3] }
 0x552   : > { %5420 = vadd.xlane.f32.xlu0 %v5275_v35  ;;  %v7897_v35 = vld [vmem:[#allocation2 + $0xf8] sm:$0xff] }
 0x553   : > { %5562 = vadd.xlane.f32.xlu1 %v5346_v57  ;;  %v5289_v41 = vmul.f32 %v7897_v35, %v10789_v2  ;;  %v7898_v57 = vld [vmem:[#allocation2 + $0x260] sm:$0xff]  ;;  %v7907_v35 = vld [vmem:[#allocation2 + $0x270] sm:$0xff] }
 0x554   : > { %v5334_v44 = vmul.f32 %v7898_v57, %v10553_v4 }
 0x556   : > { %5424 = vadd.xlane.f32.xlu0 %v5277_v14  ;;  %v10823_v14 = vpop.xlane.xlu1 %5418 }
 0x557   : > { %5622 = vadd.xlane.f32.xlu1 %v5376_v17  ;;  %v7899_v17 = vld [vmem:[#allocation2 + $0x108] sm:$0xff] }
 0x558   : > { %v5291_v20 = vmul.f32 %v7899_v17, %v10653_v23 }
 0x55a   : > { %5428 = vadd.xlane.f32.xlu0 %v5279_v37  ;;  %v7900_v37 = vld [vmem:[#allocation2 + $0x350] sm:$0xff]  ;;  %v10829_v52 = vpop.xlane.xlu1 %5422 }
 0x55b   : > { %5534 = vadd.xlane.f32.xlu1 %v5332_v45  ;;  %v5364_v47 = vmul.f32 %v7900_v37, %v10542_v36  ;;  %v7901_v45 = vld [vmem:[#allocation2 + $0x118] sm:$0xff] }
 0x55c   : > { %v5293_v7 = vmul.f32 %v7901_v45, %v10671_v5  ;;  %v7909_v45 = vld [vmem:[#allocation2 + $0x360] sm:$0xff] }
 0x55e   : > { %5432 = vadd.xlane.f32.xlu0 %v5281_v26  ;;  %v5320_v26 = vmul.f32 %v7902_v62, %v11420_v38  ;;  %v11425_v62 = vld [vmem:[#allocation21_spill] sm:$0xff] }
 0x55f   : > { %5594 = vadd.xlane.f32.xlu1 %v5362_v48  ;;  %v7903_v48 = vld [vmem:[#allocation2 + $0x128] sm:$0xff] }
 0x560   : > { %v5295_v59 = vmul.f32 %v7903_v48, %v10688_v60  ;;  %v11426_v48 = vld [vmem:[#allocation20_spill] sm:$0xff] }
 0x562   : > { %5436 = vadd.xlane.f32.xlu0 %v5283_v13  ;;  %v7904_v13 = vld [vmem:[#allocation2 + $0x2e0] sm:$0xff] }
 0x563   : > { %5506 = vadd.xlane.f32.xlu1 %v5318_v40  ;;  %v5350_v55 = vmul.f32 %v7904_v13, %v10553_v4  ;;  %v10833_v40 = vpop.xlane.xlu1 %5426 }
 0x566   : > { %5440 = vadd.xlane.f32.xlu0 %v5285_v33  ;;  %v5297_v33 = vmul.f32 %v7905_v61, %v10767_v22  ;;  %v7910_v61 = vld [vmem:[#allocation2 + $0x168] sm:$0xff] }
 0x567   : > { %5566 = vadd.xlane.f32.xlu1 %v5348_v50  ;;  %v5380_v50 = vmul.f32 %v10542_v36, %v11421_v8  ;;  %v10843_v57 = vpop.xlane.xlu1 %5430  ;;  %v7908_v36 = vld [vmem:[#allocation2 + $0x158] sm:$0xff] }
 0x568   : > { %v7911_v8 = vld [vmem:[#allocation2 + $0x278] sm:$0xff] }
 0x56a   : > { %5444 = vadd.xlane.f32.xlu0 %v5287_v1  ;;  %v7906_v1 = vld [vmem:[#allocation2 + $0x148] sm:$0xff] }
 0x56b   : > { %5626 = vadd.xlane.f32.xlu1 %v5378_v31  ;;  %v5299_v31 = vmul.f32 %v7906_v1, %v10771_v39  ;;  %v10851_v13 = vpop.xlane.xlu1 %5434  ;;  %v7912_v1 = vld [vmem:[#allocation2 + $0x178] sm:$0xff] }
 0x56e   : > { %5448 = vadd.xlane.f32.xlu0 %v5289_v41  ;;  %v5336_v41 = vmul.f32 %v7907_v35, %v11420_v38 }
 0x56f   : > { %5538 = vadd.xlane.f32.xlu1 %v5334_v44  ;;  %v11423_v44 = vld [vmem:[#allocation23_spill] sm:$0xff]  ;;  %v10861_v35 = vpop.xlane.xlu1 %5438 }
 0x570   : > { %v6421_v17 = vrot.slane %v6415_v56, %v11423_v44 }
 0x572   : > { %5452 = vadd.xlane.f32.xlu0 %v5291_v20  ;;  %v11424_v20 = vld [vmem:[#allocation22_spill] sm:$0xff] }
 0x573   : > { %5598 = vadd.xlane.f32.xlu1 %v5364_v47  ;;  %v6426_v37 = vrot.slane %v6415_v56, %v11424_v20  ;;  %v5301_v47 = vmul.f32 %v7908_v36, %v10778_v21  ;;  %v7914_v36 = vld [vmem:[#allocation2 + $0x188] sm:$0xff] }
 0x576   : > { %5456 = vadd.xlane.f32.xlu0 %v5293_v7  ;;  %v5366_v7 = vmul.f32 %v7909_v45, %v10553_v4  ;;  %v7915_v45 = vld [vmem:[#allocation2 + $0x2f8] sm:$0xff] }
 0x577   : > { %5510 = vadd.xlane.f32.xlu1 %v5320_v26  ;;  %v6422_v26 = vsub.f32 %v6421_v17, %v11425_v62 }
 0x57a   : > { %5460 = vadd.xlane.f32.xlu0 %v5295_v59  ;;  %v6427_v59 = vsub.f32 %v6426_v37, %v11426_v48  ;;  %v6417_v37 = vld [vmem:[%s499_s12] sm:$0xff] }
 0x57b   : > { %5570 = vadd.xlane.f32.xlu1 %v5350_v55  ;;  %v6416_v55 = vld [vmem:[%s495_s23] sm:$0xff]  ;;  %v6433_v48 = vmul.f32 %v6417_v37, %v6417_v37 }
 0x57c   : > { %v6428_v4 = vmul.f32 %v6422_v26, %v6416_v55  ;;  %v6429_v56 = vmul.f32 %v6427_v59, %v6416_v55  ;;  %v10871_v55 = vpop.xlane.xlu1 %5442  ;;  %v7918_v37 = vld [vmem:[#allocation2 + $0x280] sm:$0xff] }
 0x57e   : > { %5464 = vadd.xlane.f32.xlu0 %v5297_v33  ;;  %v5303_v33 = vmul.f32 %v7910_v61, %v10784_v28  ;;  %v6430_v17 = vmul.f32 %v6428_v4, %v6428_v4  ;;  %v6431_v20 = vmul.f32 %v6429_v56, %v6429_v56  ;;  %v7916_v61 = vld [vmem:[#allocation2 + $0x200] sm:$0xff]  ;;  %v6435_v56 = vmul.f32 4.0, %v6422_v26 }
 0x57f   : > { %5630 = vadd.xlane.f32.xlu1 %v5380_v50  ;;  %v5337_v50 = vmul.f32 %v7911_v8, %v10789_v2  ;;  %v11427_v8 = vld [vmem:[#allocation25_spill] sm:$0xff] }
 0x580   : > { %v6432_v62 = vadd.f32 %v6431_v20, %v6430_v17  ;;  %v6437_v20 = vmul.f32 4.0, %v6427_v59 }
 0x582   : > { %5468 = vadd.xlane.f32.xlu0 %v5299_v31  ;;  %v5305_v31 = vmul.f32 %v7912_v1, %v10789_v2  ;;  %v6434_v4 = vsub.f32 %v6432_v62, %v6433_v48  ;;  %v7917_v1 = vld [vmem:[#allocation2 + $0x198] sm:$0xff]  ;;  %v7919_v62 = vld [vmem:[#allocation2 + $0x1a0] sm:$0xff] }
 0x583   : > { %5542 = vadd.xlane.f32.xlu1 %v5336_v41  ;;  %v7913_v41 = vld [vmem:[#allocation2 + $0x368] sm:$0xff]  ;;  %v5310_v48 = vmul.f32 %v7919_v62, %v10521_v0 }
 0x584   : > { %v5367_v44 = vmul.f32 %v7913_v41, %v10784_v28  ;;  %v5309_v41 = vmul.f32 %v7917_v1, %v10671_v5  ;;  %v6436_v17 = vmul.f32 %v6435_v56, %v6434_v4  ;;  %v6438_v26 = vmul.f32 %v6437_v20, %v6434_v4  ;;  %v7922_v4 = vld [vmem:[#allocation2 + $0x220] sm:$0xff] }
 0x585   : > { %v5326_v56 = vmul.f32 %v7922_v4, %v10521_v0  ;;  %v7926_v0 = vld [vmem:[#allocation2 + $0x318] sm:$0xff] }
 0x586   : > { %5472 = vadd.xlane.f32.xlu0 %v5301_v47  ;;  %v5307_v47 = vmul.f32 %v7914_v36, %v10653_v23  ;;  %v10877_v36 = vpop.xlane.xlu1 %5446 }
 0x587   : > { %5602 = vadd.xlane.f32.xlu1 %v5366_v7  ;;  %v5353_v7 = vmul.f32 %v7915_v45, %v10789_v2  ;;  %v6442_v45 = vsel %vm6441_vm7, %v6436_v17, 0.0 }
 0x58a   : > { %5476 = vadd.xlane.f32.xlu0 %v5303_v33  ;;  %v5322_v33 = vmul.f32 %v7916_v61, %v10506_v32  ;;  %v6446_v61 = vsel %vm6441_vm7, %v6438_v26, 0.0  ;;  %v5357_v26 = vmul.f32 %v7926_v0, %v10671_v5  ;;  %v5802_v0 = vrot.slane %v10797_v10, %v10303_v25 }
 0x58b   : > { %5544 = vadd.xlane.f32.xlu1 %v5337_v50  ;;  %v5383_v50 = vmul.f32 %v10784_v28, %v11427_v8  ;;  %vm11429_vm7 = vcmask 720512  }
 0x58e   : > { %5480 = vadd.xlane.f32.xlu0 %v5305_v31  ;;  %v11428_v31 = vld [vmem:[#allocation26_spill] sm:$0xff] }
 0x58f   : > { %5604 = vadd.xlane.f32.xlu1 %v5367_v44  ;;  %v5384_v44 = vmul.f32 %v11420_v38, %v11428_v31 }
 0x592   : > { %5484 = vadd.xlane.f32.xlu0 %v5307_v47  ;;  %v5338_v47 = vmul.f32 %v7918_v37, %v10506_v32  ;;  %v7921_v32 = vld [vmem:[#allocation2 + $0x308] sm:$0xff] }
 0x593   : > { %5576 = vadd.xlane.f32.xlu1 %v5353_v7  ;;  %v10882_v7 = vpop.xlane.xlu1 %5450  ;;  %v5355_v8 = vmul.f32 %v7921_v32, %v10653_v23  ;;  %v7925_v37 = vld [vmem:[#allocation2 + $0x228] sm:$0xff] }
 0x596   : > { %5514 = vadd.xlane.f32.xlu0 %v5322_v33  ;;  %v7920_v33 = vld [vmem:[#allocation2 + $0x290] sm:$0xff] }
 0x597   : > { %5636 = vadd.xlane.f32.xlu1 %v5383_v50  ;;  %v5340_v38 = vmul.f32 %v7920_v33, %v10514_v46  ;;  %v10886_v59 = vpop.xlane.xlu1 %5454 }
 0x59a   : > { %5488 = vadd.xlane.f32.xlu0 %v5309_v41  ;;  %v7923_v41 = vld [vmem:[#allocation2 + $0x310] sm:$0xff] }
 0x59b   : > { %5638 = vadd.xlane.f32.xlu1 %v5384_v44  ;;  %v10889_v50 = vpop.xlane.xlu1 %5458  ;;  %v5356_v31 = vmul.f32 %v7923_v41, %v10514_v46  ;;  %v7924_v44 = vld [vmem:[#allocation2 + $0x388] sm:$0xff]  ;;  %v5792_v41 = vrot.slane %v10791_v43, %v10283_v42 }
 0x59c   : > { %v5371_v17 = vmul.f32 %v7924_v44, %v10653_v23  ;;  %v5773_v23 = vrot.slane %v10773_v16, %v10266_v6 }
 0x59e   : > { %5546 = vadd.xlane.f32.xlu0 %v5338_v47  ;;  %v5327_v47 = vmul.f32 %v7925_v37, %v10688_v60  ;;  %v7929_v37 = vld [vmem:[#allocation2 + $0x398] sm:$0xff] }
 0x59f   : > { %6443 = vadd.xlane.f32.xlu1 %v6442_v45  ;;  %v10892_v1 = vpop.xlane.xlu1 %5462 }
 0x5a2   : > { %5490 = vadd.xlane.f32.xlu0 %v5310_v48  ;;  %v7927_v48 = vld [vmem:[#allocation2 + $0x1b8] sm:$0xff] }
 0x5a3   : > { %6447 = vadd.xlane.f32.xlu1 %v6446_v61  ;;  %v10896_v20 = vpop.xlane.xlu1 %5466  ;;  %v5313_v46 = vmul.f32 %v7927_v48, %v10767_v22  ;;  %v5782_v61 = vrot.slane %v10782_v9, %v10275_v15 }
 0x5a6   : > { %5550 = vadd.xlane.f32.xlu0 %v5340_v38 }
 0x5a7   : > { %v10899_v45 = vpop.xlane.xlu1 %5470 }
 0x5aa   : > { %5580 = vadd.xlane.f32.xlu0 %v5355_v8  ;;  %v7928_v8 = vld [vmem:[#allocation2 + $0x2a8] sm:$0xff] }
 0x5ab   : > { %v10909_v38 = vpop.xlane.xlu1 %5474  ;;  %v5343_v4 = vmul.f32 %v7928_v8, %v10688_v60 }
 0x5ae   : > { %5522 = vadd.xlane.f32.xlu0 %v5326_v56 }
 0x5af   : > { %v10918_v9 = vpop.xlane.xlu1 %5478 }
 0x5b2   : > { %5582 = vadd.xlane.f32.xlu0 %v5356_v31 }
 0x5b3   : > { %v10931_v8 = vpop.xlane.xlu1 %5482 }
 0x5b6   : > { %5612 = vadd.xlane.f32.xlu0 %v5371_v17 }
 0x5ba   : > { %5524 = vadd.xlane.f32.xlu0 %v5327_v47  ;;  %v5373_v47 = vmul.f32 %v7929_v37, %v10671_v5 }
 0x5bb   : > { %v10902_v62 = vpop.xlane.xlu0 %5240 }
 0x5be   : > { %5584 = vadd.xlane.f32.xlu0 %v5357_v26 }
 0x5bf   : > { %v5389_v33 = vpop.xlane.xlu0 %5388 }
 0x5c0   : > { %v5777_v32 = vrot.slane %v5389_v33, %v10272_v12  ;;  %v5812_v33 = vrot.slane %v10802_v53, %v10317_v27 }
 0x5c2   : > { %v5778_v56 = vsel %vm4572_vm12, %v5777_v32, %v5773_v23  ;;  %5496 = vadd.xlane.f32.xlu0 %v5313_v46  ;;  %v7930_v46 = vld [vmem:[#allocation2 + $0x238] sm:$0xff] }
 0x5c3   : > { %v5783_v16 = vsel %vm4579_vm13, %v5782_v61, %v5778_v56  ;;  %v5393_v31 = vpop.xlane.xlu0 %5392  ;;  %v5329_v23 = vmul.f32 %v7930_v46, %v10767_v22  ;;  %v7931_v56 = vld [vmem:[#allocation2 + $0x328] sm:$0xff]  ;;  %v7933_v46 = vld [vmem:[#allocation2 + $0x2b8] sm:$0xff] }
 0x5c4   : > { %v5787_v44 = vrot.slane %v5393_v31, %v10269_v11 }
 0x5c6   : > { %v5788_v17 = vsel %vm4586_vm14, %v5787_v44, %v5783_v16  ;;  %5556 = vadd.xlane.f32.xlu0 %v5343_v4  ;;  %v5822_v16 = vrot.slane %v10807_v30, %v10331_v58 }
 0x5c7   : > { %v5793_v26 = vsel %vm4593_vm15, %v5792_v41, %v5788_v17  ;;  %v5397_v48 = vpop.xlane.xlu0 %5396  ;;  %v5359_v41 = vmul.f32 %v7931_v56, %v10688_v60  ;;  %v7932_v17 = vld [vmem:[#allocation2 + $0x1c8] sm:$0xff] }
 0x5c8   : > { %v5797_v43 = vrot.slane %v5397_v48, %v10280_v29  ;;  %v5315_v37 = vmul.f32 %v7932_v17, %v10771_v39  ;;  %v7934_v56 = vld [vmem:[#allocation2 + $0x3a8] sm:$0xff]  ;;  %v5852_v17 = vrot.slane %v10823_v14, %v10266_v6  ;;  %v5871_v14 = vrot.slane %v10833_v40, %v10283_v42 }
 0x5ca   : > { %v5798_v61 = vsel %vm4600_vm0, %v5797_v43, %v5793_v26  ;;  %5616 = vadd.xlane.f32.xlu0 %v5373_v47  ;;  %v10941_v47 = vpop.xlane.xlu1 %5486  ;;  %v5832_v26 = vrot.slane %v10812_v3, %v10345_v24 }
 0x5cb   : > { %v5803_v32 = vsel %vm4607_vm1, %v5802_v0, %v5798_v61  ;;  %v5401_v5 = vpop.xlane.xlu0 %5400 }
 0x5cc   : > { %v5807_v10 = vrot.slane %v5401_v5, %v10297_v34 }
 0x5ce   : > { %v5808_v4 = vsel %vm4614_vm4, %v5807_v10, %v5803_v32  ;;  %5528 = vadd.xlane.f32.xlu0 %v5329_v23  ;;  %v5345_v23 = vmul.f32 %v7933_v46, %v10767_v22  ;;  %v10953_v10 = vpop.xlane.xlu1 %5516 }
 0x5cf   : > { %v5813_v31 = vsel %vm4621_vm5, %v5812_v33, %v5808_v4  ;;  %v5405_v44 = vpop.xlane.xlu0 %5404  ;;  %v5842_v33 = vrot.slane %v10817_v63, %v10358_v51 }
 0x5d0   : > { %v5817_v53 = vrot.slane %v5405_v44, %v10312_v19 }
 0x5d2   : > { %v5818_v0 = vsel %vm4628_vm6, %v5817_v53, %v5813_v31  ;;  %5588 = vadd.xlane.f32.xlu0 %v5359_v41  ;;  %v5375_v41 = vmul.f32 %v7934_v56, %v10688_v60  ;;  %v7935_v53 = vld [vmem:[#allocation2 + $0x248] sm:$0xff]  ;;  %v5861_v60 = vrot.slane %v10829_v52, %v10275_v15  ;;  %v7937_v52 = vld [vmem:[#allocation2 + $0x1d8] sm:$0xff] }
 0x5d3   : > { %v5823_v48 = vsel %vm11429_vm7, %v5822_v16, %v5818_v0  ;;  %v5409_v43 = vpop.xlane.xlu0 %5408  ;;  %v5331_v63 = vmul.f32 %v7935_v53, %v10771_v39 }
 0x5d4   : > { %v5827_v30 = vrot.slane %v5409_v43, %v10326_v54 }
 0x5d6   : > { %v5828_v61 = vsel %vm4642_vm8, %v5827_v30, %v5823_v48  ;;  %5500 = vadd.xlane.f32.xlu0 %v5315_v37  ;;  %v10963_v37 = vpop.xlane.xlu1 %5518  ;;  %v7936_v30 = vld [vmem:[#allocation2 + $0x338] sm:$0xff] }
 0x5d7   : > { %v5833_v32 = vsel %vm4649_vm9, %v5832_v26, %v5828_v61  ;;  %v5413_v5 = vpop.xlane.xlu0 %5412  ;;  %v5361_v46 = vmul.f32 %v7936_v30, %v10767_v22  ;;  %v5901_v30 = vrot.slane %v10861_v35, %v10331_v58 }
 0x5d8   : > { %v5837_v3 = vrot.slane %v5413_v5, %v10340_v18  ;;  %v5317_v5 = vmul.f32 %v7937_v52, %v10778_v21 }
 0x5da   : > { %v5838_v4 = vsel %vm4656_vm2, %v5837_v3, %v5833_v32  ;;  %5560 = vadd.xlane.f32.xlu0 %v5345_v23 }
 0x5db   : > { %v5843_v16 = vsel %vm4663_vm3, %v5842_v33, %v5838_v4  ;;  %v5417_v31 = vpop.xlane.xlu0 %5416  ;;  %v10976_v33 = vpop.xlane.xlu1 %5548  ;;  %v5881_v4 = vrot.slane %v10843_v57, %v10303_v25 }
 0x5dc   : > { %v5847_v44 = vrot.slane %v5417_v31, %v10354_v49 }
 0x5de   : > { %v10966_v0 = vsel %vm4670_vm10, %v5847_v44, %v5843_v16  ;;  %5620 = vadd.xlane.f32.xlu0 %v5375_v41  ;;  %v7938_v16 = vld [vmem:[#allocation2 + $0x2c8] sm:$0xff] }
 0x5df   : > { %v5421_v26 = vpop.xlane.xlu0 %5420  ;;  %v5347_v31 = vmul.f32 %v7938_v16, %v10771_v39  ;;  %v10986_v44 = vpop.xlane.xlu1 %5520  ;;  %v5921_v16 = vrot.slane %v10877_v36, %v10358_v51 }
 0x5e0   : > { %v5856_v48 = vrot.slane %v5421_v26, %v10272_v12 }
 0x5e2   : > { %v5857_v43 = vsel %vm4572_vm12, %v5856_v48, %v5852_v17  ;;  %5532 = vadd.xlane.f32.xlu0 %v5331_v63  ;;  %v5891_v63 = vrot.slane %v10851_v13, %v10317_v27  ;;  %v7939_v48 = vld [vmem:[#allocation2 + $0x3b8] sm:$0xff] }
 0x5e3   : > { %v5862_v23 = vsel %vm4579_vm13, %v5861_v60, %v5857_v43  ;;  %v5425_v61 = vpop.xlane.xlu0 %5424  ;;  %v5377_v43 = vmul.f32 %v7939_v48, %v10767_v22 }
 0x5e4   : > { %v5866_v32 = vrot.slane %v5425_v61, %v10269_v11  ;;  %v7940_v61 = vld [vmem:[#allocation2 + $0x258] sm:$0xff] }
 0x5e6   : > { %v5867_v3 = vsel %vm4586_vm14, %v5866_v32, %v5862_v23  ;;  %5592 = vadd.xlane.f32.xlu0 %v5361_v46  ;;  %v10998_v23 = vpop.xlane.xlu1 %5578  ;;  %v5333_v32 = vmul.f32 %v7940_v61, %v10778_v21 }
 0x5e7   : > { %v5872_v56 = vsel %vm4593_vm15, %v5871_v14, %v5867_v3  ;;  %v5429_v41 = vpop.xlane.xlu0 %5428 }
 0x5e8   : > { %v5876_v40 = vrot.slane %v5429_v41, %v10280_v29  ;;  %v7941_v41 = vld [vmem:[#allocation2 + $0x348] sm:$0xff] }
 0x5ea   : > { %v5877_v53 = vsel %vm4600_vm0, %v5876_v40, %v5872_v56  ;;  %5504 = vadd.xlane.f32.xlu0 %v5317_v5  ;;  %v5911_v5 = vrot.slane %v10871_v55, %v10345_v24  ;;  %v5363_v40 = vmul.f32 %v7941_v41, %v10771_v39  ;;  %v7945_v41 = vld [vmem:[#allocation2 + $0x268] sm:$0xff] }
 0x5eb   : > { %v5882_v17 = vsel %vm4607_vm1, %v5881_v4, %v5877_v53  ;;  %v5433_v60 = vpop.xlane.xlu0 %5432  ;;  %v11007_v4 = vpop.xlane.xlu1 %5492 }
 0x5ec   : > { %v5886_v57 = vrot.slane %v5433_v60, %v10297_v34 }
 0x5ee   : > { %v5887_v26 = vsel %vm4614_vm4, %v5886_v57, %v5882_v17  ;;  %5564 = vadd.xlane.f32.xlu0 %v5347_v31 }
 0x5ef   : > { %v5892_v46 = vsel %vm4621_vm5, %v5891_v63, %v5887_v26  ;;  %v5437_v14 = vpop.xlane.xlu0 %5436  ;;  %v7942_v63 = vld [vmem:[#allocation2 + $0x1e8] sm:$0xff]  ;;  %v11018_v48 = vpop.xlane.xlu1 %5552 }
 0x5f0   : > { %v5896_v13 = vrot.slane %v5437_v14, %v10312_v19  ;;  %v5319_v17 = vmul.f32 %v7942_v63, %v10784_v28 }
 0x5f2   : > { %v5897_v52 = vsel %vm4628_vm6, %v5896_v13, %v5892_v46  ;;  %5624 = vadd.xlane.f32.xlu0 %v5377_v43  ;;  %v5931_v46 = vrot.slane %v10882_v7, %v10266_v6  ;;  %v5940_v13 = vrot.slane %v10886_v59, %v10275_v15 }
 0x5f3   : > { %v5902_v22 = vsel %vm11429_vm7, %v5901_v30, %v5897_v52  ;;  %v5441_v3 = vpop.xlane.xlu0 %5440  ;;  %v7943_v30 = vld [vmem:[#allocation2 + $0x2d8] sm:$0xff]  ;;  %vm11430_vm7 = vcmask 1041409  }
 0x5f4   : > { %v5906_v35 = vrot.slane %v5441_v3, %v10326_v54  ;;  %v5349_v36 = vmul.f32 %v7943_v30, %v10778_v21  ;;  %v7944_v3 = vld [vmem:[#allocation2 + $0x3c8] sm:$0xff]  ;;  %v7947_v30 = vld [vmem:[#allocation2 + $0x1f8] sm:$0xff] }
 0x5f5   : > { %v5379_v7 = vmul.f32 %v7944_v3, %v10771_v39 }
 0x5f6   : > { %v5907_v56 = vsel %vm4642_vm8, %v5906_v35, %v5902_v22  ;;  %5536 = vadd.xlane.f32.xlu0 %v5333_v32  ;;  %v5950_v35 = vrot.slane %v10889_v50, %v10283_v42 }
 0x5f7   : > { %v5912_v31 = vsel %vm4649_vm9, %v5911_v5, %v5907_v56  ;;  %v5445_v53 = vpop.xlane.xlu0 %5444  ;;  %v11032_v5 = vpop.xlane.xlu1 %5610 }
 0x5f8   : > { %v5916_v55 = vrot.slane %v5445_v53, %v10340_v18 }
 0x5fa   : > { %v5917_v60 = vsel %vm4656_vm2, %v5916_v55, %v5912_v31  ;;  %5596 = vadd.xlane.f32.xlu0 %v5363_v40  ;;  %v5335_v40 = vmul.f32 %v7945_v41, %v10784_v28  ;;  %v5960_v31 = vrot.slane %v10892_v1, %v10303_v25 }
 0x5fb   : > { %v5922_v57 = vsel %vm4663_vm3, %v5921_v16, %v5917_v60  ;;  %v5449_v26 = vpop.xlane.xlu0 %5448  ;;  %v11045_v55 = vpop.xlane.xlu1 %5494 }
 0x5fc   : > { %v5926_v43 = vrot.slane %v5449_v26, %v10354_v49 }
 0x5fe   : > { %v5927_v14 = vsel %vm4670_vm10, %v5926_v43, %v5922_v57  ;;  %5508 = vadd.xlane.f32.xlu0 %v5319_v17  ;;  %v7946_v17 = vld [vmem:[#allocation2 + $0x358] sm:$0xff]  ;;  %v5970_v57 = vrot.slane %v10896_v20, %v10317_v27 }
 0x5ff   : > { %v11029_v61 = vsel %vm11430_vm7, %v5927_v14, %v10966_v0  ;;  %v5453_v32 = vpop.xlane.xlu0 %5452  ;;  %v5365_v60 = vmul.f32 %v7946_v17, %v10778_v21  ;;  %vm11431_vm7 = vcmask 720512  }
 0x600   : > { %v5935_v52 = vrot.slane %v5453_v32, %v10272_v12 }
 0x602   : > { %v5936_v22 = vsel %vm4572_vm12, %v5935_v52, %v5931_v46  ;;  %5568 = vadd.xlane.f32.xlu0 %v5349_v36  ;;  %v5321_v36 = vmul.f32 %v7947_v30, %v10789_v2  ;;  %v11055_v46 = vpop.xlane.xlu1 %5554  ;;  %v7953_v30 = vld [vmem:[#allocation10 + $0x60] sm:$0xff] }
 0x603   : > { %v5941_v59 = vsel %vm4579_vm13, %v5940_v13, %v5936_v22  ;;  %v5457_v56 = vpop.xlane.xlu0 %5456  ;;  %v5980_v13 = vrot.slane %v10899_v45, %v10331_v58  ;;  %v7948_v22 = vld [vmem:[#allocation2 + $0x2e8] sm:$0xff] }
 0x604   : > { %v5945_v0 = vrot.slane %v5457_v56, %v10269_v11  ;;  %v5351_v3 = vmul.f32 %v7948_v22, %v10784_v28  ;;  %v6000_v28 = vrot.slane %v10918_v9, %v10358_v51  ;;  %v6010_v9 = vrot.slane %v10931_v8, %v10266_v6 }
 0x605   : > { %v6093_v8 = vrot.slane %v10953_v10, %v10272_v12 }
 0x606   : > { %v5946_v16 = vsel %vm4586_vm14, %v5945_v0, %v5941_v59  ;;  %5628 = vadd.xlane.f32.xlu0 %v5379_v7  ;;  %v11067_v0 = vpop.xlane.xlu1 %5614 }
 0x607   : > { %v5951_v53 = vsel %vm4593_vm15, %v5950_v35, %v5946_v16  ;;  %v5461_v39 = vpop.xlane.xlu0 %5460  ;;  %v5990_v35 = vrot.slane %v10909_v38, %v10345_v24 }
 0x608   : > { %v5955_v50 = vrot.slane %v5461_v39, %v10280_v29  ;;  %v7950_v39 = vld [vmem:[#allocation2 + $0x2f0] sm:$0xff] }
 0x60a   : > { %v5956_v63 = vsel %vm4600_vm0, %v5955_v50, %v5951_v53  ;;  %5540 = vadd.xlane.f32.xlu0 %v5335_v40  ;;  %v7949_v40 = vld [vmem:[#allocation2 + $0x3d8] sm:$0xff]  ;;  %v7951_v50 = vld [vmem:[#allocation10 + $0x70] sm:$0xff]  ;;  %v11076_v17 = vpop.xlane.xlu1 %5526 }
 0x60b   : > { %v5961_v26 = vsel %vm4607_vm1, %v5960_v31, %v5956_v63  ;;  %v5465_v43 = vpop.xlane.xlu0 %5464  ;;  %v5381_v16 = vmul.f32 %v7949_v40, %v10778_v21  ;;  %v5352_v63 = vmul.f32 %v7951_v50, %v7950_v39 }
 0x60c   : > { %v5965_v1 = vrot.slane %v5465_v43, %v10297_v34 }
 0x60e   : > { %v5966_v14 = vsel %vm4614_vm4, %v5965_v1, %v5961_v26  ;;  %5600 = vadd.xlane.f32.xlu0 %v5365_v60  ;;  %v7952_v1 = vld [vmem:[#allocation2 + $0x3e0] sm:$0xff] }
 0x60f   : > { %v5971_v32 = vsel %vm4621_vm5, %v5970_v57, %v5966_v14  ;;  %v5469_v52 = vpop.xlane.xlu0 %5468  ;;  %v6019_v14 = vrot.slane %v10941_v47, %v10275_v15  ;;  %v6098_v47 = vrot.slane %v10963_v37, %v10275_v15 }
 0x610   : > { %v5975_v20 = vrot.slane %v5469_v52, %v10312_v19  ;;  %v11090_v52 = vpop.xlane.xlu1 %5586 }
 0x612   : > { %v5976_v7 = vsel %vm4628_vm6, %v5975_v20, %v5971_v32  ;;  %5512 = vadd.xlane.f32.xlu0 %v5321_v36  ;;  %v5382_v36 = vmul.f32 %v7953_v30, %v7952_v1  ;;  %v6182_v1 = vrot.slane %v11018_v48, %v10269_v11 }
 0x613   : > { %v5981_v59 = vsel %vm11431_vm7, %v5980_v13, %v5976_v7  ;;  %v5473_v56 = vpop.xlane.xlu0 %5472  ;;  %vm11432_vm7 = vcmask 1042434  }
 0x614   : > { %v5985_v45 = vrot.slane %v5473_v56, %v10326_v54 }
 0x616   : > { %v5986_v41 = vsel %vm4642_vm8, %v5985_v45, %v5981_v59  ;;  %5572 = vadd.xlane.f32.xlu0 %v5351_v3  ;;  %v7954_v3 = vld [vmem:[#allocation2 + $0x370] sm:$0xff]  ;;  %v6103_v59 = vrot.slane %v10986_v44, %v10269_v11  ;;  %v11102_v45 = vpop.xlane.xlu1 %5498  ;;  %v6172_v44 = vrot.slane %v10976_v33, %v10272_v12  ;;  %v6039_v33 = vrot.slane %v11045_v55, %v10303_v25 }
 0x617   : > { %v5991_v31 = vsel %vm4649_vm9, %v5990_v35, %v5986_v41  ;;  %v5477_v53 = vpop.xlane.xlu0 %5476  ;;  %v5368_v7 = vmul.f32 %v7954_v3, %v7951_v50  ;;  %v7955_v41 = vld [vmem:[#allocation2 + $0x378] sm:$0xff]  ;;  %v6247_v55 = vrot.slane %v10998_v23, %v10266_v6 }
 0x618   : > { %v5995_v38 = vrot.slane %v5477_v53, %v10340_v18  ;;  %v5369_v40 = vmul.f32 %v7955_v41, %v10789_v2 }
 0x61a   : > { %v5996_v60 = vsel %vm4656_vm2, %v5995_v38, %v5991_v31  ;;  %5632 = vadd.xlane.f32.xlu0 %v5381_v16  ;;  %v7956_v38 = vld [vmem:[#allocation2 + $0x3f8] sm:$0xff] }
 0x61b   : > { %v6001_v57 = vsel %vm4663_vm3, %v6000_v28, %v5996_v60  ;;  %v5481_v26 = vpop.xlane.xlu0 %5480  ;;  %v5385_v39 = vmul.f32 %v7956_v38, %v10789_v2 }
 0x61c   : > { %v6005_v21 = vrot.slane %v5481_v26, %v10354_v49  ;;  %v6034_v26 = vrot.slane %v11007_v4, %v10280_v29 }
 0x61e   : > { %v6006_v43 = vsel %vm4670_vm10, %v6005_v21, %v6001_v57  ;;  %5574 = vadd.xlane.f32.xlu0 %v5352_v63  ;;  %v11113_v63 = vpop.xlane.xlu1 %5558 }
 0x61f   : > { %v11088_v13 = vsel %vm11432_vm7, %v6006_v43, %v11029_v61  ;;  %v5485_v32 = vpop.xlane.xlu0 %5484 }
 0x620   : > { %v6014_v20 = vrot.slane %v5485_v32, %v10272_v12 }
 0x622   : > { %v6015_v22 = vsel %vm4572_vm12, %v6014_v20, %v6010_v9  ;;  %5634 = vadd.xlane.f32.xlu0 %v5382_v36  ;;  %v5619_v43 = vpop.xlane.xlu1 %5618 }
 0x623   : > { %v5515_v35 = vpop.xlane.xlu0 %5514  ;;  %v6020_v61 = vsel %vm4579_vm13, %v6019_v14, %v6015_v22  ;;  %v6187_v14 = vrot.slane %v11055_v46, %v10283_v42 }
 0x624   : > { %v6089_v56 = vrot.slane %v5515_v35, %v10266_v6 }
 0x626   : > { %v6094_v10 = vsel %vm4572_vm12, %v6093_v8, %v6089_v56  ;;  %5606 = vadd.xlane.f32.xlu0 %v5368_v7  ;;  %v5531_v3 = vpop.xlane.xlu1 %5530 }
 0x627   : > { %v6099_v16 = vsel %vm4579_vm13, %v6098_v47, %v6094_v10  ;;  %v5489_v28 = vpop.xlane.xlu0 %5488  ;;  %v6326_v10 = vrot.slane %v11032_v5, %v10266_v6 }
 0x628   : > { %v6024_v37 = vrot.slane %v5489_v28, %v10269_v11  ;;  %v6104_v31 = vsel %vm4586_vm14, %v6103_v59, %v6099_v16 }
 0x62a   : > { %v6025_v53 = vsel %vm4586_vm14, %v6024_v37, %v6020_v61  ;;  %5608 = vadd.xlane.f32.xlu0 %v5369_v40  ;;  %v5591_v61 = vpop.xlane.xlu1 %5590  ;;  %v6335_v40 = vrot.slane %v11067_v0, %v10275_v15 }
 0x62b   : > { %v5547_v50 = vpop.xlane.xlu0 %5546 }
 0x62c   : > { %v6168_v60 = vrot.slane %v5547_v50, %v10266_v6 }
 0x62e   : > { %v6173_v57 = vsel %vm4572_vm12, %v6172_v44, %v6168_v60  ;;  %5640 = vadd.xlane.f32.xlu0 %v5385_v39  ;;  %v5503_v28 = vpop.xlane.xlu1 %5502 }
 0x62f   : > { %v5491_v21 = vpop.xlane.xlu0 %5490 }
 0x630   : > { %v6029_v9 = vrot.slane %v5491_v21, %v10283_v42 }
 0x632   : > { %v6030_v2 = vsel %vm4593_vm15, %v6029_v9, %v6025_v53  ;;  %v5563_v6 = vpop.xlane.xlu1 %5562 }
 0x633   : > { %v6035_v30 = vsel %vm4600_vm0, %v6034_v26, %v6030_v2  ;;  %v5551_v36 = vpop.xlane.xlu0 %5550 }
 0x634   : > { %v6177_v4 = vrot.slane %v5551_v36, %v10275_v15  ;;  %v6040_v32 = vsel %vm4607_vm1, %v6039_v33, %v6035_v30 }
 0x636   : > { %v6178_v20 = vsel %vm4579_vm13, %v6177_v4, %v6173_v57  ;;  %v11160_v21 = vpop.xlane.xlu1 %5622 }
 0x637   : > { %v6183_v8 = vsel %vm4586_vm14, %v6182_v1, %v6178_v20  ;;  %v5581_v22 = vpop.xlane.xlu0 %5580 }
 0x638   : > { %v6251_v48 = vrot.slane %v5581_v22, %v10272_v12  ;;  %v6188_v7 = vsel %vm4593_vm15, %v6187_v14, %v6183_v8  ;;  %v6345_v14 = vrot.slane %v5619_v43, %v10283_v42  ;;  %v6128_v8 = vrot.slane %v5531_v3, %v10317_v27 }
 0x639   : > { %v6059_v3 = vrot.slane %v5503_v28, %v10331_v58 }
 0x63a   : > { %v6252_v47 = vsel %vm4572_vm12, %v6251_v48, %v6247_v55  ;;  %v5535_v36 = vpop.xlane.xlu1 %5534 }
 0x63b   : > { %v5523_v46 = vpop.xlane.xlu0 %5522 }
 0x63c   : > { %v6108_v35 = vrot.slane %v5523_v46, %v10283_v42 }
 0x63e   : > { %v6109_v59 = vsel %vm4593_vm15, %v6108_v35, %v6104_v31  ;;  %v6118_v31 = vrot.slane %v11076_v17, %v10303_v25  ;;  %v6049_v17 = vrot.slane %v11102_v45, %v10317_v27  ;;  %v11175_v48 = vpop.xlane.xlu1 %5594 }
 0x63f   : > { %v5583_v56 = vpop.xlane.xlu0 %5582 }
 0x640   : > { %v6256_v23 = vrot.slane %v5583_v56, %v10275_v15  ;;  %v6266_v15 = vrot.slane %v11090_v52, %v10283_v42  ;;  %v6197_v52 = vrot.slane %v11113_v63, %v10303_v25  ;;  %v6276_v42 = vrot.slane %v5591_v61, %v10303_v25 }
 0x641   : > { %v6207_v61 = vrot.slane %v5563_v6, %v10317_v27 }
 0x642   : > { %v6257_v41 = vsel %vm4579_vm13, %v6256_v23, %v6252_v47  ;;  %v5507_v35 = vpop.xlane.xlu1 %5506 }
 0x643   : > { %v5613_v16 = vpop.xlane.xlu0 %5612 }
 0x644   : > { %v6330_v37 = vrot.slane %v5613_v16, %v10272_v12 }
 0x646   : > { %v6331_v44 = vsel %vm4572_vm12, %v6330_v37, %v6326_v10  ;;  %vm11433_vm12 = vcmask 720512   ;;  %v11191_v37 = vpop.xlane.xlu1 %5566 }
 0x647   : > { %v5525_v53 = vpop.xlane.xlu0 %5524  ;;  %v6336_v38 = vsel %vm4579_vm13, %v6335_v40, %v6331_v44  ;;  %vm11434_vm13 = vmmov %vm11433_vm12 }
 0x648   : > { %v6113_v39 = vrot.slane %v5525_v53, %v10280_v29 }
 0x64a   : > { %v6114_v5 = vsel %vm4600_vm0, %v6113_v39, %v6109_v59  ;;  %v11197_v39 = vpop.xlane.xlu1 %5626 }
 0x64b   : > { %v5585_v0 = vpop.xlane.xlu0 %5584  ;;  %v6119_v50 = vsel %vm4607_vm1, %v6118_v31, %v6114_v5 }
 0x64c   : > { %v6261_v12 = vrot.slane %v5585_v0, %v10269_v11 }
 0x64e   : > { %v6262_v60 = vsel %vm4586_vm14, %v6261_v12, %v6257_v41  ;;  %v5539_v12 = vpop.xlane.xlu1 %5538 }
 0x64f   : > { %v5497_v57 = vpop.xlane.xlu0 %5496  ;;  %v6267_v26 = vsel %vm4593_vm15, %v6266_v15, %v6262_v60 }
 0x650   : > { %v6044_v33 = vrot.slane %v5497_v57, %v10297_v34 }
 0x652   : > { %v6045_v9 = vsel %vm4614_vm4, %v6044_v33, %v6040_v32 }
 0x653   : > { %v5557_v2 = vpop.xlane.xlu0 %5556  ;;  %v6050_v1 = vsel %vm4621_vm5, %v6049_v17, %v6045_v9  ;;  %v11204_v17 = vpop.xlane.xlu1 %5598 }
 0x654   : > { %v6192_v30 = vrot.slane %v5557_v2, %v10280_v29 }
 0x656   : > { %v6193_v45 = vsel %vm4600_vm0, %v6192_v30, %v6188_v7 }
 0x657   : > { %v5617_v4 = vpop.xlane.xlu0 %5616  ;;  %v6198_v55 = vsel %vm4607_vm1, %v6197_v52, %v6193_v45  ;;  %v5511_v33 = vpop.xlane.xlu1 %5510 }
 0x658   : > { %v6340_v20 = vrot.slane %v5617_v4, %v10269_v11  ;;  %v6138_v4 = vrot.slane %v5535_v36, %v10331_v58 }
 0x65a   : > { %v6341_v32 = vsel %vm4586_vm14, %v6340_v20, %v6336_v38  ;;  %vm11435_vm14 = vcmask 1043459  }
 0x65b   : > { %v5529_v63 = vpop.xlane.xlu0 %5528  ;;  %v6346_v22 = vsel %vm4593_vm15, %v6345_v14, %v6341_v32  ;;  %v5571_v9 = vpop.xlane.xlu1 %5570  ;;  %vm11436_vm15 = vcmask 1044484  }
 0x65c   : > { %v6123_v47 = vrot.slane %v5529_v63, %v10297_v34 }
 0x65e   : > { %v6124_v7 = vsel %vm4614_vm4, %v6123_v47, %v6119_v50  ;;  %v6069_v47 = vrot.slane %v5507_v35, %v10345_v24 }
 0x65f   : > { %v5589_v43 = vpop.xlane.xlu0 %5588  ;;  %v6129_v46 = vsel %vm4621_vm5, %v6128_v8, %v6124_v7  ;;  %v6148_v8 = vrot.slane %v5539_v12, %v10345_v24  ;;  %v6217_v12 = vrot.slane %v11191_v37, %v10331_v58  ;;  %v6286_v37 = vrot.slane %v11175_v48, %v10317_v27 }
 0x660   : > { %v6271_v11 = vrot.slane %v5589_v43, %v10280_v29  ;;  %v6365_v48 = vrot.slane %v11197_v39, %v10317_v27 }
 0x662   : > { %v6272_v59 = vsel %vm4600_vm0, %v6271_v11, %v6267_v26 }
 0x663   : > { %v5501_v56 = vpop.xlane.xlu0 %5500  ;;  %v11185_v23 = vsel %vm4607_vm1, %v6276_v42, %v6272_v59 }
 0x664   : > { %v6054_v10 = vrot.slane %v5501_v56, %v10312_v19 }
 0x666   : > { %v6055_v41 = vsel %vm4628_vm6, %v6054_v10, %v6050_v1  ;;  %v11210_v1 = vpop.xlane.xlu1 %5630 }
 0x667   : > { %v5561_v40 = vpop.xlane.xlu0 %5560  ;;  %v6060_v16 = vsel %vm11433_vm12, %v6059_v3, %v6055_v41  ;;  %v6079_v3 = vrot.slane %v5511_v33, %v10358_v51 }
 0x668   : > { %v6202_v44 = vrot.slane %v5561_v40, %v10297_v34 }
 0x66a   : > { %v6203_v31 = vsel %vm4614_vm4, %v6202_v44, %v6198_v55  ;;  %v5543_v45 = vpop.xlane.xlu1 %5542 }
 0x66b   : > { %v5621_v28 = vpop.xlane.xlu0 %5620  ;;  %v6208_v53 = vsel %vm4621_vm5, %v6207_v61, %v6203_v31  ;;  %v6158_v11 = vrot.slane %v5543_v45, %v10358_v51 }
 0x66c   : > { %v6350_v38 = vrot.slane %v5621_v28, %v10280_v29 }
 0x66e   : > { %v11200_v5 = vsel %vm4600_vm0, %v6350_v38, %v6346_v22  ;;  %v11218_v63 = vpop.xlane.xlu1 %5602  ;;  %vm11437_vm0 = vmmov %vm11433_vm12 }
 0x66f   : > { %v5533_v6 = vpop.xlane.xlu0 %5532  ;;  %vm11440_vm7 = vmmov %vm11437_vm0 }
 0x670   : > { %v6133_v15 = vrot.slane %v5533_v6, %v10312_v19 }
 0x672   : > { %v6134_v0 = vsel %vm4628_vm6, %v6133_v15, %v6129_v46  ;;  %v5545_v35 = vpop.xlane.xlu1 %5544 }
 0x673   : > { %v5593_v50 = vpop.xlane.xlu0 %5592  ;;  %v6139_v22 = vsel %vm11434_vm13, %v6138_v4, %v6134_v0  ;;  %v6163_v61 = vrot.slane %v5545_v35, %v10354_v49  ;;  %v6355_v4 = vrot.slane %v11160_v21, %v10303_v25 }
 0x677   : > { %v5505_v60 = vpop.xlane.xlu0 %5504 }
 0x678   : > { %v6064_v20 = vrot.slane %v5505_v60, %v10326_v54  ;;  %v5605_v60 = vpop.xlane.xlu1 %5604 }
 0x67a   : > { %v6065_v43 = vsel %vm4642_vm8, %v6064_v20, %v6060_v16 }
 0x67b   : > { %v5565_v57 = vpop.xlane.xlu0 %5564  ;;  %v6070_v56 = vsel %vm4649_vm9, %v6069_v47, %v6065_v43 }
 0x67c   : > { %v6212_v31 = vrot.slane %v5565_v57, %v10312_v19 }
 0x67f   : > { %v11206_v26 = vpop.xlane.xlu0 %5624 }
 0x680   : > { %v6360_v20 = vrot.slane %v11206_v26, %v10297_v34 }
 0x683   : > { %v5537_v29 = vpop.xlane.xlu0 %5536 }
 0x684   : > { %v6143_v55 = vrot.slane %v5537_v29, %v10326_v54  ;;  %v6213_v29 = vsel %vm4628_vm6, %v6212_v31, %v6208_v53 }
 0x686   : > { %v6144_v7 = vsel %vm4642_vm8, %v6143_v55, %v6139_v22  ;;  %v6227_v55 = vrot.slane %v5571_v9, %v10345_v24  ;;  %v6296_v22 = vrot.slane %v11204_v17, %v10331_v58 }
 0x687   : > { %v11208_v52 = vpop.xlane.xlu0 %5596  ;;  %v6149_v59 = vsel %vm4649_vm9, %v6148_v8, %v6144_v7 }
 0x688   : > { %v6291_v25 = vrot.slane %v11208_v52, %v10312_v19 }
 0x68b   : > { %v5509_v2 = vpop.xlane.xlu0 %5508 }
 0x68c   : > { %v6074_v36 = vrot.slane %v5509_v2, %v10340_v18  ;;  %v6281_v2 = vrot.slane %v5593_v50, %v10297_v34  ;;  %v6356_v34 = vsel %vm4607_vm1, %v6355_v4, %v11200_v5  ;;  %vm11438_vm1 = vcmask 1045509  }
 0x68e   : > { %v6075_v41 = vsel %vm4656_vm2, %v6074_v36, %v6070_v56  ;;  %v6282_v50 = vsel %vm4614_vm4, %v6281_v2, %v11185_v23  ;;  %v6361_v23 = vsel %vm4614_vm4, %v6360_v20, %v6356_v34  ;;  %v6375_v36 = vrot.slane %v11210_v1, %v10331_v58  ;;  %vm11439_vm4 = vmmov %vm11437_vm0 }
 0x68f   : > { %v5569_v30 = vpop.xlane.xlu0 %5568  ;;  %v6080_v28 = vsel %vm4663_vm3, %v6079_v3, %v6075_v41  ;;  %v6287_v52 = vsel %vm4621_vm5, %v6286_v37, %v6282_v50  ;;  %v6311_v41 = vrot.slane %v5605_v60, %v10340_v18 }
 0x690   : > { %v6222_v57 = vrot.slane %v5569_v30, %v10326_v54  ;;  %v6292_v7 = vsel %vm4628_vm6, %v6291_v25, %v6287_v52 }
 0x691   : > { %v6297_v3 = vsel %vm11439_vm4, %v6296_v22, %v6292_v7 }
 0x693   : > { %v11212_v14 = vpop.xlane.xlu0 %5628 }
 0x694   : > { %v6370_v27 = vrot.slane %v11212_v14, %v10312_v19 }
 0x697   : > { %v5541_v32 = vpop.xlane.xlu0 %5540 }
 0x698   : > { %v6153_v42 = vrot.slane %v5541_v32, %v10340_v18  ;;  %v5577_v32 = vpop.xlane.xlu1 %5576 }
 0x699   : > { %v6242_v21 = vrot.slane %v5577_v32, %v10354_v49 }
 0x69a   : > { %v6154_v10 = vsel %vm4656_vm2, %v6153_v42, %v6149_v59  ;;  %v6366_v59 = vsel %vm4621_vm5, %v6365_v48, %v6361_v23  ;;  %vm11441_vm5 = vcmask 1047559  }
 0x69b   : > { %v5601_v46 = vpop.xlane.xlu0 %5600  ;;  %v6159_v16 = vsel %vm4663_vm3, %v6158_v11, %v6154_v10  ;;  %v6306_v11 = vrot.slane %v11218_v63, %v10345_v24  ;;  %v6371_v14 = vsel %vm4628_vm6, %v6370_v27, %v6366_v59  ;;  %vm6412_vm6 = vcmp.ne.f32.partialorder %v10902_v62, 0.0 }
 0x69c   : > { %v6164_v6 = vsel %vm4670_vm10, %v6163_v61, %v6159_v16  ;;  %v6301_v39 = vrot.slane %v5601_v46, %v10326_v54  ;;  %v5637_v19 = vpop.xlane.xlu1 %5636  ;;  %v6376_v1 = vsel %vm11440_vm7, %v6375_v36, %v6371_v14 }
 0x69d   : > { %v6390_v61 = vrot.slane %v5637_v19, %v10340_v18 }
 0x69e   : > { %v6302_v46 = vsel %vm4642_vm8, %v6301_v39, %v6297_v3 }
 0x69f   : > { %v5513_v40 = vpop.xlane.xlu0 %5512  ;;  %v6307_v58 = vsel %vm4649_vm9, %v6306_v11, %v6302_v46 }
 0x6a0   : > { %v6084_v44 = vrot.slane %v5513_v40, %v10354_v49 }
 0x6a2   : > { %v6085_v38 = vsel %vm4670_vm10, %v6084_v44, %v6080_v28 }
 0x6a3   : > { %v6404_v15 = vsel %vm11435_vm14, %v6085_v38, %v11088_v13  ;;  %v5573_v0 = vpop.xlane.xlu0 %5572  ;;  %v6218_v13 = vsel %vm11437_vm0, %v6217_v12, %v6213_v29 }
 0x6a4   : > { %v6405_v33 = vsel %vm11436_vm15, %v6164_v6, %v6404_v15  ;;  %v6223_v53 = vsel %vm4642_vm8, %v6222_v57, %v6218_v13  ;;  %v6232_v30 = vrot.slane %v5573_v0, %v10340_v18  ;;  %v8164_v57 = vmov 0.0  }
 0x6a5   : > { %v6228_v26 = vsel %vm4649_vm9, %v6227_v55, %v6223_v53  ;;  %v7693_v2 = vsel %vm6412_vm6, 1.0, %v8164_v57  ;;  %v7694_v13 = vclamps-f32 %v10902_v62, 400.0 }
 0x6a6   : > { %v6233_v47 = vsel %vm4656_vm2, %v6232_v30, %v6228_v26 }
 0x6a7   : > { %v5633_v45 = vpop.xlane.xlu0 %5632  ;;  %v6452_v32 = vmul.f32 0.003, %v7694_v13 }
 0x6a8   : > { %v6380_v56 = vrot.slane %v5633_v45, %v10326_v54  ;;  %v5639_v54 = vpop.xlane.xlu1 %5638 }
 0x6a9   : > { %v6395_v28 = vrot.slane %v5639_v54, %v10358_v51 }
 0x6aa   : > { %v6381_v40 = vsel %vm4642_vm8, %v6380_v56, %v6376_v1  ;;  %vm6466_vm8 = vcmask 7168  }
 0x6ab   : > { %v5575_v9 = vpop.xlane.xlu0 %5574 }
 0x6ac   : > { %v6237_v8 = vrot.slane %v5575_v9, %v10358_v51  ;;  %v6444_v45 = vpop.xlane.xlu1 %6443  ;;  %v11443_v9 = vld [vmem:[#allocation19_spill] sm:$0xff] }
 0x6ad   : > { %v6453_v34 = vsub.f32 %v11443_v9, %v6452_v32 }
 0x6ae   : > { %v6238_v5 = vsel %vm4663_vm3, %v6237_v8, %v6233_v47 }
 0x6af   : > { %v6243_v42 = vsel %vm4670_vm10, %v6242_v21, %v6238_v5  ;;  %v5635_v43 = vpop.xlane.xlu0 %5634 }
 0x6b0   : > { %v6406_v17 = vsel %vm11438_vm1, %v6243_v42, %v6405_v33  ;;  %v6385_v10 = vrot.slane %v5635_v43, %v10345_v24  ;;  %v6312_v24 = vsel %vm4656_vm2, %v6311_v41, %v6307_v58  ;;  %v6448_v37 = vpop.xlane.xlu1 %6447 }
 0x6b2   : > { %v6386_v16 = vsel %vm4649_vm9, %v6385_v10, %v6381_v40  ;;  %vm6468_vm9 = vcmask 15360  }
 0x6b3   : > { %v5607_v35 = vpop.xlane.xlu0 %5606  ;;  %v6391_v6 = vsel %vm4656_vm2, %v6390_v61, %v6386_v16 }
 0x6b4   : > { %v6316_v63 = vrot.slane %v5607_v35, %v10358_v51  ;;  %v6396_v60 = vsel %vm4663_vm3, %v6395_v28, %v6391_v6  ;;  %v6439_v51 = vld [vmem:[%s503_s10] sm:$0xff] }
 0x6b5   : > { %v6440_v4 = vmul.f32 %v7693_v2, %v6439_v51 }
 0x6b6   : > { %v6317_v38 = vsel %vm4663_vm3, %v6316_v63, %v6312_v24 }
 0x6b7   : > { %v5609_v44 = vpop.xlane.xlu0 %5608  ;;  %v6445_v55 = vmul.f32 %v6444_v45, %v6440_v4  ;;  %v6449_v53 = vmul.f32 %v6448_v37, %v6440_v4 }
 0x6b8   : > { %v6321_v31 = vrot.slane %v5609_v44, %v10354_v49 }
 0x6b9   : > { %v6464_v21 = vmul.f32 2.5e-07, %v6449_v53 }
 0x6ba   : > { %v6322_v15 = vsel %vm4670_vm10, %v6321_v31, %v6317_v38 }
 0x6bb   : > { %v5641_v18 = vpop.xlane.xlu0 %5640  ;;  %v6407_v0 = vsel %vm5235_vm11, %v6322_v15, %v6406_v17 }
 0x6bc   : > { %v6400_v12 = vrot.slane %v5641_v18, %v10354_v49  ;;  %v6454_v49 = vmul.f32 2.5e-07, %v6445_v55 }
 0x6be   : > { %v6401_v33 = vsel %vm4670_vm10, %v6400_v12, %v6396_v60 }
 0x6bf   : > { %v6408_v29 = vsel %vm11441_vm5, %v6401_v33, %v6407_v0 }
 0x6c0   : > { %6410 = vadd.xlane.f32.xlu0 %v6408_v29 }
 0x6d6   : > { %6456 = vrot.lane.b32.xlu0 %v6454_v49, %s8165_s25 }
 0x74d   : > { %v6411_v20 = vpop.xlane.xlu0 %6410 }
 0x74e   : > { %v7695_v30 = vclamps-f32 %v6411_v20, 400.0 }
 0x750   : > { %v6462_v50 = vmul.f32 0.003, %v7695_v30 }
 0x751   : > { %v6457_v25 = vpop.permute.xlu0 %6456 }
 0x752   : > { %v6463_v48 = vsub.f32 %v11443_v9, %v6462_v50  ;;  %v6459_v8 = vadd.f32 %v6457_v25, %v6453_v34 }
 0x754   : > { %v6465_v26 = vadd.f32 %v6464_v21, %v6463_v48 }
 0x756   : > { %v6467_v22 = vsel %vm6466_vm8, %v6465_v26, %v6459_v8 }
 0x757   : > { %6469 = vst.msk [vmem:[%s507_s24] sm:$0xff] %vm6468_vm9, %v6467_v22 }
 0x758 PF: > { %s28_s0 = sadd.s32 1, %s8151_s0   ;;  %s11445_s18 = sld [smem:[#allocation17_spill]] }
 0x759   : > { %p25_p12 = scmp.ge.s32.totalorder %s28_s0, 6   ;;  %s11446_s20 = sld [smem:[#allocation18_spill]] }
 0x75a   : > { %s11447_s15 = smov %s8127_s16  ;;  %s11448_s16 = smov %s8131_s17 }
 0x75b   : > { %s11449_s17 = smov %s8366_s6  ;;  %s11450_s19 = smov %s8147_s21 }
 0x75c   : > { %s11451_s21 = smov %s11457_s22  ;;  %27 = sbr.rel (!%p25_p12) target bundleno = 15 (0xf), region = 137 }
 0x763   :  { %6489 = vsyncpa [#allocation6], 1 }
 0x764   :  { %6491 = vsyncpa [#allocation6 + $0x1], 1 }
 0x765   :  { %6492 = vsyncpa [#allocation8], 1 }
 0x766   :  { %6494 = vsyncpa [#allocation8 + $0x1], 1 }
 0x767   :  { %6495 = vsyncpa [#allocation11], 1 }

</bundles_post_ra>
